<compile_context>
chip_gen: v7x
topology: tpu7x:2x2x1
jax: 0.10.0
libtpu: 0.0.40
codegen_flags: <defaults>
</compile_context>

<pallas_src>
import numpy as np
import jax
import jax.numpy as jnp
from jax.experimental import pallas as pl
from jax.experimental.pallas import tpu as pltpu

D = 768          # BERT hidden size (fixed by the module)
Co = 100         # conv output channels (module)
CP = 128         # Co padded to a full lane register
C = 3            # number of classes
KS = (3, 4, 5)   # kernel sizes for convs1 / convs2
KA = 3           # kernel size for convs3 (padding = KA - 2 = 1)

# order in which the context-conv taps are packed into the fused weight
CTX_CONVS = tuple(("1", K) for K in KS) + tuple(("2", K) for K in KS)
NTAPS = sum(K for _, K in CTX_CONVS)          # 24

SUB = 16         # pad time dims to a multiple of this (bf16 sublane tile)

# column offset of each (branch, K) group inside the fused context weight
CTX_OFF = {}
_col = 0
for _branch, _K in CTX_CONVS:
    CTX_OFF[(_branch, _K)] = _col
    _col += _K * CP


def _round_up(x, m):
    return -(-x // m) * m


# ----------------------------------------------------------------------------
# Pallas kernel: the entire GCAE head for one block of Bt batch rows.
# ----------------------------------------------------------------------------
def make_gcae_head_kernel(L, La, Lp, Lap, Bt):
    """L / La = true context / aspect lengths; Lp / Lap = padded block lengths."""
    rows = Bt * Lp
    rows_a = Bt * Lap

    def kernel(feat_ref, asp_ref, wctx_ref, w3_ref, wfa_ref, wfc2_ref,
               bias_ref, bfc2_ref, out_ref):
        # ---------- aspect branch: convs3 (K=3, pad=1) -> relu -> max over t --
        asp2d = asp_ref[...].reshape(rows_a, D)                          # bf16
        ya = jnp.dot(asp2d, w3_ref[...],
                     preferred_element_type=jnp.float32)                 # (rows_a, KA*CP)
        acc_a = ya[:, 0:CP]
        for k in range(1, KA):
            # shift tap-k result up by k rows (XLU rotate, lane-aligned slice)
            acc_a = acc_a + pltpu.roll(ya[:, k * CP:(k + 1) * CP],
                                       shift=(rows_a - k) % rows_a, axis=0)
        a = jnp.maximum(acc_a.reshape(Bt, Lap, CP) + bias_ref[6:7, :], 0.0)
        ta = jax.lax.broadcasted_iota(jnp.int32, (Bt, Lap, CP), 1)
        # relu >= 0, so masking invalid time rows with 0 keeps the max exact
        aspect_v = jnp.max(jnp.where(ta < La, a, 0.0), axis=1)           # (Bt, CP)

        # fc_aspect gate (padded lanes of wfa / bias are zero -> gate pads 0)
        gate = jnp.dot(aspect_v.astype(jnp.bfloat16), wfa_ref[...],
                       preferred_element_type=jnp.float32) + bias_ref[7:8, :]

        # ---------- context branch: one (branch, K) tap-group at a time -------
        feat2d = feat_ref[...].reshape(rows, D)                          # bf16
        t_idx = jax.lax.broadcasted_iota(jnp.int32, (Bt, Lp, CP), 1)

        def conv_group(branch, K):
            off = CTX_OFF[(branch, K)]
            y = jnp.dot(feat2d, wctx_ref[:, off:off + K * CP],
                        preferred_element_type=jnp.float32)              # (rows, K*CP)
            acc = y[:, 0:CP]
            for k in range(1, K):
                acc = acc + pltpu.roll(y[:, k * CP:(k + 1) * CP],
                                       shift=(rows - k) % rows, axis=0)
            return acc.reshape(Bt, Lp, CP)

        pooled = []
        for i, K in enumerate(KS):
            Lo = L - K + 1
            c1 = jnp.tanh(conv_group("1", K) + bias_ref[i:i + 1, :])
            bg = gate + bias_ref[3 + i:4 + i, :]                         # (Bt, CP)
            c2 = jnp.maximum(conv_group("2", K) + bg[:, None, :], 0.0)
            prod = jnp.where(t_idx < Lo, c1 * c2, -jnp.inf)
            pooled.append(jnp.max(prod, axis=1))                         # (Bt, CP)
        xcat = jnp.concatenate(pooled, axis=1)                           # (Bt, 3*CP)

        # dropout is identity at inference; fc2 written lane-dense (CP wide)
        logit = jnp.dot(xcat.astype(jnp.bfloat16), wfc2_ref[...],
                        preferred_element_type=jnp.float32) + bfc2_ref[...]
        out_ref[...] = logit[None]                                       # (1, Bt, CP)

    return kernel


# ----------------------------------------------------------------------------
# Per-device batch-block / VMEM-budget selection.
# ----------------------------------------------------------------------------
def _vmem_capacity_bytes():
    try:
        return int(pltpu.get_tpu_info().vmem_capacity_bytes)
    except Exception:
        return 64 * 1024 * 1024          # conservative: assume v7x-class core


def _choose_block(B, Lp, Lap, batch_block=None):
    cap = _vmem_capacity_bytes()
    if cap >= 96 * 1024 * 1024:          # v5e / v6e: 128 MiB VMEM, 1 TC
        vmem_limit = 100 * 1024 * 1024
        bt_pref = 16
        split_cores = False
    else:                                # v7x-class: 64 MiB per TC, 2 TCs
        vmem_limit = 40 * 1024 * 1024
        bt_pref = 8
        split_cores = True

    # generous working-set estimate (bytes); constants counted double-buffered
    const_bytes = 2 * (D * NTAPS * CP * 2 + D * KA * CP * 2
                       + CP * CP * 2 + 3 * CP * CP * 2 + 8 * CP * 4 + CP * 4)
    per_row = (Lp * (2 * D * 2 + (max(KS) + 10) * CP * 4)
               + Lap * (2 * D * 2 + (KA + 6) * CP * 4))
    headroom = vmem_limit - const_bytes - 6 * 1024 * 1024
    bt_fit = max(1, headroom // per_row)

    bt = int(min(bt_pref if batch_block is None else batch_block, bt_fit, B))
    if split_cores and B > 1:
        bt = min(bt, -(-B // 2))         # >= 2 grid steps -> both TensorCores
    return max(1, bt), int(vmem_limit)


# ----------------------------------------------------------------------------
# Wrapper: pallas_call with BlockSpecs, gridded over batch blocks.
# ----------------------------------------------------------------------------
def gcae_head_pallas(feature, aspect_embed, prep, *, batch_block=None):
    B, L, _ = feature.shape
    La = aspect_embed.shape[1]
    assert L >= max(KS) and La >= 1, "sequence too short for the conv windows"

    Lp = _round_up(L, SUB)
    Lap = _round_up(La + 2, SUB)        # +2 = convs3 zero padding (padding=1)

    Bt, vmem_limit = _choose_block(B, Lp, Lap, batch_block)
    Bpad = _round_up(B, Bt)
    nblk = Bpad // Bt

    feat = jnp.pad(feature,
                   ((0, Bpad - B), (0, Lp - L), (0, 0))).astype(jnp.bfloat16)
    asp = jnp.pad(aspect_embed,
                  ((0, Bpad - B), (1, Lap - La - 1), (0, 0))).astype(jnp.bfloat16)

    ordered = [prep["wctx"], prep["w3"], prep["wfa"], prep["wfc2"],
               prep["bias"], prep["bfc2"]]

    def const_spec(a):
        nd = a.ndim
        # grid-invariant -> single buffer (second pipeline buffer is dead weight)
        return pl.BlockSpec(a.shape, lambda b, _nd=nd: (0,) * _nd,
                            pipeline_mode=pl.Buffered(1))

    in_specs = [
        pl.BlockSpec((Bt, Lp, D), lambda b: (b, 0, 0)),     # context block
        pl.BlockSpec((Bt, Lap, D), lambda b: (b, 0, 0)),    # aspect block
    ] + [const_spec(a) for a in ordered]

    out = pl.pallas_call(
        make_gcae_head_kernel(L, La, Lp, Lap, Bt),
        out_shape=jax.ShapeDtypeStruct((nblk, Bt, CP), jnp.float32),
        grid_spec=pltpu.PrefetchScalarGridSpec(
            num_scalar_prefetch=0,
            grid=(nblk,),
            in_specs=in_specs,
            out_specs=pl.BlockSpec((1, Bt, CP), lambda b: (b, 0, 0)),
        ),
        compiler_params=pltpu.CompilerParams(
            dimension_semantics=("parallel",),          # batch blocks independent
            vmem_limit_bytes=vmem_limit,
        ),
    )(feat, asp, *ordered)
    return out.reshape(Bpad, CP)[:B, :C]                 # (B, C)


# ----------------------------------------------------------------------------
# Full forward (glue).
# ----------------------------------------------------------------------------
def gcae_bert_forward(bert_token, bert_token_aspect, offset, embed_table, prep):
    # TODO(synk): the external BERT encoder and SqueezeEmbedding's
    # data-dependent sequence packing have no clean Pallas equivalent; a
    # deterministic embedding-table lookup stands in for `self.bert`, and
    # dropout is identity (inference mode).  The GCAE head itself is exact.
    del offset  # unused in the PyTorch forward as well
    feature = embed_table[bert_token]                    # (B, L, D)
    aspect_embed = embed_table[bert_token_aspect]        # (B, La, D)
    return gcae_head_pallas(feature, aspect_embed, prep)


# ----------------------------------------------------------------------------
# Deterministic parameter init (shapes from the module __init__), raw layout.
# ----------------------------------------------------------------------------
def init_params(key):
    keys = iter(jax.random.split(key, 32))

    def w(shape, scale=0.1):
        return (scale * jax.random.normal(next(keys), shape)).astype(jnp.float32)

    p = {}
    p["w3"] = w((KA, D, Co))           # convs3: Conv1d(D, Co, 3, padding=1), transposed
    p["b3"] = w((1, Co))
    for K in KS:
        p[f"w1_{K}"] = w((K, D, Co))   # convs1: Conv1d(D, Co, K), transposed
        p[f"b1_{K}"] = w((1, Co))
        p[f"w2_{K}"] = w((K, D, Co))   # convs2: Conv1d(D, Co, K), transposed
        p[f"b2_{K}"] = w((1, Co))
    p["wfa"] = w((Co, Co))             # fc_aspect: Linear(100, Co), transposed
    p["bfa"] = w((1, Co))
    p["wfc2"] = w((len(KS) * Co, C))   # fc2: Linear(300, 3), transposed
    p["bfc2"] = w((1, C))
    return p


# ----------------------------------------------------------------------------
# Pack / pad / cast parameters into the kernel's fused bf16 layout.
# ----------------------------------------------------------------------------
def prepare_params(p):
    def pad_w(w2d):                       # (D, Co) -> (D, CP), zero-padded lanes
        return jnp.pad(w2d, ((0, 0), (0, CP - Co)))

    # fused context conv weight: taps in CTX_CONVS order, each CP columns
    cols = []
    for branch, K in CTX_CONVS:
        w = p[f"w{branch}_{K}"]           # (K, D, Co)
        for k in range(K):
            cols.append(pad_w(w[k]))
    wctx = jnp.concatenate(cols, axis=1).astype(jnp.bfloat16)   # (D, NTAPS*CP)

    w3 = jnp.concatenate([pad_w(p["w3"][k]) for k in range(KA)],
                         axis=1).astype(jnp.bfloat16)           # (D, KA*CP)

    wfa = jnp.zeros((CP, CP), jnp.float32).at[:Co, :Co].set(p["wfa"])
    wfa = wfa.astype(jnp.bfloat16)

    wfc2 = jnp.zeros((len(KS) * CP, CP), jnp.float32)
    for j in range(len(KS)):
        wfc2 = wfc2.at[j * CP:j * CP + Co, :C].set(p["wfc2"][j * Co:(j + 1) * Co, :])
    wfc2 = wfc2.astype(jnp.bfloat16)

    # biases stay f32 (added to f32 accumulators); padded lanes are zero
    bias = jnp.zeros((8, CP), jnp.float32)
    for i, K in enumerate(KS):
        bias = bias.at[i, :Co].set(p[f"b1_{K}"][0])
        bias = bias.at[3 + i, :Co].set(p[f"b2_{K}"][0])
    bias = bias.at[6, :Co].set(p["b3"][0])
    bias = bias.at[7, :Co].set(p["bfa"][0])

    bfc2 = jnp.zeros((1, CP), jnp.float32).at[0, :C].set(p["bfc2"][0])

    return dict(wctx=wctx, w3=w3, wfa=wfa, wfc2=wfc2, bias=bias, bfc2=bfc2)


# ----------------------------------------------------------------------------
# Pure-JAX reference of the GCAE head, mirroring the kernel's bf16 rounding
# points (f32 accumulation), for the correctness check.
# ----------------------------------------------------------------------------
def reference_forward(feature, aspect_embed, params):
    r = lambda a: a.astype(jnp.bfloat16).astype(jnp.float32)   # bf16 rounding
    feature = r(feature)
    aspect = jnp.pad(r(aspect_embed), ((0, 0), (1, 1), (0, 0)))

    def conv(x, w, b):
        w = r(w)
        K = w.shape[0]
        Lo = x.shape[1] - K + 1
        acc = jnp.zeros((x.shape[0], Lo, w.shape[2]), jnp.float32)
        for k in range(K):
            acc = acc + jnp.einsum("bld,dc->blc", x[:, k:k + Lo, :], w[k],
                                   preferred_element_type=jnp.float32)
        return acc + b

    a = jax.nn.relu(conv(aspect, params["w3"], params["b3"]))
    aspect_v = jnp.max(a, axis=1)                                   # (B, Co)
    gate = r(aspect_v) @ r(params["wfa"]) + params["bfa"]           # (B, Co)
    pooled = []
    for K in KS:
        c1 = jnp.tanh(conv(feature, params[f"w1_{K}"], params[f"b1_{K}"]))
        c2 = jax.nn.relu(conv(feature, params[f"w2_{K}"], params[f"b2_{K}"])
                         + gate[:, None, :])
        pooled.append(jnp.max(c1 * c2, axis=1))
    x = jnp.concatenate(pooled, axis=1)                             # (B, 300)
    return r(x) @ r(params["wfc2"]) + params["bfc2"]                # (B, 3)


if __name__ == "__main__":
    B, L, La, V = 2, 16, 8, 64
    key = jax.random.PRNGKey(0)
    k_tok, k_asp, k_emb, k_par = jax.random.split(key, 4)

    bert_token = jax.random.randint(k_tok, (B, L), 1, V).astype(jnp.int32)
    bert_token_aspect = jax.random.randint(k_asp, (B, La), 1, V).astype(jnp.int32)
    offset = jnp.zeros((B,), jnp.int32)
    embed_table = (0.1 * jax.random.normal(k_emb, (V, D))).astype(jnp.float32)
    params = init_params(k_par)
    prep = prepare_params(params)

    logits = gcae_bert_forward(bert_token, bert_token_aspect, offset,
                               embed_table, prep)
    logits = jax.block_until_ready(logits)
    assert logits.shape == (B, C)

    # correctness check against a pure-JAX reference of the head (bf16-matched)
    feature = embed_table[bert_token]
    aspect_embed = embed_table[bert_token_aspect]
    ref = reference_forward(feature, aspect_embed, params)
    np.testing.assert_allclose(np.asarray(logits), np.asarray(ref),
                               rtol=5e-3, atol=5e-3)

    print("KERNEL_OK")
</pallas_src>

<mosaic_0001>
module attributes {stable_mosaic.version = 11 : i64} {
  func.func @kernel(%arg0: i32, %arg1: memref<1x16x768xbf16, #tpu.memory_space<vmem>>, %arg2: memref<1x16x768xbf16, #tpu.memory_space<vmem>>, %arg3: memref<768x3072xbf16, #tpu.memory_space<vmem>>, %arg4: memref<768x384xbf16, #tpu.memory_space<vmem>>, %arg5: memref<128x128xbf16, #tpu.memory_space<vmem>>, %arg6: memref<384x128xbf16, #tpu.memory_space<vmem>>, %arg7: memref<8x128xf32, #tpu.memory_space<vmem>>, %arg8: memref<1x128xf32, #tpu.memory_space<vmem>>, %arg9: memref<1x1x128xf32, #tpu.memory_space<vmem>>) attributes {dimension_semantics = [#tpu.dimension_semantics<parallel>], iteration_bounds = array<i64: 2>, scalar_prefetch = 0 : i64, scratch_operands = 0 : i64, tpu.core_type = #tpu.core_type<tc>, window_params = [{transform_indices = @transform_0, window_bounds = array<i64: 1, 16, 768>}, {transform_indices = @transform_1, window_bounds = array<i64: 1, 16, 768>}, {pipeline_mode = #tpu.pipeline_mode<synchronous>, transform_indices = @transform_2, window_bounds = array<i64: 768, 3072>}, {pipeline_mode = #tpu.pipeline_mode<synchronous>, transform_indices = @transform_3, window_bounds = array<i64: 768, 384>}, {pipeline_mode = #tpu.pipeline_mode<synchronous>, transform_indices = @transform_4, window_bounds = array<i64: 128, 128>}, {pipeline_mode = #tpu.pipeline_mode<synchronous>, transform_indices = @transform_5, window_bounds = array<i64: 384, 128>}, {pipeline_mode = #tpu.pipeline_mode<synchronous>, transform_indices = @transform_6, window_bounds = array<i64: 8, 128>}, {pipeline_mode = #tpu.pipeline_mode<synchronous>, transform_indices = @transform_7, window_bounds = array<i64: 1, 128>}, {transform_indices = @transform_8, window_bounds = array<i64: 1, 1, 128>}]} {
    %c0 = arith.constant 0 : index
    %c0_0 = arith.constant 0 : index
    %c0_1 = arith.constant 0 : index
    %0 = vector.load %arg2[%c0, %c0_0, %c0_1] : memref<1x16x768xbf16, #tpu.memory_space<vmem>>, vector<1x16x768xbf16>
    %1 = vector.shape_cast %0 : vector<1x16x768xbf16> to vector<16x768xbf16>
    %c0_2 = arith.constant 0 : index
    %c0_3 = arith.constant 0 : index
    %2 = vector.load %arg4[%c0_2, %c0_3] : memref<768x384xbf16, #tpu.memory_space<vmem>>, vector<768x384xbf16>
    %cst = arith.constant dense<0.000000e+00> : vector<16x384xf32>
    %3 = tpu.matmul %1, %2, %cst {dimension_numbers = #tpu.dot_dimension_numbers<[1], [0], [0], [1], [0, 0, 1, 1], [], []>} : vector<16x768xbf16>, vector<768x384xbf16>, vector<16x384xf32> -> vector<16x384xf32>
    %4 = vector.extract_strided_slice %3 {offsets = [0, 0], sizes = [16, 128], strides = [1, 1]} : vector<16x384xf32> to vector<16x128xf32>
    %5 = vector.extract_strided_slice %3 {offsets = [0, 128], sizes = [16, 128], strides = [1, 1]} : vector<16x384xf32> to vector<16x128xf32>
    %c15_i32 = arith.constant 15 : i32
    %6 = tpu.dynamic_rotate %5 by %c15_i32 dim 0 : vector<16x128xf32>, i32 -> vector<16x128xf32>
    %7 = arith.addf %4, %6 : vector<16x128xf32>
    %8 = vector.extract_strided_slice %3 {offsets = [0, 256], sizes = [16, 128], strides = [1, 1]} : vector<16x384xf32> to vector<16x128xf32>
    %c14_i32 = arith.constant 14 : i32
    %9 = tpu.dynamic_rotate %8 by %c14_i32 dim 0 : vector<16x128xf32>, i32 -> vector<16x128xf32>
    %10 = arith.addf %7, %9 : vector<16x128xf32>
    %11 = vector.shape_cast %10 : vector<16x128xf32> to vector<1x16x128xf32>
    %c6 = arith.constant 6 : index
    %c0_4 = arith.constant 0 : index
    %12 = vector.load %arg7[%c6, %c0_4] : memref<8x128xf32, #tpu.memory_space<vmem>>, vector<1x128xf32>
    %13 = vector.shape_cast %12 : vector<1x128xf32> to vector<1x1x128xf32>
    %14 = vector.broadcast %13 : vector<1x1x128xf32> to vector<1x16x128xf32>
    %15 = arith.addf %11, %14 : vector<1x16x128xf32>
    %cst_5 = arith.constant 0.000000e+00 : f32
    %16 = vector.broadcast %cst_5 : f32 to vector<1x16x128xf32>
    %17 = arith.maximumf %15, %16 : vector<1x16x128xf32>
    %18 = tpu.iota {dimensions = array<i32: 1>} : vector<1x16x128xi32>
    %c8_i32 = arith.constant 8 : i32
    %19 = vector.broadcast %c8_i32 : i32 to vector<1x16x128xi32>
    %20 = arith.cmpi slt, %18, %19 : vector<1x16x128xi32>
    %cst_6 = arith.constant 0.000000e+00 : f32
    %21 = vector.broadcast %cst_6 : f32 to vector<1x16x128xf32>
    %22 = arith.select %20, %17, %21 : vector<1x16x128xi1>, vector<1x16x128xf32>
    %cst_7 = arith.constant dense<0xFF800000> : vector<1x128xf32>
    %23 = vector.multi_reduction <maximumf>, %22, %cst_7 [1] : vector<1x16x128xf32> to vector<1x128xf32>
    %24 = arith.truncf %23 : vector<1x128xf32> to vector<1x128xbf16>
    %c0_8 = arith.constant 0 : index
    %c0_9 = arith.constant 0 : index
    %25 = vector.load %arg5[%c0_8, %c0_9] : memref<128x128xbf16, #tpu.memory_space<vmem>>, vector<128x128xbf16>
    %cst_10 = arith.constant dense<0.000000e+00> : vector<1x128xf32>
    %26 = tpu.matmul %24, %25, %cst_10 {dimension_numbers = #tpu.dot_dimension_numbers<[1], [0], [0], [1], [0, 0, 1, 1], [], []>} : vector<1x128xbf16>, vector<128x128xbf16>, vector<1x128xf32> -> vector<1x128xf32>
    %c7 = arith.constant 7 : index
    %c0_11 = arith.constant 0 : index
    %27 = vector.load %arg7[%c7, %c0_11] : memref<8x128xf32, #tpu.memory_space<vmem>>, vector<1x128xf32>
    %28 = arith.addf %26, %27 : vector<1x128xf32>
    %c0_12 = arith.constant 0 : index
    %c0_13 = arith.constant 0 : index
    %c0_14 = arith.constant 0 : index
    %29 = vector.load %arg1[%c0_12, %c0_13, %c0_14] : memref<1x16x768xbf16, #tpu.memory_space<vmem>>, vector<1x16x768xbf16>
    %30 = vector.shape_cast %29 : vector<1x16x768xbf16> to vector<16x768xbf16>
    %31 = tpu.iota {dimensions = array<i32: 1>} : vector<1x16x128xi32>
    %c0_15 = arith.constant 0 : index
    %c0_16 = arith.constant 0 : index
    %32 = vector.load %arg3[%c0_15, %c0_16] : memref<768x3072xbf16, #tpu.memory_space<vmem>>, vector<768x384xbf16>
    %cst_17 = arith.constant dense<0.000000e+00> : vector<16x384xf32>
    %33 = tpu.matmul %30, %32, %cst_17 {dimension_numbers = #tpu.dot_dimension_numbers<[1], [0], [0], [1], [0, 0, 1, 1], [], []>} : vector<16x768xbf16>, vector<768x384xbf16>, vector<16x384xf32> -> vector<16x384xf32>
    %34 = vector.extract_strided_slice %33 {offsets = [0, 0], sizes = [16, 128], strides = [1, 1]} : vector<16x384xf32> to vector<16x128xf32>
    %35 = vector.extract_strided_slice %33 {offsets = [0, 128], sizes = [16, 128], strides = [1, 1]} : vector<16x384xf32> to vector<16x128xf32>
    %c15_i32_18 = arith.constant 15 : i32
    %36 = tpu.dynamic_rotate %35 by %c15_i32_18 dim 0 : vector<16x128xf32>, i32 -> vector<16x128xf32>
    %37 = arith.addf %34, %36 : vector<16x128xf32>
    %38 = vector.extract_strided_slice %33 {offsets = [0, 256], sizes = [16, 128], strides = [1, 1]} : vector<16x384xf32> to vector<16x128xf32>
    %c14_i32_19 = arith.constant 14 : i32
    %39 = tpu.dynamic_rotate %38 by %c14_i32_19 dim 0 : vector<16x128xf32>, i32 -> vector<16x128xf32>
    %40 = arith.addf %37, %39 : vector<16x128xf32>
    %41 = vector.shape_cast %40 : vector<16x128xf32> to vector<1x16x128xf32>
    %c0_20 = arith.constant 0 : index
    %c0_21 = arith.constant 0 : index
    %42 = vector.load %arg7[%c0_20, %c0_21] : memref<8x128xf32, #tpu.memory_space<vmem>>, vector<1x128xf32>
    %43 = vector.shape_cast %42 : vector<1x128xf32> to vector<1x1x128xf32>
    %44 = vector.broadcast %43 : vector<1x1x128xf32> to vector<1x16x128xf32>
    %45 = arith.addf %41, %44 : vector<1x16x128xf32>
    %46 = math.tanh %45 : vector<1x16x128xf32>
    %c3 = arith.constant 3 : index
    %c0_22 = arith.constant 0 : index
    %47 = vector.load %arg7[%c3, %c0_22] : memref<8x128xf32, #tpu.memory_space<vmem>>, vector<1x128xf32>
    %48 = arith.addf %28, %47 : vector<1x128xf32>
    %c0_23 = arith.constant 0 : index
    %c1536 = arith.constant 1536 : index
    %49 = vector.load %arg3[%c0_23, %c1536] : memref<768x3072xbf16, #tpu.memory_space<vmem>>, vector<768x384xbf16>
    %cst_24 = arith.constant dense<0.000000e+00> : vector<16x384xf32>
    %50 = tpu.matmul %30, %49, %cst_24 {dimension_numbers = #tpu.dot_dimension_numbers<[1], [0], [0], [1], [0, 0, 1, 1], [], []>} : vector<16x768xbf16>, vector<768x384xbf16>, vector<16x384xf32> -> vector<16x384xf32>
    %51 = vector.extract_strided_slice %50 {offsets = [0, 0], sizes = [16, 128], strides = [1, 1]} : vector<16x384xf32> to vector<16x128xf32>
    %52 = vector.extract_strided_slice %50 {offsets = [0, 128], sizes = [16, 128], strides = [1, 1]} : vector<16x384xf32> to vector<16x128xf32>
    %c15_i32_25 = arith.constant 15 : i32
    %53 = tpu.dynamic_rotate %52 by %c15_i32_25 dim 0 : vector<16x128xf32>, i32 -> vector<16x128xf32>
    %54 = arith.addf %51, %53 : vector<16x128xf32>
    %55 = vector.extract_strided_slice %50 {offsets = [0, 256], sizes = [16, 128], strides = [1, 1]} : vector<16x384xf32> to vector<16x128xf32>
    %c14_i32_26 = arith.constant 14 : i32
    %56 = tpu.dynamic_rotate %55 by %c14_i32_26 dim 0 : vector<16x128xf32>, i32 -> vector<16x128xf32>
    %57 = arith.addf %54, %56 : vector<16x128xf32>
    %58 = vector.shape_cast %57 : vector<16x128xf32> to vector<1x16x128xf32>
    %59 = vector.shape_cast %48 : vector<1x128xf32> to vector<1x1x128xf32>
    %60 = vector.broadcast %59 : vector<1x1x128xf32> to vector<1x16x128xf32>
    %61 = arith.addf %58, %60 : vector<1x16x128xf32>
    %cst_27 = arith.constant 0.000000e+00 : f32
    %62 = vector.broadcast %cst_27 : f32 to vector<1x16x128xf32>
    %63 = arith.maximumf %61, %62 : vector<1x16x128xf32>
    %c14_i32_28 = arith.constant 14 : i32
    %64 = vector.broadcast %c14_i32_28 : i32 to vector<1x16x128xi32>
    %65 = arith.cmpi slt, %31, %64 : vector<1x16x128xi32>
    %66 = arith.mulf %46, %63 : vector<1x16x128xf32>
    %cst_29 = arith.constant 0xFF800000 : f32
    %67 = vector.broadcast %cst_29 : f32 to vector<1x16x128xf32>
    %68 = arith.select %65, %66, %67 : vector<1x16x128xi1>, vector<1x16x128xf32>
    %cst_30 = arith.constant dense<0xFF800000> : vector<1x128xf32>
    %69 = vector.multi_reduction <maximumf>, %68, %cst_30 [1] : vector<1x16x128xf32> to vector<1x128xf32>
    %c0_31 = arith.constant 0 : index
    %c384 = arith.constant 384 : index
    %70 = vector.load %arg3[%c0_31, %c384] : memref<768x3072xbf16, #tpu.memory_space<vmem>>, vector<768x512xbf16>
    %cst_32 = arith.constant dense<0.000000e+00> : vector<16x512xf32>
    %71 = tpu.matmul %30, %70, %cst_32 {dimension_numbers = #tpu.dot_dimension_numbers<[1], [0], [0], [1], [0, 0, 1, 1], [], []>} : vector<16x768xbf16>, vector<768x512xbf16>, vector<16x512xf32> -> vector<16x512xf32>
    %72 = vector.extract_strided_slice %71 {offsets = [0, 0], sizes = [16, 128], strides = [1, 1]} : vector<16x512xf32> to vector<16x128xf32>
    %73 = vector.extract_strided_slice %71 {offsets = [0, 128], sizes = [16, 128], strides = [1, 1]} : vector<16x512xf32> to vector<16x128xf32>
    %c15_i32_33 = arith.constant 15 : i32
    %74 = tpu.dynamic_rotate %73 by %c15_i32_33 dim 0 : vector<16x128xf32>, i32 -> vector<16x128xf32>
    %75 = arith.addf %72, %74 : vector<16x128xf32>
    %76 = vector.extract_strided_slice %71 {offsets = [0, 256], sizes = [16, 128], strides = [1, 1]} : vector<16x512xf32> to vector<16x128xf32>
    %c14_i32_34 = arith.constant 14 : i32
    %77 = tpu.dynamic_rotate %76 by %c14_i32_34 dim 0 : vector<16x128xf32>, i32 -> vector<16x128xf32>
    %78 = arith.addf %75, %77 : vector<16x128xf32>
    %79 = vector.extract_strided_slice %71 {offsets = [0, 384], sizes = [16, 128], strides = [1, 1]} : vector<16x512xf32> to vector<16x128xf32>
    %c13_i32 = arith.constant 13 : i32
    %80 = tpu.dynamic_rotate %79 by %c13_i32 dim 0 : vector<16x128xf32>, i32 -> vector<16x128xf32>
    %81 = arith.addf %78, %80 : vector<16x128xf32>
    %82 = vector.shape_cast %81 : vector<16x128xf32> to vector<1x16x128xf32>
    %c1 = arith.constant 1 : index
    %c0_35 = arith.constant 0 : index
    %83 = vector.load %arg7[%c1, %c0_35] : memref<8x128xf32, #tpu.memory_space<vmem>>, vector<1x128xf32>
    %84 = vector.shape_cast %83 : vector<1x128xf32> to vector<1x1x128xf32>
    %85 = vector.broadcast %84 : vector<1x1x128xf32> to vector<1x16x128xf32>
    %86 = arith.addf %82, %85 : vector<1x16x128xf32>
    %87 = math.tanh %86 : vector<1x16x128xf32>
    %c4 = arith.constant 4 : index
    %c0_36 = arith.constant 0 : index
    %88 = vector.load %arg7[%c4, %c0_36] : memref<8x128xf32, #tpu.memory_space<vmem>>, vector<1x128xf32>
    %89 = arith.addf %28, %88 : vector<1x128xf32>
    %c0_37 = arith.constant 0 : index
    %c1920 = arith.constant 1920 : index
    %90 = vector.load %arg3[%c0_37, %c1920] : memref<768x3072xbf16, #tpu.memory_space<vmem>>, vector<768x512xbf16>
    %cst_38 = arith.constant dense<0.000000e+00> : vector<16x512xf32>
    %91 = tpu.matmul %30, %90, %cst_38 {dimension_numbers = #tpu.dot_dimension_numbers<[1], [0], [0], [1], [0, 0, 1, 1], [], []>} : vector<16x768xbf16>, vector<768x512xbf16>, vector<16x512xf32> -> vector<16x512xf32>
    %92 = vector.extract_strided_slice %91 {offsets = [0, 0], sizes = [16, 128], strides = [1, 1]} : vector<16x512xf32> to vector<16x128xf32>
    %93 = vector.extract_strided_slice %91 {offsets = [0, 128], sizes = [16, 128], strides = [1, 1]} : vector<16x512xf32> to vector<16x128xf32>
    %c15_i32_39 = arith.constant 15 : i32
    %94 = tpu.dynamic_rotate %93 by %c15_i32_39 dim 0 : vector<16x128xf32>, i32 -> vector<16x128xf32>
    %95 = arith.addf %92, %94 : vector<16x128xf32>
    %96 = vector.extract_strided_slice %91 {offsets = [0, 256], sizes = [16, 128], strides = [1, 1]} : vector<16x512xf32> to vector<16x128xf32>
    %c14_i32_40 = arith.constant 14 : i32
    %97 = tpu.dynamic_rotate %96 by %c14_i32_40 dim 0 : vector<16x128xf32>, i32 -> vector<16x128xf32>
    %98 = arith.addf %95, %97 : vector<16x128xf32>
    %99 = vector.extract_strided_slice %91 {offsets = [0, 384], sizes = [16, 128], strides = [1, 1]} : vector<16x512xf32> to vector<16x128xf32>
    %c13_i32_41 = arith.constant 13 : i32
    %100 = tpu.dynamic_rotate %99 by %c13_i32_41 dim 0 : vector<16x128xf32>, i32 -> vector<16x128xf32>
    %101 = arith.addf %98, %100 : vector<16x128xf32>
    %102 = vector.shape_cast %101 : vector<16x128xf32> to vector<1x16x128xf32>
    %103 = vector.shape_cast %89 : vector<1x128xf32> to vector<1x1x128xf32>
    %104 = vector.broadcast %103 : vector<1x1x128xf32> to vector<1x16x128xf32>
    %105 = arith.addf %102, %104 : vector<1x16x128xf32>
    %cst_42 = arith.constant 0.000000e+00 : f32
    %106 = vector.broadcast %cst_42 : f32 to vector<1x16x128xf32>
    %107 = arith.maximumf %105, %106 : vector<1x16x128xf32>
    %c13_i32_43 = arith.constant 13 : i32
    %108 = vector.broadcast %c13_i32_43 : i32 to vector<1x16x128xi32>
    %109 = arith.cmpi slt, %31, %108 : vector<1x16x128xi32>
    %110 = arith.mulf %87, %107 : vector<1x16x128xf32>
    %cst_44 = arith.constant 0xFF800000 : f32
    %111 = vector.broadcast %cst_44 : f32 to vector<1x16x128xf32>
    %112 = arith.select %109, %110, %111 : vector<1x16x128xi1>, vector<1x16x128xf32>
    %cst_45 = arith.constant dense<0xFF800000> : vector<1x128xf32>
    %113 = vector.multi_reduction <maximumf>, %112, %cst_45 [1] : vector<1x16x128xf32> to vector<1x128xf32>
    %c0_46 = arith.constant 0 : index
    %c896 = arith.constant 896 : index
    %114 = vector.load %arg3[%c0_46, %c896] : memref<768x3072xbf16, #tpu.memory_space<vmem>>, vector<768x640xbf16>
    %cst_47 = arith.constant dense<0.000000e+00> : vector<16x640xf32>
    %115 = tpu.matmul %30, %114, %cst_47 {dimension_numbers = #tpu.dot_dimension_numbers<[1], [0], [0], [1], [0, 0, 1, 1], [], []>} : vector<16x768xbf16>, vector<768x640xbf16>, vector<16x640xf32> -> vector<16x640xf32>
    %116 = vector.extract_strided_slice %115 {offsets = [0, 0], sizes = [16, 128], strides = [1, 1]} : vector<16x640xf32> to vector<16x128xf32>
    %117 = vector.extract_strided_slice %115 {offsets = [0, 128], sizes = [16, 128], strides = [1, 1]} : vector<16x640xf32> to vector<16x128xf32>
    %c15_i32_48 = arith.constant 15 : i32
    %118 = tpu.dynamic_rotate %117 by %c15_i32_48 dim 0 : vector<16x128xf32>, i32 -> vector<16x128xf32>
    %119 = arith.addf %116, %118 : vector<16x128xf32>
    %120 = vector.extract_strided_slice %115 {offsets = [0, 256], sizes = [16, 128], strides = [1, 1]} : vector<16x640xf32> to vector<16x128xf32>
    %c14_i32_49 = arith.constant 14 : i32
    %121 = tpu.dynamic_rotate %120 by %c14_i32_49 dim 0 : vector<16x128xf32>, i32 -> vector<16x128xf32>
    %122 = arith.addf %119, %121 : vector<16x128xf32>
    %123 = vector.extract_strided_slice %115 {offsets = [0, 384], sizes = [16, 128], strides = [1, 1]} : vector<16x640xf32> to vector<16x128xf32>
    %c13_i32_50 = arith.constant 13 : i32
    %124 = tpu.dynamic_rotate %123 by %c13_i32_50 dim 0 : vector<16x128xf32>, i32 -> vector<16x128xf32>
    %125 = arith.addf %122, %124 : vector<16x128xf32>
    %126 = vector.extract_strided_slice %115 {offsets = [0, 512], sizes = [16, 128], strides = [1, 1]} : vector<16x640xf32> to vector<16x128xf32>
    %c12_i32 = arith.constant 12 : i32
    %127 = tpu.dynamic_rotate %126 by %c12_i32 dim 0 : vector<16x128xf32>, i32 -> vector<16x128xf32>
    %128 = arith.addf %125, %127 : vector<16x128xf32>
    %129 = vector.shape_cast %128 : vector<16x128xf32> to vector<1x16x128xf32>
    %c2 = arith.constant 2 : index
    %c0_51 = arith.constant 0 : index
    %130 = vector.load %arg7[%c2, %c0_51] : memref<8x128xf32, #tpu.memory_space<vmem>>, vector<1x128xf32>
    %131 = vector.shape_cast %130 : vector<1x128xf32> to vector<1x1x128xf32>
    %132 = vector.broadcast %131 : vector<1x1x128xf32> to vector<1x16x128xf32>
    %133 = arith.addf %129, %132 : vector<1x16x128xf32>
    %134 = math.tanh %133 : vector<1x16x128xf32>
    %c5 = arith.constant 5 : index
    %c0_52 = arith.constant 0 : index
    %135 = vector.load %arg7[%c5, %c0_52] : memref<8x128xf32, #tpu.memory_space<vmem>>, vector<1x128xf32>
    %136 = arith.addf %28, %135 : vector<1x128xf32>
    %c0_53 = arith.constant 0 : index
    %c2432 = arith.constant 2432 : index
    %137 = vector.load %arg3[%c0_53, %c2432] : memref<768x3072xbf16, #tpu.memory_space<vmem>>, vector<768x640xbf16>
    %cst_54 = arith.constant dense<0.000000e+00> : vector<16x640xf32>
    %138 = tpu.matmul %30, %137, %cst_54 {dimension_numbers = #tpu.dot_dimension_numbers<[1], [0], [0], [1], [0, 0, 1, 1], [], []>} : vector<16x768xbf16>, vector<768x640xbf16>, vector<16x640xf32> -> vector<16x640xf32>
    %139 = vector.extract_strided_slice %138 {offsets = [0, 0], sizes = [16, 128], strides = [1, 1]} : vector<16x640xf32> to vector<16x128xf32>
    %140 = vector.extract_strided_slice %138 {offsets = [0, 128], sizes = [16, 128], strides = [1, 1]} : vector<16x640xf32> to vector<16x128xf32>
    %c15_i32_55 = arith.constant 15 : i32
    %141 = tpu.dynamic_rotate %140 by %c15_i32_55 dim 0 : vector<16x128xf32>, i32 -> vector<16x128xf32>
    %142 = arith.addf %139, %141 : vector<16x128xf32>
    %143 = vector.extract_strided_slice %138 {offsets = [0, 256], sizes = [16, 128], strides = [1, 1]} : vector<16x640xf32> to vector<16x128xf32>
    %c14_i32_56 = arith.constant 14 : i32
    %144 = tpu.dynamic_rotate %143 by %c14_i32_56 dim 0 : vector<16x128xf32>, i32 -> vector<16x128xf32>
    %145 = arith.addf %142, %144 : vector<16x128xf32>
    %146 = vector.extract_strided_slice %138 {offsets = [0, 384], sizes = [16, 128], strides = [1, 1]} : vector<16x640xf32> to vector<16x128xf32>
    %c13_i32_57 = arith.constant 13 : i32
    %147 = tpu.dynamic_rotate %146 by %c13_i32_57 dim 0 : vector<16x128xf32>, i32 -> vector<16x128xf32>
    %148 = arith.addf %145, %147 : vector<16x128xf32>
    %149 = vector.extract_strided_slice %138 {offsets = [0, 512], sizes = [16, 128], strides = [1, 1]} : vector<16x640xf32> to vector<16x128xf32>
    %c12_i32_58 = arith.constant 12 : i32
    %150 = tpu.dynamic_rotate %149 by %c12_i32_58 dim 0 : vector<16x128xf32>, i32 -> vector<16x128xf32>
    %151 = arith.addf %148, %150 : vector<16x128xf32>
    %152 = vector.shape_cast %151 : vector<16x128xf32> to vector<1x16x128xf32>
    %153 = vector.shape_cast %136 : vector<1x128xf32> to vector<1x1x128xf32>
    %154 = vector.broadcast %153 : vector<1x1x128xf32> to vector<1x16x128xf32>
    %155 = arith.addf %152, %154 : vector<1x16x128xf32>
    %cst_59 = arith.constant 0.000000e+00 : f32
    %156 = vector.broadcast %cst_59 : f32 to vector<1x16x128xf32>
    %157 = arith.maximumf %155, %156 : vector<1x16x128xf32>
    %c12_i32_60 = arith.constant 12 : i32
    %158 = vector.broadcast %c12_i32_60 : i32 to vector<1x16x128xi32>
    %159 = arith.cmpi slt, %31, %158 : vector<1x16x128xi32>
    %160 = arith.mulf %134, %157 : vector<1x16x128xf32>
    %cst_61 = arith.constant 0xFF800000 : f32
    %161 = vector.broadcast %cst_61 : f32 to vector<1x16x128xf32>
    %162 = arith.select %159, %160, %161 : vector<1x16x128xi1>, vector<1x16x128xf32>
    %cst_62 = arith.constant dense<0xFF800000> : vector<1x128xf32>
    %163 = vector.multi_reduction <maximumf>, %162, %cst_62 [1] : vector<1x16x128xf32> to vector<1x128xf32>
    %164 = tpu.concatenate %69, %113, %163 in 1 : vector<1x128xf32>, vector<1x128xf32>, vector<1x128xf32> -> vector<1x384xf32>
    %165 = arith.truncf %164 : vector<1x384xf32> to vector<1x384xbf16>
    %c0_63 = arith.constant 0 : index
    %c0_64 = arith.constant 0 : index
    %166 = vector.load %arg6[%c0_63, %c0_64] : memref<384x128xbf16, #tpu.memory_space<vmem>>, vector<384x128xbf16>
    %cst_65 = arith.constant dense<0.000000e+00> : vector<1x128xf32>
    %167 = tpu.matmul %165, %166, %cst_65 {dimension_numbers = #tpu.dot_dimension_numbers<[1], [0], [0], [1], [0, 0, 1, 1], [], []>} : vector<1x384xbf16>, vector<384x128xbf16>, vector<1x128xf32> -> vector<1x128xf32>
    %c0_66 = arith.constant 0 : index
    %c0_67 = arith.constant 0 : index
    %168 = vector.load %arg8[%c0_66, %c0_67] : memref<1x128xf32, #tpu.memory_space<vmem>>, vector<1x128xf32>
    %169 = arith.addf %167, %168 : vector<1x128xf32>
    %170 = vector.shape_cast %169 : vector<1x128xf32> to vector<1x1x128xf32>
    %c0_68 = arith.constant 0 : index
    %c0_69 = arith.constant 0 : index
    %c0_70 = arith.constant 0 : index
    %171 = vector.load %arg9[%c0_68, %c0_69, %c0_70] : memref<1x1x128xf32, #tpu.memory_space<vmem>>, vector<1x1x128xf32>
    tpu.vector_store %arg9[%c0_68, %c0_69, %c0_70], %170 {strides = array<i32>} : memref<1x1x128xf32, #tpu.memory_space<vmem>>, vector<1x1x128xf32>,
    return
  }
  func.func @transform_0(%arg0: i32) -> (i32, i32, i32) {
    %c0_i32 = arith.constant 0 : i32
    %c0_i32_0 = arith.constant 0 : i32
    %c0_i32_1 = arith.constant 0 : i32
    return %arg0, %c0_i32, %c0_i32_0 : i32, i32, i32
  }
  func.func @transform_1(%arg0: i32) -> (i32, i32, i32) {
    %c0_i32 = arith.constant 0 : i32
    %c0_i32_0 = arith.constant 0 : i32
    %c0_i32_1 = arith.constant 0 : i32
    return %arg0, %c0_i32, %c0_i32_0 : i32, i32, i32
  }
  func.func @transform_2(%arg0: i32) -> (i32, i32) {
    %c0_i32 = arith.constant 0 : i32
    %c0_i32_0 = arith.constant 0 : i32
    %c0_i32_1 = arith.constant 0 : i32
    return %c0_i32, %c0_i32_0 : i32, i32
  }
  func.func @transform_3(%arg0: i32) -> (i32, i32) {
    %c0_i32 = arith.constant 0 : i32
    %c0_i32_0 = arith.constant 0 : i32
    %c0_i32_1 = arith.constant 0 : i32
    return %c0_i32, %c0_i32_0 : i32, i32
  }
  func.func @transform_4(%arg0: i32) -> (i32, i32) {
    %c0_i32 = arith.constant 0 : i32
    %c0_i32_0 = arith.constant 0 : i32
    %c0_i32_1 = arith.constant 0 : i32
    return %c0_i32, %c0_i32_0 : i32, i32
  }
  func.func @transform_5(%arg0: i32) -> (i32, i32) {
    %c0_i32 = arith.constant 0 : i32
    %c0_i32_0 = arith.constant 0 : i32
    %c0_i32_1 = arith.constant 0 : i32
    return %c0_i32, %c0_i32_0 : i32, i32
  }
  func.func @transform_6(%arg0: i32) -> (i32, i32) {
    %c0_i32 = arith.constant 0 : i32
    %c0_i32_0 = arith.constant 0 : i32
    %c0_i32_1 = arith.constant 0 : i32
    return %c0_i32, %c0_i32_0 : i32, i32
  }
  func.func @transform_7(%arg0: i32) -> (i32, i32) {
    %c0_i32 = arith.constant 0 : i32
    %c0_i32_0 = arith.constant 0 : i32
    %c0_i32_1 = arith.constant 0 : i32
    return %c0_i32, %c0_i32_0 : i32, i32
  }
  func.func @transform_8(%arg0: i32) -> (i32, i32, i32) {
    %c0_i32 = arith.constant 0 : i32
    %c0_i32_0 = arith.constant 0 : i32
    %c0_i32_1 = arith.constant 0 : i32
    return %arg0, %c0_i32, %c0_i32_0 : i32, i32, i32
  }
}

</mosaic_0001>

<bundles_post_ra>
// kernel: tpu_custom_call.1
= control target key start
LH: loop header
LB: loop body
LE: loop exit
PB: predicated region body
PF: predicated region fallthrough
CT: control target
= control target key end

     0   :  { %s15086_s0 = inlined_call_operand.hbm [shape: bf16[2,16,768], index: 0, kind: input, shape index: {}]   ;;  %s15087_s1 = inlined_call_operand.hbm [shape: bf16[2,16,768], index: 1, kind: input, shape index: {}]   ;;  %s15088_s2 = inlined_call_operand.hbm [shape: bf16[768,3072], index: 2, kind: input, shape index: {}]   ;;  %s15089_s3 = inlined_call_operand.hbm [shape: bf16[768,384], index: 3, kind: input, shape index: {}]   ;;  %s15090_s4 = inlined_call_operand.hbm [shape: bf16[128,128], index: 4, kind: input, shape index: {}]   ;;  %s15091_s5 = inlined_call_operand.hbm [shape: bf16[384,128], index: 5, kind: input, shape index: {}]   ;;  %s15092_s6 = inlined_call_operand.hbm [shape: f32[8,128], index: 6, kind: input, shape index: {}]   ;;  %s15093_s7 = inlined_call_operand.hbm [shape: f32[1,128], index: 7, kind: input, shape index: {}]   ;;  %s15094_s8 = inlined_call_operand.hbm [shape: f32[2,1,128], index: 8, kind: output, shape index: {}]  }
   0x1   :  { %15099 = sst [smem:[#allocation24_spill]] %s15086_s0 }
   0x2   :  { %15100 = sst [smem:[#allocation25_spill]] %s15088_s2 }
   0x3   :  { %15101 = sst [smem:[#allocation26_spill]] %s15089_s3 }
   0x4   :  { %15102 = sst [smem:[#allocation27_spill]] %s15090_s4 }
   0x5   :  { %15103 = sst [smem:[#allocation28_spill]] %s15091_s5 }
   0x6   :  { %13 = vsyncpa [#allocation3], 0 }
   0x7   :  { %15 = vsyncpa [#allocation3 + $0x1], 0 }
   0x8   :  { %16 = vsyncpa [#allocation6], 0 }
   0x9   :  { %18 = vsyncpa [#allocation6 + $0x1], 0 }
   0xa   :  { %19 = vsyncpa [#allocation9], 0 }
   0xb   :  { %20 = vsyncpa [#allocation12], 0 }
   0xc   :  { %21 = vsyncpa [#allocation15], 0 }
   0xd   :  { %22 = vsyncpa [#allocation4], 0 }
   0xe   :  { %24 = vsyncpa [#allocation4 + $0x1], 0  ;;  %s14242_s27 = smov 0   ;;  %s14244_s28 = smov 0  }
   0xf   :  { %s14246_s29 = smov 0   ;;  %s14248_s30 = smov 0  }
  0x10 LB: > { %s14178_s9 = smov [#allocation7]   ;;  %s14263_s11 = sadd.s32 4294967295, %s14176_s30   ;;  %s14176_s30 = sphi %s14248_s30, %s15133_s30   ;;  %s14172_s29 = sphi %s14246_s29, %s15132_s29   ;;  %s14168_s28 = sphi %s14244_s28, %s15131_s28   ;;  %s14164_s27 = sphi %s14242_s27, %s15130_s27  }
  0x11   : > { %s251_s10 = sshll.u32 %s14178_s9, 4  ;;  %p11595_p0 = scmp.ge.s32.totalorder %s14176_s30, 1  ;;  %s14268_s10 = int_to_ptr.vmem [resolvable:$true] %s251_s10 }
  0x12   : > { %p15095_p1 = scmp.eq.s32.totalorder %s14263_s11, 0  ;;  %p239_p2 = scmp.lt.s32.totalorder %s14176_s30, 3 }
  0x13   : > { %s14179_s13 = smov [#allocation8]   ;;  %s15106_s2 = sld [smem:[#allocation25_spill]] }
  0x14   : > { %p14270_p3 = pnand %p11595_p0, %p239_p2  ;;  %s264_s14 = sshll.u32 %s14179_s13, 4  ;;  %s14283_s14 = int_to_ptr.vmem [resolvable:$true] %s264_s14 }
  0x16   : > { %s15104_s12 = scalar_select %p14270_p3, 1, 0 }
  0x17   : > { %p13484_p5 = pneg %p14270_p3 }
  0x19   : > { %p14279_p6 = pnand %p13484_p5, %p15095_p1  ;;  %s13862_s18 = scalar_lea.hbm %s15106_s2, 147456 }
  0x1a   : > { %p13863_p7 = scmp.ne.s32.totalorder %s15106_s2, %s13862_s18  ;;  %p13869_p11 = scmp.lt.u32.totalorder %s13862_s18, %s15106_s2 }
  0x1b   : > { %p14293_p8 = pneg %p14279_p6 }
  0x1d   : > { %p13865_p9 = pnand %p14293_p8, %p13863_p7 }
  0x1f   : > { %p13866_p10 = pneg %p13865_p9 }
  0x21   : > { %p13871_p12 = pnand %p13869_p11, %p13866_p10 }
  0x23   : > { %13874 = shalt.err (!%p13871_p12)
}
  0x24   : > { %s13875_s24 = scalar_lea.vmem %s14268_s10, 147456  ;;  %p13883_p5 = scmp.lt.s32.totalorder %s14268_s10, %s14268_s10 }
  0x25   : > { %p13876_p13 = scmp.ne.s32.totalorder %s14268_s10, %s13875_s24  ;;  %p13884_p4 = scmp.lt.s32.totalorder %s13875_s24, %s13875_s24 }
  0x27   : > { %p13878_p0 = pnand %p13876_p13, %p14293_p8  ;;  %p13885_p7 = por %p13884_p4, %p13883_p5 }
  0x29   : > { %p13879_p2 = pneg %p13878_p0 }
  0x2b   : > { %p13886_p9 = pnand %p13885_p7, %p13879_p2 }
  0x2d   : > { %13889 = shalt.err (!%p13886_p9)
}
  0x2e   : > { %s14180_s25 = smov 1536   ;;  %s14181_s26 = smov 96  }
  0x2f   : > { %13487 = dma.hbm_to_vmem [thread:$0]  (!%p14279_p6), %s15106_s2, 147456, %s14268_s10, [#allocation6], %s14180_s25, %s14180_s25, %s14181_s26  }
  0x30   : > { %s15108_s3 = sld [smem:[#allocation26_spill]] }
  0x36   : > { %s13890_s18 = scalar_lea.hbm %s15108_s3, 18432 }
  0x37   : > { %p13891_p4 = scmp.ne.s32.totalorder %s15108_s3, %s13890_s18  ;;  %p13897_p12 = scmp.lt.u32.totalorder %s13890_s18, %s15108_s3 }
  0x39   : > { %p13893_p10 = pnand %p13891_p4, %p14293_p8 }
  0x3b   : > { %p13894_p11 = pneg %p13893_p10 }
  0x3d   : > { %p13899_p13 = pnand %p13897_p12, %p13894_p11 }
  0x3f   : > { %13902 = shalt.err (!%p13899_p13)
}
  0x40   : > { %s13903_s10 = scalar_lea.vmem %s14283_s14, 18432  ;;  %p13911_p7 = scmp.lt.s32.totalorder %s14283_s14, %s14283_s14 }
  0x41   : > { %p13904_p0 = scmp.ne.s32.totalorder %s14283_s14, %s13903_s10  ;;  %p13912_p9 = scmp.lt.s32.totalorder %s13903_s10, %s13903_s10 }
  0x43   : > { %p13906_p2 = pnand %p13904_p0, %p14293_p8  ;;  %p13913_p4 = por %p13912_p9, %p13911_p7 }
  0x45   : > { %p13907_p5 = pneg %p13906_p2 }
  0x47   : > { %p13914_p10 = pnand %p13913_p4, %p13907_p5 }
  0x49   : > { %13917 = shalt.err (!%p13914_p10)
}
  0x4a   : > { %s14182_s24 = smov 192   ;;  %s14183_s25 = smov 12  }
  0x4b   : > { %13490 = dma.hbm_to_vmem [thread:$0]  (!%p14279_p6), %s15108_s3, 18432, %s14283_s14, [#allocation9], %s14182_s24, %s14182_s24, %s14183_s25  }
  0x4c   : > { %s14184_s13 = smov [#allocation11]   ;;  %s14185_s17 = smov [#allocation10]  }
  0x4d   : > { %s290_s16 = sshll.u32 %s14184_s13, 4  ;;  %s277_s18 = sshll.u32 %s14185_s17, 4  ;;  %s291_s16 = int_to_ptr.vmem [resolvable:$true] %s290_s16  ;;  %s14337_s18 = int_to_ptr.vmem [resolvable:$true] %s277_s18 }
  0x4e   : > { %s15109_s5 = sld [smem:[#allocation28_spill]] }
  0x54   : > { %s13918_s22 = scalar_lea.hbm %s15109_s5, 3072 }
  0x55   : > { %p13919_p11 = scmp.ne.s32.totalorder %s15109_s5, %s13918_s22  ;;  %p13925_p0 = scmp.lt.u32.totalorder %s13918_s22, %s15109_s5 }
  0x57   : > { %p13921_p12 = pnand %p13919_p11, %p14293_p8 }
  0x59   : > { %p13922_p13 = pneg %p13921_p12 }
  0x5b   : > { %p13927_p2 = pnand %p13925_p0, %p13922_p13 }
  0x5d   : > { %13930 = shalt.err (!%p13927_p2)
}
  0x5e   : > { %s13931_s24 = scalar_lea.vmem %s291_s16, 3072  ;;  %p13939_p4 = scmp.lt.s32.totalorder %s291_s16, %s291_s16 }
  0x5f   : > { %p13932_p5 = scmp.ne.s32.totalorder %s291_s16, %s13931_s24  ;;  %p13940_p10 = scmp.lt.s32.totalorder %s13931_s24, %s13931_s24 }
  0x61   : > { %p13934_p7 = pnand %p13932_p5, %p14293_p8  ;;  %p13941_p1 = por %p13940_p10, %p13939_p4 }
  0x63   : > { %p13935_p9 = pneg %p13934_p7 }
  0x65   : > { %p13942_p3 = pnand %p13941_p1, %p13935_p9 }
  0x67   : > { %13945 = shalt.err (!%p13942_p3)
}
  0x68   : > { %s14186_s25 = smov 64   ;;  %s14187_s9 = smov 4  }
  0x69   : > { %13496 = dma.hbm_to_vmem [thread:$0]  (!%p14279_p6), %s15109_s5, 3072, %s291_s16, [#allocation12], %s14186_s25, %s14186_s25, %s14187_s9  }
  0x6a   : > { %s15110_s4 = sld [smem:[#allocation27_spill]] }
  0x70   : > { %s13946_s22 = scalar_lea.hbm %s15110_s4, 1024 }
  0x71   : > { %p13947_p11 = scmp.ne.s32.totalorder %s15110_s4, %s13946_s22  ;;  %p13953_p12 = scmp.lt.u32.totalorder %s13946_s22, %s15110_s4 }
  0x73   : > { %p13949_p1 = pnand %p13947_p11, %p14293_p8 }
  0x75   : > { %p13950_p3 = pneg %p13949_p1 }
  0x77   : > { %p13955_p13 = pnand %p13953_p12, %p13950_p3 }
  0x79   : > { %13958 = shalt.err (!%p13955_p13)
}
  0x7a   : > { %s13959_s16 = scalar_lea.vmem %s14337_s18, 1024  ;;  %p13967_p7 = scmp.lt.s32.totalorder %s14337_s18, %s14337_s18 }
  0x7b   : > { %p13960_p0 = scmp.ne.s32.totalorder %s14337_s18, %s13959_s16  ;;  %p13968_p9 = scmp.lt.s32.totalorder %s13959_s16, %s13959_s16 }
  0x7d   : > { %p13962_p2 = pnand %p13960_p0, %p14293_p8  ;;  %p13969_p4 = por %p13968_p9, %p13967_p7 }
  0x7f   : > { %p13963_p5 = pneg %p13962_p2 }
  0x81   : > { %p13970_p10 = pnand %p13969_p4, %p13963_p5 }
  0x83   : > { %13973 = shalt.err (!%p13970_p10)
}
  0x84   : > { %13493 = dma.hbm_to_vmem [thread:$0]  (!%p14279_p6), %s15110_s4, 1024, %s14337_s18, [#allocation9], %s14186_s25, %s14186_s25, %s14187_s9  }
  0x85   : > { %s14188_s17 = smov [#allocation13]   ;;  %s14189_s20 = smov [#allocation14]  }
  0x86   : > { %s304_s19 = sshll.u32 %s14188_s17, 4  ;;  %s315_s22 = sshll.u32 %s14189_s20, 4  ;;  %s305_s19 = int_to_ptr.vmem [resolvable:$true] %s304_s19  ;;  %s14380_s22 = int_to_ptr.vmem [resolvable:$true] %s315_s22 }
  0x87   : > { %s13974_s26 = scalar_lea.hbm %s15092_s6, 128 }
  0x88   : > { %p13975_p11 = scmp.ne.s32.totalorder %s15092_s6, %s13974_s26  ;;  %p13981_p12 = scmp.lt.u32.totalorder %s13974_s26, %s15092_s6 }
  0x8a   : > { %p13977_p1 = pnand %p13975_p11, %p14293_p8 }
  0x8c   : > { %p13978_p3 = pneg %p13977_p1 }
  0x8e   : > { %p13983_p13 = pnand %p13981_p12, %p13978_p3 }
  0x90   : > { %13986 = shalt.err (!%p13983_p13)
}
  0x91   : > { %s13987_s25 = scalar_lea.vmem %s305_s19, 128  ;;  %p13995_p7 = scmp.lt.s32.totalorder %s305_s19, %s305_s19 }
  0x92   : > { %p13988_p0 = scmp.ne.s32.totalorder %s305_s19, %s13987_s25  ;;  %p13996_p9 = scmp.lt.s32.totalorder %s13987_s25, %s13987_s25 }
  0x94   : > { %p13990_p2 = pnand %p13988_p0, %p14293_p8  ;;  %p13997_p4 = por %p13996_p9, %p13995_p7 }
  0x96   : > { %p13991_p5 = pneg %p13990_p2 }
  0x98   : > { %p13998_p10 = pnand %p13997_p4, %p13991_p5 }
  0x9a   : > { %14001 = shalt.err (!%p13998_p10)
}
  0x9b   : > { %13499 = dma.hbm_to_vmem [thread:$0]  (!%p14279_p6), %s15092_s6, 128, %s305_s19, [#allocation12]  }
  0x9c   : > { %s14002_s23 = scalar_lea.hbm %s15093_s7, 16 }
  0x9d   : > { %p14003_p11 = scmp.ne.s32.totalorder %s15093_s7, %s14002_s23  ;;  %p14009_p12 = scmp.lt.u32.totalorder %s14002_s23, %s15093_s7 }
  0x9f   : > { %p14005_p1 = pnand %p14003_p11, %p14293_p8 }
  0xa1   : > { %p14006_p3 = pneg %p14005_p1 }
  0xa3   : > { %p14011_p13 = pnand %p14009_p12, %p14006_p3 }
  0xa5   : > { %14014 = shalt.err (!%p14011_p13)
}
  0xa6   : > { %s14015_s19 = scalar_lea.vmem %s14380_s22, 16  ;;  %s14022_s24 = scalar_lea.vmem %s14380_s22, 32 }
  0xa7   : > { %p14016_p0 = scmp.ne.s32.totalorder %s14380_s22, %s14015_s19  ;;  %p14023_p7 = scmp.lt.s32.totalorder %s14380_s22, %s14380_s22 }
  0xa8   : > { %p14024_p9 = scmp.lt.s32.totalorder %s14022_s24, %s14015_s19 }
  0xa9   : > { %p14018_p2 = pnand %p14016_p0, %p14293_p8 }
  0xaa   : > { %p14025_p4 = por %p14024_p9, %p14023_p7 }
  0xab   : > { %p14019_p5 = pneg %p14018_p2 }
  0xad   : > { %p14026_p10 = pnand %p14025_p4, %p14019_p5 }
  0xaf   : > { %14029 = shalt.err (!%p14026_p10)
}
  0xb0   : > { %13502 = dma.hbm_to_vmem [thread:$0]  (!%p14279_p6), %s15093_s7, 16, %s14380_s22, [#allocation15]  }
  0xb1   : > { %s11594_s15 = sadd.s32 4294967294, %s14176_s30   ;;  %s14426_s21 = sadd.s32 1, %s14176_s30  }
  0xb2   : > { %s34_s9 = ssub.s32 %s14176_s30, %s14426_s21  ;;  %s37_s13 = sadd.s32 1, %s14172_s29 }
  0xb3   : > { %p35_p8 = scmp.eq.s32.totalorder %s34_s9, 0  ;;  %p44_p11 = scmp.ne.s32.totalorder %s14172_s29, %s14168_s28 }
  0xb4   : > { %p45_p1 = scmp.eq.s32.totalorder %s14176_s30, 0  ;;  %p50_p3 = scmp.ne.s32.totalorder %s14168_s28, %s14164_s27 }
  0xb5   : > { %s14437_s17 = scalar_select %p35_p8, %s14172_s29, %s37_s13  }
  0xb6   : > { %p46_p12 = por %p45_p1, %p44_p11  ;;  %p15111_p13 = scmp.eq.s32.totalorder %s14263_s11, 0 }
  0xb7   : > { %p226_p6 = scmp.eq.s32.totalorder %s14263_s11, 1  ;;  %p232_p2 = scmp.eq.s32.totalorder %s11594_s15, 1 }
  0xb8   : > { %p14441_p0 = por %p15111_p13, %p50_p3  ;;  %p13520_p5 = scmp.lt.s32.totalorder %s14176_s30, 2 }
  0xb9   : > { %s326_s22 = sand.u32 1, %s14172_s29   ;;  %p14448_p7 = por %p226_p6, %p44_p11 }
  0xba   : > { %p14452_p9 = por %p232_p2, %p50_p3  ;;  %s14456_s26 = smul.u32 48, %s326_s22 }
  0xbb   : > { %s15113_s23 = scalar_select %p14448_p7, 1, 0 }
  0xbc   : > { %s15114_s10 = scalar_select %p14452_p9, 1, 0 }
  0xbd   : > { %s15097_s14 = smul.u32 768, %s14176_s30  ;;  %p14459_p4 = pnand %p13520_p5, %p46_p12 }
  0xbe   : > { %s15116_s0 = sld [smem:[#allocation24_spill]]  ;;  %s330_s25 = scalar_lea.vmem [#allocation2], %s14456_s26 }
  0xbf   : > { %s337_s15 = sshll.u32 %s330_s25, 4  ;;  %s347_s9 = sand.u32 1, %s14176_s30   ;;  %s14471_s15 = int_to_ptr.vmem [resolvable:$true] %s337_s15 }
  0xc0   : > { %s14474_s13 = scalar_lea.sflag [#allocation3], %s326_s22  ;;  %p14032_p8 = pneg %p14459_p4 }
  0xc4   : > { %s14468_s18 = scalar_lea.hbm %s15116_s0, %s15097_s14  ;;  %s14035_s14 = scalar_lea.hbm %s15116_s0, 1536 }
  0xc5   : > { %s14030_s2 = scalar_lea.hbm %s14468_s18, 768  ;;  %p14036_p3 = scmp.lt.u32.totalorder %s14468_s18, %s15116_s0 }
  0xc6   : > { %p14031_p10 = scmp.ne.s32.totalorder %s14468_s18, %s14030_s2  ;;  %p14037_p12 = scmp.lt.u32.totalorder %s14035_s14, %s14030_s2 }
  0xc7   : > { %p14039_p6 = scmp.lt.u32.totalorder %s14030_s2, %s14468_s18 }
  0xc8   : > { %p14033_p11 = pnand %p14032_p8, %p14031_p10  ;;  %p14038_p13 = por %p14037_p12, %p14036_p3 }
  0xca   : > { %p14034_p1 = pneg %p14033_p11  ;;  %p14040_p2 = por %p14039_p6, %p14038_p13 }
  0xcc   : > { %p14041_p5 = pnand %p14040_p2, %p14034_p1 }
  0xce   : > { %14044 = shalt.err (!%p14041_p5)
}
  0xcf   : > { %s14045_s22 = scalar_lea.vmem %s14471_s15, 768  ;;  %s14190_s25 = smov [#allocation2]  }
  0xd0   : > { %p14046_p10 = scmp.ne.s32.totalorder %s14471_s15, %s14045_s22  ;;  %s14050_s19 = sshll.u32 %s14190_s25, 4  ;;  %s14051_s19 = int_to_ptr.vmem [resolvable:$false] %s14050_s19 }
  0xd1   : > { %s14052_s3 = scalar_lea.vmem %s14051_s19, 1536  ;;  %p14053_p7 = scmp.lt.s32.totalorder %s14471_s15, %s14051_s19 }
  0xd2   : > { %p14048_p11 = pnand %p14046_p10, %p14032_p8  ;;  %p14054_p3 = scmp.lt.s32.totalorder %s14052_s3, %s14045_s22 }
  0xd4   : > { %p14049_p9 = pneg %p14048_p11  ;;  %p14055_p12 = por %p14054_p3, %p14053_p7 }
  0xd6   : > { %p14056_p13 = pnand %p14055_p12, %p14049_p9 }
  0xd8   : > { %14059 = shalt.err (!%p14056_p13)
}
  0xd9   : > { %s14191_s2 = smov 384   ;;  %s14192_s4 = smov 24  }
  0xda   : > { %13506 = dma.hbm_to_vmem [thread:$0]  (!%p14459_p4), %s14468_s18, 768, %s14471_s15, %s14474_s13, %s14191_s2, %s14191_s2, %s14192_s4  }
  0xdb   : > { %s15117_s14 = smul.u32 768, %s14176_s30  ;;  %s351_s19 = scalar_lea.vmem [#allocation5], %s14456_s26 }
  0xdc   : > { %s358_s3 = sshll.u32 %s351_s19, 4  ;;  %s14517_s0 = scalar_lea.sflag [#allocation6], %s347_s9  ;;  %s14513_s3 = int_to_ptr.vmem [resolvable:$true] %s358_s3 }
  0xdd   : > { %s14510_s25 = scalar_lea.hbm %s15087_s1, %s15117_s14  ;;  %s14065_s13 = scalar_lea.hbm %s15087_s1, 1536 }
  0xde   : > { %s14060_s5 = scalar_lea.hbm %s14510_s25, 768  ;;  %p14066_p6 = scmp.lt.u32.totalorder %s14510_s25, %s15087_s1 }
  0xdf   : > { %p14061_p7 = scmp.ne.s32.totalorder %s14510_s25, %s14060_s5  ;;  %p14067_p2 = scmp.lt.u32.totalorder %s14065_s13, %s14060_s5 }
  0xe0   : > { %p14069_p10 = scmp.lt.u32.totalorder %s14060_s5, %s14510_s25 }
  0xe1   : > { %p14063_p9 = pnand %p14061_p7, %p14032_p8  ;;  %p14068_p5 = por %p14067_p2, %p14066_p6 }
  0xe3   : > { %p14064_p1 = pneg %p14063_p9  ;;  %p14070_p11 = por %p14069_p10, %p14068_p5 }
  0xe5   : > { %p14071_p3 = pnand %p14070_p11, %p14064_p1 }
  0xe7   : > { %14074 = shalt.err (!%p14071_p3)
}
  0xe8   : > { %s14075_s26 = scalar_lea.vmem %s14513_s3, 768  ;;  %s14193_s9 = smov [#allocation5]  }
  0xe9   : > { %p14076_p12 = scmp.ne.s32.totalorder %s14513_s3, %s14075_s26  ;;  %s14080_s22 = sshll.u32 %s14193_s9, 4  ;;  %s14081_s22 = int_to_ptr.vmem [resolvable:$false] %s14080_s22 }
  0xea   : > { %s14082_s19 = scalar_lea.vmem %s14081_s22, 1536  ;;  %p14083_p9 = scmp.lt.s32.totalorder %s14513_s3, %s14081_s22 }
  0xeb   : > { %p14078_p13 = pnand %p14076_p12, %p14032_p8  ;;  %p14084_p6 = scmp.lt.s32.totalorder %s14082_s19, %s14075_s26 }
  0xed   : > { %p14079_p7 = pneg %p14078_p13  ;;  %p14085_p2 = por %p14084_p6, %p14083_p9 }
  0xef   : > { %p14086_p5 = pnand %p14085_p2, %p14079_p7 }
  0xf1   : > { %14089 = shalt.err (!%p14086_p5)
}
  0xf2   : > { %13509 = dma.hbm_to_vmem [thread:$0]  (!%p14459_p4), %s14510_s25, 768, %s14513_s3, %s14517_s0, %s14191_s2, %s14191_s2, %s14192_s4  }
  0xf3   : > { %p15118_p8 = scmp.ne.s32.totalorder %s15104_s12, 0 }
  0xf4   : > { %s14549_s5 = sand.u32 (!%p15118_p8), 1, %s14168_s28  }
  0xf5   : > { %370 = sbr.rel (%p15118_p8) target bundleno = 2301 (0x8fd), region = 52  ;;  %s373_s15 = scalar_lea.sflag (!%p15118_p8), [#allocation3], %s14549_s5 }
  0xf6   : > { %s13453_s18 = smul.u32 (!%p15118_p8), 48, %s14549_s5 }
  0xf8   : > { %s14553_s13 = scalar_lea.vmem (!%p15118_p8), [#allocation2], %s13453_s18 }
  0xfc   : > { %14135 = dma.done.wait (%p14441_p0), %s373_s15, 768  }
  0xfd   : > { %14137 = vsyncadd (%p14441_p0), %s373_s15, 4294966528  ;;  %s381_s0 = sand.u32 1, %s14263_s11   ;;  %s14560_s16 = scalar_lea.vmem [#allocation5], %s13453_s18 }
  0xfe   : > { %s382_s12 = scalar_lea.sflag [#allocation6], %s381_s0 }
  0xff   : > { %14139 = dma.done.wait (%p14441_p0), %s382_s12, 768  }
 0x100   : > { %14141 = vsyncadd (%p14441_p0), %s382_s12, 4294966528  ;;  %p15119_p4 = scmp.eq.s32.totalorder %s14263_s11, 0 }
 0x102   : > { %14143 = dma.done.wait (%p15119_p4), [#allocation6], 147456   ;;  %p15120_p1 = pmov %p15119_p4 }
 0x104   : > { %14145 = vsyncadd (%p15120_p1), [#allocation6], 4294819840  ;;  %p15121_p10 = pmov %p15120_p1 }
 0x105   : > { %p15122_p11 = pmov %p15120_p1 }
 0x106   : > { %14147 = dma.done.wait (%p15121_p10), [#allocation9], 19456  }
 0x107   : > { %14149 = vsyncadd (%p15122_p11), [#allocation9], 4294947840  ;;  %p15123_p3 = pmov %p15120_p1 }
 0x108   : > { %p15124_p12 = pmov %p15120_p1 }
 0x109   : > { %14151 = dma.done.wait (%p15123_p3), [#allocation12], 3200  }
 0x10a   : > { %14153 = vsyncadd (%p15124_p12), [#allocation12], 4294964096  ;;  %p15125_p0 = pmov %p15120_p1 }
 0x10c   : > { %14155 = dma.done.wait (%p15125_p0), [#allocation15], 16   ;;  %p15126_p13 = pmov %p15125_p0 }
 0x10d   : > { %v13576_v0 = vld [vmem:[#allocation8 + $0x4] ss:$12 sps:$4 sm:$0xff]   ;;  %v13580_v2 = vld [vmem:[#allocation8] ss:$12 sps:$4 sm:$0xff]   ;;  %v13582_v4 = vld [vmem:[#allocation8 + $0x1c] ss:$12 sps:$4 sm:$0xff]  }
 0x10e   : > { %14157 = vsyncadd (%p15126_p13), [#allocation15], 4294967280  ;;  %v13578_v1 = vld [vmem:[#allocation8 + $0x184] ss:$12 sps:$4 sm:$0xff]   ;;  %1443 = vmatprep.subr.bf16.mxu0 %v13576_v0  ;;  %v13581_v3 = vld [vmem:[#allocation8 + $0x180] ss:$12 sps:$4 sm:$0xff]  }
 0x10f   : > { %1486 = vmatprep.subr.bf16.mxu1 %v13578_v1  ;;  %1444 = vmatpush1.bf16.msra.mxu0 %v13580_v2  ;;  %v13584_v5 = vld [vmem:[#allocation8 + $0x19c] ss:$12 sps:$4 sm:$0xff]   ;;  %v13586_v6 = vld [vmem:[#allocation8 + $0x18] ss:$12 sps:$4 sm:$0xff]   ;;  %v13588_v8 = vld [vmem:[#allocation8 + $0x34] ss:$12 sps:$4 sm:$0xff]  }
 0x110   : > { %1487 = vmatpush1.bf16.msra.mxu1 %v13581_v3  ;;  %1445 = vmatprep.subr.bf16.mxu0 %v13582_v4  ;;  %v13587_v7 = vld [vmem:[#allocation8 + $0x198] ss:$12 sps:$4 sm:$0xff]   ;;  %v13590_v9 = vld [vmem:[#allocation8 + $0x1b4] ss:$12 sps:$4 sm:$0xff]   ;;  %v13592_v10 = vld [vmem:[#allocation8 + $0x30] ss:$12 sps:$4 sm:$0xff]  }
 0x111   : > { %1488 = vmatprep.subr.bf16.mxu1 %v13584_v5  ;;  %v13593_v11 = vld [vmem:[#allocation8 + $0x1b0] ss:$12 sps:$4 sm:$0xff]   ;;  %v13594_v12 = vld [vmem:[#allocation8 + $0x4c] ss:$12 sps:$4 sm:$0xff]   ;;  %v13598_v14 = vld [vmem:[#allocation8 + $0x48] ss:$12 sps:$4 sm:$0xff]  }
 0x112   : > { %v13596_v13 = vld [vmem:[#allocation8 + $0x1cc] ss:$12 sps:$4 sm:$0xff]   ;;  %v13599_v15 = vld [vmem:[#allocation8 + $0x1c8] ss:$12 sps:$4 sm:$0xff]   ;;  %v13600_v16 = vld [vmem:[#allocation8 + $0x64] ss:$12 sps:$4 sm:$0xff]  }
 0x113   : > { %1446 = vmatpush1.bf16.msra.mxu0 %v13586_v6  ;;  %v13602_v17 = vld [vmem:[#allocation8 + $0x1e4] ss:$12 sps:$4 sm:$0xff]   ;;  %v13604_v18 = vld [vmem:[#allocation8 + $0x60] ss:$12 sps:$4 sm:$0xff]   ;;  %v13606_v20 = vld [vmem:[#allocation8 + $0x7c] ss:$12 sps:$4 sm:$0xff]  }
 0x114   : > { %1489 = vmatpush1.bf16.msra.mxu1 %v13587_v7  ;;  %1447 = vmatprep.subr.bf16.mxu0 %v13588_v8  ;;  %v13605_v19 = vld [vmem:[#allocation8 + $0x1e0] ss:$12 sps:$4 sm:$0xff]   ;;  %v13608_v21 = vld [vmem:[#allocation8 + $0x1fc] ss:$12 sps:$4 sm:$0xff]   ;;  %v13610_v22 = vld [vmem:[#allocation8 + $0x78] ss:$12 sps:$4 sm:$0xff]  }
 0x115   : > { %1490 = vmatprep.subr.bf16.mxu1 %v13590_v9  ;;  %v13611_v23 = vld [vmem:[#allocation8 + $0x1f8] ss:$12 sps:$4 sm:$0xff]   ;;  %v13612_v24 = vld [vmem:[#allocation8 + $0x94] ss:$12 sps:$4 sm:$0xff]   ;;  %v13616_v26 = vld [vmem:[#allocation8 + $0x90] ss:$12 sps:$4 sm:$0xff]  }
 0x116   : > { %v13614_v25 = vld [vmem:[#allocation8 + $0x214] ss:$12 sps:$4 sm:$0xff]   ;;  %v13617_v27 = vld [vmem:[#allocation8 + $0x210] ss:$12 sps:$4 sm:$0xff]   ;;  %v13618_v28 = vld [vmem:[#allocation8 + $0xac] ss:$12 sps:$4 sm:$0xff]  }
 0x117   : > { %1448 = vmatpush1.bf16.msra.mxu0 %v13592_v10  ;;  %v13620_v29 = vld [vmem:[#allocation8 + $0x22c] ss:$12 sps:$4 sm:$0xff]   ;;  %v13622_v30 = vld [vmem:[#allocation8 + $0xa8] ss:$12 sps:$4 sm:$0xff]   ;;  %v13624_v32 = vld [vmem:[#allocation8 + $0xc4] ss:$12 sps:$4 sm:$0xff]  }
 0x118   : > { %1491 = vmatpush1.bf16.msra.mxu1 %v13593_v11  ;;  %1449 = vmatprep.subr.bf16.mxu0 %v13594_v12  ;;  %v13623_v31 = vld [vmem:[#allocation8 + $0x228] ss:$12 sps:$4 sm:$0xff]   ;;  %v13626_v33 = vld [vmem:[#allocation8 + $0x244] ss:$12 sps:$4 sm:$0xff]   ;;  %v13628_v34 = vld [vmem:[#allocation8 + $0xc0] ss:$12 sps:$4 sm:$0xff]  }
 0x119   : > { %1492 = vmatprep.subr.bf16.mxu1 %v13596_v13  ;;  %v13629_v35 = vld [vmem:[#allocation8 + $0x240] ss:$12 sps:$4 sm:$0xff]   ;;  %v13630_v36 = vld [vmem:[#allocation8 + $0xdc] ss:$12 sps:$4 sm:$0xff]   ;;  %v13634_v38 = vld [vmem:[#allocation8 + $0xd8] ss:$12 sps:$4 sm:$0xff]  }
 0x11a   : > { %v13632_v37 = vld [vmem:[#allocation8 + $0x25c] ss:$12 sps:$4 sm:$0xff]   ;;  %v13635_v39 = vld [vmem:[#allocation8 + $0x258] ss:$12 sps:$4 sm:$0xff]   ;;  %v13636_v40 = vld [vmem:[#allocation8 + $0xf4] ss:$12 sps:$4 sm:$0xff]  }
 0x11b   : > { %1450 = vmatpush1.bf16.msra.mxu0 %v13598_v14  ;;  %v13638_v41 = vld [vmem:[#allocation8 + $0x274] ss:$12 sps:$4 sm:$0xff]   ;;  %v13640_v42 = vld [vmem:[#allocation8 + $0xf0] ss:$12 sps:$4 sm:$0xff]   ;;  %v13642_v44 = vld [vmem:[#allocation8 + $0x10c] ss:$12 sps:$4 sm:$0xff]  }
 0x11c   : > { %1493 = vmatpush1.bf16.msra.mxu1 %v13599_v15  ;;  %1451 = vmatprep.subr.bf16.mxu0 %v13600_v16  ;;  %v13641_v43 = vld [vmem:[#allocation8 + $0x270] ss:$12 sps:$4 sm:$0xff]   ;;  %v13644_v45 = vld [vmem:[#allocation8 + $0x28c] ss:$12 sps:$4 sm:$0xff]   ;;  %v13646_v46 = vld [vmem:[#allocation8 + $0x108] ss:$12 sps:$4 sm:$0xff]  }
 0x11d   : > { %1494 = vmatprep.subr.bf16.mxu1 %v13602_v17  ;;  %v13647_v47 = vld [vmem:[#allocation8 + $0x288] ss:$12 sps:$4 sm:$0xff]   ;;  %v13648_v48 = vld [vmem:[#allocation8 + $0x124] ss:$12 sps:$4 sm:$0xff]   ;;  %v13652_v52 = vld [vmem:[#allocation8 + $0x120] ss:$12 sps:$4 sm:$0xff]  }
 0x11e   : > { %v13674_v49 = vld [vmem:[%s14560_s16 + $0x4] ss:$24 sps:$4 sm:$0xff]   ;;  %v14588_v3 = vld [vmem:[%s14560_s16] ss:$24 sps:$4 sm:$0xff]   ;;  %vm14195_vm0 = vmmov 0   ;;  %s12956_s20 = sshll.u32 %s14263_s11, 4 }
 0x11f   : > { %1452 = vmatpush1.bf16.msra.mxu0 %v13604_v18  ;;  %v13650_v50 = vld [vmem:[#allocation8 + $0x2a4] ss:$12 sps:$4 sm:$0xff]   ;;  %1475 = vmatprep.mubr.bf16.mxu0 %v13674_v49  ;;  %v13653_v53 = vld [vmem:[#allocation8 + $0x2a0] ss:$12 sps:$4 sm:$0xff]   ;;  %v13654_v54 = vld [vmem:[#allocation8 + $0x13c] ss:$12 sps:$4 sm:$0xff]   ;;  %s15042_s14 = scalar_lea.hbm %s15094_s8, %s12956_s20 }
 0x120   : > { %1495 = vmatpush1.bf16.msra.mxu1 %v13605_v19  ;;  %1453 = vmatprep.subr.bf16.mxu0 %v13606_v20  ;;  %v14584_v51 = vld [vmem:[%s14560_s16 + $0xc] ss:$24 sps:$4 sm:$0xff]   ;;  %v14591_v4 = vld [vmem:[%s14560_s16 + $0x8] ss:$24 sps:$4 sm:$0xff]   ;;  %s445_s2 = scalar_lea.vmem [#allocation16], %s14549_s5  ;;  %s11436_s11 = scalar_lea.sflag [#allocation4], %s14549_s5 }
 0x121   : > { %1496 = vmatprep.subr.bf16.mxu1 %v13608_v21  ;;  %1518 = vmatprep.mubr.bf16.mxu1 %v14584_v51  ;;  %v13656_v55 = vld [vmem:[#allocation8 + $0x2bc] ss:$12 sps:$4 sm:$0xff]   ;;  %v13658_v56 = vld [vmem:[#allocation8 + $0x138] ss:$12 sps:$4 sm:$0xff]   ;;  %v13660_v58 = vld [vmem:[#allocation8 + $0x154] ss:$12 sps:$4 sm:$0xff]  }
 0x122   : > { %v13659_v57 = vld [vmem:[#allocation8 + $0x2b8] ss:$12 sps:$4 sm:$0xff]   ;;  %v13662_v59 = vld [vmem:[#allocation8 + $0x2d4] ss:$12 sps:$4 sm:$0xff]   ;;  %v13664_v60 = vld [vmem:[#allocation8 + $0x150] ss:$12 sps:$4 sm:$0xff]  }
 0x123   : > { %1454 = vmatpush1.bf16.msra.mxu0 %v13610_v22  ;;  %v13665_v61 = vld [vmem:[#allocation8 + $0x2d0] ss:$12 sps:$4 sm:$0xff]   ;;  %v13666_v62 = vld [vmem:[#allocation8 + $0x16c] ss:$12 sps:$4 sm:$0xff]   ;;  %v13670_v0 = vld [vmem:[#allocation8 + $0x168] ss:$12 sps:$4 sm:$0xff]  }
 0x124   : > { %1497 = vmatpush1.bf16.msra.mxu1 %v13611_v23  ;;  %1455 = vmatprep.subr.bf16.mxu0 %v13612_v24  ;;  %v13668_v63 = vld [vmem:[#allocation8 + $0x2ec] ss:$12 sps:$4 sm:$0xff]   ;;  %v13671_v1 = vld [vmem:[#allocation8 + $0x2e8] ss:$12 sps:$4 sm:$0xff]   ;;  %v13680_v2 = vld [vmem:[#allocation8 + $0x304] ss:$12 sps:$4 sm:$0xff]  }
 0x125   : > { %1498 = vmatprep.subr.bf16.mxu1 %v13614_v25  ;;  %v13681_v5 = vld [vmem:[#allocation8 + $0xc8] ss:$12 sps:$4 sm:$0xff]   ;;  %v13678_v6 = vld [vmem:[#allocation8 + $0x300] ss:$12 sps:$4 sm:$0xff]   ;;  %v13683_v10 = vld [vmem:[#allocation8 + $0x318] ss:$12 sps:$4 sm:$0xff]  }
 0x126   : > { %v13682_v7 = vld [vmem:[#allocation8 + $0x8] ss:$12 sps:$4 sm:$0xff]   ;;  %v13686_v9 = vld [vmem:[#allocation8 + $0xe0] ss:$12 sps:$4 sm:$0xff]   ;;  %v13691_v13 = vld [vmem:[#allocation8 + $0xf8] ss:$12 sps:$4 sm:$0xff]  }
 0x127   : > { %1456 = vmatpush1.bf16.msra.mxu0 %v13616_v26  ;;  %v13685_v8 = vld [vmem:[#allocation8 + $0x31c] ss:$12 sps:$4 sm:$0xff]   ;;  %v13687_v11 = vld [vmem:[#allocation8 + $0x20] ss:$12 sps:$4 sm:$0xff]   ;;  %v13692_v15 = vld [vmem:[#allocation8 + $0x38] ss:$12 sps:$4 sm:$0xff]  }
 0x128   : > { %1499 = vmatpush1.bf16.msra.mxu1 %v13617_v27  ;;  %1457 = vmatprep.subr.bf16.mxu0 %v13618_v28  ;;  %v13690_v12 = vld [vmem:[#allocation8 + $0x334] ss:$12 sps:$4 sm:$0xff]   ;;  %v13688_v14 = vld [vmem:[#allocation8 + $0x330] ss:$12 sps:$4 sm:$0xff]   ;;  %v13695_v16 = vld [vmem:[#allocation8 + $0x34c] ss:$12 sps:$4 sm:$0xff]  }
 0x129   : > { %1500 = vmatprep.subr.bf16.mxu1 %v13620_v29  ;;  %v13696_v17 = vld [vmem:[#allocation8 + $0x110] ss:$12 sps:$4 sm:$0xff]   ;;  %v13693_v18 = vld [vmem:[#allocation8 + $0x348] ss:$12 sps:$4 sm:$0xff]   ;;  %v13698_v22 = vld [vmem:[#allocation8 + $0x360] ss:$12 sps:$4 sm:$0xff]  }
 0x12a   : > { %v13697_v19 = vld [vmem:[#allocation8 + $0x50] ss:$12 sps:$4 sm:$0xff]   ;;  %v13701_v21 = vld [vmem:[#allocation8 + $0x128] ss:$12 sps:$4 sm:$0xff]   ;;  %v13706_v25 = vld [vmem:[#allocation8 + $0x140] ss:$12 sps:$4 sm:$0xff]  }
 0x12b   : > { %1458 = vmatpush1.bf16.msra.mxu0 %v13622_v30  ;;  %v13700_v20 = vld [vmem:[#allocation8 + $0x364] ss:$12 sps:$4 sm:$0xff]   ;;  %v13702_v23 = vld [vmem:[#allocation8 + $0x68] ss:$12 sps:$4 sm:$0xff]   ;;  %v13707_v27 = vld [vmem:[#allocation8 + $0x80] ss:$12 sps:$4 sm:$0xff]  }
 0x12c   : > { %1501 = vmatpush1.bf16.msra.mxu1 %v13623_v31  ;;  %1459 = vmatprep.subr.bf16.mxu0 %v13624_v32  ;;  %v13705_v24 = vld [vmem:[#allocation8 + $0x37c] ss:$12 sps:$4 sm:$0xff]   ;;  %v13703_v26 = vld [vmem:[#allocation8 + $0x378] ss:$12 sps:$4 sm:$0xff]   ;;  %v13710_v28 = vld [vmem:[#allocation8 + $0x394] ss:$12 sps:$4 sm:$0xff]  }
 0x12d   : > { %1502 = vmatprep.subr.bf16.mxu1 %v13626_v33  ;;  %v13711_v29 = vld [vmem:[#allocation8 + $0x158] ss:$12 sps:$4 sm:$0xff]   ;;  %v13708_v30 = vld [vmem:[#allocation8 + $0x390] ss:$12 sps:$4 sm:$0xff]   ;;  %s11448_s4 = sshll.u32 %s445_s2, 4  ;;  %p15127_p9 = scmp.ne.s32.totalorder %s15113_s23, 0  ;;  %s15044_s4 = int_to_ptr.vmem [resolvable:$true] %s11448_s4 }
 0x12e   : > { %v13712_v31 = vld [vmem:[#allocation8 + $0x98] ss:$12 sps:$4 sm:$0xff]   ;;  %v13716_v33 = vld [vmem:[#allocation8 + $0x170] ss:$12 sps:$4 sm:$0xff]   ;;  %s14090_s24 = scalar_lea.vmem %s15044_s4, 16  ;;  %s14196_s26 = smov [#allocation16]  }
 0x12f   : > { %1460 = vmatpush1.bf16.msra.mxu0 %v13628_v34  ;;  %v13715_v32 = vld [vmem:[#allocation8 + $0x3ac] ss:$12 sps:$4 sm:$0xff]   ;;  %v13713_v34 = vld [vmem:[#allocation8 + $0x3a8] ss:$12 sps:$4 sm:$0xff]   ;;  %p14091_p7 = scmp.ne.s32.totalorder %s15044_s4, %s14090_s24  ;;  %s14094_s9 = sshll.u32 %s14196_s26, 4  ;;  %s14095_s9 = int_to_ptr.vmem [resolvable:$false] %s14094_s9 }
 0x130   : > { %1503 = vmatpush1.bf16.msra.mxu1 %v13629_v35  ;;  %1461 = vmatprep.subr.bf16.mxu0 %v13630_v36  ;;  %v13717_v35 = vld [vmem:[#allocation8 + $0xb0] ss:$12 sps:$4 sm:$0xff]   ;;  %s14096_s22 = scalar_lea.vmem %s14095_s9, 32  ;;  %p14097_p5 = scmp.lt.s32.totalorder %s15044_s4, %s14095_s9 }
 0x131   : > { %1504 = vmatprep.subr.bf16.mxu1 %v13632_v37  ;;  %v13720_v36 = vld [vmem:[#allocation8 + $0x3c4] ss:$12 sps:$4 sm:$0xff]   ;;  %v13721_v37 = vld [vmem:[#allocation8 + $0x248] ss:$12 sps:$4 sm:$0xff]   ;;  %p14092_p6 = pnand %p14091_p7, %p15127_p9  ;;  %p14098_p8 = scmp.lt.s32.totalorder %s14096_s22, %s14090_s24 }
 0x133   : > { %1462 = vmatpush1.bf16.msra.mxu0 %v13634_v38  ;;  %v13718_v38 = vld [vmem:[#allocation8 + $0x3c0] ss:$12 sps:$4 sm:$0xff]   ;;  %p14093_p2 = pneg %p14092_p6  ;;  %p14099_p4 = por %p14098_p8, %p14097_p5 }
 0x134   : > { %1505 = vmatpush1.bf16.msra.mxu1 %v13635_v39  ;;  %1463 = vmatprep.subr.bf16.mxu0 %v13636_v40  ;;  %v13722_v39 = vld [vmem:[#allocation8 + $0x188] ss:$12 sps:$4 sm:$0xff]  }
 0x135   : > { %1506 = vmatprep.subr.bf16.mxu1 %v13638_v41  ;;  %v13725_v40 = vld [vmem:[#allocation8 + $0x3dc] ss:$12 sps:$4 sm:$0xff]   ;;  %v13726_v41 = vld [vmem:[#allocation8 + $0x260] ss:$12 sps:$4 sm:$0xff]   ;;  %p14100_p1 = pnand %p14099_p4, %p14093_p2 }
 0x137   : > { %1464 = vmatpush1.bf16.msra.mxu0 %v13640_v42  ;;  %v13723_v42 = vld [vmem:[#allocation8 + $0x3d8] ss:$12 sps:$4 sm:$0xff]  }
 0x138   : > { %1507 = vmatpush1.bf16.msra.mxu1 %v13641_v43  ;;  %1465 = vmatprep.subr.bf16.mxu0 %v13642_v44  ;;  %v13727_v43 = vld [vmem:[#allocation8 + $0x1a0] ss:$12 sps:$4 sm:$0xff]  }
 0x139   : > { %1508 = vmatprep.subr.bf16.mxu1 %v13644_v45  ;;  %v14597_v44 = vld [vmem:[%s14560_s16 + $0x14] ss:$24 sps:$4 sm:$0xff]  }
 0x13a   : > { %v13730_v45 = vld [vmem:[#allocation8 + $0x3f4] ss:$12 sps:$4 sm:$0xff]  }
 0x13b   : > { %1466 = vmatpush1.bf16.msra.mxu0 %v13646_v46  ;;  %v13731_v46 = vld [vmem:[#allocation8 + $0x278] ss:$12 sps:$4 sm:$0xff]  }
 0x13c   : > { %1509 = vmatpush1.bf16.msra.mxu1 %v13647_v47  ;;  %1467 = vmatprep.subr.bf16.mxu0 %v13648_v48  ;;  %v13728_v47 = vld [vmem:[#allocation8 + $0x3f0] ss:$12 sps:$4 sm:$0xff]   ;;  %v13732_v48 = vld [vmem:[#allocation8 + $0x1b8] ss:$12 sps:$4 sm:$0xff]  }
 0x13d   : > { %1510 = vmatprep.subr.bf16.mxu1 %v13650_v50  ;;  %v13736_v50 = vld [vmem:[#allocation8 + $0x290] ss:$12 sps:$4 sm:$0xff]  }
 0x13f   : > { %1468 = vmatpush1.bf16.msra.mxu0 %v13652_v52  ;;  %v13733_v52 = vld [vmem:[#allocation8 + $0x408] ss:$12 sps:$4 sm:$0xff]  }
 0x140   : > { %1511 = vmatpush1.bf16.msra.mxu1 %v13653_v53  ;;  %1469 = vmatprep.subr.bf16.mxu0 %v13654_v54  ;;  %v13737_v53 = vld [vmem:[#allocation8 + $0x1d0] ss:$12 sps:$4 sm:$0xff]  }
 0x141   : > { %1512 = vmatprep.subr.bf16.mxu1 %v13656_v55  ;;  %v13740_v54 = vld [vmem:[#allocation8 + $0x424] ss:$12 sps:$4 sm:$0xff]   ;;  %v13741_v55 = vld [vmem:[#allocation8 + $0x2a8] ss:$12 sps:$4 sm:$0xff]  }
 0x143   : > { %1470 = vmatpush1.bf16.msra.mxu0 %v13658_v56  ;;  %v13738_v56 = vld [vmem:[#allocation8 + $0x420] ss:$12 sps:$4 sm:$0xff]  }
 0x144   : > { %1513 = vmatpush1.bf16.msra.mxu1 %v13659_v57  ;;  %1471 = vmatprep.subr.bf16.mxu0 %v13660_v58  ;;  %v13742_v57 = vld [vmem:[#allocation8 + $0x1e8] ss:$12 sps:$4 sm:$0xff]   ;;  %v13746_v58 = vld [vmem:[#allocation8 + $0x2c0] ss:$12 sps:$4 sm:$0xff]  }
 0x145   : > { %1514 = vmatprep.subr.bf16.mxu1 %v13662_v59  ;;  %v13743_v59 = vld [vmem:[#allocation8 + $0x438] ss:$12 sps:$4 sm:$0xff]  }
 0x147   : > { %1472 = vmatpush1.bf16.msra.mxu0 %v13664_v60  ;;  %v13747_v60 = vld [vmem:[#allocation8 + $0x200] ss:$12 sps:$4 sm:$0xff]  }
 0x148   : > { %1515 = vmatpush1.bf16.msra.mxu1 %v13665_v61  ;;  %1473 = vmatprep.subr.bf16.mxu0 %v13666_v62  ;;  %v13750_v61 = vld [vmem:[#allocation8 + $0x454] ss:$12 sps:$4 sm:$0xff]   ;;  %v13751_v62 = vld [vmem:[#allocation8 + $0x2d8] ss:$12 sps:$4 sm:$0xff]  }
 0x149   : > { %1516 = vmatprep.subr.bf16.mxu1 %v13668_v63  ;;  %v13748_v63 = vld [vmem:[#allocation8 + $0x450] ss:$12 sps:$4 sm:$0xff]  }
 0x14b   : > { %1474 = vmatpush1.bf16.msra.mxu0 %v13670_v0  ;;  %v13752_v0 = vld [vmem:[#allocation8 + $0x218] ss:$12 sps:$4 sm:$0xff]  }
 0x14c   : > { %1517 = vmatpush1.bf16.msra.mxu1 %v13671_v1  ;;  %1529 = vmatprep.subr.bf16.mxu0 %v13680_v2  ;;  %v13755_v1 = vld [vmem:[#allocation8 + $0x46c] ss:$12 sps:$4 sm:$0xff]   ;;  %v13756_v2 = vld [vmem:[#allocation8 + $0x2f0] ss:$12 sps:$4 sm:$0xff]  }
 0x14d   : > { %12959 = vmatprep.subr.bf16.mxu1 %v13681_v5  ;;  %v13757_v5 = vld [vmem:[#allocation8 + $0x230] ss:$12 sps:$4 sm:$0xff]  }
 0x14e   : > { %1476 = vmatmul.mubr.bf16.vlgmr.msra.gmra.mrb[0].mxu0 %v14588_v3 }
 0x14f   : > { %1519 = vmatmul.mubr.bf16.vlgmr.msra.gmra.mrb[0].mxu1 %v14591_v4  ;;  %1530 = vmatpush1.bf16.msra.mxu0 %v13678_v6  ;;  %v13761_v6 = vld [vmem:[#allocation8 + $0x3c8] ss:$12 sps:$4 sm:$0xff]  }
 0x150   : > { %12960 = vmatpush3.bf16.msra.mxu1 %v13682_v7  ;;  %1531 = vmatprep.subr.bf16.mxu0 %v13685_v8  ;;  %v13758_v7 = vld [vmem:[%s14560_s16 + $0x10] ss:$24 sps:$4 sm:$0xff]  }
 0x151   : > { %12961 = vmatprep.subr.bf16.mxu1 %v13686_v9  ;;  %1604 = vmatprep.mubr.bf16.mxu1 %v13674_v49  ;;  %v13735_v49 = vld [vmem:[#allocation8 + $0x40c] ss:$12 sps:$4 sm:$0xff]   ;;  %v13762_v8 = vld [vmem:[#allocation8 + $0x308] ss:$12 sps:$4 sm:$0xff]  }
 0x152   : > { %1561 = vmatprep.mubr.bf16.mxu0 %v14597_v44  ;;  %v13763_v9 = vld [vmem:[#allocation8 + $0x3e0] ss:$12 sps:$4 sm:$0xff]  }
 0x153   : > { %1532 = vmatpush1.bf16.msra.mxu0 %v13683_v10  ;;  %v13764_v10 = vld [vmem:[#allocation8 + $0x320] ss:$12 sps:$4 sm:$0xff]  }
 0x154   : > { %12962 = vmatpush3.bf16.msra.mxu1 %v13687_v11  ;;  %1533 = vmatprep.subr.bf16.mxu0 %v13690_v12  ;;  %v13765_v11 = vld [vmem:[#allocation8 + $0x3f8] ss:$12 sps:$4 sm:$0xff]  }
 0x155   : > { %12963 = vmatprep.subr.bf16.mxu1 %v13691_v13  ;;  %v13766_v12 = vld [vmem:[#allocation8 + $0x338] ss:$12 sps:$4 sm:$0xff]   ;;  %v13767_v13 = vld [vmem:[#allocation8 + $0x410] ss:$12 sps:$4 sm:$0xff]  }
 0x157   : > { %1534 = vmatpush1.bf16.msra.mxu0 %v13688_v14  ;;  %v13768_v14 = vld [vmem:[#allocation8 + $0x350] ss:$12 sps:$4 sm:$0xff]  }
 0x158   : > { %12964 = vmatpush3.bf16.msra.mxu1 %v13692_v15  ;;  %1535 = vmatprep.subr.bf16.mxu0 %v13695_v16  ;;  %v13769_v15 = vld [vmem:[#allocation8 + $0x428] ss:$12 sps:$4 sm:$0xff]  }
 0x159   : > { %12965 = vmatprep.subr.bf16.mxu1 %v13696_v17  ;;  %v13770_v16 = vld [vmem:[#allocation8 + $0x368] ss:$12 sps:$4 sm:$0xff]   ;;  %v13771_v17 = vld [vmem:[#allocation8 + $0x440] ss:$12 sps:$4 sm:$0xff]  }
 0x15b   : > { %1536 = vmatpush1.bf16.msra.mxu0 %v13693_v18  ;;  %v13773_v18 = vld [vmem:[#allocation8 + $0x458] ss:$12 sps:$4 sm:$0xff]  }
 0x15c   : > { %12966 = vmatpush3.bf16.msra.mxu1 %v13697_v19  ;;  %1537 = vmatprep.subr.bf16.mxu0 %v13700_v20  ;;  %v13774_v19 = vld [vmem:[#allocation8 + $0x398] ss:$12 sps:$4 sm:$0xff]   ;;  %v13775_v20 = vld [vmem:[#allocation8 + $0x470] ss:$12 sps:$4 sm:$0xff]  }
 0x15d   : > { %12967 = vmatprep.subr.bf16.mxu1 %v13701_v21  ;;  %v1844_v21 = vld [vmem:[#allocation7] sm:$0xff] }
 0x15f   : > { %1538 = vmatpush1.bf16.msra.mxu0 %v13698_v22  ;;  %v1846_v22 = vld [vmem:[#allocation7 + $0x60] sm:$0xff] }
 0x160   : > { %12968 = vmatpush3.bf16.msra.mxu1 %v13702_v23  ;;  %1539 = vmatprep.subr.bf16.mxu0 %v13705_v24  ;;  %v13776_v23 = vld [vmem:[#allocation8 + $0x3b0] ss:$12 sps:$4 sm:$0xff]   ;;  %v1848_v24 = vld [vmem:[#allocation7 + $0xc0] sm:$0xff] }
 0x161   : > { %12969 = vmatprep.subr.bf16.mxu1 %v13706_v25  ;;  %v1850_v25 = vld [vmem:[#allocation7 + $0x120] sm:$0xff] }
 0x163   : > { %1540 = vmatpush1.bf16.msra.mxu0 %v13703_v26  ;;  %v11778_v26 = vcombine.high %v1844_v21, %v1846_v22 }
 0x164   : > { %12970 = vmatpush3.bf16.msra.mxu1 %v13707_v27  ;;  %1541 = vmatprep.subr.bf16.mxu0 %v13710_v28  ;;  %v11777_v27 = vcombine.low %v1844_v21, %v1846_v22  ;;  %v14605_v28 = vld [vmem:[%s14553_s13 + $0x4] ss:$24 sps:$4 sm:$0xff]  }
 0x165   : > { %12971 = vmatprep.subr.bf16.mxu1 %v13711_v29  ;;  %v11781_v29 = vcombine.high %v1848_v24, %v1850_v25  ;;  %v1908_v22 = vld [vmem:[#allocation7 + $0xc00] sm:$0xff] }
 0x167   : > { %1542 = vmatpush1.bf16.msra.mxu0 %v13708_v30  ;;  %v1852_v30 = vld [vmem:[#allocation7 + $0x180] sm:$0xff] }
 0x168   : > { %12972 = vmatpush3.bf16.msra.mxu1 %v13712_v31  ;;  %1543 = vmatprep.subr.bf16.mxu0 %v13715_v32  ;;  %v1854_v31 = vld [vmem:[#allocation7 + $0x1e0] sm:$0xff]  ;;  %v11780_v32 = vcombine.low %v1848_v24, %v1850_v25 }
 0x169   : > { %12973 = vmatprep.subr.bf16.mxu1 %v13716_v33  ;;  %v11784_v33 = vcombine.high %v1852_v30, %v1854_v31 }
 0x16b   : > { %1544 = vmatpush1.bf16.msra.mxu0 %v13713_v34  ;;  %v1856_v34 = vld [vmem:[#allocation7 + $0x240] sm:$0xff] }
 0x16c   : > { %12974 = vmatpush3.bf16.msra.mxu1 %v13717_v35  ;;  %1545 = vmatprep.subr.bf16.mxu0 %v13720_v36  ;;  %v1858_v35 = vld [vmem:[#allocation7 + $0x2a0] sm:$0xff]  ;;  %v11783_v36 = vcombine.low %v1852_v30, %v1854_v31 }
 0x16d   : > { %12981 = vmatprep.subr.bf16.mxu1 %v13721_v37  ;;  %v11787_v37 = vcombine.high %v1856_v34, %v1858_v35  ;;  %v14612_v31 = vld [vmem:[%s14553_s13 + $0xc] ss:$24 sps:$4 sm:$0xff]  }
 0x16f   : > { %1605 = vmatmul.mubr.bf16.vlgmr.msra.gmra.mrb[4].mxu1 %v14588_v3  ;;  %1546 = vmatpush1.bf16.msra.mxu0 %v13718_v38  ;;  %v13753_v3 = vld [vmem:[#allocation8 + $0x468] ss:$12 sps:$4 sm:$0xff]   ;;  %v1860_v38 = vld [vmem:[#allocation7 + $0x300] sm:$0xff] }
 0x170   : > { %12982 = vmatpush3.bf16.msra.mxu1 %v13722_v39  ;;  %1547 = vmatprep.subr.bf16.mxu0 %v13725_v40  ;;  %v1862_v39 = vld [vmem:[#allocation7 + $0x360] sm:$0xff]  ;;  %v11786_v40 = vcombine.low %v1856_v34, %v1858_v35 }
 0x171   : > { %12983 = vmatprep.subr.bf16.mxu1 %v13726_v41  ;;  %1645 = vmatprep.mubr.bf16.mxu1 %v14584_v51  ;;  %v13745_v51 = vld [vmem:[#allocation8 + $0x43c] ss:$12 sps:$4 sm:$0xff]   ;;  %v11790_v41 = vcombine.high %v1860_v38, %v1862_v39  ;;  %v1918_v34 = vld [vmem:[#allocation7 + $0xde0] sm:$0xff] }
 0x173   : > { %1548 = vmatpush1.bf16.msra.mxu0 %v13723_v42  ;;  %v1864_v42 = vld [vmem:[#allocation7 + $0x3c0] sm:$0xff] }
 0x174   : > { %12984 = vmatpush3.bf16.msra.mxu1 %v13727_v43  ;;  %1549 = vmatprep.subr.bf16.mxu0 %v13730_v45  ;;  %v1866_v43 = vld [vmem:[#allocation7 + $0x420] sm:$0xff] }
 0x175   : > { %12985 = vmatprep.subr.bf16.mxu1 %v13731_v46  ;;  %v11793_v45 = vcombine.high %v1864_v42, %v1866_v43  ;;  %v1868_v46 = vld [vmem:[#allocation7 + $0x480] sm:$0xff] }
 0x177   : > { %1550 = vmatpush1.bf16.msra.mxu0 %v13728_v47  ;;  %v1870_v47 = vld [vmem:[#allocation7 + $0x4e0] sm:$0xff] }
 0x178   : > { %12986 = vmatpush3.bf16.msra.mxu1 %v13732_v48  ;;  %1551 = vmatprep.subr.bf16.mxu0 %v13735_v49  ;;  %v11792_v48 = vcombine.low %v1864_v42, %v1866_v43  ;;  %v11796_v49 = vcombine.high %v1868_v46, %v1870_v47  ;;  %v1926_v42 = vld [vmem:[#allocation7 + $0xf60] sm:$0xff] }
 0x179   : > { %12987 = vmatprep.subr.bf16.mxu1 %v13736_v50  ;;  %v1872_v50 = vld [vmem:[#allocation7 + $0x540] sm:$0xff] }
 0x17b   : > { %1552 = vmatpush1.bf16.msra.mxu0 %v13733_v52  ;;  %v1874_v52 = vld [vmem:[#allocation7 + $0x5a0] sm:$0xff] }
 0x17c   : > { %12988 = vmatpush3.bf16.msra.mxu1 %v13737_v53  ;;  %1553 = vmatprep.subr.bf16.mxu0 %v13740_v54  ;;  %v11795_v53 = vcombine.low %v1868_v46, %v1870_v47  ;;  %v11799_v54 = vcombine.high %v1872_v50, %v1874_v52  ;;  %v1930_v46 = vld [vmem:[#allocation7 + $0x1020] sm:$0xff] }
 0x17d   : > { %12989 = vmatprep.subr.bf16.mxu1 %v13741_v55  ;;  %v1876_v55 = vld [vmem:[#allocation7 + $0x600] sm:$0xff] }
 0x17f   : > { %1554 = vmatpush1.bf16.msra.mxu0 %v13738_v56  ;;  %v1878_v56 = vld [vmem:[#allocation7 + $0x660] sm:$0xff] }
 0x180   : > { %12990 = vmatpush3.bf16.msra.mxu1 %v13742_v57  ;;  %1555 = vmatprep.subr.bf16.mxu0 %v13745_v51  ;;  %v11798_v57 = vcombine.low %v1872_v50, %v1874_v52  ;;  %v11802_v51 = vcombine.high %v1876_v55, %v1878_v56  ;;  %v1934_v50 = vld [vmem:[#allocation7 + $0x10e0] sm:$0xff] }
 0x181   : > { %12991 = vmatprep.subr.bf16.mxu1 %v13746_v58  ;;  %v1880_v58 = vld [vmem:[#allocation7 + $0x6c0] sm:$0xff] }
 0x183   : > { %1556 = vmatpush1.bf16.msra.mxu0 %v13743_v59  ;;  %v1882_v59 = vld [vmem:[#allocation7 + $0x720] sm:$0xff] }
 0x184   : > { %12992 = vmatpush3.bf16.msra.mxu1 %v13747_v60  ;;  %1557 = vmatprep.subr.bf16.mxu0 %v13750_v61  ;;  %v11801_v60 = vcombine.low %v1876_v55, %v1878_v56  ;;  %v11805_v61 = vcombine.high %v1880_v58, %v1882_v59  ;;  %v1936_v55 = vld [vmem:[#allocation7 + $0x1140] sm:$0xff] }
 0x185   : > { %12993 = vmatprep.subr.bf16.mxu1 %v13751_v62  ;;  %v1884_v62 = vld [vmem:[#allocation7 + $0x780] sm:$0xff] }
 0x186   : > { %v1938_v56 = vld [vmem:[#allocation7 + $0x11a0] sm:$0xff] }
 0x187   : > { %1558 = vmatpush1.bf16.msra.mxu0 %v13748_v63  ;;  %v1886_v63 = vld [vmem:[#allocation7 + $0x7e0] sm:$0xff] }
 0x188   : > { %12994 = vmatpush3.bf16.msra.mxu1 %v13752_v0  ;;  %1559 = vmatprep.subr.bf16.mxu0 %v13755_v1  ;;  %v11804_v0 = vcombine.low %v1880_v58, %v1882_v59  ;;  %v11808_v1 = vcombine.high %v1884_v62, %v1886_v63  ;;  %v11847_v58 = vcombine.high %v1936_v55, %v1938_v56  ;;  %v13787_v59 = vld [vmem:[#allocation10 + $0x8] sm:$0xff]  }
 0x189   : > { %12995 = vmatprep.subr.bf16.mxu1 %v13756_v2  ;;  %v1888_v2 = vld [vmem:[#allocation7 + $0x840] sm:$0xff] }
 0x18b   : > { %1560 = vmatpush1.bf16.msra.mxu0 %v13753_v3  ;;  %v1890_v3 = vld [vmem:[#allocation7 + $0x8a0] sm:$0xff] }
 0x18c   : > { %12996 = vmatpush3.bf16.msra.mxu1 %v13757_v5  ;;  %13003 = vmatprep.subr.bf16.mxu0 %v13761_v6  ;;  %v11807_v5 = vcombine.low %v1884_v62, %v1886_v63  ;;  %v11811_v6 = vcombine.high %v1888_v2, %v1890_v3  ;;  %v11846_v62 = vcombine.low %v1936_v55, %v1938_v56  ;;  %v1976_v56 = vld [vmem:[#allocation7 + $0x18c0] sm:$0xff] }
 0x18e   : > { %1562 = vmatmul.mubr.bf16.vlgmr.msra.gmra.mrb[4].mxu0 %v13758_v7 }
 0x18f   : > { %1646 = vmatmul.mubr.bf16.vlgmr.msra.gmra.mrb[8].mxu1 %v14591_v4  ;;  %13004 = vmatpush3.bf16.msra.mxu0 %v13762_v8  ;;  %v13772_v4 = vld [vmem:[#allocation8 + $0x380] ss:$12 sps:$4 sm:$0xff]  }
 0x190   : > { %1686 = vmatprep.mubr.bf16.mxu0 %v14597_v44  ;;  %13005 = vmatprep.subr.bf16.mxu0 %v13763_v9  ;;  %v11789_v44 = vcombine.low %v1860_v38, %v1862_v39  ;;  %v1894_v8 = vld [vmem:[#allocation7 + $0x960] sm:$0xff]  ;;  %v11810_v9 = vcombine.low %v1888_v2, %v1890_v3 }
 0x191   : > { %v1922_v38 = vld [vmem:[#allocation7 + $0xea0] sm:$0xff] }
 0x192   : > { %v1946_v2 = vld [vmem:[#allocation7 + $0x1320] sm:$0xff] }
 0x193   : > { %13006 = vmatpush3.bf16.msra.mxu0 %v13764_v10 }
 0x194   : > { %13007 = vmatprep.subr.bf16.mxu0 %v13765_v11  ;;  %v1896_v11 = vld [vmem:[#allocation7 + $0x9c0] sm:$0xff] }
 0x197   : > { %13008 = vmatpush3.bf16.msra.mxu0 %v13766_v12  ;;  %v1898_v12 = vld [vmem:[#allocation7 + $0xa20] sm:$0xff] }
 0x198   : > { %13009 = vmatprep.subr.bf16.mxu0 %v13767_v13 }
 0x19b   : > { %13010 = vmatpush3.bf16.msra.mxu0 %v13768_v14  ;;  %v11817_v14 = vcombine.high %v1896_v11, %v1898_v12 }
 0x19c   : > { %13011 = vmatprep.subr.bf16.mxu0 %v13769_v15  ;;  %v1900_v15 = vld [vmem:[#allocation7 + $0xa80] sm:$0xff] }
 0x19f   : > { %13012 = vmatpush3.bf16.msra.mxu0 %v13770_v16  ;;  %v1902_v16 = vld [vmem:[#allocation7 + $0xae0] sm:$0xff] }
 0x1a0   : > { %13013 = vmatprep.subr.bf16.mxu0 %v13771_v17  ;;  %v11816_v17 = vcombine.low %v1896_v11, %v1898_v12  ;;  %v13790_v11 = vld [vmem:[#allocation10 + $0x20] sm:$0xff]  }
 0x1a1   : > { %v1952_v12 = vld [vmem:[#allocation7 + $0x1440] sm:$0xff] }
 0x1a3   : > { %13014 = vmatpush3.bf16.msra.mxu0 %v13772_v4  ;;  %v11820_v4 = vcombine.high %v1900_v15, %v1902_v16 }
 0x1a4   : > { %13015 = vmatprep.subr.bf16.mxu0 %v13773_v18  ;;  %v1904_v18 = vld [vmem:[#allocation7 + $0xb40] sm:$0xff] }
 0x1a7   : > { %13016 = vmatpush3.bf16.msra.mxu0 %v13774_v19  ;;  %v1906_v19 = vld [vmem:[#allocation7 + $0xba0] sm:$0xff] }
 0x1a8   : > { %13017 = vmatprep.subr.bf16.mxu0 %v13775_v20  ;;  %v11819_v20 = vcombine.low %v1900_v15, %v1902_v16  ;;  %v11823_v21 = vcombine.high %v1904_v18, %v1906_v19  ;;  %v11822_v24 = vcombine.low %v1904_v18, %v1906_v19  ;;  %v13791_v16 = vld [vmem:[#allocation10 + $0x28] sm:$0xff]   ;;  %v13792_v19 = vld [vmem:[#allocation10 + $0x30] sm:$0xff]  }
 0x1ab   : > { %13018 = vmatpush3.bf16.msra.mxu0 %v13776_v23  ;;  %v1910_v23 = vld [vmem:[#allocation7 + $0xc60] sm:$0xff] }
 0x1ac   : > { %2834 = vmatprep.subr.bf16.mxu0 %v11778_v26  ;;  %v11826_v25 = vcombine.high %v1908_v22, %v1910_v23  ;;  %v1912_v26 = vld [vmem:[#allocation7 + $0xcc0] sm:$0xff]  ;;  %v11825_v30 = vcombine.low %v1908_v22, %v1910_v23 }
 0x1ad   : > { %v1962_v22 = vld [vmem:[#allocation7 + $0x1620] sm:$0xff] }
 0x1ae   : > { %1687 = vmatmul.mubr.bf16.vlgmr.msra.gmra.mrb[8].mxu0 %v13758_v7  ;;  %v1892_v7 = vld [vmem:[#allocation7 + $0x900] sm:$0xff] }
 0x1af   : > { %2835 = vmatpush1.bf16.msra.mxu0 %v11777_v27  ;;  %2866 = vmatprep.mubr.bf16.mxu0 %v14605_v28  ;;  %v11814_v10 = vcombine.high %v1892_v7, %v1894_v8  ;;  %v11813_v13 = vcombine.low %v1892_v7, %v1894_v8  ;;  %v1914_v27 = vld [vmem:[#allocation7 + $0xd20] sm:$0xff] }
 0x1b0   : > { %2836 = vmatprep.subr.bf16.mxu0 %v11781_v29  ;;  %v14609_v29 = vld [vmem:[%s14553_s13] ss:$24 sps:$4 sm:$0xff]   ;;  %v11828_v35 = vcombine.low %v1912_v26, %v1914_v27 }
 0x1b1   : > { %v1948_v7 = vld [vmem:[#allocation7 + $0x1380] sm:$0xff] }
 0x1b2   : > { %v1950_v8 = vld [vmem:[#allocation7 + $0x13e0] sm:$0xff] }
 0x1b3   : > { %2837 = vmatpush1.bf16.msra.mxu0 %v11780_v32  ;;  %v11829_v32 = vcombine.high %v1912_v26, %v1914_v27  ;;  %v1964_v26 = vld [vmem:[#allocation7 + $0x1680] sm:$0xff] }
 0x1b4   : > { %2838 = vmatprep.subr.bf16.mxu0 %v11784_v33  ;;  %v1916_v33 = vld [vmem:[#allocation7 + $0xd80] sm:$0xff] }
 0x1b5   : > { %v11831_v39 = vcombine.low %v1916_v33, %v1918_v34  ;;  %v1966_v27 = vld [vmem:[#allocation7 + $0x16e0] sm:$0xff] }
 0x1b7   : > { %2839 = vmatpush1.bf16.msra.mxu0 %v11783_v36  ;;  %v11832_v36 = vcombine.high %v1916_v33, %v1918_v34 }
 0x1b8   : > { %2840 = vmatprep.subr.bf16.mxu0 %v11787_v37  ;;  %v1920_v37 = vld [vmem:[#allocation7 + $0xe40] sm:$0xff] }
 0x1b9   : > { %v11834_v43 = vcombine.low %v1920_v37, %v1922_v38 }
 0x1bb   : > { %2841 = vmatpush1.bf16.msra.mxu0 %v11786_v40  ;;  %v11835_v40 = vcombine.high %v1920_v37, %v1922_v38  ;;  %v1968_v38 = vld [vmem:[#allocation7 + $0x1740] sm:$0xff] }
 0x1bc   : > { %2842 = vmatprep.subr.bf16.mxu0 %v11790_v41  ;;  %v1924_v41 = vld [vmem:[#allocation7 + $0xf00] sm:$0xff] }
 0x1bd   : > { %v11837_v47 = vcombine.low %v1924_v41, %v1926_v42 }
 0x1bf   : > { %2843 = vmatpush1.bf16.msra.mxu0 %v11789_v44  ;;  %v11838_v44 = vcombine.high %v1924_v41, %v1926_v42 }
 0x1c0   : > { %2844 = vmatprep.subr.bf16.mxu0 %v11793_v45  ;;  %v1928_v45 = vld [vmem:[#allocation7 + $0xfc0] sm:$0xff] }
 0x1c1   : > { %v11840_v52 = vcombine.low %v1928_v45, %v1930_v46 }
 0x1c3   : > { %2845 = vmatpush1.bf16.msra.mxu0 %v11792_v48  ;;  %v11841_v48 = vcombine.high %v1928_v45, %v1930_v46  ;;  %v11867_v46 = vcombine.low %v1964_v26, %v1966_v27 }
 0x1c4   : > { %2846 = vmatprep.subr.bf16.mxu0 %v11796_v49  ;;  %v1932_v49 = vld [vmem:[#allocation7 + $0x1080] sm:$0xff] }
 0x1c7   : > { %2847 = vmatpush1.bf16.msra.mxu0 %v11795_v53  ;;  %v11844_v53 = vcombine.high %v1932_v49, %v1934_v50 }
 0x1c8   : > { %2848 = vmatprep.subr.bf16.mxu0 %v11799_v54  ;;  %v13786_v54 = vld [vmem:[#allocation10] sm:$0xff]  }
 0x1cb   : > { %2849 = vmatpush1.bf16.msra.mxu0 %v11798_v57  ;;  %v14194_v57 = vmov 0.0  }
 0x1cc   : > { %2850 = vmatprep.subr.bf16.mxu0 %v11802_v51  ;;  %13329 = vmatprep.subr.bf16.mxu1 %v14194_v57  ;;  %v11843_v51 = vcombine.low %v1932_v49, %v1934_v50 }
 0x1cd   : > { %13330 = vmatpush3.bf16.msra.mxu1 %v13786_v54  ;;  %13345 = vmatprep.mubr.msk.bf16.mxu1 %vm14195_vm0, %v14194_v57 }
 0x1ce   : > { %13331 = vmatprep.subr.bf16.mxu1 %v14194_v57 }
 0x1cf   : > { %2851 = vmatpush1.bf16.msra.mxu0 %v11801_v60  ;;  %v1940_v60 = vld [vmem:[#allocation7 + $0x1200] sm:$0xff] }
 0x1d0   : > { %2852 = vmatprep.subr.bf16.mxu0 %v11805_v61  ;;  %v1942_v61 = vld [vmem:[#allocation7 + $0x1260] sm:$0xff] }
 0x1d1   : > { %13332 = vmatpush3.bf16.msra.mxu1 %v13787_v59  ;;  %v11850_v63 = vcombine.high %v1940_v60, %v1942_v61  ;;  %v11849_v3 = vcombine.low %v1940_v60, %v1942_v61  ;;  %v14636_v60 = vld [vmem:[%s14553_s13 + $0x14] ss:$24 sps:$4 sm:$0xff]  }
 0x1d2   : > { %13333 = vmatprep.subr.bf16.mxu1 %v14194_v57 }
 0x1d3   : > { %2853 = vmatpush1.bf16.msra.mxu0 %v11804_v0  ;;  %v13788_v0 = vld [vmem:[#allocation10 + $0x10] sm:$0xff]  }
 0x1d4   : > { %2854 = vmatprep.subr.bf16.mxu0 %v11808_v1  ;;  %v1944_v1 = vld [vmem:[#allocation7 + $0x12c0] sm:$0xff] }
 0x1d5   : > { %13334 = vmatpush3.bf16.msra.mxu1 %v13788_v0 }
 0x1d6   : > { %13335 = vmatprep.subr.bf16.mxu1 %v14194_v57 }
 0x1d7   : > { %2855 = vmatpush1.bf16.msra.mxu0 %v11807_v5  ;;  %v11853_v5 = vcombine.high %v1944_v1, %v1946_v2 }
 0x1d8   : > { %2856 = vmatprep.subr.bf16.mxu0 %v11811_v6  ;;  %v13789_v6 = vld [vmem:[#allocation10 + $0x18] sm:$0xff]  }
 0x1d9   : > { %13336 = vmatpush3.bf16.msra.mxu1 %v13789_v6 }
 0x1da   : > { %13337 = vmatprep.subr.bf16.mxu1 %v14194_v57 }
 0x1db   : > { %2857 = vmatpush1.bf16.msra.mxu0 %v11810_v9  ;;  %v11852_v9 = vcombine.low %v1944_v1, %v1946_v2  ;;  %v1984_v2 = vld [vmem:[#allocation7 + $0x1a40] sm:$0xff] }
 0x1dc   : > { %2858 = vmatprep.subr.bf16.mxu0 %v11814_v10  ;;  %v11856_v10 = vcombine.high %v1948_v7, %v1950_v8 }
 0x1dd   : > { %13338 = vmatpush3.bf16.msra.mxu1 %v13790_v11  ;;  %v1992_v11 = vld [vmem:[#allocation7 + $0x1bc0] sm:$0xff] }
 0x1de   : > { %13339 = vmatprep.subr.bf16.mxu1 %v14194_v57 }
 0x1df   : > { %2859 = vmatpush1.bf16.msra.mxu0 %v11813_v13  ;;  %v1954_v13 = vld [vmem:[#allocation7 + $0x14a0] sm:$0xff] }
 0x1e0   : > { %2860 = vmatprep.subr.bf16.mxu0 %v11817_v14  ;;  %v11855_v14 = vcombine.low %v1948_v7, %v1950_v8  ;;  %v11859_v15 = vcombine.high %v1952_v12, %v1954_v13  ;;  %v11858_v18 = vcombine.low %v1952_v12, %v1954_v13  ;;  %v1988_v7 = vld [vmem:[#allocation7 + $0x1b00] sm:$0xff] }
 0x1e1   : > { %13340 = vmatpush3.bf16.msra.mxu1 %v13791_v16  ;;  %v1990_v8 = vld [vmem:[#allocation7 + $0x1b60] sm:$0xff] }
 0x1e2   : > { %13341 = vmatprep.subr.bf16.mxu1 %v14194_v57  ;;  %v1994_v12 = vld [vmem:[#allocation7 + $0x1c20] sm:$0xff]  ;;  %v11885_v13 = vcombine.low %v1988_v7, %v1990_v8 }
 0x1e3   : > { %2861 = vmatpush1.bf16.msra.mxu0 %v11816_v17  ;;  %v1956_v17 = vld [vmem:[#allocation7 + $0x1500] sm:$0xff] }
 0x1e4   : > { %2862 = vmatprep.subr.bf16.mxu0 %v11820_v4  ;;  %v1958_v4 = vld [vmem:[#allocation7 + $0x1560] sm:$0xff] }
 0x1e5   : > { %13342 = vmatpush3.bf16.msra.mxu1 %v13792_v19  ;;  %v11861_v23 = vcombine.low %v1956_v17, %v1958_v4  ;;  %v1998_v16 = vld [vmem:[#allocation7 + $0x1ce0] sm:$0xff] }
 0x1e6   : > { %13343 = vmatprep.subr.bf16.mxu1 %v14194_v57  ;;  %v2002_v19 = vld [vmem:[#allocation7 + $0x1da0] sm:$0xff] }
 0x1e7   : > { %2863 = vmatpush1.bf16.msra.mxu0 %v11819_v20  ;;  %v11862_v20 = vcombine.high %v1956_v17, %v1958_v4  ;;  %v11888_v17 = vcombine.low %v1992_v11, %v1994_v12 }
 0x1e8   : > { %2864 = vmatprep.subr.bf16.mxu0 %v11823_v21  ;;  %v1960_v21 = vld [vmem:[#allocation7 + $0x15c0] sm:$0xff] }
 0x1e9   : > { %v11864_v33 = vcombine.low %v1960_v21, %v1962_v22 }
 0x1eb   : > { %2865 = vmatpush1.bf16.msra.mxu0 %v11822_v24  ;;  %v13793_v24 = vld [vmem:[#allocation10 + $0x38] sm:$0xff]  }
 0x1ec   : > { %2877 = vmatprep.subr.bf16.mxu0 %v11826_v25  ;;  %v11865_v25 = vcombine.high %v1960_v21, %v1962_v22  ;;  %13344 = vmatpush3.bf16.msra.mxu1 %v13793_v24 }
 0x1ee   : > { %2867 = vmatmul.mubr.bf16.vlgmr.msra.gmra.mrb[12].mxu0 %v14609_v29 }
 0x1ef   : > { %2878 = vmatpush1.bf16.msra.mxu0 %v11825_v30  ;;  %2909 = vmatprep.mubr.bf16.mxu0 %v14612_v31  ;;  %v1877_v30 = vld [vmem:[#allocation7 + $0x608] sm:$0xf] }
 0x1f0   : > { %2879 = vmatprep.subr.bf16.mxu0 %v11829_v32  ;;  %v1879_v32 = vld [vmem:[#allocation7 + $0x668] sm:$0xf] }
 0x1f1   : > { %v11803_v34 = vcombine.low %v1877_v30, %v1879_v32  ;;  %v2006_v30 = vld [vmem:[#allocation7 + $0x1e60] sm:$0xff] }
 0x1f3   : > { %2880 = vmatpush1.bf16.msra.mxu0 %v11828_v35  ;;  %v11868_v35 = vcombine.high %v1964_v26, %v1966_v27  ;;  %13034 = vmatprep.subr.bf16.mxu1 %v11803_v34  ;;  %v2004_v27 = vld [vmem:[#allocation7 + $0x1e00] sm:$0xff] }
 0x1f4   : > { %2881 = vmatprep.subr.bf16.mxu0 %v11832_v36  ;;  %v11898_v34 = vcombine.high %v2004_v27, %v2006_v30 }
 0x1f7   : > { %2882 = vmatpush1.bf16.msra.mxu0 %v11831_v39  ;;  %v1970_v39 = vld [vmem:[#allocation7 + $0x17a0] sm:$0xff] }
 0x1f8   : > { %2883 = vmatprep.subr.bf16.mxu0 %v11835_v40  ;;  %v11871_v49 = vcombine.high %v1968_v38, %v1970_v39  ;;  %v11870_v54 = vcombine.low %v1968_v38, %v1970_v39  ;;  %v2012_v39 = vld [vmem:[#allocation7 + $0x1f80] sm:$0xff] }
 0x1fb   : > { %2884 = vmatpush1.bf16.msra.mxu0 %v11834_v43 }
 0x1fc   : > { %2885 = vmatprep.subr.bf16.mxu0 %v11838_v44 }
 0x1ff   : > { %2886 = vmatpush1.bf16.msra.mxu0 %v11837_v47 }
 0x200   : > { %2887 = vmatprep.subr.bf16.mxu0 %v11841_v48 }
 0x203   : > { %2888 = vmatpush1.bf16.msra.mxu0 %v11840_v52  ;;  %v1972_v52 = vld [vmem:[#allocation7 + $0x1800] sm:$0xff] }
 0x204   : > { %2889 = vmatprep.subr.bf16.mxu0 %v11844_v53  ;;  %v1974_v53 = vld [vmem:[#allocation7 + $0x1860] sm:$0xff] }
 0x205   : > { %v11874_v55 = vcombine.high %v1972_v52, %v1974_v53  ;;  %v11873_v59 = vcombine.low %v1972_v52, %v1974_v53  ;;  %v2022_v52 = vld [vmem:[#allocation7 + $0x2160] sm:$0xff] }
 0x207   : > { %2890 = vmatpush1.bf16.msra.mxu0 %v11843_v51  ;;  %v1978_v51 = vld [vmem:[#allocation7 + $0x1920] sm:$0xff] }
 0x208   : > { %2891 = vmatprep.subr.bf16.mxu0 %v11847_v58  ;;  %v14633_v58 = vld [vmem:[%s14553_s13 + $0x8] ss:$24 sps:$4 sm:$0xff]   ;;  %v11877_v61 = vcombine.high %v1976_v56, %v1978_v51  ;;  %v11876_v0 = vcombine.low %v1976_v56, %v1978_v51 }
 0x209   : > { %v2026_v56 = vld [vmem:[#allocation7 + $0x2220] sm:$0xff] }
 0x20b   : > { %2892 = vmatpush1.bf16.msra.mxu0 %v11846_v62  ;;  %v1980_v62 = vld [vmem:[#allocation7 + $0x1980] sm:$0xff] }
 0x20c   : > { %2893 = vmatprep.subr.bf16.mxu0 %v11850_v63  ;;  %v1982_v63 = vld [vmem:[#allocation7 + $0x19e0] sm:$0xff] }
 0x20d   : > { %v11880_v1 = vcombine.high %v1980_v62, %v1982_v63 }
 0x20f   : > { %2894 = vmatpush1.bf16.msra.mxu0 %v11849_v3  ;;  %v1986_v3 = vld [vmem:[#allocation7 + $0x1aa0] sm:$0xff] }
 0x210   : > { %2895 = vmatprep.subr.bf16.mxu0 %v11853_v5  ;;  %v11879_v5 = vcombine.low %v1980_v62, %v1982_v63  ;;  %v11883_v6 = vcombine.high %v1984_v2, %v1986_v3  ;;  %v2030_v62 = vld [vmem:[#allocation7 + $0x22e0] sm:$0xff]  ;;  %v1697_v63 = vlaneseq }
 0x213   : > { %2896 = vmatpush1.bf16.msra.mxu0 %v11852_v9  ;;  %v11882_v9 = vcombine.low %v1984_v2, %v1986_v3 }
 0x214   : > { %2897 = vmatprep.subr.bf16.mxu0 %v11856_v10  ;;  %v11886_v10 = vcombine.high %v1988_v7, %v1990_v8 }
 0x217   : > { %2898 = vmatpush1.bf16.msra.mxu0 %v11855_v14  ;;  %v11889_v14 = vcombine.high %v1992_v11, %v1994_v12 }
 0x218   : > { %2899 = vmatprep.subr.bf16.mxu0 %v11859_v15  ;;  %v1996_v15 = vld [vmem:[#allocation7 + $0x1c80] sm:$0xff] }
 0x219   : > { %v11892_v4 = vcombine.high %v1996_v15, %v1998_v16  ;;  %v11891_v22 = vcombine.low %v1996_v15, %v1998_v16 }
 0x21b   : > { %2900 = vmatpush1.bf16.msra.mxu0 %v11858_v18  ;;  %v2000_v18 = vld [vmem:[#allocation7 + $0x1d40] sm:$0xff] }
 0x21c   : > { %2901 = vmatprep.subr.bf16.mxu0 %v11862_v20 }
 0x21f   : > { %2902 = vmatpush1.bf16.msra.mxu0 %v11861_v23 }
 0x220   : > { %2903 = vmatprep.subr.bf16.mxu0 %v11865_v25  ;;  %v11895_v25 = vcombine.high %v2000_v18, %v2002_v19 }
 0x221   : > { %v1477_v36 = vpop.f32.mrb[0].mxu0 }
 0x222   : > { %v1520_v37 = vpop.f32.mrb[0].mxu1  ;;  %v1479_v41 = vpop.f32.mrb[1].mxu0 }
 0x223   : > { %v14626_v40 = vadd.f32 %v1520_v37, %v1477_v36  ;;  %v1522_v42 = vpop.f32.mrb[1].mxu1  ;;  %v1481_v44 = vpop.f32.mrb[2].mxu0  ;;  %2904 = vmatpush1.bf16.msra.mxu0 %v11864_v33  ;;  %v11894_v33 = vcombine.low %v2000_v18, %v2002_v19  ;;  %v2010_v36 = vld [vmem:[#allocation7 + $0x1f20] sm:$0xff]  ;;  %v11897_v37 = vcombine.low %v2004_v27, %v2006_v30  ;;  %v3110_v27 = vld [vmem:[#allocation7 + $0x38] sm:$0xf] }
 0x224   : > { %v14628_v43 = vadd.f32 %v1522_v42, %v1479_v41  ;;  %v1524_v45 = vpop.f32.mrb[2].mxu1  ;;  %v1483_v47 = vpop.f32.mrb[3].mxu0  ;;  %2905 = vmatprep.subr.bf16.mxu0 %v11868_v35  ;;  %v2008_v35 = vld [vmem:[#allocation7 + $0x1ec0] sm:$0xff]  ;;  %v3146_v30 = vld [vmem:[#allocation7 + $0x6f8] sm:$0xf] }
 0x225   : > { %v1526_v48 = vpop.f32.mrb[3].mxu1  ;;  %v11901_v38 = vcombine.high %v2008_v35, %v2010_v36  ;;  %v2014_v41 = vld [vmem:[#allocation7 + $0x1fe0] sm:$0xff]  ;;  %v11900_v42 = vcombine.low %v2008_v35, %v2010_v36 }
 0x226   : > { %v14630_v50 = vadd.f32 %v1526_v48, %v1483_v47  ;;  %v11904_v44 = vcombine.high %v2012_v39, %v2014_v41  ;;  %v2016_v45 = vld [vmem:[#allocation7 + $0x2040] sm:$0xff]  ;;  %v11903_v47 = vcombine.low %v2012_v39, %v2014_v41  ;;  %v3150_v39 = vld [vmem:[#allocation7 + $0x7b8] sm:$0xf] }
 0x227   : > { %2906 = vmatpush1.bf16.msra.mxu0 %v11867_v46  ;;  %v2018_v46 = vld [vmem:[#allocation7 + $0x20a0] sm:$0xff]  ;;  %v3152_v41 = vld [vmem:[#allocation7 + $0x818] sm:$0xf] }
 0x228   : > { %2907 = vmatprep.subr.bf16.mxu0 %v11871_v49  ;;  %v11907_v48 = vcombine.high %v2016_v45, %v2018_v46  ;;  %v2020_v49 = vld [vmem:[#allocation7 + $0x2100] sm:$0xff]  ;;  %v11906_v53 = vcombine.low %v2016_v45, %v2018_v46  ;;  %v3118_v45 = vld [vmem:[#allocation7 + $0x1b8] sm:$0xf] }
 0x229   : > { %v11909_v51 = vcombine.low %v2020_v49, %v2022_v52  ;;  %v14661_v35 = vld [vmem:[%s14553_s13 + $0x10] ss:$24 sps:$4 sm:$0xff]  }
 0x22a   : > { %v3120_v46 = vld [vmem:[#allocation7 + $0x218] sm:$0xf] }
 0x22b   : > { %2908 = vmatpush1.bf16.msra.mxu0 %v11870_v54  ;;  %v11910_v54 = vcombine.high %v2020_v49, %v2022_v52  ;;  %v11930_v49 = vcombine.low %v3118_v45, %v3120_v46  ;;  %v3180_v45 = vld [vmem:[#allocation7 + $0xd58] sm:$0xf] }
 0x22c   : > { %2920 = vmatprep.subr.bf16.mxu0 %v11874_v55  ;;  %v2024_v55 = vld [vmem:[#allocation7 + $0x21c0] sm:$0xff]  ;;  %v3214_v46 = vld [vmem:[#allocation7 + $0x13b8] sm:$0xf] }
 0x22e   : > { %2910 = vmatmul.mubr.bf16.vlgmr.msra.gmra.mrb[12].mxu0 %v14633_v58 }
 0x22f   : > { %2921 = vmatpush1.bf16.msra.mxu0 %v11873_v59  ;;  %2952 = vmatprep.mubr.bf16.mxu0 %v14636_v60  ;;  %v11913_v59 = vcombine.high %v2024_v55, %v2026_v56 }
 0x230   : > { %2922 = vmatprep.subr.bf16.mxu0 %v11877_v61  ;;  %v2028_v61 = vld [vmem:[#allocation7 + $0x2280] sm:$0xff] }
 0x231   : > { %v11915_v15 = vcombine.low %v2028_v61, %v2030_v62 }
 0x233   : > { %2923 = vmatpush1.bf16.msra.mxu0 %v11876_v0  ;;  %v11912_v0 = vcombine.low %v2024_v55, %v2026_v56  ;;  %v3158_v55 = vld [vmem:[#allocation7 + $0x938] sm:$0xf] }
 0x234   : > { %2924 = vmatprep.subr.bf16.mxu0 %v11880_v1  ;;  %v11916_v1 = vcombine.high %v2028_v61, %v2030_v62  ;;  %v3160_v56 = vld [vmem:[#allocation7 + $0x998] sm:$0xf] }
 0x235   : > { %v3126_v61 = vld [vmem:[#allocation7 + $0x338] sm:$0xf] }
 0x236   : > { %v3162_v62 = vld [vmem:[#allocation7 + $0x9f8] sm:$0xf] }
 0x237   : > { %2925 = vmatpush1.bf16.msra.mxu0 %v11879_v5  ;;  %v2032_v5 = vld [vmem:[#allocation7 + $0x2340] sm:$0xff] }
 0x238   : > { %2926 = vmatprep.subr.bf16.mxu0 %v11883_v6  ;;  %v2034_v6 = vld [vmem:[#allocation7 + $0x23a0] sm:$0xff] }
 0x23b   : > { %2927 = vmatpush1.bf16.msra.mxu0 %v11882_v9 }
 0x23c   : > { %2928 = vmatprep.subr.bf16.mxu0 %v11886_v10  ;;  %v14645_v10 = vshrl.u32 %v1697_v63, 7  ;;  %v3164_v63 = vld [vmem:[#allocation7 + $0xa58] sm:$0xf] }
 0x23e   : > { %vm1699_vm1 = vcmp.lt.s32.totalorder %v14645_v10, 7  ;;  %vm1706_vm2 = vcmp.lt.s32.totalorder %v14645_v10, 6  ;;  %vm5778_vm4 = vcmp.lt.s32.totalorder %v14645_v10, 5  ;;  %vm9180_vm6 = vcmp.lt.s32.totalorder %v14645_v10, 4 }
 0x23f   : > { %2929 = vmatpush1.bf16.msra.mxu0 %v11885_v13 }
 0x240   : > { %2930 = vmatprep.subr.bf16.mxu0 %v11889_v14 }
 0x242   : > { %v12975_v20 = vpop.f32.mrb[4].mxu1 }
 0x243   : > { %v12976_v21 = vpop.f32.mrb[5].mxu1  ;;  %2931 = vmatpush1.bf16.msra.mxu0 %v11888_v17 }
 0x244   : > { %v14640_v23 = vadd.f32 %v12976_v21, %v12975_v20  ;;  %v12978_v24 = vpop.f32.mrb[6].mxu1  ;;  %2932 = vmatprep.subr.bf16.mxu0 %v11892_v4  ;;  %v11919_v4 = vcombine.high %v2032_v5, %v2034_v6  ;;  %v3142_v20 = vld [vmem:[#allocation7 + $0x638] sm:$0xf] }
 0x245   : > { %v12979_v26 = vpop.f32.mrb[7].mxu1  ;;  %v3144_v21 = vld [vmem:[#allocation7 + $0x698] sm:$0xf] }
 0x246   : > { %v14642_v32 = vadd.f32 %v12979_v26, %v12978_v24  ;;  %v11948_v26 = vcombine.low %v3142_v20, %v3144_v21  ;;  %v3138_v20 = vld [vmem:[#allocation7 + $0x578] sm:$0xf] }
 0x247   : > { %2933 = vmatpush1.bf16.msra.mxu0 %v11891_v22  ;;  %v3140_v21 = vld [vmem:[#allocation7 + $0x5d8] sm:$0xf] }
 0x248   : > { %2934 = vmatprep.subr.bf16.mxu0 %v11895_v25  ;;  %v11918_v25 = vcombine.low %v2032_v5, %v2034_v6  ;;  %v3166_v5 = vld [vmem:[#allocation7 + $0xab8] sm:$0xf] }
 0x249   : > { %v3168_v6 = vld [vmem:[#allocation7 + $0xb18] sm:$0xf] }
 0x24b   : > { %2935 = vmatpush1.bf16.msra.mxu0 %v11894_v33  ;;  %v3148_v33 = vld [vmem:[#allocation7 + $0x758] sm:$0xf] }
 0x24c   : > { %2936 = vmatprep.subr.bf16.mxu0 %v11898_v34 }
 0x24f   : > { %2937 = vmatpush1.bf16.msra.mxu0 %v11897_v37  ;;  %v3114_v37 = vld [vmem:[#allocation7 + $0xf8] sm:$0xf] }
 0x250   : > { %2938 = vmatprep.subr.bf16.mxu0 %v11901_v38  ;;  %v3116_v38 = vld [vmem:[#allocation7 + $0x158] sm:$0xf] }
 0x253   : > { %2939 = vmatpush1.bf16.msra.mxu0 %v11900_v42  ;;  %v11927_v42 = vcombine.low %v3114_v37, %v3116_v38  ;;  %v3210_v37 = vld [vmem:[#allocation7 + $0x12f8] sm:$0xf] }
 0x254   : > { %2940 = vmatprep.subr.bf16.mxu0 %v11904_v44  ;;  %v11954_v44 = vcombine.low %v3150_v39, %v3152_v41  ;;  %v3212_v38 = vld [vmem:[#allocation7 + $0x1358] sm:$0xf]  ;;  %v11762_v39 = vld [vmem:[#allocation13 + $0x6] ss:$0 sm:$0xff] }
 0x257   : > { %2941 = vmatpush1.bf16.msra.mxu0 %v11903_v47  ;;  %v3154_v47 = vld [vmem:[#allocation7 + $0x878] sm:$0xf] }
 0x258   : > { %2942 = vmatprep.subr.bf16.mxu0 %v11907_v48  ;;  %v3156_v48 = vld [vmem:[#allocation7 + $0x8d8] sm:$0xf] }
 0x259   : > { %v11957_v52 = vcombine.low %v3154_v47, %v3156_v48  ;;  %v3216_v47 = vld [vmem:[#allocation7 + $0x1418] sm:$0xf] }
 0x25b   : > { %2943 = vmatpush1.bf16.msra.mxu0 %v11906_v53  ;;  %v3122_v53 = vld [vmem:[#allocation7 + $0x278] sm:$0xf] }
 0x25c   : > { %2944 = vmatprep.subr.bf16.mxu0 %v11910_v54  ;;  %v3124_v54 = vld [vmem:[#allocation7 + $0x2d8] sm:$0xf] }
 0x25f   : > { %2945 = vmatpush1.bf16.msra.mxu0 %v11909_v51  ;;  %v11933_v51 = vcombine.low %v3122_v53, %v3124_v54  ;;  %v12002_v53 = vcombine.low %v3214_v46, %v3216_v47  ;;  %v3182_v54 = vld [vmem:[#allocation7 + $0xdb8] sm:$0xf]  ;;  %v1889_v47 = vld [vmem:[#allocation7 + $0x848] sm:$0xf] }
 0x260   : > { %2946 = vmatprep.subr.bf16.mxu0 %v11913_v59  ;;  %v11960_v59 = vcombine.low %v3158_v55, %v3160_v56  ;;  %v3184_v55 = vld [vmem:[#allocation7 + $0xe18] sm:$0xf] }
 0x261   : > { %v1563_v2 = vpop.f32.mrb[4].mxu0  ;;  %v3218_v56 = vld [vmem:[#allocation7 + $0x1478] sm:$0xf] }
 0x262   : > { %v12997_v3 = vpop.f32.mrb[8].mxu1  ;;  %v1564_v7 = vadd.f32 %v1563_v2, %v14626_v40  ;;  %v1565_v8 = vpop.f32.mrb[5].mxu0  ;;  %v3130_v2 = vld [vmem:[#allocation7 + $0x3f8] sm:$0xf] }
 0x263   : > { %v12998_v9 = vpop.f32.mrb[9].mxu1  ;;  %v1566_v11 = vadd.f32 %v1565_v8, %v14628_v43  ;;  %v1567_v13 = vpop.f32.mrb[6].mxu0  ;;  %2947 = vmatpush1.bf16.msra.mxu0 %v11912_v0  ;;  %v11966_v8 = vcombine.low %v3166_v5, %v3168_v6  ;;  %v3192_v5 = vld [vmem:[#allocation7 + $0xf98] sm:$0xf] }
 0x264   : > { %v12999_v12 = vadd.f32 %v12998_v9, %v12997_v3  ;;  %v13000_v14 = vpop.f32.mrb[10].mxu1  ;;  %v1569_v16 = vpop.f32.mrb[7].mxu0  ;;  %2948 = vmatprep.subr.bf16.mxu0 %v11916_v1  ;;  %v11963_v1 = vcombine.low %v3162_v62, %v3164_v63  ;;  %v3132_v3 = vld [vmem:[#allocation7 + $0x458] sm:$0xf] }
 0x265   : > { %v13001_v17 = vpop.f32.mrb[11].mxu1  ;;  %v1570_v40 = vadd.f32 %v1569_v16, %v14630_v50  ;;  %v1695_v43 = vrot.slane %v1566_v11, 1  ;;  %v3134_v9 = vld [vmem:[#allocation7 + $0x4b8] sm:$0xf] }
 0x266   : > { %v14649_v18 = vadd.f32 %v12999_v12, %v14640_v23  ;;  %v13002_v19 = vadd.f32 %v13001_v17, %v13000_v14  ;;  %v3112_v23 = vld [vmem:[#allocation7 + $0x98] sm:$0xf] }
 0x267   : > { %v1696_v22 = vrot.slane %v1570_v40, 1  ;;  %2949 = vmatpush1.bf16.msra.mxu0 %v11915_v15  ;;  %v11924_v36 = vcombine.low %v3110_v27, %v3112_v23  ;;  %v3136_v11 = vld [vmem:[#allocation7 + $0x518] sm:$0xf]  ;;  %v11945_v23 = vcombine.low %v3138_v20, %v3140_v21 }
 0x268   : > { %v14654_v24 = vadd.f32 %v13002_v19, %v14642_v32  ;;  %2950 = vmatprep.subr.bf16.mxu0 %v11919_v4  ;;  %v11951_v32 = vcombine.low %v3146_v30, %v3148_v33  ;;  %v3170_v13 = vld [vmem:[#allocation7 + $0xb78] sm:$0xf]  ;;  %v11942_v4 = vcombine.low %v3134_v9, %v3136_v11 }
 0x269   : > { %v1700_v50 = vsel %vm1699_vm1, %v1695_v43, %v1696_v22  ;;  %v3172_v14 = vld [vmem:[#allocation7 + $0xbd8] sm:$0xf] }
 0x26a   : > { %v14658_v34 = vadd.f32 %v1700_v50, %v1564_v7  ;;  %v11939_v7 = vcombine.low %v3130_v2, %v3132_v3  ;;  %v11969_v19 = vcombine.low %v3170_v13, %v3172_v14  ;;  %v3174_v30 = vld [vmem:[#allocation7 + $0xc38] sm:$0xf]  ;;  %v1847_v13 = vld [vmem:[#allocation7 + $0x68] sm:$0xf] }
 0x26b   : > { %2951 = vmatpush1.bf16.msra.mxu0 %v11918_v25  ;;  %v3206_v25 = vld [vmem:[#allocation7 + $0x1238] sm:$0xf] }
 0x26c   : > { %13100 = vmatprep.subr.bf16.mxu0 %v11948_v26  ;;  %v3208_v26 = vld [vmem:[#allocation7 + $0x1298] sm:$0xf] }
 0x26d   : > { %v11996_v50 = vcombine.low %v3206_v25, %v3208_v26  ;;  %v3176_v33 = vld [vmem:[#allocation7 + $0xc98] sm:$0xf]  ;;  %v1849_v25 = vld [vmem:[#allocation7 + $0xc8] sm:$0xf] }
 0x26e   : > { %2953 = vmatmul.mubr.bf16.vlgmr.msra.gmra.mrb[12].mxu0 %v14661_v35  ;;  %v11972_v41 = vcombine.low %v3174_v30, %v3176_v33  ;;  %v3186_v62 = vld [vmem:[#allocation7 + $0xe78] sm:$0xf]  ;;  %v1851_v26 = vld [vmem:[#allocation7 + $0x128] sm:$0xf] }
 0x26f   : > { %13101 = vmatpush3.bf16.msra.mxu0 %v11924_v36  ;;  %4230 = vmatprep.mubr.bf16.mxu0 %v14605_v28  ;;  %v3128_v28 = vld [vmem:[#allocation7 + $0x398] sm:$0xf] }
 0x270   : > { %13102 = vmatprep.subr.bf16.mxu0 %v11951_v32  ;;  %v11936_v0 = vcombine.low %v3126_v61, %v3128_v28  ;;  %v3188_v63 = vld [vmem:[#allocation7 + $0xed8] sm:$0xf] }
 0x271   : > { %v3190_v3 = vld [vmem:[#allocation7 + $0xf38] sm:$0xf] }
 0x272   : > { %v11984_v11 = vcombine.low %v3190_v3, %v3192_v5  ;;  %v3194_v14 = vld [vmem:[#allocation7 + $0xff8] sm:$0xf]  ;;  %v1863_v3 = vld [vmem:[#allocation7 + $0x368] sm:$0xf] }
 0x273   : > { %13103 = vmatpush3.bf16.msra.mxu0 %v11927_v42  ;;  %v11999_v42 = vcombine.low %v3210_v37, %v3212_v38  ;;  %v3232_v20 = vld [vmem:[#allocation7 + $0x1718] sm:$0xf] }
 0x274   : > { %13104 = vmatprep.subr.bf16.mxu0 %v11954_v44  ;;  %v3178_v44 = vld [vmem:[#allocation7 + $0xcf8] sm:$0xf] }
 0x275   : > { %v3198_v30 = vld [vmem:[#allocation7 + $0x10b8] sm:$0xf] }
 0x276   : > { %v3200_v33 = vld [vmem:[#allocation7 + $0x1118] sm:$0xf] }
 0x277   : > { %13105 = vmatpush3.bf16.msra.mxu0 %v11930_v49  ;;  %v11975_v49 = vcombine.low %v3178_v44, %v3180_v45  ;;  %v3234_v37 = vld [vmem:[#allocation7 + $0x1778] sm:$0xf] }
 0x278   : > { %13106 = vmatprep.subr.bf16.mxu0 %v11957_v52  ;;  %v3236_v38 = vld [vmem:[#allocation7 + $0x17d8] sm:$0xf] }
 0x279   : > { %v12017_v44 = vcombine.low %v3234_v37, %v3236_v38  ;;  %v3202_v45 = vld [vmem:[#allocation7 + $0x1178] sm:$0xf]  ;;  %v1907_v37 = vld [vmem:[#allocation7 + $0xba8] sm:$0xf] }
 0x27a   : > { %v3204_v46 = vld [vmem:[#allocation7 + $0x11d8] sm:$0xf] }
 0x27b   : > { %13107 = vmatpush3.bf16.msra.mxu0 %v11933_v51  ;;  %v3286_v38 = vld [vmem:[#allocation7 + $0x2138] sm:$0xf] }
 0x27c   : > { %13108 = vmatprep.subr.bf16.mxu0 %v11960_v59  ;;  %v11978_v59 = vcombine.low %v3182_v54, %v3184_v55  ;;  %v11993_v55 = vcombine.low %v3202_v45, %v3204_v46  ;;  %v3254_v45 = vld [vmem:[#allocation7 + $0x1b38] sm:$0xf] }
 0x27d   : > { %v3256_v46 = vld [vmem:[#allocation7 + $0x1b98] sm:$0xf] }
 0x27f   : > { %13109 = vmatpush3.bf16.msra.mxu0 %v11936_v0  ;;  %v3224_v0 = vld [vmem:[#allocation7 + $0x1598] sm:$0xf] }
 0x280   : > { %13110 = vmatprep.subr.bf16.mxu0 %v11963_v1 }
 0x281   : > { %v13019_v12 = vpop.f32.mrb[8].mxu0 }
 0x282   : > { %v13020_v15 = vpop.f32.mrb[9].mxu0 }
 0x283   : > { %v13021_v16 = vadd.f32 %v13020_v15, %v13019_v12  ;;  %v13022_v17 = vpop.f32.mrb[10].mxu0  ;;  %13111 = vmatpush3.bf16.msra.mxu0 %v11939_v7  ;;  %v3226_v7 = vld [vmem:[#allocation7 + $0x15f8] sm:$0xf]  ;;  %v1845_v12 = vld [vmem:[#allocation7 + $0x8] sm:$0xf] }
 0x284   : > { %v13023_v40 = vpop.f32.mrb[11].mxu0  ;;  %13112 = vmatprep.subr.bf16.mxu0 %v11966_v8  ;;  %v3228_v8 = vld [vmem:[#allocation7 + $0x1658] sm:$0xf] }
 0x285   : > { %v1689_v43 = vadd.f32 %v13021_v16, %v14649_v18  ;;  %v13024_v22 = vadd.f32 %v13023_v40, %v13022_v17  ;;  %v12011_v16 = vcombine.low %v3226_v7, %v3228_v8  ;;  %v3196_v17 = vld [vmem:[#allocation7 + $0x1058] sm:$0xf]  ;;  %v1883_v40 = vld [vmem:[#allocation7 + $0x728] sm:$0xf] }
 0x286   : > { %v3242_v7 = vld [vmem:[#allocation7 + $0x18f8] sm:$0xf] }
 0x287   : > { %v1692_v27 = vadd.f32 %v13024_v22, %v14654_v24  ;;  %13113 = vmatpush3.bf16.msra.mxu0 %v11942_v4  ;;  %v1704_v36 = vrot.slane %v1689_v43, 2  ;;  %v1881_v4 = vld [vmem:[#allocation7 + $0x6c8] sm:$0xf]  ;;  %v11779_v43 = vcombine.low %v1845_v12, %v1847_v13  ;;  %v11987_v22 = vcombine.low %v3194_v14, %v3196_v17  ;;  %v3244_v8 = vld [vmem:[#allocation7 + $0x1958] sm:$0xf] }
 0x288   : > { %13114 = vmatprep.subr.bf16.mxu0 %v11969_v19  ;;  %v3230_v19 = vld [vmem:[#allocation7 + $0x16b8] sm:$0xf]  ;;  %v1867_v17 = vld [vmem:[#allocation7 + $0x428] sm:$0xf] }
 0x289   : > { %v1705_v32 = vrot.slane %v1692_v27, 2  ;;  %v3278_v12 = vld [vmem:[#allocation7 + $0x1fb8] sm:$0xf] }
 0x28a   : > { %v3280_v13 = vld [vmem:[#allocation7 + $0x2018] sm:$0xf] }
 0x28b   : > { %v1707_v18 = vsel %vm1706_vm2, %v1704_v36, %v1705_v32  ;;  %13115 = vmatpush3.bf16.msra.mxu0 %v11945_v23  ;;  %v11806_v23 = vcombine.low %v1881_v4, %v1883_v40  ;;  %v1885_v36 = vld [vmem:[#allocation7 + $0x788] sm:$0xf]  ;;  %v12050_v40 = vcombine.low %v3278_v12, %v3280_v13  ;;  %v3298_v12 = vld [vmem:[#allocation7 + $0x2378] sm:$0xf] }
 0x28c   : > { %v1709_v24 = vadd.f32 %v1707_v18, %v14658_v34  ;;  %13122 = vmatprep.subr.bf16.mxu0 %v11996_v50  ;;  %v3220_v34 = vld [vmem:[#allocation7 + $0x14d8] sm:$0xf]  ;;  %v12014_v50 = vcombine.low %v3230_v19, %v3232_v20  ;;  %v1887_v32 = vld [vmem:[#allocation7 + $0x7e8] sm:$0xf]  ;;  %v11782_v18 = vcombine.low %v1849_v25, %v1851_v26 }
 0x28d   : > { %v12005_v28 = vcombine.low %v3218_v56, %v3220_v34  ;;  %v1857_v56 = vld [vmem:[#allocation7 + $0x248] sm:$0xf]  ;;  %v3246_v19 = vld [vmem:[#allocation7 + $0x19b8] sm:$0xf] }
 0x28e   : > { %v1716_v48 = vadd.f32 %v11762_v39, %v1709_v24  ;;  %4231 = vmatmul.mubr.bf16.vlgmr.msra.gmra.mrb[16].mxu0 %v14609_v29  ;;  %v3222_v29 = vld [vmem:[#allocation7 + $0x1538] sm:$0xf]  ;;  %v11990_v39 = vcombine.low %v3198_v30, %v3200_v33  ;;  %v1855_v24 = vld [vmem:[#allocation7 + $0x1e8] sm:$0xf] }
 0x28f   : > { %13123 = vmatpush3.bf16.msra.mxu0 %v11972_v41  ;;  %4271 = vmatprep.mubr.bf16.mxu0 %v14612_v31  ;;  %v11981_v31 = vcombine.low %v3186_v62, %v3188_v63  ;;  %v12008_v2 = vcombine.low %v3222_v29, %v3224_v0  ;;  %v1853_v41 = vld [vmem:[#allocation7 + $0x188] sm:$0xf]  ;;  %v3274_v29 = vld [vmem:[#allocation7 + $0x1ef8] sm:$0xf] }
 0x290   : > { %v1718_v52 = vmax.f32 %v1716_v48, 0.0  ;;  %13124 = vmatprep.subr.bf16.mxu0 %v11999_v42  ;;  %v11809_v42 = vcombine.low %v1885_v36, %v1887_v32  ;;  %v1891_v48 = vld [vmem:[#allocation7 + $0x8a8] sm:$0xf]  ;;  %v11785_v54 = vcombine.low %v1853_v41, %v1855_v24  ;;  %v3276_v0 = vld [vmem:[#allocation7 + $0x1f58] sm:$0xf] }
 0x291   : > { %v1859_v34 = vld [vmem:[#allocation7 + $0x2a8] sm:$0xf]  ;;  %v3248_v20 = vld [vmem:[#allocation7 + $0x1a18] sm:$0xf] }
 0x292   : > { %v1725_v51 = vmax.f32 %v1718_v52, 0.0  ;;  %v3272_v52 = vld [vmem:[#allocation7 + $0x1e98] sm:$0xf]  ;;  %v1893_v62 = vld [vmem:[#allocation7 + $0x908] sm:$0xf]  ;;  %v12026_v26 = vcombine.low %v3246_v19, %v3248_v20 }
 0x293   : > { %13125 = vmatpush3.bf16.msra.mxu0 %v11975_v49  ;;  %v3270_v49 = vld [vmem:[#allocation7 + $0x1e38] sm:$0xf]  ;;  %v1895_v63 = vld [vmem:[#allocation7 + $0x968] sm:$0xf] }
 0x294   : > { %v1726_v61 = vrot.slane %v1725_v51, 4  ;;  %13126 = vmatprep.subr.bf16.mxu0 %v12002_v53  ;;  %v14674_v53 = vld [vmem:[%s14553_s13 + $0x4] ss:$24 sps:$4 sm:$0xff]   ;;  %v11815_v5 = vcombine.low %v1893_v62, %v1895_v63  ;;  %v3284_v25 = vld [vmem:[#allocation7 + $0x20d8] sm:$0xf] }
 0x295   : > { %v3250_v33 = vld [vmem:[#allocation7 + $0x1a78] sm:$0xf]  ;;  %v1905_v32 = vld [vmem:[#allocation7 + $0xb48] sm:$0xf] }
 0x296   : > { %v1727_v1 = vmax.f32 %v1725_v51, %v1726_v61  ;;  %v11812_v51 = vcombine.low %v1889_v47, %v1891_v48  ;;  %v3238_v61 = vld [vmem:[#allocation7 + $0x1838] sm:$0xf]  ;;  %v1873_v41 = vld [vmem:[#allocation7 + $0x548] sm:$0xf] }
 0x297   : > { %13127 = vmatpush3.bf16.msra.mxu0 %v11978_v59  ;;  %v12044_v59 = vcombine.low %v3270_v49, %v3272_v52  ;;  %v3252_v36 = vld [vmem:[#allocation7 + $0x1ad8] sm:$0xf]  ;;  %v1875_v24 = vld [vmem:[#allocation7 + $0x5a8] sm:$0xf] }
 0x298   : > { %13128 = vmatprep.subr.bf16.mxu0 %v12005_v28  ;;  %v1728_v6 = vrot.slane %v1727_v1, 2  ;;  %v3240_v28 = vld [vmem:[#allocation7 + $0x1898] sm:$0xf]  ;;  %v1941_v47 = vld [vmem:[#allocation7 + $0x1208] sm:$0xf] }
 0x299   : > { %v1943_v48 = vld [vmem:[#allocation7 + $0x1268] sm:$0xf]  ;;  %v3290_v49 = vld [vmem:[#allocation7 + $0x21f8] sm:$0xf] }
 0x29a   : > { %v1729_v9 = vmax.f32 %v1727_v1, %v1728_v6  ;;  %v11788_v1 = vcombine.low %v1857_v56, %v1859_v34  ;;  %v12047_v6 = vcombine.low %v3274_v29, %v3276_v0  ;;  %v3292_v52 = vld [vmem:[#allocation7 + $0x2258] sm:$0xf]  ;;  %v1909_v56 = vld [vmem:[#allocation7 + $0xc08] sm:$0xf] }
 0x29b   : > { %13129 = vmatpush3.bf16.msra.mxu0 %v11981_v31  ;;  %v12020_v31 = vcombine.low %v3238_v61, %v3240_v28  ;;  %v1911_v34 = vld [vmem:[#allocation7 + $0xc68] sm:$0xf]  ;;  %v3258_v61 = vld [vmem:[#allocation7 + $0x1bf8] sm:$0xf] }
 0x29c   : > { %13130 = vmatprep.subr.bf16.mxu0 %v12008_v2  ;;  %v1730_v15 = vrot.slane %v1729_v9, 1  ;;  %v1861_v2 = vld [vmem:[#allocation7 + $0x308] sm:$0xf]  ;;  %v3260_v28 = vld [vmem:[#allocation7 + $0x1c58] sm:$0xf] }
 0x29d   : > { %v11791_v14 = vcombine.low %v1861_v2, %v1863_v3  ;;  %v1945_v62 = vld [vmem:[#allocation7 + $0x12c8] sm:$0xf]  ;;  %v3294_v29 = vld [vmem:[#allocation7 + $0x22b8] sm:$0xf] }
 0x29e   : > { %v1731_v21 = vmax.f32 %v1729_v9, %v1730_v15  ;;  %v1897_v9 = vld [vmem:[#allocation7 + $0x9c8] sm:$0xf]  ;;  %v12023_v15 = vcombine.low %v3242_v7, %v3244_v8  ;;  %v3296_v0 = vld [vmem:[#allocation7 + $0x2318] sm:$0xf] }
 0x29f   : > { %13131 = vmatpush3.bf16.msra.mxu0 %v11984_v11  ;;  %v1899_v11 = vld [vmem:[#allocation7 + $0xa28] sm:$0xf]  ;;  %v3262_v7 = vld [vmem:[#allocation7 + $0x1cb8] sm:$0xf] }
 0x2a0   : > { %v1732_v27 = vpack.c.bf16 %v1731_v21, %v1731_v21  ;;  %13132 = vmatprep.subr.bf16.mxu0 %v12011_v16  ;;  %v1865_v16 = vld [vmem:[#allocation7 + $0x3c8] sm:$0xf]  ;;  %v11818_v4 = vcombine.low %v1897_v9, %v1899_v11  ;;  %v3264_v8 = vld [vmem:[#allocation7 + $0x1d18] sm:$0xf] }
 0x2a1   : > { %v1901_v21 = vld [vmem:[#allocation7 + $0xa88] sm:$0xf]  ;;  %v3300_v13 = vld [vmem:[#allocation7 + $0x23d8] sm:$0xf] }
 0x2a2   : > { %13346 = vmatmul.mubr.bf16.vlgmr.msra.gmra.mrb[12].mxu1 %v1732_v27  ;;  %v1869_v27 = vld [vmem:[#allocation7 + $0x488] sm:$0xf]  ;;  %v12065_v19 = vcombine.low %v3298_v12, %v3300_v13  ;;  %v3266_v20 = vld [vmem:[#allocation7 + $0x1d78] sm:$0xf] }
 0x2a3   : > { %13035 = vmatpush3.bf16.msra.mxu1 %v11779_v43  ;;  %13133 = vmatpush3.bf16.msra.mxu0 %v11987_v22  ;;  %v1903_v43 = vld [vmem:[#allocation7 + $0xae8] sm:$0xf]  ;;  %v3282_v22 = vld [vmem:[#allocation7 + $0x2078] sm:$0xf] }
 0x2a4   : > { %13036 = vmatprep.subr.bf16.mxu1 %v11806_v23  ;;  %13134 = vmatprep.subr.bf16.mxu0 %v12014_v50  ;;  %v1871_v23 = vld [vmem:[#allocation7 + $0x4e8] sm:$0xf]  ;;  %v11821_v50 = vcombine.low %v1901_v21, %v1903_v43  ;;  %v12053_v30 = vcombine.low %v3282_v22, %v3284_v25  ;;  %v3268_v21 = vld [vmem:[#allocation7 + $0x1dd8] sm:$0xf]  ;;  %v4354_v25 = vld [vmem:[#allocation7 + $0xc] sm:$0xff] }
 0x2a5   : > { %2995 = vmatprep.mubr.bf16.mxu1 %v14674_v53  ;;  %v1947_v63 = vld [vmem:[#allocation7 + $0x1328] sm:$0xf] }
 0x2a6   : > { %v1913_v2 = vld [vmem:[#allocation7 + $0xcc8] sm:$0xf] }
 0x2a7   : > { %13037 = vmatpush3.bf16.msra.mxu1 %v11782_v18  ;;  %13135 = vmatpush3.bf16.msra.mxu0 %v11990_v39  ;;  %v3288_v18 = vld [vmem:[#allocation7 + $0x2198] sm:$0xf]  ;;  %v11797_v39 = vcombine.low %v1869_v27, %v1871_v23  ;;  %v1915_v3 = vld [vmem:[#allocation7 + $0xd28] sm:$0xf]  ;;  %v12041_v23 = vcombine.low %v3266_v20, %v3268_v21 }
 0x2a8   : > { %13038 = vmatprep.subr.bf16.mxu1 %v11809_v42  ;;  %13136 = vmatprep.subr.bf16.mxu0 %v12017_v44  ;;  %v11824_v42 = vcombine.low %v1905_v32, %v1907_v37  ;;  %v12056_v44 = vcombine.low %v3286_v38, %v3288_v18  ;;  %v1949_v9 = vld [vmem:[#allocation7 + $0x1388] sm:$0xf]  ;;  %v4358_v38 = vld [vmem:[#allocation7 + $0xcc] sm:$0xff] }
 0x2a9   : > { %v1951_v11 = vld [vmem:[#allocation7 + $0x13e8] sm:$0xf]  ;;  %v4360_v18 = vld [vmem:[#allocation7 + $0x12c] sm:$0xff] }
 0x2aa   : > { %v1953_v43 = vld [vmem:[#allocation7 + $0x1448] sm:$0xf] }
 0x2ab   : > { %13039 = vmatpush3.bf16.msra.mxu1 %v11785_v54  ;;  %13137 = vmatpush3.bf16.msra.mxu0 %v11993_v55  ;;  %v11800_v54 = vcombine.low %v1873_v41, %v1875_v24  ;;  %v12032_v55 = vcombine.low %v3254_v45, %v3256_v46  ;;  %v1955_v22 = vld [vmem:[#allocation7 + $0x14a8] sm:$0xf] }
 0x2ac   : > { %13040 = vmatprep.subr.bf16.mxu1 %v11812_v51  ;;  %13144 = vmatprep.subr.bf16.mxu0 %v12044_v59  ;;  %v11851_v51 = vcombine.low %v1941_v47, %v1943_v48  ;;  %v12059_v59 = vcombine.low %v3290_v49, %v3292_v52  ;;  %v1957_v32 = vld [vmem:[#allocation7 + $0x1508] sm:$0xf]  ;;  %v4362_v47 = vld [vmem:[#allocation7 + $0x18c] sm:$0xff]  ;;  %v12070_v52 = vcombine.low %v4358_v38, %v4360_v18 }
 0x2ad   : > { %v1959_v37 = vld [vmem:[#allocation7 + $0x1568] sm:$0xf]  ;;  %v4364_v48 = vld [vmem:[#allocation7 + $0x1ec] sm:$0xff] }
 0x2ae   : > { %4272 = vmatmul.mubr.bf16.vlgmr.msra.gmra.mrb[20].mxu0 %v14633_v58  ;;  %v11794_v58 = vcombine.low %v1865_v16, %v1867_v17  ;;  %v12038_v16 = vcombine.low %v3262_v7, %v3264_v8  ;;  %v1917_v17 = vld [vmem:[#allocation7 + $0xd88] sm:$0xf]  ;;  %v11863_v41 = vcombine.low %v1957_v32, %v1959_v37 }
 0x2af   : > { %13041 = vmatpush3.bf16.msra.mxu1 %v11788_v1  ;;  %13145 = vmatpush3.bf16.msra.mxu0 %v12020_v31  ;;  %v11827_v1 = vcombine.low %v1909_v56, %v1911_v34  ;;  %v12035_v31 = vcombine.low %v3258_v61, %v3260_v28  ;;  %v1925_v24 = vld [vmem:[#allocation7 + $0xf08] sm:$0xf]  ;;  %v12075_v34 = vcombine.high %v4362_v47, %v4364_v48  ;;  %v4366_v61 = vld [vmem:[#allocation7 + $0x24c] sm:$0xff] }
 0x2b0   : > { %13042 = vmatprep.subr.bf16.mxu1 %v11815_v5  ;;  %13146 = vmatprep.subr.bf16.mxu0 %v12047_v6  ;;  %v11854_v5 = vcombine.low %v1945_v62, %v1947_v63  ;;  %v12062_v6 = vcombine.low %v3294_v29, %v3296_v0  ;;  %v1961_v45 = vld [vmem:[#allocation7 + $0x15c8] sm:$0xf]  ;;  %v4368_v28 = vld [vmem:[#allocation7 + $0x2ac] sm:$0xff]  ;;  %v12074_v63 = vcombine.low %v4362_v47, %v4364_v48 }
 0x2b1   : > { %4312 = vmatprep.mubr.bf16.mxu0 %v14636_v60  ;;  %v12029_v60 = vcombine.low %v3250_v33, %v3252_v36  ;;  %v1923_v33 = vld [vmem:[#allocation7 + $0xea8] sm:$0xf]  ;;  %v12078_v8 = vcombine.low %v4366_v61, %v4368_v28 }
 0x2b2   : > { %v1963_v46 = vld [vmem:[#allocation7 + $0x1628] sm:$0xf] }
 0x2b3   : > { %13043 = vmatpush3.bf16.msra.mxu1 %v11791_v14  ;;  %13147 = vmatpush3.bf16.msra.mxu0 %v12023_v15  ;;  %v14680_v14 = vld [vmem:[%s14553_s13] ss:$24 sps:$4 sm:$0xff]   ;;  %v11830_v15 = vcombine.low %v1913_v2, %v1915_v3 }
 0x2b4   : > { %13044 = vmatprep.subr.bf16.mxu1 %v11818_v4  ;;  %13148 = vmatprep.subr.bf16.mxu0 %v12050_v40  ;;  %v1919_v4 = vld [vmem:[#allocation7 + $0xde8] sm:$0xf]  ;;  %v11857_v40 = vcombine.low %v1949_v9, %v1951_v11 }
 0x2b5   : > { %v11833_v27 = vcombine.low %v1917_v17, %v1919_v4  ;;  %v1931_v56 = vld [vmem:[#allocation7 + $0x1028] sm:$0xf]  ;;  %v4374_v17 = vld [vmem:[#allocation7 + $0x3cc] sm:$0xff] }
 0x2b6   : > { %v1933_v0 = vld [vmem:[#allocation7 + $0x1088] sm:$0xf]  ;;  %v4376_v4 = vld [vmem:[#allocation7 + $0x42c] sm:$0xff] }
 0x2b7   : > { %13045 = vmatpush3.bf16.msra.mxu1 %v11794_v58  ;;  %13149 = vmatpush3.bf16.msra.mxu0 %v12026_v26  ;;  %v4356_v58 = vld [vmem:[#allocation7 + $0x6c] sm:$0xff]  ;;  %v1969_v2 = vld [vmem:[#allocation7 + $0x1748] sm:$0xf] }
 0x2b8   : > { %13046 = vmatprep.subr.bf16.mxu1 %v11821_v50  ;;  %13150 = vmatprep.subr.bf16.mxu0 %v12053_v30  ;;  %v14684_v26 = vld [vmem:[%s14553_s13 + $0xc] ss:$24 sps:$4 sm:$0xff]   ;;  %v11860_v50 = vcombine.low %v1953_v43, %v1955_v22  ;;  %v1921_v30 = vld [vmem:[#allocation7 + $0xe48] sm:$0xf]  ;;  %v12067_v36 = vcombine.high %v4354_v25, %v4356_v58  ;;  %v12087_v22 = vcombine.high %v4374_v17, %v4376_v4 }
 0x2b9   : > { %v1971_v3 = vld [vmem:[#allocation7 + $0x17a8] sm:$0xf] }
 0x2ba   : > { %v11872_v9 = vcombine.low %v1969_v2, %v1971_v3  ;;  %v1937_v11 = vld [vmem:[#allocation7 + $0x1148] sm:$0xf] }
 0x2bb   : > { %13047 = vmatpush3.bf16.msra.mxu1 %v11797_v39  ;;  %13151 = vmatpush3.bf16.msra.mxu0 %v12029_v60  ;;  %v11836_v39 = vcombine.low %v1921_v30, %v1923_v33  ;;  %v12066_v60 = vcombine.low %v4354_v25, %v4356_v58  ;;  %v1939_v12 = vld [vmem:[#allocation7 + $0x11a8] sm:$0xf]  ;;  %v12086_v30 = vcombine.low %v4374_v17, %v4376_v4 }
 0x2bc   : > { %13048 = vmatprep.subr.bf16.mxu1 %v11824_v42  ;;  %13152 = vmatprep.subr.bf16.mxu0 %v12056_v44  ;;  %v1927_v42 = vld [vmem:[#allocation7 + $0xf68] sm:$0xf]  ;;  %v12071_v44 = vcombine.high %v4358_v38, %v4360_v18 }
 0x2bd   : > { %v11839_v49 = vcombine.low %v1925_v24, %v1927_v42  ;;  %v1973_v21 = vld [vmem:[#allocation7 + $0x1808] sm:$0xf] }
 0x2be   : > { %v1975_v43 = vld [vmem:[#allocation7 + $0x1868] sm:$0xf] }
 0x2bf   : > { %13049 = vmatpush3.bf16.msra.mxu1 %v11800_v54  ;;  %13153 = vmatpush3.bf16.msra.mxu0 %v12032_v55  ;;  %v11866_v54 = vcombine.low %v1961_v45, %v1963_v46  ;;  %v1929_v55 = vld [vmem:[#allocation7 + $0xfc8] sm:$0xf] }
 0x2c0   : > { %13056 = vmatprep.subr.bf16.mxu1 %v11851_v51  ;;  %13154 = vmatprep.subr.bf16.mxu0 %v12059_v59  ;;  %v1965_v51 = vld [vmem:[#allocation7 + $0x1688] sm:$0xf]  ;;  %v11842_v62 = vcombine.low %v1929_v55, %v1931_v56  ;;  %v14694_v55 = vld [vmem:[%s14553_s13 + $0x14] ss:$24 sps:$4 sm:$0xff]  }
 0x2c1   : > { %v1967_v59 = vld [vmem:[#allocation7 + $0x16e8] sm:$0xf] }
 0x2c2   : > { %2996 = vmatmul.mubr.bf16.vlgmr.msra.gmra.mrb[16].mxu1 %v14680_v14  ;;  %v11869_v29 = vcombine.low %v1965_v51, %v1967_v59  ;;  %v2009_v25 = vld [vmem:[#allocation7 + $0x1ec8] sm:$0xf] }
 0x2c3   : > { %13057 = vmatpush3.bf16.msra.mxu1 %v11827_v1  ;;  %13155 = vmatpush3.bf16.msra.mxu0 %v12035_v31  ;;  %v1935_v1 = vld [vmem:[#allocation7 + $0x10e8] sm:$0xf]  ;;  %v12079_v31 = vcombine.high %v4366_v61, %v4368_v28 }
 0x2c4   : > { %13058 = vmatprep.subr.bf16.mxu1 %v11854_v5  ;;  %13156 = vmatprep.subr.bf16.mxu0 %v12062_v6  ;;  %v4370_v5 = vld [vmem:[#allocation7 + $0x30c] sm:$0xff]  ;;  %v11845_v7 = vcombine.low %v1933_v0, %v1935_v1  ;;  %v2011_v58 = vld [vmem:[#allocation7 + $0x1f28] sm:$0xf] }
 0x2c5   : > { %3036 = vmatprep.mubr.bf16.mxu1 %v14684_v26  ;;  %v4372_v6 = vld [vmem:[#allocation7 + $0x36c] sm:$0xff]  ;;  %v11902_v33 = vcombine.low %v2009_v25, %v2011_v58  ;;  %v1979_v32 = vld [vmem:[#allocation7 + $0x1928] sm:$0xf] }
 0x2c6   : > { %v12083_v13 = vcombine.high %v4370_v5, %v4372_v6  ;;  %v2013_v38 = vld [vmem:[#allocation7 + $0x1f88] sm:$0xf]  ;;  %v4392_v0 = vld [vmem:[#allocation7 + $0x72c] sm:$0xff] }
 0x2c7   : > { %13059 = vmatpush3.bf16.msra.mxu1 %v11830_v15  ;;  %13157 = vmatpush3.bf16.msra.mxu0 %v12038_v16  ;;  %v2005_v15 = vld [vmem:[#allocation7 + $0x1e08] sm:$0xf] }
 0x2c8   : > { %13060 = vmatprep.subr.bf16.mxu1 %v11857_v40  ;;  %13158 = vmatprep.subr.bf16.mxu0 %v12065_v19  ;;  %v2007_v16 = vld [vmem:[#allocation7 + $0x1e68] sm:$0xf]  ;;  %v11848_v40 = vcombine.low %v1937_v11, %v1939_v12  ;;  %v12082_v19 = vcombine.low %v4370_v5, %v4372_v6  ;;  %v4396_v11 = vld [vmem:[#allocation7 + $0x7ec] sm:$0xff] }
 0x2c9   : > { %v11899_v20 = vcombine.low %v2005_v15, %v2007_v16  ;;  %v2015_v18 = vld [vmem:[#allocation7 + $0x1fe8] sm:$0xf] }
 0x2ca   : > { %v1981_v45 = vld [vmem:[#allocation7 + $0x1988] sm:$0xf] }
 0x2cb   : > { %13061 = vmatpush3.bf16.msra.mxu1 %v11833_v27  ;;  %13159 = vmatpush3.bf16.msra.mxu0 %v12041_v23  ;;  %v4378_v27 = vld [vmem:[#allocation7 + $0x48c] sm:$0xff]  ;;  %v1983_v46 = vld [vmem:[#allocation7 + $0x19e8] sm:$0xf] }
 0x2cc   : > { %13062 = vmatprep.subr.bf16.mxu1 %v11860_v50  ;;  %5506 = vmatprep.subr.bf16.mxu0 %v12067_v36  ;;  %v4380_v23 = vld [vmem:[#allocation7 + $0x4ec] sm:$0xff]  ;;  %v11875_v50 = vcombine.low %v1973_v21, %v1975_v43  ;;  %v1977_v36 = vld [vmem:[#allocation7 + $0x18c8] sm:$0xf]  ;;  %v11881_v56 = vcombine.low %v1981_v45, %v1983_v46 }
 0x2cd   : > { %v12091_v37 = vcombine.high %v4378_v27, %v4380_v23  ;;  %v11878_v24 = vcombine.low %v1977_v36, %v1979_v32  ;;  %v12090_v42 = vcombine.low %v4378_v27, %v4380_v23  ;;  %v2017_v48 = vld [vmem:[#allocation7 + $0x2048] sm:$0xf]  ;;  %v4400_v21 = vld [vmem:[#allocation7 + $0x8ac] sm:$0xff] }
 0x2ce   : > { %4313 = vmatmul.mubr.bf16.vlgmr.msra.gmra.mrb[24].mxu0 %v14661_v35  ;;  %v1985_v59 = vld [vmem:[#allocation7 + $0x1a48] sm:$0xf]  ;;  %v4404_v36 = vld [vmem:[#allocation7 + $0x96c] sm:$0xff] }
 0x2cf   : > { %13063 = vmatpush3.bf16.msra.mxu1 %v11836_v39  ;;  %5507 = vmatpush1.bf16.msra.mxu0 %v12066_v60  ;;  %v4382_v39 = vld [vmem:[#allocation7 + $0x54c] sm:$0xff]  ;;  %v1987_v61 = vld [vmem:[#allocation7 + $0x1aa8] sm:$0xf] }
 0x2d0   : > { %13064 = vmatprep.subr.bf16.mxu1 %v11863_v41  ;;  %5508 = vmatprep.subr.bf16.mxu0 %v12071_v44  ;;  %v4384_v60 = vld [vmem:[#allocation7 + $0x5ac] sm:$0xff]  ;;  %v11905_v44 = vcombine.low %v2013_v38, %v2015_v18  ;;  %v11884_v1 = vcombine.low %v1985_v59, %v1987_v61  ;;  %v1989_v3 = vld [vmem:[#allocation7 + $0x1b08] sm:$0xf] }
 0x2d1   : > { %5538 = vmatprep.mubr.bf16.mxu0 %v14674_v53  ;;  %v14690_v41 = vld [vmem:[%s14553_s13 + $0x8] ss:$24 sps:$4 sm:$0xff]   ;;  %v12095_v47 = vcombine.high %v4382_v39, %v4384_v60 }
 0x2d2   : > { %v1991_v5 = vld [vmem:[#allocation7 + $0x1b68] sm:$0xf]  ;;  %v4408_v45 = vld [vmem:[#allocation7 + $0xa2c] sm:$0xff] }
 0x2d3   : > { %13065 = vmatpush3.bf16.msra.mxu1 %v11839_v49  ;;  %5509 = vmatpush1.bf16.msra.mxu0 %v12070_v52  ;;  %v2019_v49 = vld [vmem:[#allocation7 + $0x20a8] sm:$0xf]  ;;  %v4386_v52 = vld [vmem:[#allocation7 + $0x60c] sm:$0xff]  ;;  %v11887_v12 = vcombine.low %v1989_v3, %v1991_v5 }
 0x2d4   : > { %13066 = vmatprep.subr.bf16.mxu1 %v11866_v54  ;;  %5510 = vmatprep.subr.bf16.mxu0 %v12075_v34  ;;  %v4388_v54 = vld [vmem:[#allocation7 + $0x66c] sm:$0xff]  ;;  %v12094_v34 = vcombine.low %v4382_v39, %v4384_v60  ;;  %v11908_v51 = vcombine.low %v2017_v48, %v2019_v49  ;;  %v1993_v16 = vld [vmem:[#allocation7 + $0x1bc8] sm:$0xf] }
 0x2d5   : > { %v12099_v28 = vcombine.high %v4386_v52, %v4388_v54  ;;  %v1995_v17 = vld [vmem:[#allocation7 + $0x1c28] sm:$0xf]  ;;  %v3121_v5 = vld [vmem:[#allocation7 + $0x270] sm:$0xff] }
 0x2d6   : > { %v11890_v43 = vcombine.low %v1993_v16, %v1995_v17  ;;  %v1997_v58 = vld [vmem:[#allocation7 + $0x1c88] sm:$0xf]  ;;  %v4422_v16 = vld [vmem:[#allocation7 + $0xccc] sm:$0xff] }
 0x2d7   : > { %13067 = vmatpush3.bf16.msra.mxu1 %v11842_v62  ;;  %5511 = vmatpush1.bf16.msra.mxu0 %v12074_v63  ;;  %v2021_v62 = vld [vmem:[#allocation7 + $0x2108] sm:$0xf]  ;;  %v4424_v17 = vld [vmem:[#allocation7 + $0xd2c] sm:$0xff] }
 0x2d8   : > { %13068 = vmatprep.subr.bf16.mxu1 %v11869_v29  ;;  %5512 = vmatprep.subr.bf16.mxu0 %v12079_v31  ;;  %v2023_v63 = vld [vmem:[#allocation7 + $0x2168] sm:$0xf]  ;;  %v4390_v29 = vld [vmem:[#allocation7 + $0x6cc] sm:$0xff]  ;;  %v12098_v31 = vcombine.low %v4386_v52, %v4388_v54 }
 0x2d9   : > { %v11911_v2 = vcombine.low %v2021_v62, %v2023_v63  ;;  %v12103_v6 = vcombine.high %v4390_v29, %v4392_v0  ;;  %v1999_v27 = vld [vmem:[#allocation7 + $0x1ce8] sm:$0xf]  ;;  %v3113_v52 = vld [vmem:[#allocation7 + $0xf0] sm:$0xff] }
 0x2da   : > { %v11893_v32 = vcombine.low %v1997_v58, %v1999_v27  ;;  %v2001_v18 = vld [vmem:[#allocation7 + $0x1d48] sm:$0xf]  ;;  %v3115_v54 = vld [vmem:[#allocation7 + $0x150] sm:$0xff]  ;;  %v12134_v58 = vcombine.low %v4422_v16, %v4424_v17 }
 0x2db   : > { %13069 = vmatpush3.bf16.msra.mxu1 %v11845_v7  ;;  %5513 = vmatpush1.bf16.msra.mxu0 %v12078_v8  ;;  %v2025_v7 = vld [vmem:[#allocation7 + $0x21c8] sm:$0xf]  ;;  %v11926_v61 = vcombine.high %v3113_v52, %v3115_v54  ;;  %v3117_v62 = vld [vmem:[#allocation7 + $0x1b0] sm:$0xff] }
 0x2dc   : > { %13070 = vmatprep.subr.bf16.mxu1 %v11872_v9  ;;  %5514 = vmatprep.subr.bf16.mxu0 %v12083_v13  ;;  %v2027_v8 = vld [vmem:[#allocation7 + $0x2228] sm:$0xf]  ;;  %v4394_v9 = vld [vmem:[#allocation7 + $0x78c] sm:$0xff]  ;;  %v12102_v13 = vcombine.low %v4390_v29, %v4392_v0 }
 0x2dd   : > { %v11914_v15 = vcombine.low %v2025_v7, %v2027_v8  ;;  %v12107_v4 = vcombine.high %v4394_v9, %v4396_v11  ;;  %v2003_v39 = vld [vmem:[#allocation7 + $0x1da8] sm:$0xf]  ;;  %v3119_v63 = vld [vmem:[#allocation7 + $0x210] sm:$0xff] }
 0x2de   : > { %v11896_v46 = vcombine.low %v2001_v18, %v2003_v39  ;;  %v4414_v29 = vld [vmem:[#allocation7 + $0xb4c] sm:$0xff] }
 0x2df   : > { %13071 = vmatpush3.bf16.msra.mxu1 %v11848_v40  ;;  %5515 = vmatpush1.bf16.msra.mxu0 %v12082_v19  ;;  %v2029_v40 = vld [vmem:[#allocation7 + $0x2288] sm:$0xf]  ;;  %v4416_v0 = vld [vmem:[#allocation7 + $0xbac] sm:$0xff] }
 0x2e0   : > { %13078 = vmatprep.subr.bf16.mxu1 %v11899_v20  ;;  %5516 = vmatprep.subr.bf16.mxu0 %v12087_v22  ;;  %v2031_v19 = vld [vmem:[#allocation7 + $0x22e8] sm:$0xf]  ;;  %v4398_v20 = vld [vmem:[#allocation7 + $0x84c] sm:$0xff]  ;;  %v12106_v22 = vcombine.low %v4394_v9, %v4396_v11  ;;  %v12127_v3 = vcombine.high %v4414_v29, %v4416_v0  ;;  %v11928_v9 = vcombine.low %v3117_v62, %v3119_v63 }
 0x2e1   : > { %v11917_v25 = vcombine.low %v2029_v40, %v2031_v19  ;;  %v12111_v23 = vcombine.high %v4398_v20, %v4400_v21  ;;  %v4418_v7 = vld [vmem:[#allocation7 + $0xc0c] sm:$0xff]  ;;  %v12126_v11 = vcombine.low %v4414_v29, %v4416_v0 }
 0x2e2   : > { %3037 = vmatmul.mubr.bf16.vlgmr.msra.gmra.mrb[20].mxu1 %v14690_v41  ;;  %v4420_v8 = vld [vmem:[#allocation7 + $0xc6c] sm:$0xff] }
 0x2e3   : > { %13079 = vmatpush3.bf16.msra.mxu1 %v11875_v50  ;;  %5517 = vmatpush1.bf16.msra.mxu0 %v12086_v30  ;;  %v2033_v50 = vld [vmem:[#allocation7 + $0x2348] sm:$0xf]  ;;  %v12130_v40 = vcombine.low %v4418_v7, %v4420_v8  ;;  %v3137_v39 = vld [vmem:[#allocation7 + $0x570] sm:$0xff] }
 0x2e4   : > { %13080 = vmatprep.subr.bf16.mxu1 %v11902_v33  ;;  %5518 = vmatprep.subr.bf16.mxu0 %v12091_v37  ;;  %v2035_v30 = vld [vmem:[#allocation7 + $0x23a8] sm:$0xf]  ;;  %v4402_v33 = vld [vmem:[#allocation7 + $0x90c] sm:$0xff]  ;;  %v12110_v37 = vcombine.low %v4398_v20, %v4400_v21 }
 0x2e5   : > { %3077 = vmatprep.mubr.bf16.mxu1 %v14694_v55  ;;  %v11920_v38 = vcombine.low %v2033_v50, %v2035_v30  ;;  %v12115_v60 = vcombine.high %v4402_v33, %v4404_v36  ;;  %v3129_v20 = vld [vmem:[#allocation7 + $0x3f0] sm:$0xff] }
 0x2e6   : > { %v3131_v21 = vld [vmem:[#allocation7 + $0x450] sm:$0xff] }
 0x2e7   : > { %13081 = vmatpush3.bf16.msra.mxu1 %v11878_v24  ;;  %5519 = vmatpush1.bf16.msra.mxu0 %v12090_v42  ;;  %v3109_v24 = vld [vmem:[#allocation7 + $0x30] sm:$0xff]  ;;  %v11938_v27 = vcombine.high %v3129_v20, %v3131_v21 }
 0x2e8   : > { %13082 = vmatprep.subr.bf16.mxu1 %v11905_v44  ;;  %5520 = vmatprep.subr.bf16.mxu0 %v12095_v47  ;;  %v3111_v42 = vld [vmem:[#allocation7 + $0x90] sm:$0xff]  ;;  %v12114_v47 = vcombine.low %v4402_v33, %v4404_v36 }
 0x2e9   : > { %v4406_v44 = vld [vmem:[#allocation7 + $0x9cc] sm:$0xff]  ;;  %v11923_v48 = vcombine.high %v3109_v24, %v3111_v42 }
 0x2ea   : > { %v12119_v49 = vcombine.high %v4406_v44, %v4408_v45  ;;  %v12118_v59 = vcombine.low %v4406_v44, %v4408_v45  ;;  %v3133_v50 = vld [vmem:[#allocation7 + $0x4b0] sm:$0xff] }
 0x2eb   : > { %13083 = vmatpush3.bf16.msra.mxu1 %v11881_v56  ;;  %5521 = vmatpush1.bf16.msra.mxu0 %v12094_v34  ;;  %v4410_v56 = vld [vmem:[#allocation7 + $0xa8c] sm:$0xff] }
 0x2ec   : > { %13084 = vmatprep.subr.bf16.mxu1 %v11908_v51  ;;  %5522 = vmatprep.subr.bf16.mxu0 %v12099_v28  ;;  %v4412_v34 = vld [vmem:[#allocation7 + $0xaec] sm:$0xff]  ;;  %v11922_v51 = vcombine.low %v3109_v24, %v3111_v42 }
 0x2ed   : > { %v12123_v28 = vcombine.high %v4410_v56, %v4412_v34  ;;  %v3135_v30 = vld [vmem:[#allocation7 + $0x510] sm:$0xff] }
 0x2ee   : > { %v4430_v33 = vld [vmem:[#allocation7 + $0xe4c] sm:$0xff]  ;;  %v11940_v44 = vcombine.low %v3133_v50, %v3135_v30 }
 0x2ef   : > { %13085 = vmatpush3.bf16.msra.mxu1 %v11884_v1  ;;  %5523 = vmatpush1.bf16.msra.mxu0 %v12098_v31  ;;  %v11925_v1 = vcombine.low %v3113_v52, %v3115_v54  ;;  %v12122_v31 = vcombine.low %v4410_v56, %v4412_v34  ;;  %v4432_v36 = vld [vmem:[#allocation7 + $0xeac] sm:$0xff] }
 0x2f0   : > { %13086 = vmatprep.subr.bf16.mxu1 %v11911_v2  ;;  %5524 = vmatprep.subr.bf16.mxu0 %v12103_v6  ;;  %v11929_v2 = vcombine.high %v3117_v62, %v3119_v63  ;;  %v3123_v6 = vld [vmem:[#allocation7 + $0x2d0] sm:$0xff]  ;;  %v12143_v18 = vcombine.high %v4430_v33, %v4432_v36  ;;  %v12142_v45 = vcombine.low %v4430_v33, %v4432_v36 }
 0x2f1   : > { %v4434_v24 = vld [vmem:[#allocation7 + $0xf0c] sm:$0xff] }
 0x2f2   : > { %v4436_v42 = vld [vmem:[#allocation7 + $0xf6c] sm:$0xff] }
 0x2f3   : > { %13087 = vmatpush3.bf16.msra.mxu1 %v11887_v12  ;;  %5525 = vmatpush1.bf16.msra.mxu0 %v12102_v13  ;;  %v12131_v12 = vcombine.high %v4418_v7, %v4420_v8  ;;  %v3125_v13 = vld [vmem:[#allocation7 + $0x330] sm:$0xff]  ;;  %v12146_v34 = vcombine.low %v4434_v24, %v4436_v42 }
 0x2f4   : > { %13088 = vmatprep.subr.bf16.mxu1 %v11914_v15  ;;  %5526 = vmatprep.subr.bf16.mxu0 %v12107_v4  ;;  %v3127_v15 = vld [vmem:[#allocation7 + $0x390] sm:$0xff]  ;;  %v11931_v4 = vcombine.low %v3121_v5, %v3123_v6 }
 0x2f5   : > { %v11935_v19 = vcombine.high %v3125_v13, %v3127_v15  ;;  %v4438_v52 = vld [vmem:[#allocation7 + $0xfcc] sm:$0xff] }
 0x2f6   : > { %v4440_v54 = vld [vmem:[#allocation7 + $0x102c] sm:$0xff] }
 0x2f7   : > { %13089 = vmatpush3.bf16.msra.mxu1 %v11890_v43  ;;  %5527 = vmatpush1.bf16.msra.mxu0 %v12106_v22  ;;  %v4426_v43 = vld [vmem:[#allocation7 + $0xd8c] sm:$0xff]  ;;  %v12150_v0 = vcombine.low %v4438_v52, %v4440_v54 }
 0x2f8   : > { %13090 = vmatprep.subr.bf16.mxu1 %v11917_v25  ;;  %5528 = vmatprep.subr.bf16.mxu0 %v12111_v23  ;;  %v4428_v22 = vld [vmem:[#allocation7 + $0xdec] sm:$0xff]  ;;  %v11934_v25 = vcombine.low %v3125_v13, %v3127_v15 }
 0x2f9   : > { %v12139_v23 = vcombine.high %v4426_v43, %v4428_v22  ;;  %v4442_v62 = vld [vmem:[#allocation7 + $0x108c] sm:$0xff] }
 0x2fa   : > { %v4444_v63 = vld [vmem:[#allocation7 + $0x10ec] sm:$0xff] }
 0x2fb   : > { %13091 = vmatpush3.bf16.msra.mxu1 %v11893_v32  ;;  %5529 = vmatpush1.bf16.msra.mxu0 %v12110_v37  ;;  %v11937_v32 = vcombine.low %v3129_v20, %v3131_v21  ;;  %v12138_v37 = vcombine.low %v4426_v43, %v4428_v22  ;;  %v12154_v8 = vcombine.low %v4442_v62, %v4444_v63  ;;  %v4450_v13 = vld [vmem:[#allocation7 + $0x120c] sm:$0xff] }
 0x2fc   : > { %13092 = vmatprep.subr.bf16.mxu1 %v11920_v38  ;;  %5530 = vmatprep.subr.bf16.mxu0 %v12115_v60  ;;  %v11941_v38 = vcombine.high %v3133_v50, %v3135_v30  ;;  %v3139_v60 = vld [vmem:[#allocation7 + $0x5d0] sm:$0xff] }
 0x2fd   : > { %v11943_v56 = vcombine.low %v3137_v39, %v3139_v60  ;;  %v4452_v15 = vld [vmem:[#allocation7 + $0x126c] sm:$0xff] }
 0x2fe   : > { %v4454_v20 = vld [vmem:[#allocation7 + $0x12cc] sm:$0xff]  ;;  %v12162_v22 = vcombine.low %v4450_v13, %v4452_v15 }
 0x2ff   : > { %13093 = vmatpush3.bf16.msra.mxu1 %v11896_v46  ;;  %5531 = vmatpush1.bf16.msra.mxu0 %v12114_v47  ;;  %v11944_v46 = vcombine.high %v3137_v39, %v3139_v60  ;;  %v12147_v47 = vcombine.high %v4434_v24, %v4436_v42  ;;  %v4456_v21 = vld [vmem:[#allocation7 + $0x132c] sm:$0xff] }
 0x300   : > { %4069 = vmatprep.subr.bf16.mxu1 %v11923_v48  ;;  %5532 = vmatprep.subr.bf16.mxu0 %v12119_v49  ;;  %v3141_v48 = vld [vmem:[#allocation7 + $0x630] sm:$0xff]  ;;  %v12166_v36 = vcombine.low %v4454_v20, %v4456_v21 }
 0x301   : > { %v3143_v49 = vld [vmem:[#allocation7 + $0x690] sm:$0xff] }
 0x302   : > { %3078 = vmatmul.mubr.bf16.vlgmr.msra.gmra.mrb[24].mxu1 %v14661_v35  ;;  %v11932_v35 = vcombine.high %v3121_v5, %v3123_v6  ;;  %v11946_v29 = vcombine.low %v3141_v48, %v3143_v49  ;;  %v4446_v5 = vld [vmem:[#allocation7 + $0x114c] sm:$0xff] }
 0x303   : > { %4070 = vmatpush1.bf16.msra.mxu1 %v11922_v51  ;;  %5533 = vmatpush1.bf16.msra.mxu0 %v12118_v59  ;;  %v11947_v51 = vcombine.high %v3141_v48, %v3143_v49  ;;  %v12151_v59 = vcombine.high %v4438_v52, %v4440_v54  ;;  %v4448_v6 = vld [vmem:[#allocation7 + $0x11ac] sm:$0xff] }
 0x304   : > { %4071 = vmatprep.subr.bf16.mxu1 %v11926_v61  ;;  %5534 = vmatprep.subr.bf16.mxu0 %v12123_v28  ;;  %v3145_v61 = vld [vmem:[#allocation7 + $0x6f0] sm:$0xff] }
 0x305   : > { %4101 = vmatprep.mubr.bf16.mxu1 %v14674_v53  ;;  %v12135_v53 = vcombine.high %v4422_v16, %v4424_v17  ;;  %v3147_v28 = vld [vmem:[#allocation7 + $0x750] sm:$0xff]  ;;  %v12158_v17 = vcombine.low %v4446_v5, %v4448_v6 }
 0x306   : > { %v11949_v7 = vcombine.low %v3145_v61, %v3147_v28  ;;  %v4458_v50 = vld [vmem:[#allocation7 + $0x138c] sm:$0xff] }
 0x307   : > { %4072 = vmatpush1.bf16.msra.mxu1 %v11925_v1  ;;  %5535 = vmatpush1.bf16.msra.mxu0 %v12122_v31  ;;  %v11950_v1 = vcombine.high %v3145_v61, %v3147_v28  ;;  %v12155_v31 = vcombine.high %v4442_v62, %v4444_v63  ;;  %v4460_v30 = vld [vmem:[#allocation7 + $0x13ec] sm:$0xff] }
 0x308   : > { %4073 = vmatprep.subr.bf16.mxu1 %v11929_v2  ;;  %5536 = vmatprep.subr.bf16.mxu0 %v12127_v3  ;;  %v3149_v2 = vld [vmem:[#allocation7 + $0x7b0] sm:$0xff]  ;;  %v12170_v42 = vcombine.low %v4458_v50, %v4460_v30 }
 0x309   : > { %v3151_v3 = vld [vmem:[#allocation7 + $0x810] sm:$0xff] }
 0x30a   : > { %v11952_v16 = vcombine.low %v3149_v2, %v3151_v3  ;;  %v4462_v39 = vld [vmem:[#allocation7 + $0x144c] sm:$0xff] }
 0x30b   : > { %4074 = vmatpush1.bf16.msra.mxu1 %v11928_v9  ;;  %5537 = vmatpush1.bf16.msra.mxu0 %v12126_v11  ;;  %v11953_v9 = vcombine.high %v3149_v2, %v3151_v3  ;;  %v12159_v11 = vcombine.high %v4446_v5, %v4448_v6  ;;  %v4464_v60 = vld [vmem:[#allocation7 + $0x14ac] sm:$0xff] }
 0x30c   : > { %4075 = vmatprep.subr.bf16.mxu1 %v11932_v35  ;;  %5549 = vmatprep.subr.bf16.mxu0 %v12131_v12  ;;  %v3153_v35 = vld [vmem:[#allocation7 + $0x870] sm:$0xff]  ;;  %v12174_v54 = vcombine.low %v4462_v39, %v4464_v60 }
 0x30d   : > { %v3155_v12 = vld [vmem:[#allocation7 + $0x8d0] sm:$0xff] }
 0x30e   : > { %5539 = vmatmul.mubr.bf16.vlgmr.msra.gmra.mrb[28].mxu0 %v14680_v14  ;;  %v11955_v43 = vcombine.low %v3153_v35, %v3155_v12  ;;  %v4466_v48 = vld [vmem:[#allocation7 + $0x150c] sm:$0xff] }
 0x30f   : > { %4076 = vmatpush1.bf16.msra.mxu1 %v11931_v4  ;;  %5550 = vmatpush1.bf16.msra.mxu0 %v12130_v40  ;;  %v11956_v4 = vcombine.high %v3153_v35, %v3155_v12  ;;  %v12163_v40 = vcombine.high %v4450_v13, %v4452_v15  ;;  %v4468_v49 = vld [vmem:[#allocation7 + $0x156c] sm:$0xff] }
 0x310   : > { %4077 = vmatprep.subr.bf16.mxu1 %v11935_v19  ;;  %5551 = vmatprep.subr.bf16.mxu0 %v12135_v53  ;;  %v3157_v19 = vld [vmem:[#allocation7 + $0x930] sm:$0xff]  ;;  %v12178_v63 = vcombine.low %v4466_v48, %v4468_v49 }
 0x311   : > { %5581 = vmatprep.mubr.bf16.mxu0 %v14684_v26  ;;  %v3159_v53 = vld [vmem:[#allocation7 + $0x990] sm:$0xff] }
 0x312   : > { %v11958_v33 = vcombine.low %v3157_v19, %v3159_v53  ;;  %v4470_v61 = vld [vmem:[#allocation7 + $0x15cc] sm:$0xff] }
 0x313   : > { %4078 = vmatpush1.bf16.msra.mxu1 %v11934_v25  ;;  %5552 = vmatpush1.bf16.msra.mxu0 %v12134_v58  ;;  %v11959_v25 = vcombine.high %v3157_v19, %v3159_v53  ;;  %v12167_v58 = vcombine.high %v4454_v20, %v4456_v21  ;;  %v4472_v28 = vld [vmem:[#allocation7 + $0x162c] sm:$0xff] }
 0x314   : > { %4079 = vmatprep.subr.bf16.mxu1 %v11938_v27  ;;  %5553 = vmatprep.subr.bf16.mxu0 %v12139_v23  ;;  %v3161_v27 = vld [vmem:[#allocation7 + $0x9f0] sm:$0xff]  ;;  %v12182_v6 = vcombine.low %v4470_v61, %v4472_v28 }
 0x315   : > { %v3163_v23 = vld [vmem:[#allocation7 + $0xa50] sm:$0xff] }
 0x316   : > { %v11961_v24 = vcombine.low %v3161_v27, %v3163_v23  ;;  %v4474_v2 = vld [vmem:[#allocation7 + $0x168c] sm:$0xff] }
 0x317   : > { %4080 = vmatpush1.bf16.msra.mxu1 %v11937_v32  ;;  %5554 = vmatpush1.bf16.msra.mxu0 %v12138_v37  ;;  %v11962_v32 = vcombine.high %v3161_v27, %v3163_v23  ;;  %v12171_v37 = vcombine.high %v4458_v50, %v4460_v30  ;;  %v4476_v3 = vld [vmem:[#allocation7 + $0x16ec] sm:$0xff] }
 0x318   : > { %4081 = vmatprep.subr.bf16.mxu1 %v11941_v38  ;;  %5555 = vmatprep.subr.bf16.mxu0 %v12143_v18  ;;  %v3165_v38 = vld [vmem:[#allocation7 + $0xab0] sm:$0xff] }
 0x319   : > { %v3167_v18 = vld [vmem:[#allocation7 + $0xb10] sm:$0xff] }
 0x31a   : > { %v11964_v52 = vcombine.low %v3165_v38, %v3167_v18  ;;  %v4478_v35 = vld [vmem:[#allocation7 + $0x174c] sm:$0xff] }
 0x31b   : > { %4082 = vmatpush1.bf16.msra.mxu1 %v11940_v44  ;;  %5556 = vmatpush1.bf16.msra.mxu0 %v12142_v45  ;;  %v11965_v44 = vcombine.high %v3165_v38, %v3167_v18  ;;  %v12175_v45 = vcombine.high %v4462_v39, %v4464_v60  ;;  %v4480_v12 = vld [vmem:[#allocation7 + $0x17ac] sm:$0xff] }
 0x31c   : > { %4083 = vmatprep.subr.bf16.mxu1 %v11944_v46  ;;  %5557 = vmatprep.subr.bf16.mxu0 %v12147_v47  ;;  %v3169_v46 = vld [vmem:[#allocation7 + $0xb70] sm:$0xff]  ;;  %v12191_v53 = vcombine.high %v4478_v35, %v4480_v12  ;;  %v12190_v27 = vcombine.low %v4478_v35, %v4480_v12 }
 0x31d   : > { %v3171_v47 = vld [vmem:[#allocation7 + $0xbd0] sm:$0xff] }
 0x31e   : > { %v11967_v62 = vcombine.low %v3169_v46, %v3171_v47  ;;  %v3185_v20 = vld [vmem:[#allocation7 + $0xe70] sm:$0xff] }
 0x31f   : > { %4084 = vmatpush1.bf16.msra.mxu1 %v11943_v56  ;;  %5558 = vmatpush1.bf16.msra.mxu0 %v12146_v34  ;;  %v11968_v56 = vcombine.high %v3169_v46, %v3171_v47  ;;  %v12179_v34 = vcombine.high %v4466_v48, %v4468_v49  ;;  %v3187_v21 = vld [vmem:[#allocation7 + $0xed0] sm:$0xff] }
 0x320   : > { %4085 = vmatprep.subr.bf16.mxu1 %v11947_v51  ;;  %5559 = vmatprep.subr.bf16.mxu0 %v12151_v59  ;;  %v3173_v51 = vld [vmem:[#allocation7 + $0xc30] sm:$0xff]  ;;  %v11980_v23 = vcombine.high %v3185_v20, %v3187_v21  ;;  %v11979_v39 = vcombine.low %v3185_v20, %v3187_v21 }
 0x321   : > { %v3175_v59 = vld [vmem:[#allocation7 + $0xc90] sm:$0xff] }
 0x322   : > { %v11970_v5 = vcombine.low %v3173_v51, %v3175_v59  ;;  %v4486_v38 = vld [vmem:[#allocation7 + $0x18cc] sm:$0xff] }
 0x323   : > { %4086 = vmatpush1.bf16.msra.mxu1 %v11946_v29  ;;  %5560 = vmatpush1.bf16.msra.mxu0 %v12150_v0  ;;  %v11971_v29 = vcombine.high %v3173_v51, %v3175_v59  ;;  %v12183_v0 = vcombine.high %v4470_v61, %v4472_v28  ;;  %v4488_v18 = vld [vmem:[#allocation7 + $0x192c] sm:$0xff] }
 0x324   : > { %4087 = vmatprep.subr.bf16.mxu1 %v11950_v1  ;;  %5561 = vmatprep.subr.bf16.mxu0 %v12155_v31  ;;  %v3177_v1 = vld [vmem:[#allocation7 + $0xcf0] sm:$0xff]  ;;  %v12198_v49 = vcombine.low %v4486_v38, %v4488_v18 }
 0x325   : > { %v3179_v31 = vld [vmem:[#allocation7 + $0xd50] sm:$0xff] }
 0x326   : > { %v4490_v46 = vld [vmem:[#allocation7 + $0x198c] sm:$0xff] }
 0x327   : > { %4088 = vmatpush1.bf16.msra.mxu1 %v11949_v7  ;;  %5562 = vmatpush1.bf16.msra.mxu0 %v12154_v8  ;;  %v11974_v7 = vcombine.high %v3177_v1, %v3179_v31  ;;  %v12187_v8 = vcombine.high %v4474_v2, %v4476_v3  ;;  %v4492_v47 = vld [vmem:[#allocation7 + $0x19ec] sm:$0xff] }
 0x328   : > { %4089 = vmatprep.subr.bf16.mxu1 %v11953_v9  ;;  %5563 = vmatprep.subr.bf16.mxu0 %v12159_v11  ;;  %v3181_v9 = vld [vmem:[#allocation7 + $0xdb0] sm:$0xff]  ;;  %v12202_v28 = vcombine.low %v4490_v46, %v4492_v47 }
 0x329   : > { %v3183_v11 = vld [vmem:[#allocation7 + $0xe10] sm:$0xff] }
 0x32a   : > { %v11977_v19 = vcombine.high %v3181_v9, %v3183_v11  ;;  %v4494_v51 = vld [vmem:[#allocation7 + $0x1a4c] sm:$0xff] }
 0x32b   : > { %4090 = vmatpush1.bf16.msra.mxu1 %v11952_v16  ;;  %5564 = vmatpush1.bf16.msra.mxu0 %v12158_v17  ;;  %v11973_v16 = vcombine.low %v3177_v1, %v3179_v31  ;;  %v12186_v17 = vcombine.low %v4474_v2, %v4476_v3  ;;  %v4496_v59 = vld [vmem:[#allocation7 + $0x1aac] sm:$0xff] }
 0x32c   : > { %4091 = vmatprep.subr.bf16.mxu1 %v11956_v4  ;;  %5565 = vmatprep.subr.bf16.mxu0 %v12163_v40  ;;  %v4500_v1 = vld [vmem:[#allocation7 + $0x1b6c] sm:$0xff]  ;;  %v12206_v2 = vcombine.low %v4494_v51, %v4496_v59 }
 0x32d   : > { %v3213_v20 = vld [vmem:[#allocation7 + $0x13b0] sm:$0xff] }
 0x32e   : > { %v3215_v21 = vld [vmem:[#allocation7 + $0x1410] sm:$0xff] }
 0x32f   : > { %4092 = vmatpush1.bf16.msra.mxu1 %v11955_v43  ;;  %5566 = vmatpush1.bf16.msra.mxu0 %v12162_v22  ;;  %v4482_v22 = vld [vmem:[#allocation7 + $0x180c] sm:$0xff] }
 0x330   : > { %4093 = vmatprep.subr.bf16.mxu1 %v11959_v25  ;;  %5567 = vmatprep.subr.bf16.mxu0 %v12167_v58  ;;  %v4484_v25 = vld [vmem:[#allocation7 + $0x186c] sm:$0xff] }
 0x331   : > { %v12194_v60 = vcombine.low %v4482_v22, %v4484_v25 }
 0x333   : > { %4094 = vmatpush1.bf16.msra.mxu1 %v11958_v33  ;;  %5568 = vmatpush1.bf16.msra.mxu0 %v12166_v36  ;;  %v12195_v33 = vcombine.high %v4482_v22, %v4484_v25  ;;  %v3189_v36 = vld [vmem:[#allocation7 + $0xf30] sm:$0xff] }
 0x334   : > { %4095 = vmatprep.subr.bf16.mxu1 %v11962_v32  ;;  %5569 = vmatprep.subr.bf16.mxu0 %v12171_v37  ;;  %v4512_v22 = vld [vmem:[#allocation7 + $0x1dac] sm:$0xff] }
 0x337   : > { %4096 = vmatpush1.bf16.msra.mxu1 %v11961_v24  ;;  %5570 = vmatpush1.bf16.msra.mxu0 %v12170_v42  ;;  %v12199_v42 = vcombine.high %v4486_v38, %v4488_v18 }
 0x338   : > { %4097 = vmatprep.subr.bf16.mxu1 %v11965_v44  ;;  %5571 = vmatprep.subr.bf16.mxu0 %v12175_v45  ;;  %v3193_v44 = vld [vmem:[#allocation7 + $0xff0] sm:$0xff] }
 0x339   : > { %v3195_v45 = vld [vmem:[#allocation7 + $0x1050] sm:$0xff] }
 0x33a   : > { %v11985_v61 = vcombine.low %v3193_v44, %v3195_v45 }
 0x33b   : > { %4098 = vmatpush1.bf16.msra.mxu1 %v11964_v52  ;;  %5572 = vmatpush1.bf16.msra.mxu0 %v12174_v54  ;;  %v11986_v52 = vcombine.high %v3193_v44, %v3195_v45  ;;  %v12203_v54 = vcombine.high %v4490_v46, %v4492_v47 }
 0x33c   : > { %4099 = vmatprep.subr.bf16.mxu1 %v11968_v56  ;;  %5573 = vmatprep.subr.bf16.mxu0 %v12179_v34  ;;  %v3197_v56 = vld [vmem:[#allocation7 + $0x10b0] sm:$0xff] }
 0x33d   : > { %v3199_v34 = vld [vmem:[#allocation7 + $0x1110] sm:$0xff] }
 0x33e   : > { %v11988_v31 = vcombine.low %v3197_v56, %v3199_v34 }
 0x33f   : > { %4100 = vmatpush1.bf16.msra.mxu1 %v11967_v62  ;;  %5574 = vmatpush1.bf16.msra.mxu0 %v12178_v63  ;;  %v12207_v62 = vcombine.high %v4494_v51, %v4496_v59  ;;  %v3201_v63 = vld [vmem:[#allocation7 + $0x1170] sm:$0xff] }
 0x340   : > { %4112 = vmatprep.subr.bf16.mxu1 %v11971_v29  ;;  %5575 = vmatprep.subr.bf16.mxu0 %v12183_v0  ;;  %v3203_v29 = vld [vmem:[#allocation7 + $0x11d0] sm:$0xff] }
 0x341   : > { %v2954_v13 = vpop.f32.mrb[12].mxu0  ;;  %v4498_v0 = vld [vmem:[#allocation7 + $0x1b0c] sm:$0xff]  ;;  %v11992_v3 = vcombine.high %v3201_v63, %v3203_v29 }
 0x342   : > { %4102 = vmatmul.mubr.bf16.vlgmr.msra.gmra.mrb[28].mxu1 %v14680_v14  ;;  %v2956_v15 = vpop.f32.mrb[13].mxu0  ;;  %v11976_v14 = vcombine.low %v3181_v9, %v3183_v11  ;;  %v11991_v9 = vcombine.low %v3201_v63, %v3203_v29  ;;  %v12210_v11 = vcombine.low %v4498_v0, %v4500_v1  ;;  %v1749_v63 = vld [vmem:[#allocation13 + $0x7] sm:$0x1] }
 0x343   : > { %4113 = vmatpush1.bf16.msra.mxu1 %v11970_v5  ;;  %5576 = vmatpush1.bf16.msra.mxu0 %v12182_v6  ;;  %v3086_v4 = vrot.slane %v2956_v15, 1  ;;  %v2958_v40 = vpop.f32.mrb[14].mxu0  ;;  %v3205_v5 = vld [vmem:[#allocation7 + $0x1230] sm:$0xff] }
 0x344   : > { %4114 = vmatprep.subr.bf16.mxu1 %v11974_v7  ;;  %5577 = vmatprep.subr.bf16.mxu0 %v12187_v8  ;;  %v2960_v43 = vpop.f32.mrb[15].mxu0  ;;  %v3207_v6 = vld [vmem:[#allocation7 + $0x1290] sm:$0xff] }
 0x345   : > { %4144 = vmatprep.mubr.bf16.mxu1 %v14684_v26  ;;  %v3087_v58 = vrot.slane %v2960_v43, 1  ;;  %v3191_v26 = vld [vmem:[#allocation7 + $0xf90] sm:$0xff]  ;;  %v11995_v35 = vcombine.high %v3205_v5, %v3207_v6 }
 0x346   : > { %v11983_v24 = vcombine.high %v3189_v36, %v3191_v26  ;;  %v11982_v48 = vcombine.low %v3189_v36, %v3191_v26  ;;  %v4502_v7 = vld [vmem:[#allocation7 + $0x1bcc] sm:$0xff]  ;;  %v12000_v36 = vcombine.low %v3213_v20, %v3215_v21 }
 0x347   : > { %4115 = vmatpush1.bf16.msra.mxu1 %v11973_v16  ;;  %5578 = vmatpush1.bf16.msra.mxu0 %v12186_v17  ;;  %v3088_v50 = vsel %vm1699_vm1, %v3086_v4, %v3087_v58  ;;  %v3089_v30 = vsel %vm1699_vm1, %v3087_v58, %v3086_v4  ;;  %v4504_v8 = vld [vmem:[#allocation7 + $0x1c2c] sm:$0xff]  ;;  %v11994_v4 = vcombine.low %v3205_v5, %v3207_v6 }
 0x348   : > { %4116 = vmatprep.subr.bf16.mxu1 %v11977_v19  ;;  %5579 = vmatprep.subr.bf16.mxu0 %v12191_v53  ;;  %v14707_v32 = vadd.f32 %v3088_v50, %v2954_v13  ;;  %v14709_v37 = vadd.f32 %v3089_v30, %v2958_v40  ;;  %v12215_v12 = vcombine.high %v4502_v7, %v4504_v8  ;;  %v3209_v13 = vld [vmem:[#allocation7 + $0x12f0] sm:$0xff] }
 0x349   : > { %v3211_v15 = vld [vmem:[#allocation7 + $0x1350] sm:$0xff]  ;;  %v12214_v40 = vcombine.low %v4502_v7, %v4504_v8 }
 0x34a   : > { %v4506_v16 = vld [vmem:[#allocation7 + $0x1c8c] sm:$0xff]  ;;  %v11998_v19 = vcombine.high %v3209_v13, %v3211_v15  ;;  %v11997_v25 = vcombine.low %v3209_v13, %v3211_v15 }
 0x34b   : > { %4117 = vmatpush1.bf16.msra.mxu1 %v11976_v14  ;;  %5580 = vmatpush1.bf16.msra.mxu0 %v12190_v27  ;;  %v4508_v17 = vld [vmem:[#allocation7 + $0x1cec] sm:$0xff]  ;;  %v12001_v14 = vcombine.high %v3213_v20, %v3215_v21 }
 0x34c   : > { %4118 = vmatprep.subr.bf16.mxu1 %v11980_v23  ;;  %5592 = vmatprep.subr.bf16.mxu0 %v12195_v33  ;;  %v12219_v53 = vcombine.high %v4506_v16, %v4508_v17  ;;  %v4510_v43 = vld [vmem:[#allocation7 + $0x1d4c] sm:$0xff]  ;;  %v12218_v58 = vcombine.low %v4506_v16, %v4508_v17 }
 0x34d   : > { %v12223_v27 = vcombine.high %v4510_v43, %v4512_v22  ;;  %v3217_v23 = vld [vmem:[#allocation7 + $0x1470] sm:$0xff]  ;;  %v12222_v26 = vcombine.low %v4510_v43, %v4512_v22 }
 0x34e   : > { %5582 = vmatmul.mubr.bf16.vlgmr.msra.gmra.mrb[28].mxu0 %v14690_v41  ;;  %v11989_v41 = vcombine.high %v3197_v56, %v3199_v34  ;;  %v3219_v50 = vld [vmem:[#allocation7 + $0x14d0] sm:$0xff] }
 0x34f   : > { %4119 = vmatpush1.bf16.msra.mxu1 %v11979_v39  ;;  %5593 = vmatpush1.bf16.msra.mxu0 %v12194_v60  ;;  %v4514_v30 = vld [vmem:[#allocation7 + $0x1e0c] sm:$0xff]  ;;  %v12004_v38 = vcombine.high %v3217_v23, %v3219_v50  ;;  %v12003_v44 = vcombine.low %v3217_v23, %v3219_v50 }
 0x350   : > { %4120 = vmatprep.subr.bf16.mxu1 %v11983_v24  ;;  %5594 = vmatprep.subr.bf16.mxu0 %v12199_v42  ;;  %v4516_v33 = vld [vmem:[#allocation7 + $0x1e6c] sm:$0xff] }
 0x351   : > { %5624 = vmatprep.mubr.bf16.mxu0 %v14694_v55  ;;  %v12211_v55 = vcombine.high %v4498_v0, %v4500_v1  ;;  %v12227_v18 = vcombine.high %v4514_v30, %v4516_v33  ;;  %v3221_v39 = vld [vmem:[#allocation7 + $0x1530] sm:$0xff]  ;;  %v12226_v45 = vcombine.low %v4514_v30, %v4516_v33  ;;  %v9194_v1 = vld [vmem:[#allocation13 + $0x5] sm:$0x1] }
 0x352   : > { %v3223_v60 = vld [vmem:[#allocation7 + $0x1590] sm:$0xff] }
 0x353   : > { %4121 = vmatpush1.bf16.msra.mxu1 %v11982_v48  ;;  %5595 = vmatpush1.bf16.msra.mxu0 %v12198_v49  ;;  %v4518_v24 = vld [vmem:[#allocation7 + $0x1ecc] sm:$0xff]  ;;  %v12007_v46 = vcombine.high %v3221_v39, %v3223_v60  ;;  %v12006_v56 = vcombine.low %v3221_v39, %v3223_v60 }
 0x354   : > { %4122 = vmatprep.subr.bf16.mxu1 %v11986_v52  ;;  %5596 = vmatprep.subr.bf16.mxu0 %v12203_v54  ;;  %v4520_v42 = vld [vmem:[#allocation7 + $0x1f2c] sm:$0xff] }
 0x355   : > { %v12231_v47 = vcombine.high %v4518_v24, %v4520_v42  ;;  %v3225_v48 = vld [vmem:[#allocation7 + $0x15f0] sm:$0xff]  ;;  %v12230_v34 = vcombine.low %v4518_v24, %v4520_v42 }
 0x356   : > { %v3227_v49 = vld [vmem:[#allocation7 + $0x1650] sm:$0xff] }
 0x357   : > { %4123 = vmatpush1.bf16.msra.mxu1 %v11985_v61  ;;  %5597 = vmatpush1.bf16.msra.mxu0 %v12202_v28  ;;  %v4522_v52 = vld [vmem:[#allocation7 + $0x1f8c] sm:$0xff]  ;;  %v12010_v51 = vcombine.high %v3225_v48, %v3227_v49  ;;  %v12009_v29 = vcombine.low %v3225_v48, %v3227_v49  ;;  %v5794_v49 = vld [vmem:[#allocation7 + $0x3c] sm:$0xff] }
 0x358   : > { %4124 = vmatprep.subr.bf16.mxu1 %v11989_v41  ;;  %5598 = vmatprep.subr.bf16.mxu0 %v12207_v62  ;;  %v4524_v54 = vld [vmem:[#allocation7 + $0x1fec] sm:$0xff] }
 0x359   : > { %v12235_v59 = vcombine.high %v4522_v52, %v4524_v54  ;;  %v3229_v61 = vld [vmem:[#allocation7 + $0x16b0] sm:$0xff]  ;;  %v12234_v0 = vcombine.low %v4522_v52, %v4524_v54  ;;  %v5796_v52 = vld [vmem:[#allocation7 + $0x9c] sm:$0xff] }
 0x35a   : > { %v3231_v28 = vld [vmem:[#allocation7 + $0x1710] sm:$0xff] }
 0x35b   : > { %4125 = vmatpush1.bf16.msra.mxu1 %v11988_v31  ;;  %5599 = vmatpush1.bf16.msra.mxu0 %v12206_v2  ;;  %v4526_v41 = vld [vmem:[#allocation7 + $0x204c] sm:$0xff]  ;;  %v12013_v31 = vcombine.high %v3229_v61, %v3231_v28 }
 0x35c   : > { %4126 = vmatprep.subr.bf16.mxu1 %v11992_v3  ;;  %5600 = vmatprep.subr.bf16.mxu0 %v12211_v55  ;;  %v4528_v62 = vld [vmem:[#allocation7 + $0x20ac] sm:$0xff] }
 0x35d   : > { %v12239_v2 = vcombine.high %v4526_v41, %v4528_v62  ;;  %v3233_v3 = vld [vmem:[#allocation7 + $0x1770] sm:$0xff]  ;;  %v12238_v13 = vcombine.low %v4526_v41, %v4528_v62  ;;  %v5798_v41 = vld [vmem:[#allocation7 + $0xfc] sm:$0xff] }
 0x35e   : > { %v3235_v5 = vld [vmem:[#allocation7 + $0x17d0] sm:$0xff]  ;;  %v5800_v62 = vld [vmem:[#allocation7 + $0x15c] sm:$0xff] }
 0x35f   : > { %4127 = vmatpush1.bf16.msra.mxu1 %v11991_v9  ;;  %5601 = vmatpush1.bf16.msra.mxu0 %v12210_v11  ;;  %v4530_v6 = vld [vmem:[#allocation7 + $0x210c] sm:$0xff]  ;;  %v14716_v9 = vsub.s32 0, %v14645_v10  ;;  %v12016_v17 = vcombine.high %v3233_v3, %v3235_v5  ;;  %v12015_v43 = vcombine.low %v3233_v3, %v3235_v5  ;;  %v5802_v3 = vld [vmem:[#allocation7 + $0x1bc] sm:$0xff] }
 0x360   : > { %4128 = vmatprep.subr.bf16.mxu1 %v11995_v35  ;;  %5602 = vmatprep.subr.bf16.mxu0 %v12215_v12  ;;  %v4532_v7 = vld [vmem:[#allocation7 + $0x216c] sm:$0xff]  ;;  %v12012_v12 = vcombine.low %v3229_v61, %v3231_v28 }
 0x361   : > { %v4536_v20 = vld [vmem:[#allocation7 + $0x222c] sm:$0xff]  ;;  %v12242_v22 = vcombine.low %v4530_v6, %v4532_v7 }
 0x362   : > { %v4538_v23 = vld [vmem:[#allocation7 + $0x228c] sm:$0xff] }
 0x363   : > { %4129 = vmatpush1.bf16.msra.mxu1 %v11994_v4  ;;  %5603 = vmatpush1.bf16.msra.mxu0 %v12214_v40  ;;  %v12243_v4 = vcombine.high %v4530_v6, %v4532_v7  ;;  %v3237_v40 = vld [vmem:[#allocation7 + $0x1830] sm:$0xff]  ;;  %v12263_v7 = vcombine.low %v5798_v41, %v5800_v62 }
 0x364   : > { %4130 = vmatprep.subr.bf16.mxu1 %v11998_v19  ;;  %5604 = vmatprep.subr.bf16.mxu0 %v12219_v53  ;;  %v3239_v19 = vld [vmem:[#allocation7 + $0x1890] sm:$0xff] }
 0x365   : > { %v4534_v53 = vld [vmem:[#allocation7 + $0x21cc] sm:$0xff]  ;;  %v12018_v30 = vcombine.low %v3237_v40, %v3239_v19 }
 0x366   : > { %v4540_v50 = vld [vmem:[#allocation7 + $0x22ec] sm:$0xff]  ;;  %v12246_v33 = vcombine.low %v4534_v53, %v4536_v20 }
 0x367   : > { %4131 = vmatpush1.bf16.msra.mxu1 %v11997_v25  ;;  %5605 = vmatpush1.bf16.msra.mxu0 %v12218_v58  ;;  %v12019_v25 = vcombine.high %v3237_v40, %v3239_v19  ;;  %v12247_v58 = vcombine.high %v4534_v53, %v4536_v20  ;;  %v4542_v39 = vld [vmem:[#allocation7 + $0x234c] sm:$0xff] }
 0x368   : > { %4132 = vmatprep.subr.bf16.mxu1 %v12001_v14  ;;  %5606 = vmatprep.subr.bf16.mxu0 %v12223_v27  ;;  %v3241_v14 = vld [vmem:[#allocation7 + $0x18f0] sm:$0xff] }
 0x369   : > { %v3243_v27 = vld [vmem:[#allocation7 + $0x1950] sm:$0xff] }
 0x36a   : > { %v4544_v60 = vld [vmem:[#allocation7 + $0x23ac] sm:$0xff]  ;;  %v12021_v42 = vcombine.low %v3241_v14, %v3243_v27 }
 0x36b   : > { %4133 = vmatpush1.bf16.msra.mxu1 %v12000_v36  ;;  %5607 = vmatpush1.bf16.msra.mxu0 %v12222_v26  ;;  %v12022_v36 = vcombine.high %v3241_v14, %v3243_v27  ;;  %v12251_v26 = vcombine.high %v4538_v23, %v4540_v50  ;;  %v14723_v24 = vld [vmem:[%s14553_s13 + $0x8] ss:$24 sps:$4 sm:$0xff]   ;;  %v14727_v54 = vld [vmem:[%s14553_s13 + $0x14] ss:$24 sps:$4 sm:$0xff]  }
 0x36c   : > { %4134 = vmatprep.subr.bf16.mxu1 %v12004_v38  ;;  %5608 = vmatprep.subr.bf16.mxu0 %v12227_v18  ;;  %v3245_v38 = vld [vmem:[#allocation7 + $0x19b0] sm:$0xff] }
 0x36d   : > { %v3247_v18 = vld [vmem:[#allocation7 + $0x1a10] sm:$0xff] }
 0x36e   : > { %v3251_v48 = vld [vmem:[#allocation7 + $0x1ad0] sm:$0xff] }
 0x36f   : > { %4135 = vmatpush1.bf16.msra.mxu1 %v12003_v44  ;;  %5609 = vmatpush1.bf16.msra.mxu0 %v12226_v45  ;;  %v12250_v44 = vcombine.low %v4538_v23, %v4540_v50  ;;  %v12025_v45 = vcombine.high %v3245_v38, %v3247_v18  ;;  %v3253_v61 = vld [vmem:[#allocation7 + $0x1b30] sm:$0xff] }
 0x370   : > { %4136 = vmatprep.subr.bf16.mxu1 %v12007_v46  ;;  %5610 = vmatprep.subr.bf16.mxu0 %v12231_v47  ;;  %v12255_v46 = vcombine.high %v4542_v39, %v4544_v60  ;;  %v3249_v47 = vld [vmem:[#allocation7 + $0x1a70] sm:$0xff] }
 0x371   : > { %v3255_v28 = vld [vmem:[#allocation7 + $0x1b90] sm:$0xff] }
 0x372   : > { %v14731_v5 = vld [vmem:[%s14553_s13 + $0x10] ss:$24 sps:$4 sm:$0xff]   ;;  %v12030_v6 = vcombine.low %v3253_v61, %v3255_v28 }
 0x373   : > { %4137 = vmatpush1.bf16.msra.mxu1 %v12006_v56  ;;  %5611 = vmatpush1.bf16.msra.mxu0 %v12230_v34  ;;  %v12024_v56 = vcombine.low %v3245_v38, %v3247_v18  ;;  %v12254_v34 = vcombine.low %v4542_v39, %v4544_v60  ;;  %v3265_v20 = vld [vmem:[#allocation7 + $0x1d70] sm:$0xff]  ;;  %v5814_v60 = vld [vmem:[#allocation7 + $0x3fc] sm:$0xff] }
 0x374   : > { %4138 = vmatprep.subr.bf16.mxu1 %v12010_v51  ;;  %5612 = vmatprep.subr.bf16.mxu0 %v12235_v59  ;;  %v12028_v51 = vcombine.high %v3249_v47, %v3251_v48  ;;  %v12260_v59 = vcombine.high %v5794_v49, %v5796_v52  ;;  %v3269_v38 = vld [vmem:[#allocation7 + $0x1e30] sm:$0xff] }
 0x375   : > { %v1832_v55 = vpop.f32.mrb[12].mxu1  ;;  %v3271_v39 = vld [vmem:[#allocation7 + $0x1e90] sm:$0xff] }
 0x376   : > { %v14713_v8 = vadd.f32 %v1832_v55, %v1749_v63  ;;  %v13347_v11 = vpop.f32.mrb[13].mxu1  ;;  %v12027_v63 = vcombine.low %v3249_v47, %v3251_v48  ;;  %v5804_v55 = vld [vmem:[#allocation7 + $0x21c] sm:$0xff]  ;;  %v3273_v48 = vld [vmem:[#allocation7 + $0x1ef0] sm:$0xff] }
 0x377   : > { %4139 = vmatpush1.bf16.msra.mxu1 %v12009_v29  ;;  %v1835_v35 = vpop.f32.mrb[14].mxu1  ;;  %5613 = vmatpush1.bf16.msra.mxu0 %v12234_v0  ;;  %v12259_v29 = vcombine.low %v5794_v49, %v5796_v52  ;;  %v12031_v0 = vcombine.high %v3253_v61, %v3255_v28  ;;  %v12267_v40 = vcombine.low %v5802_v3, %v5804_v55  ;;  %v3275_v49 = vld [vmem:[#allocation7 + $0x1f50] sm:$0xff]  ;;  %v5818_v52 = vld [vmem:[#allocation7 + $0x4bc] sm:$0xff] }
 0x378   : > { %v9195_v15 = vadd.f32 %v9194_v1, %v14713_v8  ;;  %v13348_v16 = vpop.f32.mrb[15].mxu1  ;;  %4140 = vmatprep.subr.bf16.mxu1 %v12013_v31  ;;  %5614 = vmatprep.subr.bf16.mxu0 %v12239_v2  ;;  %v12264_v1 = vcombine.high %v5798_v41, %v5800_v62  ;;  %v3257_v31 = vld [vmem:[#allocation7 + $0x1bf0] sm:$0xff]  ;;  %v12268_v35 = vcombine.high %v5802_v3, %v5804_v55  ;;  %v5822_v62 = vld [vmem:[#allocation7 + $0x57c] sm:$0xff] }
 0x379   : > { %v3259_v2 = vld [vmem:[#allocation7 + $0x1c50] sm:$0xff]  ;;  %v5808_v16 = vld [vmem:[#allocation7 + $0x2dc] sm:$0xff] }
 0x37a   : > { %v14720_v21 = vrot.slane %v9195_v15, %v14716_v9  ;;  %v12034_v11 = vcombine.high %v3257_v31, %v3259_v2  ;;  %v5806_v15 = vld [vmem:[#allocation7 + $0x27c] sm:$0xff]  ;;  %v3277_v28 = vld [vmem:[#allocation7 + $0x1fb0] sm:$0xff] }
 0x37b   : > { %4141 = vmatpush1.bf16.msra.mxu1 %v12012_v12  ;;  %5615 = vmatpush1.bf16.msra.mxu0 %v12238_v13  ;;  %v3261_v12 = vld [vmem:[#allocation7 + $0x1cb0] sm:$0xff]  ;;  %v12272_v53 = vcombine.high %v5806_v15, %v5808_v16  ;;  %v5826_v55 = vld [vmem:[#allocation7 + $0x63c] sm:$0xff] }
 0x37c   : > { %4142 = vmatprep.subr.bf16.mxu1 %v12016_v17  ;;  %5616 = vmatprep.subr.bf16.mxu0 %v12243_v4  ;;  %v3263_v13 = vld [vmem:[#allocation7 + $0x1d10] sm:$0xff]  ;;  %v12033_v4 = vcombine.low %v3257_v31, %v3259_v2 }
 0x37d   : > { %v14735_v17 = vld [vmem:[%s14553_s13 + $0x4] ss:$24 sps:$4 sm:$0xff]   ;;  %v12037_v19 = vcombine.high %v3261_v12, %v3263_v13  ;;  %v12036_v50 = vcombine.low %v3261_v12, %v3263_v13 }
 0x37e   : > { %v3279_v41 = vld [vmem:[#allocation7 + $0x2010] sm:$0xff] }
 0x37f   : > { %4143 = vmatpush1.bf16.msra.mxu1 %v12015_v43  ;;  %5617 = vmatpush1.bf16.msra.mxu0 %v12242_v22  ;;  %v3267_v22 = vld [vmem:[#allocation7 + $0x1dd0] sm:$0xff] }
 0x380   : > { %4155 = vmatprep.subr.bf16.mxu1 %v12019_v25  ;;  %5618 = vmatprep.subr.bf16.mxu0 %v12247_v58  ;;  %v5810_v25 = vld [vmem:[#allocation7 + $0x33c] sm:$0xff]  ;;  %v3281_v2 = vld [vmem:[#allocation7 + $0x2070] sm:$0xff] }
 0x381   : > { %v5812_v58 = vld [vmem:[#allocation7 + $0x39c] sm:$0xff]  ;;  %v3283_v3 = vld [vmem:[#allocation7 + $0x20d0] sm:$0xff] }
 0x382   : > { %4145 = vmatmul.mubr.bf16.vlgmr.msra.gmra.mrb[28].mxu1 %v14723_v24  ;;  %v3285_v13 = vld [vmem:[#allocation7 + $0x2130] sm:$0xff] }
 0x383   : > { %4156 = vmatpush1.bf16.msra.mxu1 %v12018_v30  ;;  %5619 = vmatpush1.bf16.msra.mxu0 %v12246_v33  ;;  %v12271_v30 = vcombine.low %v5806_v15, %v5808_v16  ;;  %v3287_v15 = vld [vmem:[#allocation7 + $0x2190] sm:$0xff]  ;;  %v5830_v16 = vld [vmem:[#allocation7 + $0x6fc] sm:$0xff] }
 0x384   : > { %4157 = vmatprep.subr.bf16.mxu1 %v12022_v36  ;;  %5620 = vmatprep.subr.bf16.mxu0 %v12251_v26  ;;  %v12040_v36 = vcombine.high %v3265_v20, %v3267_v22  ;;  %v12276_v26 = vcombine.high %v5810_v25, %v5812_v58 }
 0x385   : > { %4187 = vmatprep.mubr.bf16.mxu1 %v14727_v54 }
 0x387   : > { %4158 = vmatpush1.bf16.msra.mxu1 %v12021_v42  ;;  %5621 = vmatpush1.bf16.msra.mxu0 %v12250_v44  ;;  %v5816_v42 = vld [vmem:[#allocation7 + $0x45c] sm:$0xff]  ;;  %v12039_v44 = vcombine.low %v3265_v20, %v3267_v22  ;;  %v3291_v22 = vld [vmem:[#allocation7 + $0x2250] sm:$0xff] }
 0x388   : > { %4159 = vmatprep.subr.bf16.mxu1 %v12025_v45  ;;  %5622 = vmatprep.subr.bf16.mxu0 %v12255_v46  ;;  %v12275_v45 = vcombine.low %v5810_v25, %v5812_v58  ;;  %v12043_v46 = vcombine.high %v3269_v38, %v3271_v39  ;;  %v12280_v47 = vcombine.high %v5814_v60, %v5816_v42  ;;  %v5834_v25 = vld [vmem:[#allocation7 + $0x7bc] sm:$0xff] }
 0x389   : > { %v5836_v58 = vld [vmem:[#allocation7 + $0x81c] sm:$0xff] }
 0x38b   : > { %4160 = vmatpush1.bf16.msra.mxu1 %v12024_v56  ;;  %5623 = vmatpush1.bf16.msra.mxu0 %v12254_v34  ;;  %v5820_v56 = vld [vmem:[#allocation7 + $0x51c] sm:$0xff]  ;;  %v12042_v34 = vcombine.low %v3269_v38, %v3271_v39 }
 0x38c   : > { %4161 = vmatprep.subr.bf16.mxu1 %v12028_v51  ;;  %6946 = vmatprep.subr.bf16.mxu0 %v12260_v59  ;;  %v12279_v51 = vcombine.low %v5814_v60, %v5816_v42  ;;  %v12046_v59 = vcombine.high %v3273_v48, %v3275_v49  ;;  %v12284_v61 = vcombine.high %v5818_v52, %v5820_v56  ;;  %v5840_v38 = vld [vmem:[#allocation7 + $0x8dc] sm:$0xff] }
 0x38d   : > { %v12299_v60 = vcombine.low %v5834_v25, %v5836_v58 }
 0x38e   : > { %5625 = vmatmul.mubr.bf16.vlgmr.msra.gmra.mrb[28].mxu0 %v14731_v5 }
 0x38f   : > { %4162 = vmatpush1.bf16.msra.mxu1 %v12027_v63  ;;  %6947 = vmatpush1.bf16.msra.mxu0 %v12259_v29  ;;  %v5824_v63 = vld [vmem:[#allocation7 + $0x5dc] sm:$0xff]  ;;  %v12045_v29 = vcombine.low %v3273_v48, %v3275_v49 }
 0x390   : > { %4163 = vmatprep.subr.bf16.mxu1 %v12031_v0  ;;  %6948 = vmatprep.subr.bf16.mxu0 %v12264_v1  ;;  %v12283_v0 = vcombine.low %v5818_v52, %v5820_v56  ;;  %v12049_v1 = vcombine.high %v3277_v28, %v3279_v41  ;;  %v12288_v31 = vcombine.high %v5822_v62, %v5824_v63  ;;  %v5842_v48 = vld [vmem:[#allocation7 + $0x93c] sm:$0xff] }
 0x391   : > { %6978 = vmatprep.mubr.bf16.mxu0 %v14735_v17  ;;  %v5844_v49 = vld [vmem:[#allocation7 + $0x99c] sm:$0xff] }
 0x393   : > { %4164 = vmatpush1.bf16.msra.mxu1 %v12030_v6  ;;  %6949 = vmatpush1.bf16.msra.mxu0 %v12263_v7  ;;  %v5828_v6 = vld [vmem:[#allocation7 + $0x69c] sm:$0xff]  ;;  %v12048_v7 = vcombine.low %v3277_v28, %v3279_v41  ;;  %v12308_v41 = vcombine.high %v5842_v48, %v5844_v49 }
 0x394   : > { %4165 = vmatprep.subr.bf16.mxu1 %v12034_v11  ;;  %6950 = vmatprep.subr.bf16.mxu0 %v12268_v35  ;;  %v12287_v11 = vcombine.low %v5822_v62, %v5824_v63  ;;  %v12052_v35 = vcombine.high %v3281_v2, %v3283_v3  ;;  %v12292_v12 = vcombine.high %v5826_v55, %v5828_v6  ;;  %v4355_v62 = vld [vmem:[#allocation7 + $0x14] sm:$0xff] }
 0x395   : > { %v13050_v43 = vpop.f32.mrb[16].mxu1 }
 0x396   : > { %v13051_v14 = vpop.f32.mrb[17].mxu1 }
 0x397   : > { %v14738_v27 = vadd.f32 %v13051_v14, %v13050_v43  ;;  %v13053_v23 = vpop.f32.mrb[18].mxu1  ;;  %4166 = vmatpush1.bf16.msra.mxu1 %v12033_v4  ;;  %6951 = vmatpush1.bf16.msra.mxu0 %v12267_v40  ;;  %v5832_v4 = vld [vmem:[#allocation7 + $0x75c] sm:$0xff]  ;;  %v12051_v40 = vcombine.low %v3281_v2, %v3283_v3  ;;  %v3289_v43 = vld [vmem:[#allocation7 + $0x21f0] sm:$0xff]  ;;  %v12054_v14 = vcombine.low %v3285_v13, %v3287_v15 }
 0x398   : > { %v13054_v33 = vpop.f32.mrb[19].mxu1  ;;  %4167 = vmatprep.subr.bf16.mxu1 %v12037_v19  ;;  %6952 = vmatprep.subr.bf16.mxu0 %v12272_v53  ;;  %v12291_v19 = vcombine.low %v5826_v55, %v5828_v6  ;;  %v12055_v53 = vcombine.high %v3285_v13, %v3287_v15  ;;  %v12296_v20 = vcombine.high %v5830_v16, %v5832_v4 }
 0x399   : > { %v14740_v18 = vadd.f32 %v13054_v33, %v13053_v23  ;;  %v12295_v23 = vcombine.low %v5830_v16, %v5832_v4  ;;  %v3293_v33 = vld [vmem:[#allocation7 + $0x22b0] sm:$0xff]  ;;  %v12057_v39 = vcombine.low %v3289_v43, %v3291_v22  ;;  %v12307_v55 = vcombine.low %v5842_v48, %v5844_v49 }
 0x39a   : > { %v4363_v4 = vld [vmem:[#allocation7 + $0x194] sm:$0xff] }
 0x39b   : > { %4168 = vmatpush1.bf16.msra.mxu1 %v12036_v50  ;;  %6953 = vmatpush1.bf16.msra.mxu0 %v12271_v30  ;;  %v12058_v50 = vcombine.high %v3289_v43, %v3291_v22  ;;  %v12300_v30 = vcombine.high %v5834_v25, %v5836_v58  ;;  %v4367_v58 = vld [vmem:[#allocation7 + $0x254] sm:$0xff] }
 0x39c   : > { %4169 = vmatprep.subr.bf16.mxu1 %v12040_v36  ;;  %6954 = vmatprep.subr.bf16.mxu0 %v12276_v26  ;;  %v3295_v36 = vld [vmem:[#allocation7 + $0x2310] sm:$0xff]  ;;  %v5838_v26 = vld [vmem:[#allocation7 + $0x87c] sm:$0xff] }
 0x39d   : > { %v12061_v42 = vcombine.high %v3293_v33, %v3295_v36  ;;  %v4375_v48 = vld [vmem:[#allocation7 + $0x3d4] sm:$0xff] }
 0x39f   : > { %4170 = vmatpush1.bf16.msra.mxu1 %v12039_v44  ;;  %6955 = vmatpush1.bf16.msra.mxu0 %v12275_v45  ;;  %v12304_v44 = vcombine.high %v5838_v26, %v5840_v38  ;;  %v3297_v45 = vld [vmem:[#allocation7 + $0x2370] sm:$0xff] }
 0x3a0   : > { %4171 = vmatprep.subr.bf16.mxu1 %v12043_v46  ;;  %6956 = vmatprep.subr.bf16.mxu0 %v12280_v47  ;;  %v3299_v47 = vld [vmem:[#allocation7 + $0x23d0] sm:$0xff] }
 0x3a1   : > { %v12064_v28 = vcombine.high %v3297_v45, %v3299_v47  ;;  %v12063_v3 = vcombine.low %v3297_v45, %v3299_v47 }
 0x3a3   : > { %4172 = vmatpush1.bf16.msra.mxu1 %v12042_v34  ;;  %6957 = vmatpush1.bf16.msra.mxu0 %v12279_v51  ;;  %v12060_v51 = vcombine.low %v3293_v33, %v3295_v36 }
 0x3a4   : > { %4173 = vmatprep.subr.bf16.mxu1 %v12046_v59  ;;  %6958 = vmatprep.subr.bf16.mxu0 %v12284_v61  ;;  %v12303_v59 = vcombine.low %v5838_v26, %v5840_v38  ;;  %v4371_v26 = vld [vmem:[#allocation7 + $0x314] sm:$0xff]  ;;  %v13116_v38 = vpop.f32.mrb[16].mxu0 }
 0x3a7   : > { %4174 = vmatpush1.bf16.msra.mxu1 %v12045_v29  ;;  %6959 = vmatpush1.bf16.msra.mxu0 %v12283_v0  ;;  %v4357_v0 = vld [vmem:[#allocation7 + $0x74] sm:$0xff] }
 0x3a8   : > { %4175 = vmatprep.subr.bf16.mxu1 %v12049_v1  ;;  %6960 = vmatprep.subr.bf16.mxu0 %v12288_v31  ;;  %v5846_v1 = vld [vmem:[#allocation7 + $0x9fc] sm:$0xff]  ;;  %v12069_v6 = vcombine.high %v4355_v62, %v4357_v0  ;;  %v12068_v13 = vcombine.low %v4355_v62, %v4357_v0 }
 0x3a9   : > { %v5848_v31 = vld [vmem:[#allocation7 + $0xa5c] sm:$0xff] }
 0x3aa   : > { %v12311_v15 = vcombine.low %v5846_v1, %v5848_v31 }
 0x3ab   : > { %4176 = vmatpush1.bf16.msra.mxu1 %v12048_v7  ;;  %6961 = vmatpush1.bf16.msra.mxu0 %v12287_v11  ;;  %v12312_v7 = vcombine.high %v5846_v1, %v5848_v31  ;;  %v4359_v11 = vld [vmem:[#allocation7 + $0xd4] sm:$0xff] }
 0x3ac   : > { %4177 = vmatprep.subr.bf16.mxu1 %v12052_v35  ;;  %6962 = vmatprep.subr.bf16.mxu0 %v12292_v12  ;;  %v4361_v35 = vld [vmem:[#allocation7 + $0x134] sm:$0xff]  ;;  %v5850_v12 = vld [vmem:[#allocation7 + $0xabc] sm:$0xff] }
 0x3af   : > { %4178 = vmatpush1.bf16.msra.mxu1 %v12051_v40  ;;  %6963 = vmatpush1.bf16.msra.mxu0 %v12291_v19  ;;  %v4365_v40 = vld [vmem:[#allocation7 + $0x1f4] sm:$0xff]  ;;  %v5854_v19 = vld [vmem:[#allocation7 + $0xb7c] sm:$0xff] }
 0x3b0   : > { %4179 = vmatprep.subr.bf16.mxu1 %v12055_v53  ;;  %6964 = vmatprep.subr.bf16.mxu0 %v12296_v20  ;;  %v5856_v53 = vld [vmem:[#allocation7 + $0xbdc] sm:$0xff]  ;;  %v12072_v20 = vcombine.low %v4359_v11, %v4361_v35  ;;  %v12077_v22 = vcombine.high %v4363_v4, %v4365_v40 }
 0x3b1   : > { %v12320_v25 = vcombine.high %v5854_v19, %v5856_v53  ;;  %v12319_v33 = vcombine.low %v5854_v19, %v5856_v53 }
 0x3b3   : > { %4180 = vmatpush1.bf16.msra.mxu1 %v12054_v14  ;;  %6965 = vmatpush1.bf16.msra.mxu0 %v12295_v23  ;;  %v4369_v14 = vld [vmem:[#allocation7 + $0x2b4] sm:$0xff]  ;;  %v5858_v23 = vld [vmem:[#allocation7 + $0xc3c] sm:$0xff] }
 0x3b4   : > { %4181 = vmatprep.subr.bf16.mxu1 %v12058_v50  ;;  %6966 = vmatprep.subr.bf16.mxu0 %v12300_v30  ;;  %v5860_v50 = vld [vmem:[#allocation7 + $0xc9c] sm:$0xff]  ;;  %v12076_v30 = vcombine.low %v4363_v4, %v4365_v40 }
 0x3b5   : > { %v13072_v46 = vpop.f32.mrb[20].mxu1  ;;  %v12324_v36 = vcombine.high %v5858_v23, %v5860_v50  ;;  %v12323_v45 = vcombine.low %v5858_v23, %v5860_v50  ;;  %v5874_v23 = vld [vmem:[#allocation7 + $0xf3c] sm:$0xff] }
 0x3b6   : > { %v13073_v52 = vpop.f32.mrb[21].mxu1  ;;  %v5876_v50 = vld [vmem:[#allocation7 + $0xf9c] sm:$0xff] }
 0x3b7   : > { %v13074_v56 = vadd.f32 %v13073_v52, %v13072_v46  ;;  %v13075_v34 = vpop.f32.mrb[22].mxu1  ;;  %4182 = vmatpush1.bf16.msra.mxu1 %v12057_v39  ;;  %6967 = vmatpush1.bf16.msra.mxu0 %v12299_v60  ;;  %v4373_v39 = vld [vmem:[#allocation7 + $0x374] sm:$0xff]  ;;  %v5862_v60 = vld [vmem:[#allocation7 + $0xcfc] sm:$0xff]  ;;  %v13117_v46 = vpop.f32.mrb[17].mxu0 }
 0x3b8   : > { %v13076_v61 = vpop.f32.mrb[23].mxu1  ;;  %4183 = vmatprep.subr.bf16.mxu1 %v12061_v42  ;;  %6968 = vmatprep.subr.bf16.mxu0 %v12304_v44  ;;  %v5864_v42 = vld [vmem:[#allocation7 + $0xd5c] sm:$0xff]  ;;  %v12080_v44 = vcombine.low %v4367_v58, %v4369_v14  ;;  %v13118_v49 = vadd.f32 %v13117_v46, %v13116_v38  ;;  %v13119_v52 = vpop.f32.mrb[18].mxu0  ;;  %v12084_v62 = vcombine.low %v4371_v26, %v4373_v39  ;;  %v4387_v46 = vld [vmem:[#allocation7 + $0x614] sm:$0xff] }
 0x3b9   : > { %v14743_v63 = vadd.f32 %v13074_v56, %v14738_v27  ;;  %v13077_v29 = vadd.f32 %v13076_v61, %v13075_v34  ;;  %v5852_v27 = vld [vmem:[#allocation7 + $0xb1c] sm:$0xff]  ;;  %v12328_v47 = vcombine.high %v5862_v60, %v5864_v42  ;;  %v4377_v56 = vld [vmem:[#allocation7 + $0x434] sm:$0xff] }
 0x3ba   : > { %v12316_v16 = vcombine.high %v5850_v12, %v5852_v27  ;;  %v12315_v43 = vcombine.low %v5850_v12, %v5852_v27  ;;  %v5866_v34 = vld [vmem:[#allocation7 + $0xdbc] sm:$0xff]  ;;  %v12089_v1 = vcombine.high %v4375_v48, %v4377_v56 }
 0x3bb   : > { %v14746_v2 = vadd.f32 %v13077_v29, %v14740_v18  ;;  %4184 = vmatpush1.bf16.msra.mxu1 %v12060_v51  ;;  %6969 = vmatpush1.bf16.msra.mxu0 %v12303_v59  ;;  %v12073_v18 = vcombine.high %v4359_v11, %v4361_v35  ;;  %v5868_v51 = vld [vmem:[#allocation7 + $0xe1c] sm:$0xff]  ;;  %v13120_v59 = vpop.f32.mrb[19].mxu0  ;;  %v12327_v29 = vcombine.low %v5862_v60, %v5864_v42 }
 0x3bc   : > { %4185 = vmatprep.subr.bf16.mxu1 %v12064_v28  ;;  %6970 = vmatprep.subr.bf16.mxu0 %v12308_v41  ;;  %v14751_v61 = vld [vmem:[%s14553_s13] ss:$24 sps:$4 sm:$0xff]   ;;  %v13121_v28 = vadd.f32 %v13120_v59, %v13119_v52  ;;  %v13138_v41 = vpop.f32.mrb[20].mxu0  ;;  %v12332_v31 = vcombine.high %v5866_v34, %v5868_v51  ;;  %v14755_v12 = vld [vmem:[%s14553_s13 + $0xc] ss:$24 sps:$4 sm:$0xff]   ;;  %v12331_v4 = vcombine.low %v5866_v34, %v5868_v51 }
 0x3bd   : > { %v13139_v0 = vpop.f32.mrb[21].mxu0  ;;  %v5870_v11 = vld [vmem:[#allocation7 + $0xe7c] sm:$0xff] }
 0x3be   : > { %v5872_v35 = vld [vmem:[#allocation7 + $0xedc] sm:$0xff] }
 0x3bf   : > { %4186 = vmatpush1.bf16.msra.mxu1 %v12063_v3  ;;  %6971 = vmatpush1.bf16.msra.mxu0 %v12307_v55  ;;  %v4379_v3 = vld [vmem:[#allocation7 + $0x494] sm:$0xff]  ;;  %v12336_v53 = vcombine.high %v5870_v11, %v5872_v35  ;;  %v12335_v60 = vcombine.low %v5870_v11, %v5872_v35  ;;  %v5880_v34 = vld [vmem:[#allocation7 + $0x105c] sm:$0xff] }
 0x3c0   : > { %5635 = vmatprep.subr.bf16.mxu1 %v12069_v6  ;;  %6972 = vmatprep.subr.bf16.mxu0 %v12312_v7  ;;  %v4381_v55 = vld [vmem:[#allocation7 + $0x4f4] sm:$0xff]  ;;  %v13140_v6 = vadd.f32 %v13139_v0, %v13138_v41  ;;  %v13141_v7 = vpop.f32.mrb[22].mxu0  ;;  %v12339_v41 = vcombine.low %v5874_v23, %v5876_v50 }
 0x3c1   : > { %v13142_v27 = vpop.f32.mrb[23].mxu0  ;;  %v12093_v40 = vcombine.high %v4379_v3, %v4381_v55  ;;  %v4391_v0 = vld [vmem:[#allocation7 + $0x6d4] sm:$0xff] }
 0x3c2   : > { %4188 = vmatmul.mubr.bf16.vlgmr.msra.gmra.mrb[28].mxu1 %v14731_v5  ;;  %v12081_v5 = vcombine.high %v4367_v58, %v4369_v14  ;;  %v4385_v14 = vld [vmem:[#allocation7 + $0x5b4] sm:$0xff] }
 0x3c3   : > { %5636 = vmatpush1.bf16.msra.mxu1 %v12068_v13  ;;  %6973 = vmatpush1.bf16.msra.mxu0 %v12311_v15  ;;  %v4274_v13 = vadd.f32 %v13140_v6, %v13118_v49  ;;  %v13143_v15 = vadd.f32 %v13142_v27, %v13141_v7  ;;  %v5884_v6 = vld [vmem:[#allocation7 + $0x111c] sm:$0xff] }
 0x3c4   : > { %5637 = vmatprep.subr.bf16.mxu1 %v12073_v18  ;;  %6974 = vmatprep.subr.bf16.mxu0 %v12316_v16  ;;  %v13160_v18 = vpop.f32.mrb[24].mxu0  ;;  %v12088_v16 = vcombine.low %v4375_v48, %v4377_v56  ;;  %v5878_v56 = vld [vmem:[#allocation7 + $0xffc] sm:$0xff] }
 0x3c5   : > { %5667 = vmatprep.mubr.bf16.mxu1 %v14735_v17  ;;  %v12085_v17 = vcombine.high %v4371_v26, %v4373_v39  ;;  %v13161_v19 = vpop.f32.mrb[25].mxu0  ;;  %v12092_v39 = vcombine.low %v4379_v3, %v4381_v55  ;;  %v12343_v11 = vcombine.low %v5878_v56, %v5880_v34 }
 0x3c7   : > { %5638 = vmatpush1.bf16.msra.mxu1 %v12072_v20  ;;  %6975 = vmatpush1.bf16.msra.mxu0 %v12315_v43  ;;  %v4383_v20 = vld [vmem:[#allocation7 + $0x554] sm:$0xff]  ;;  %v4277_v43 = vadd.f32 %v13143_v15, %v13121_v28 }
 0x3c8   : > { %5639 = vmatprep.subr.bf16.mxu1 %v12077_v22  ;;  %6976 = vmatprep.subr.bf16.mxu0 %v12320_v25  ;;  %v13162_v22 = vadd.f32 %v13161_v19, %v13160_v18  ;;  %v13163_v25 = vpop.f32.mrb[26].mxu0  ;;  %v12096_v51 = vcombine.low %v4383_v20, %v4385_v14  ;;  %v5886_v19 = vld [vmem:[#allocation7 + $0x117c] sm:$0xff] }
 0x3cb   : > { %5640 = vmatpush1.bf16.msra.mxu1 %v12076_v30  ;;  %6977 = vmatpush1.bf16.msra.mxu0 %v12319_v33  ;;  %v13164_v30 = vpop.f32.mrb[27].mxu0 }
 0x3cc   : > { %5641 = vmatprep.subr.bf16.mxu1 %v12081_v5  ;;  %6989 = vmatprep.subr.bf16.mxu0 %v12324_v36  ;;  %v4315_v5 = vadd.f32 %v13162_v22, %v4274_v13  ;;  %v13165_v36 = vadd.f32 %v13164_v30, %v13163_v25 }
 0x3ce   : > { %6979 = vmatmul.mubr.bf16.vlgmr.msra.gmra.mrb[32].mxu0 %v14751_v61  ;;  %v4318_v48 = vadd.f32 %v13165_v36, %v4277_v43  ;;  %v4405_v36 = vld [vmem:[#allocation7 + $0x974] sm:$0xff] }
 0x3cf   : > { %5642 = vmatpush1.bf16.msra.mxu1 %v12080_v44  ;;  %6990 = vmatpush1.bf16.msra.mxu0 %v12323_v45  ;;  %v12097_v44 = vcombine.high %v4383_v20, %v4385_v14  ;;  %v12340_v45 = vcombine.high %v5874_v23, %v5876_v50  ;;  %v5890_v14 = vld [vmem:[#allocation7 + $0x123c] sm:$0xff] }
 0x3d0   : > { %5643 = vmatprep.subr.bf16.mxu1 %v12085_v17  ;;  %6991 = vmatprep.subr.bf16.mxu0 %v12328_v47  ;;  %v4389_v17 = vld [vmem:[#allocation7 + $0x674] sm:$0xff]  ;;  %v4327_v47 = vrot.slane %v4315_v5, 2  ;;  %v4328_v59 = vrot.slane %v4318_v48, 2 }
 0x3d1   : > { %7021 = vmatprep.mubr.bf16.mxu0 %v14755_v12  ;;  %v12100_v7 = vcombine.low %v4387_v46, %v4389_v17  ;;  %v4403_v5 = vld [vmem:[#allocation7 + $0x914] sm:$0xff] }
 0x3d2   : > { %v12116_v48 = vcombine.low %v4403_v5, %v4405_v36 }
 0x3d3   : > { %5644 = vmatpush1.bf16.msra.mxu1 %v12084_v62  ;;  %6992 = vmatpush1.bf16.msra.mxu0 %v12327_v29  ;;  %v12101_v62 = vcombine.high %v4387_v46, %v4389_v17  ;;  %v12344_v29 = vcombine.high %v5878_v56, %v5880_v34  ;;  %v4409_v46 = vld [vmem:[#allocation7 + $0xa34] sm:$0xff]  ;;  %v5898_v17 = vld [vmem:[#allocation7 + $0x13bc] sm:$0xff] }
 0x3d4   : > { %5645 = vmatprep.subr.bf16.mxu1 %v12089_v1  ;;  %6993 = vmatprep.subr.bf16.mxu0 %v12332_v31  ;;  %v4393_v1 = vld [vmem:[#allocation7 + $0x734] sm:$0xff]  ;;  %v14762_v31 = vsel %vm1706_vm2, %v4327_v47, %v4328_v59 }
 0x3d5   : > { %v13094_v58 = vpop.f32.mrb[24].mxu1  ;;  %v12105_v13 = vcombine.high %v4391_v0, %v4393_v1  ;;  %v12104_v20 = vcombine.low %v4391_v0, %v4393_v1  ;;  %v4411_v34 = vld [vmem:[#allocation7 + $0xa94] sm:$0xff] }
 0x3d6   : > { %v13095_v33 = vpop.f32.mrb[25].mxu1  ;;  %v4415_v1 = vld [vmem:[#allocation7 + $0xb54] sm:$0xff] }
 0x3d7   : > { %v13096_v26 = vadd.f32 %v13095_v33, %v13094_v58  ;;  %v13097_v38 = vpop.f32.mrb[26].mxu1  ;;  %5646 = vmatpush1.bf16.msra.mxu1 %v12088_v16  ;;  %6994 = vmatpush1.bf16.msra.mxu0 %v12331_v4  ;;  %v4395_v4 = vld [vmem:[#allocation7 + $0x794] sm:$0xff] }
 0x3d8   : > { %v13098_v42 = vpop.f32.mrb[27].mxu1  ;;  %5647 = vmatprep.subr.bf16.mxu1 %v12093_v40  ;;  %6995 = vmatprep.subr.bf16.mxu0 %v12336_v53  ;;  %v4397_v40 = vld [vmem:[#allocation7 + $0x7f4] sm:$0xff]  ;;  %v5888_v53 = vld [vmem:[#allocation7 + $0x11dc] sm:$0xff] }
 0x3d9   : > { %v3080_v49 = vadd.f32 %v13096_v26, %v14743_v63  ;;  %v13099_v52 = vadd.f32 %v13098_v42, %v13097_v38  ;;  %v14766_v63 = vsel %vm1706_vm2, %v4328_v59, %v4327_v47  ;;  %v12109_v22 = vcombine.high %v4395_v4, %v4397_v40  ;;  %v4401_v58 = vld [vmem:[#allocation7 + $0x8b4] sm:$0xff]  ;;  %v5894_v26 = vld [vmem:[#allocation7 + $0x12fc] sm:$0xff] }
 0x3da   : > { %v12352_v25 = vcombine.high %v5886_v19, %v5888_v53  ;;  %v12108_v23 = vcombine.low %v4395_v4, %v4397_v40  ;;  %v12351_v50 = vcombine.low %v5886_v19, %v5888_v53  ;;  %v5896_v38 = vld [vmem:[#allocation7 + $0x135c] sm:$0xff]  ;;  %v12117_v42 = vcombine.high %v4403_v5, %v4405_v36 }
 0x3db   : > { %v3083_v28 = vadd.f32 %v13099_v52, %v14746_v2  ;;  %5648 = vmatpush1.bf16.msra.mxu1 %v12092_v39  ;;  %6996 = vmatpush1.bf16.msra.mxu0 %v12335_v60  ;;  %v3092_v3 = vrot.slane %v3080_v49, 2  ;;  %v5882_v2 = vld [vmem:[#allocation7 + $0x10bc] sm:$0xff]  ;;  %v12359_v49 = vcombine.low %v5894_v26, %v5896_v38 }
 0x3dc   : > { %5649 = vmatprep.subr.bf16.mxu1 %v12097_v44  ;;  %6997 = vmatprep.subr.bf16.mxu0 %v12340_v45  ;;  %v12348_v16 = vcombine.high %v5882_v2, %v5884_v6  ;;  %v12347_v43 = vcombine.low %v5882_v2, %v5884_v6  ;;  %v12360_v44 = vcombine.high %v5894_v26, %v5896_v38  ;;  %v4407_v45 = vld [vmem:[#allocation7 + $0x9d4] sm:$0xff]  ;;  %v5900_v47 = vld [vmem:[#allocation7 + $0x141c] sm:$0xff] }
 0x3dd   : > { %v3093_v55 = vrot.slane %v3083_v28, 2  ;;  %v12121_v52 = vcombine.high %v4407_v45, %v4409_v46  ;;  %v12364_v56 = vcombine.high %v5898_v17, %v5900_v47  ;;  %v5902_v59 = vld [vmem:[#allocation7 + $0x147c] sm:$0xff] }
 0x3de   : > { %v5904_v28 = vld [vmem:[#allocation7 + $0x14dc] sm:$0xff] }
 0x3df   : > { %v3094_v35 = vsel %vm1706_vm2, %v3092_v3, %v3093_v55  ;;  %v3095_v27 = vsel %vm1706_vm2, %v3093_v55, %v3092_v3  ;;  %5650 = vmatpush1.bf16.msra.mxu1 %v12096_v51  ;;  %6998 = vmatpush1.bf16.msra.mxu0 %v12339_v41  ;;  %v4413_v51 = vld [vmem:[#allocation7 + $0xaf4] sm:$0xff]  ;;  %v12120_v41 = vcombine.low %v4407_v45, %v4409_v46  ;;  %v5906_v55 = vld [vmem:[#allocation7 + $0x153c] sm:$0xff] }
 0x3e0   : > { %v14773_v15 = vadd.f32 %v3094_v35, %v14707_v32  ;;  %v14776_v18 = vadd.f32 %v3095_v27, %v14709_v37  ;;  %5651 = vmatprep.subr.bf16.mxu1 %v12101_v62  ;;  %6999 = vmatprep.subr.bf16.mxu0 %v12344_v29  ;;  %v4399_v32 = vld [vmem:[#allocation7 + $0x854] sm:$0xff]  ;;  %v5892_v37 = vld [vmem:[#allocation7 + $0x129c] sm:$0xff]  ;;  %v12363_v62 = vcombine.low %v5898_v17, %v5900_v47 }
 0x3e1   : > { %v12113_v30 = vcombine.high %v4399_v32, %v4401_v58  ;;  %v12356_v33 = vcombine.high %v5890_v14, %v5892_v37  ;;  %v12112_v39 = vcombine.low %v4399_v32, %v4401_v58  ;;  %v12355_v60 = vcombine.low %v5890_v14, %v5892_v37  ;;  %v4417_v3 = vld [vmem:[#allocation7 + $0xbb4] sm:$0xff]  ;;  %v5908_v2 = vld [vmem:[#allocation7 + $0x159c] sm:$0xff] }
 0x3e2   : > { %v12125_v29 = vcombine.high %v4411_v34, %v4413_v51  ;;  %v12368_v0 = vcombine.high %v5902_v59, %v5904_v28  ;;  %v12124_v6 = vcombine.low %v4411_v34, %v4413_v51  ;;  %v12372_v35 = vcombine.high %v5906_v55, %v5908_v2  ;;  %v4419_v27 = vld [vmem:[#allocation7 + $0xc14] sm:$0xff]  ;;  %v5912_v4 = vld [vmem:[#allocation7 + $0x165c] sm:$0xff] }
 0x3e3   : > { %5652 = vmatpush1.bf16.msra.mxu1 %v12100_v7  ;;  %7000 = vmatpush1.bf16.msra.mxu0 %v12343_v11  ;;  %v12367_v7 = vcombine.low %v5902_v59, %v5904_v28  ;;  %v12129_v11 = vcombine.high %v4415_v1, %v4417_v3  ;;  %v12128_v40 = vcombine.low %v4415_v1, %v4417_v3  ;;  %v5916_v32 = vld [vmem:[#allocation7 + $0x171c] sm:$0xff]  ;;  %v4439_v28 = vld [vmem:[#allocation7 + $0xfd4] sm:$0xff] }
 0x3e4   : > { %5653 = vmatprep.subr.bf16.mxu1 %v12105_v13  ;;  %7001 = vmatprep.subr.bf16.mxu0 %v12348_v16  ;;  %v4421_v13 = vld [vmem:[#allocation7 + $0xc74] sm:$0xff]  ;;  %v5910_v16 = vld [vmem:[#allocation7 + $0x15fc] sm:$0xff]  ;;  %v12371_v19 = vcombine.low %v5906_v55, %v5908_v2 }
 0x3e5   : > { %v12133_v53 = vcombine.high %v4419_v27, %v4421_v13  ;;  %v12132_v58 = vcombine.low %v4419_v27, %v4421_v13  ;;  %v12375_v14 = vcombine.low %v5910_v16, %v5912_v4  ;;  %v5920_v5 = vld [vmem:[#allocation7 + $0x17dc] sm:$0xff]  ;;  %v4443_v2 = vld [vmem:[#allocation7 + $0x1094] sm:$0xff] }
 0x3e6   : > { %v5924_v45 = vld [vmem:[#allocation7 + $0x189c] sm:$0xff] }
 0x3e7   : > { %5654 = vmatpush1.bf16.msra.mxu1 %v12104_v20  ;;  %7002 = vmatpush1.bf16.msra.mxu0 %v12347_v43  ;;  %v12376_v20 = vcombine.high %v5910_v16, %v5912_v4  ;;  %v4423_v43 = vld [vmem:[#allocation7 + $0xcd4] sm:$0xff] }
 0x3e8   : > { %5655 = vmatprep.subr.bf16.mxu1 %v12109_v22  ;;  %7003 = vmatprep.subr.bf16.mxu0 %v12352_v25  ;;  %v4425_v22 = vld [vmem:[#allocation7 + $0xd34] sm:$0xff]  ;;  %v5914_v25 = vld [vmem:[#allocation7 + $0x16bc] sm:$0xff] }
 0x3e9   : > { %v12137_v37 = vcombine.high %v4423_v43, %v4425_v22  ;;  %v12136_v36 = vcombine.low %v4423_v43, %v4425_v22  ;;  %v12379_v26 = vcombine.low %v5914_v25, %v5916_v32  ;;  %v4447_v16 = vld [vmem:[#allocation7 + $0x1154] sm:$0xff] }
 0x3ea   : > { %v4449_v4 = vld [vmem:[#allocation7 + $0x11b4] sm:$0xff] }
 0x3eb   : > { %5656 = vmatpush1.bf16.msra.mxu1 %v12108_v23  ;;  %7004 = vmatpush1.bf16.msra.mxu0 %v12351_v50  ;;  %v12380_v23 = vcombine.high %v5914_v25, %v5916_v32  ;;  %v4427_v50 = vld [vmem:[#allocation7 + $0xd94] sm:$0xff]  ;;  %v12161_v43 = vcombine.high %v4447_v16, %v4449_v4  ;;  %v5942_v32 = vld [vmem:[#allocation7 + $0x1bfc] sm:$0xff] }
 0x3ec   : > { %5657 = vmatprep.subr.bf16.mxu1 %v12113_v30  ;;  %7005 = vmatprep.subr.bf16.mxu0 %v12356_v33  ;;  %v4429_v30 = vld [vmem:[#allocation7 + $0xdf4] sm:$0xff]  ;;  %v5918_v33 = vld [vmem:[#allocation7 + $0x177c] sm:$0xff] }
 0x3ed   : > { %v12141_v38 = vcombine.high %v4427_v50, %v4429_v30  ;;  %v12140_v46 = vcombine.low %v4427_v50, %v4429_v30  ;;  %v12383_v17 = vcombine.low %v5918_v33, %v5920_v5  ;;  %v4451_v22 = vld [vmem:[#allocation7 + $0x1214] sm:$0xff] }
 0x3ee   : > { %v4453_v25 = vld [vmem:[#allocation7 + $0x1274] sm:$0xff] }
 0x3ef   : > { %5658 = vmatpush1.bf16.msra.mxu1 %v12112_v39  ;;  %7006 = vmatpush1.bf16.msra.mxu0 %v12355_v60  ;;  %v12384_v39 = vcombine.high %v5918_v33, %v5920_v5  ;;  %v4431_v60 = vld [vmem:[#allocation7 + $0xe54] sm:$0xff]  ;;  %v5946_v5 = vld [vmem:[#allocation7 + $0x1cbc] sm:$0xff] }
 0x3f0   : > { %5659 = vmatprep.subr.bf16.mxu1 %v12117_v42  ;;  %7007 = vmatprep.subr.bf16.mxu0 %v12360_v44  ;;  %v4433_v42 = vld [vmem:[#allocation7 + $0xeb4] sm:$0xff]  ;;  %v5922_v44 = vld [vmem:[#allocation7 + $0x183c] sm:$0xff] }
 0x3f1   : > { %v12388_v47 = vcombine.high %v5922_v44, %v5924_v45  ;;  %v12144_v34 = vcombine.low %v4431_v60, %v4433_v42  ;;  %v12387_v51 = vcombine.low %v5922_v44, %v5924_v45  ;;  %v4455_v30 = vld [vmem:[#allocation7 + $0x12d4] sm:$0xff]  ;;  %v5950_v45 = vld [vmem:[#allocation7 + $0x1d7c] sm:$0xff] }
 0x3f2   : > { %v4457_v33 = vld [vmem:[#allocation7 + $0x1334] sm:$0xff] }
 0x3f3   : > { %5660 = vmatpush1.bf16.msra.mxu1 %v12116_v48  ;;  %7008 = vmatpush1.bf16.msra.mxu0 %v12359_v49  ;;  %v4435_v48 = vld [vmem:[#allocation7 + $0xf14] sm:$0xff] }
 0x3f4   : > { %5661 = vmatprep.subr.bf16.mxu1 %v12121_v52  ;;  %7009 = vmatprep.subr.bf16.mxu0 %v12364_v56  ;;  %v4437_v49 = vld [vmem:[#allocation7 + $0xf74] sm:$0xff]  ;;  %v5926_v52 = vld [vmem:[#allocation7 + $0x18fc] sm:$0xff] }
 0x3f5   : > { %v5928_v56 = vld [vmem:[#allocation7 + $0x195c] sm:$0xff]  ;;  %v12149_v59 = vcombine.high %v4435_v48, %v4437_v49  ;;  %v4461_v44 = vld [vmem:[#allocation7 + $0x13f4] sm:$0xff] }
 0x3f6   : > { %v12391_v1 = vcombine.low %v5926_v52, %v5928_v56 }
 0x3f7   : > { %5662 = vmatpush1.bf16.msra.mxu1 %v12120_v41  ;;  %7010 = vmatpush1.bf16.msra.mxu0 %v12363_v62  ;;  %v4441_v41 = vld [vmem:[#allocation7 + $0x1034] sm:$0xff]  ;;  %v5930_v62 = vld [vmem:[#allocation7 + $0x19bc] sm:$0xff] }
 0x3f8   : > { %5663 = vmatprep.subr.bf16.mxu1 %v12125_v29  ;;  %7011 = vmatprep.subr.bf16.mxu0 %v12368_v0  ;;  %v5932_v29 = vld [vmem:[#allocation7 + $0x1a1c] sm:$0xff]  ;;  %v12148_v0 = vcombine.low %v4435_v48, %v4437_v49  ;;  %v12153_v3 = vcombine.high %v4439_v28, %v4441_v41  ;;  %v4463_v49 = vld [vmem:[#allocation7 + $0x1454] sm:$0xff] }
 0x3f9   : > { %v12396_v55 = vcombine.high %v5930_v62, %v5932_v29  ;;  %v12395_v27 = vcombine.low %v5930_v62, %v5932_v29  ;;  %v4469_v62 = vld [vmem:[#allocation7 + $0x1574] sm:$0xff]  ;;  %v5958_v29 = vld [vmem:[#allocation7 + $0x1efc] sm:$0xff] }
 0x3fb   : > { %5664 = vmatpush1.bf16.msra.mxu1 %v12124_v6  ;;  %7012 = vmatpush1.bf16.msra.mxu0 %v12367_v7  ;;  %v4445_v6 = vld [vmem:[#allocation7 + $0x10f4] sm:$0xff]  ;;  %v5934_v7 = vld [vmem:[#allocation7 + $0x1a7c] sm:$0xff] }
 0x3fc   : > { %5665 = vmatprep.subr.bf16.mxu1 %v12129_v11  ;;  %7013 = vmatprep.subr.bf16.mxu0 %v12372_v35  ;;  %v5936_v11 = vld [vmem:[#allocation7 + $0x1adc] sm:$0xff]  ;;  %v12152_v35 = vcombine.low %v4439_v28, %v4441_v41  ;;  %v4467_v41 = vld [vmem:[#allocation7 + $0x1514] sm:$0xff] }
 0x3fd   : > { %v12400_v13 = vcombine.high %v5934_v7, %v5936_v11 }
 0x3ff   : > { %5666 = vmatpush1.bf16.msra.mxu1 %v12128_v40  ;;  %7014 = vmatpush1.bf16.msra.mxu0 %v12371_v19  ;;  %v5938_v40 = vld [vmem:[#allocation7 + $0x1b3c] sm:$0xff] }
 0x400   : > { %5678 = vmatprep.subr.bf16.mxu1 %v12133_v53  ;;  %7015 = vmatprep.subr.bf16.mxu0 %v12376_v20  ;;  %v5940_v19 = vld [vmem:[#allocation7 + $0x1b9c] sm:$0xff]  ;;  %v12156_v53 = vcombine.low %v4443_v2, %v4445_v6  ;;  %v12399_v20 = vcombine.low %v5934_v7, %v5936_v11  ;;  %v4473_v7 = vld [vmem:[#allocation7 + $0x1634] sm:$0xff] }
 0x401   : > { %v5962_v11 = vld [vmem:[#allocation7 + $0x1fbc] sm:$0xff] }
 0x402   : > { %5668 = vmatmul.mubr.bf16.vlgmr.msra.gmra.mrb[32].mxu1 %v14751_v61  ;;  %v12145_v61 = vcombine.high %v4431_v60, %v4433_v42  ;;  %v4459_v42 = vld [vmem:[#allocation7 + $0x1394] sm:$0xff] }
 0x403   : > { %5679 = vmatpush1.bf16.msra.mxu1 %v12132_v58  ;;  %7016 = vmatpush1.bf16.msra.mxu0 %v12375_v14  ;;  %v5944_v58 = vld [vmem:[#allocation7 + $0x1c5c] sm:$0xff]  ;;  %v12160_v14 = vcombine.low %v4447_v16, %v4449_v4  ;;  %v4475_v4 = vld [vmem:[#allocation7 + $0x1694] sm:$0xff] }
 0x404   : > { %5680 = vmatprep.subr.bf16.mxu1 %v12137_v37  ;;  %7017 = vmatprep.subr.bf16.mxu0 %v12380_v23  ;;  %v12403_v37 = vcombine.low %v5938_v40, %v5940_v19  ;;  %v12165_v23 = vcombine.high %v4451_v22, %v4453_v25  ;;  %v12408_v50 = vcombine.high %v5942_v32, %v5944_v58 }
 0x405   : > { %5710 = vmatprep.mubr.bf16.mxu1 %v14755_v12  ;;  %v12392_v12 = vcombine.high %v5926_v52, %v5928_v56  ;;  %v4465_v52 = vld [vmem:[#allocation7 + $0x14b4] sm:$0xff]  ;;  %v5954_v56 = vld [vmem:[#allocation7 + $0x1e3c] sm:$0xff] }
 0x407   : > { %5681 = vmatpush1.bf16.msra.mxu1 %v12136_v36  ;;  %7018 = vmatpush1.bf16.msra.mxu0 %v12379_v26  ;;  %v5948_v36 = vld [vmem:[#allocation7 + $0x1d1c] sm:$0xff]  ;;  %v12164_v26 = vcombine.low %v4451_v22, %v4453_v25  ;;  %v4479_v25 = vld [vmem:[#allocation7 + $0x1754] sm:$0xff] }
 0x408   : > { %5682 = vmatprep.subr.bf16.mxu1 %v12141_v38  ;;  %7019 = vmatprep.subr.bf16.mxu0 %v12384_v39  ;;  %v12407_v38 = vcombine.low %v5942_v32, %v5944_v58  ;;  %v12169_v39 = vcombine.high %v4455_v30, %v4457_v33  ;;  %v12412_v60 = vcombine.high %v5946_v5, %v5948_v36  ;;  %v4481_v32 = vld [vmem:[#allocation7 + $0x17b4] sm:$0xff]  ;;  %v5970_v58 = vld [vmem:[#allocation7 + $0x213c] sm:$0xff] }
 0x40b   : > { %5683 = vmatpush1.bf16.msra.mxu1 %v12140_v46  ;;  %7020 = vmatpush1.bf16.msra.mxu0 %v12383_v17  ;;  %v5952_v46 = vld [vmem:[#allocation7 + $0x1ddc] sm:$0xff]  ;;  %v12168_v17 = vcombine.low %v4455_v30, %v4457_v33  ;;  %v4483_v33 = vld [vmem:[#allocation7 + $0x1814] sm:$0xff] }
 0x40c   : > { %5684 = vmatprep.subr.bf16.mxu1 %v12145_v61  ;;  %7032 = vmatprep.subr.bf16.mxu0 %v12388_v47  ;;  %v12411_v61 = vcombine.low %v5946_v5, %v5948_v36  ;;  %v12173_v47 = vcombine.high %v4459_v42, %v4461_v44  ;;  %v12416_v48 = vcombine.high %v5950_v45, %v5952_v46  ;;  %v4485_v5 = vld [vmem:[#allocation7 + $0x1874] sm:$0xff]  ;;  %v5974_v36 = vld [vmem:[#allocation7 + $0x21fc] sm:$0xff] }
 0x40e   : > { %7022 = vmatmul.mubr.bf16.vlgmr.msra.gmra.mrb[32].mxu0 %v14723_v24  ;;  %v12157_v24 = vcombine.high %v4443_v2, %v4445_v6  ;;  %v4471_v6 = vld [vmem:[#allocation7 + $0x15d4] sm:$0xff] }
 0x40f   : > { %5685 = vmatpush1.bf16.msra.mxu1 %v12144_v34  ;;  %7033 = vmatpush1.bf16.msra.mxu0 %v12387_v51  ;;  %v5956_v34 = vld [vmem:[#allocation7 + $0x1e9c] sm:$0xff]  ;;  %v12172_v51 = vcombine.low %v4459_v42, %v4461_v44  ;;  %v4487_v44 = vld [vmem:[#allocation7 + $0x18d4] sm:$0xff] }
 0x410   : > { %5686 = vmatprep.subr.bf16.mxu1 %v12149_v59  ;;  %7034 = vmatprep.subr.bf16.mxu0 %v12392_v12  ;;  %v12415_v59 = vcombine.low %v5950_v45, %v5952_v46  ;;  %v12177_v12 = vcombine.high %v4463_v49, %v4465_v52  ;;  %v12420_v28 = vcombine.high %v5954_v56, %v5956_v34  ;;  %v4489_v45 = vld [vmem:[#allocation7 + $0x1934] sm:$0xff]  ;;  %v5978_v46 = vld [vmem:[#allocation7 + $0x22bc] sm:$0xff] }
 0x411   : > { %7064 = vmatprep.mubr.bf16.mxu0 %v14727_v54  ;;  %v12404_v54 = vcombine.high %v5938_v40, %v5940_v19  ;;  %v4477_v40 = vld [vmem:[#allocation7 + $0x16f4] sm:$0xff]  ;;  %v5966_v19 = vld [vmem:[#allocation7 + $0x207c] sm:$0xff] }
 0x413   : > { %5687 = vmatpush1.bf16.msra.mxu1 %v12148_v0  ;;  %7035 = vmatpush1.bf16.msra.mxu0 %v12391_v1  ;;  %v5960_v0 = vld [vmem:[#allocation7 + $0x1f5c] sm:$0xff]  ;;  %v12176_v1 = vcombine.low %v4463_v49, %v4465_v52  ;;  %v4491_v52 = vld [vmem:[#allocation7 + $0x1994] sm:$0xff] }
 0x414   : > { %5688 = vmatprep.subr.bf16.mxu1 %v12153_v3  ;;  %7036 = vmatprep.subr.bf16.mxu0 %v12396_v55  ;;  %v12419_v3 = vcombine.low %v5954_v56, %v5956_v34  ;;  %v12181_v55 = vcombine.high %v4467_v41, %v4469_v62  ;;  %v12424_v2 = vcombine.high %v5958_v29, %v5960_v0  ;;  %v4493_v56 = vld [vmem:[#allocation7 + $0x19f4] sm:$0xff]  ;;  %v5982_v34 = vld [vmem:[#allocation7 + $0x237c] sm:$0xff] }
 0x417   : > { %5689 = vmatpush1.bf16.msra.mxu1 %v12152_v35  ;;  %7037 = vmatpush1.bf16.msra.mxu0 %v12395_v27  ;;  %v5964_v35 = vld [vmem:[#allocation7 + $0x201c] sm:$0xff]  ;;  %v12180_v27 = vcombine.low %v4467_v41, %v4469_v62  ;;  %v12205_v41 = vcombine.high %v4491_v52, %v4493_v56 }
 0x418   : > { %5690 = vmatprep.subr.bf16.mxu1 %v12157_v24  ;;  %7038 = vmatprep.subr.bf16.mxu0 %v12400_v13  ;;  %v12423_v24 = vcombine.low %v5958_v29, %v5960_v0  ;;  %v12185_v13 = vcombine.high %v4471_v6, %v4473_v7  ;;  %v12428_v16 = vcombine.high %v5962_v11, %v5964_v35  ;;  %v4495_v29 = vld [vmem:[#allocation7 + $0x1a54] sm:$0xff] }
 0x419   : > { %v4497_v0 = vld [vmem:[#allocation7 + $0x1ab4] sm:$0xff] }
 0x41b   : > { %5691 = vmatpush1.bf16.msra.mxu1 %v12156_v53  ;;  %7039 = vmatpush1.bf16.msra.mxu0 %v12399_v20  ;;  %v5968_v53 = vld [vmem:[#allocation7 + $0x20dc] sm:$0xff]  ;;  %v12184_v20 = vcombine.low %v4471_v6, %v4473_v7  ;;  %v12209_v7 = vcombine.high %v4495_v29, %v4497_v0 }
 0x41c   : > { %5692 = vmatprep.subr.bf16.mxu1 %v12161_v43  ;;  %7040 = vmatprep.subr.bf16.mxu0 %v12404_v54  ;;  %v12427_v43 = vcombine.low %v5962_v11, %v5964_v35  ;;  %v12189_v54 = vcombine.high %v4475_v4, %v4477_v40  ;;  %v12432_v22 = vcombine.high %v5966_v19, %v5968_v53  ;;  %v4499_v35 = vld [vmem:[#allocation7 + $0x1b14] sm:$0xff] }
 0x41f   : > { %5693 = vmatpush1.bf16.msra.mxu1 %v12160_v14  ;;  %7041 = vmatpush1.bf16.msra.mxu0 %v12403_v37  ;;  %v5972_v14 = vld [vmem:[#allocation7 + $0x219c] sm:$0xff]  ;;  %v12188_v37 = vcombine.low %v4475_v4, %v4477_v40 }
 0x420   : > { %5694 = vmatprep.subr.bf16.mxu1 %v12165_v23  ;;  %7042 = vmatprep.subr.bf16.mxu0 %v12408_v50  ;;  %v12431_v23 = vcombine.low %v5966_v19, %v5968_v53  ;;  %v12193_v50 = vcombine.high %v4479_v25, %v4481_v32  ;;  %v12436_v30 = vcombine.high %v5970_v58, %v5972_v14  ;;  %v4503_v53 = vld [vmem:[#allocation7 + $0x1bd4] sm:$0xff] }
 0x423   : > { %5695 = vmatpush1.bf16.msra.mxu1 %v12164_v26  ;;  %7043 = vmatpush1.bf16.msra.mxu0 %v12407_v38  ;;  %v5976_v26 = vld [vmem:[#allocation7 + $0x225c] sm:$0xff]  ;;  %v12192_v38 = vcombine.low %v4479_v25, %v4481_v32 }
 0x424   : > { %5696 = vmatprep.subr.bf16.mxu1 %v12169_v39  ;;  %7044 = vmatprep.subr.bf16.mxu0 %v12412_v60  ;;  %v12435_v39 = vcombine.low %v5970_v58, %v5972_v14  ;;  %v12197_v60 = vcombine.high %v4483_v33, %v4485_v5  ;;  %v12440_v42 = vcombine.high %v5974_v36, %v5976_v26 }
 0x427   : > { %5697 = vmatpush1.bf16.msra.mxu1 %v12168_v17  ;;  %7045 = vmatpush1.bf16.msra.mxu0 %v12411_v61  ;;  %v5980_v17 = vld [vmem:[#allocation7 + $0x231c] sm:$0xff]  ;;  %v12196_v61 = vcombine.low %v4483_v33, %v4485_v5 }
 0x428   : > { %5698 = vmatprep.subr.bf16.mxu1 %v12173_v47  ;;  %7046 = vmatprep.subr.bf16.mxu0 %v12416_v48  ;;  %v12439_v47 = vcombine.low %v5974_v36, %v5976_v26  ;;  %v12201_v48 = vcombine.high %v4487_v44, %v4489_v45  ;;  %v12444_v49 = vcombine.high %v5978_v46, %v5980_v17  ;;  %v14795_v33 = vld [vmem:[%s14553_s13 + $0x4] ss:$24 sps:$4 sm:$0xff]  }
 0x42b   : > { %5699 = vmatpush1.bf16.msra.mxu1 %v12172_v51  ;;  %7047 = vmatpush1.bf16.msra.mxu0 %v12415_v59  ;;  %v5984_v51 = vld [vmem:[#allocation7 + $0x23dc] sm:$0xff] }
 0x42c   : > { %5700 = vmatprep.subr.bf16.mxu1 %v12177_v12  ;;  %7048 = vmatprep.subr.bf16.mxu0 %v12420_v28  ;;  %v14783_v59 = vld [vmem:[%s14553_s13 + $0x8] ss:$24 sps:$4 sm:$0xff]   ;;  %v12200_v12 = vcombine.low %v4487_v44, %v4489_v45  ;;  %v12443_v28 = vcombine.low %v5978_v46, %v5980_v17  ;;  %v12448_v62 = vcombine.high %v5982_v34, %v5984_v51 }
 0x42d   : > { %v12447_v6 = vcombine.low %v5982_v34, %v5984_v51  ;;  %v7270_v44 = vld [vmem:[#allocation7 + $0x37c] sm:$0xff] }
 0x42f   : > { %5701 = vmatpush1.bf16.msra.mxu1 %v12176_v1  ;;  %7049 = vmatpush1.bf16.msra.mxu0 %v12419_v3  ;;  %v7243_v1 = vld [vmem:[#allocation7 + $0x1c] sm:$0xff] }
 0x430   : > { %5702 = vmatprep.subr.bf16.mxu1 %v12181_v55  ;;  %7050 = vmatprep.subr.bf16.mxu0 %v12424_v2  ;;  %v7246_v3 = vld [vmem:[#allocation7 + $0x7c] sm:$0xff]  ;;  %v12204_v2 = vcombine.low %v4491_v52, %v4493_v56 }
 0x431   : > { %v14787_v55 = vld [vmem:[%s14553_s13 + $0x14] ss:$24 sps:$4 sm:$0xff]   ;;  %v12452_v11 = vcombine.high %v7243_v1, %v7246_v3  ;;  %v12451_v4 = vcombine.low %v7243_v1, %v7246_v3 }
 0x432   : > { %v7276_v52 = vld [vmem:[#allocation7 + $0x43c] sm:$0xff] }
 0x433   : > { %5703 = vmatpush1.bf16.msra.mxu1 %v12180_v27  ;;  %7051 = vmatpush1.bf16.msra.mxu0 %v12423_v24  ;;  %v4501_v27 = vld [vmem:[#allocation7 + $0x1b74] sm:$0xff]  ;;  %v7249_v24 = vld [vmem:[#allocation7 + $0xdc] sm:$0xff] }
 0x434   : > { %5704 = vmatprep.subr.bf16.mxu1 %v12185_v13  ;;  %7052 = vmatprep.subr.bf16.mxu0 %v12428_v16  ;;  %v7252_v13 = vld [vmem:[#allocation7 + $0x13c] sm:$0xff]  ;;  %v12208_v16 = vcombine.low %v4495_v29, %v4497_v0  ;;  %v12213_v40 = vcombine.high %v4499_v35, %v4501_v27  ;;  %v12212_v25 = vcombine.low %v4499_v35, %v4501_v27 }
 0x435   : > { %v12457_v19 = vcombine.high %v7249_v24, %v7252_v13  ;;  %v12456_v32 = vcombine.low %v7249_v24, %v7252_v13  ;;  %v7282_v29 = vld [vmem:[#allocation7 + $0x4fc] sm:$0xff] }
 0x436   : > { %v7288_v35 = vld [vmem:[#allocation7 + $0x5bc] sm:$0xff] }
 0x437   : > { %5705 = vmatpush1.bf16.msra.mxu1 %v12184_v20  ;;  %7053 = vmatpush1.bf16.msra.mxu0 %v12427_v43  ;;  %v4505_v20 = vld [vmem:[#allocation7 + $0x1c34] sm:$0xff]  ;;  %v7255_v43 = vld [vmem:[#allocation7 + $0x19c] sm:$0xff] }
 0x438   : > { %5706 = vmatprep.subr.bf16.mxu1 %v12189_v54  ;;  %7054 = vmatprep.subr.bf16.mxu0 %v12432_v22  ;;  %v7258_v54 = vld [vmem:[#allocation7 + $0x1fc] sm:$0xff]  ;;  %v12217_v58 = vcombine.high %v4503_v53, %v4505_v20  ;;  %v12216_v5 = vcombine.low %v4503_v53, %v4505_v20  ;;  %v4527_v20 = vld [vmem:[#allocation7 + $0x2054] sm:$0xff] }
 0x439   : > { %v14791_v22 = vld [vmem:[%s14553_s13 + $0x10] ss:$24 sps:$4 sm:$0xff]   ;;  %v12462_v14 = vcombine.high %v7255_v43, %v7258_v54  ;;  %v12461_v36 = vcombine.low %v7255_v43, %v7258_v54 }
 0x43a   : > { %v4529_v43 = vld [vmem:[#allocation7 + $0x20b4] sm:$0xff] }
 0x43b   : > { %5707 = vmatpush1.bf16.msra.mxu1 %v12188_v37  ;;  %7055 = vmatpush1.bf16.msra.mxu0 %v12431_v23  ;;  %v4507_v37 = vld [vmem:[#allocation7 + $0x1c94] sm:$0xff] }
 0x43c   : > { %5708 = vmatprep.subr.bf16.mxu1 %v12193_v50  ;;  %7056 = vmatprep.subr.bf16.mxu0 %v12436_v30  ;;  %v4509_v23 = vld [vmem:[#allocation7 + $0x1cf4] sm:$0xff]  ;;  %v7261_v50 = vld [vmem:[#allocation7 + $0x25c] sm:$0xff] }
 0x43d   : > { %v7264_v30 = vld [vmem:[#allocation7 + $0x2bc] sm:$0xff]  ;;  %v12221_v26 = vcombine.high %v4507_v37, %v4509_v23  ;;  %v12220_v45 = vcombine.low %v4507_v37, %v4509_v23  ;;  %v12241_v23 = vcombine.high %v4527_v20, %v4529_v43 }
 0x43e   : > { %v12466_v46 = vcombine.low %v7261_v50, %v7264_v30 }
 0x43f   : > { %5709 = vmatpush1.bf16.msra.mxu1 %v12192_v38  ;;  %7057 = vmatpush1.bf16.msra.mxu0 %v12435_v39  ;;  %v12467_v38 = vcombine.high %v7261_v50, %v7264_v30  ;;  %v4511_v39 = vld [vmem:[#allocation7 + $0x1d54] sm:$0xff] }
 0x440   : > { %5721 = vmatprep.subr.bf16.mxu1 %v12197_v60  ;;  %7058 = vmatprep.subr.bf16.mxu0 %v12440_v42  ;;  %v4513_v60 = vld [vmem:[#allocation7 + $0x1db4] sm:$0xff]  ;;  %v7267_v42 = vld [vmem:[#allocation7 + $0x31c] sm:$0xff] }
 0x441   : > { %v12225_v17 = vcombine.high %v4511_v39, %v4513_v60  ;;  %v12224_v56 = vcombine.low %v4511_v39, %v4513_v60  ;;  %v12471_v34 = vcombine.low %v7267_v42, %v7270_v44  ;;  %v4533_v39 = vld [vmem:[#allocation7 + $0x2174] sm:$0xff]  ;;  %v7297_v60 = vld [vmem:[#allocation7 + $0x6dc] sm:$0xff] }
 0x442   : > { %5711 = vmatmul.mubr.bf16.vlgmr.msra.gmra.mrb[32].mxu1 %v14783_v59 }
 0x443   : > { %5722 = vmatpush1.bf16.msra.mxu1 %v12196_v61  ;;  %7059 = vmatpush1.bf16.msra.mxu0 %v12439_v47  ;;  %v12472_v61 = vcombine.high %v7267_v42, %v7270_v44  ;;  %v4515_v47 = vld [vmem:[#allocation7 + $0x1e14] sm:$0xff]  ;;  %v7300_v42 = vld [vmem:[#allocation7 + $0x73c] sm:$0xff]  ;;  %v12240_v44 = vcombine.low %v4527_v20, %v4529_v43 }
 0x444   : > { %5723 = vmatprep.subr.bf16.mxu1 %v12201_v48  ;;  %7060 = vmatprep.subr.bf16.mxu0 %v12444_v49  ;;  %v4517_v48 = vld [vmem:[#allocation7 + $0x1e74] sm:$0xff]  ;;  %v7273_v49 = vld [vmem:[#allocation7 + $0x3dc] sm:$0xff] }
 0x445   : > { %5753 = vmatprep.mubr.bf16.mxu1 %v14787_v55  ;;  %v12229_v51 = vcombine.high %v4515_v47, %v4517_v48  ;;  %v12228_v0 = vcombine.low %v4515_v47, %v4517_v48  ;;  %v12476_v1 = vcombine.low %v7273_v49, %v7276_v52  ;;  %v4537_v47 = vld [vmem:[#allocation7 + $0x2234] sm:$0xff]  ;;  %v7303_v48 = vld [vmem:[#allocation7 + $0x79c] sm:$0xff] }
 0x447   : > { %5724 = vmatpush1.bf16.msra.mxu1 %v12200_v12  ;;  %7061 = vmatpush1.bf16.msra.mxu0 %v12443_v28  ;;  %v12477_v12 = vcombine.high %v7273_v49, %v7276_v52  ;;  %v4519_v28 = vld [vmem:[#allocation7 + $0x1ed4] sm:$0xff]  ;;  %v7306_v49 = vld [vmem:[#allocation7 + $0x7fc] sm:$0xff] }
 0x448   : > { %5725 = vmatprep.subr.bf16.mxu1 %v12205_v41  ;;  %7062 = vmatprep.subr.bf16.mxu0 %v12448_v62  ;;  %v4521_v41 = vld [vmem:[#allocation7 + $0x1f34] sm:$0xff]  ;;  %v7279_v62 = vld [vmem:[#allocation7 + $0x49c] sm:$0xff] }
 0x449   : > { %v12233_v3 = vcombine.high %v4519_v28, %v4521_v41  ;;  %v12232_v13 = vcombine.low %v4519_v28, %v4521_v41  ;;  %v4541_v28 = vld [vmem:[#allocation7 + $0x22f4] sm:$0xff]  ;;  %v7309_v41 = vld [vmem:[#allocation7 + $0x85c] sm:$0xff] }
 0x44b   : > { %5726 = vmatpush1.bf16.msra.mxu1 %v12204_v2  ;;  %7063 = vmatpush1.bf16.msra.mxu0 %v12447_v6  ;;  %v12482_v2 = vcombine.high %v7279_v62, %v7282_v29  ;;  %v4523_v6 = vld [vmem:[#allocation7 + $0x1f94] sm:$0xff] }
 0x44c   : > { %5727 = vmatprep.subr.bf16.mxu1 %v12209_v7  ;;  %8779 = vmatprep.subr.bf16.mxu0 %v12452_v11  ;;  %v4525_v7 = vld [vmem:[#allocation7 + $0x1ff4] sm:$0xff]  ;;  %v7285_v11 = vld [vmem:[#allocation7 + $0x55c] sm:$0xff] }
 0x44d   : > { %v12487_v53 = vcombine.high %v7285_v11, %v7288_v35  ;;  %v12486_v37 = vcombine.low %v7285_v11, %v7288_v35  ;;  %v7318_v11 = vld [vmem:[#allocation7 + $0x97c] sm:$0xff] }
 0x44e   : > { %7065 = vmatmul.mubr.bf16.vlgmr.msra.gmra.mrb[32].mxu0 %v14791_v22 }
 0x44f   : > { %5728 = vmatpush1.bf16.msra.mxu1 %v12208_v16  ;;  %8780 = vmatpush1.bf16.msra.mxu0 %v12451_v4  ;;  %v12481_v16 = vcombine.low %v7279_v62, %v7282_v29  ;;  %v7312_v62 = vld [vmem:[#allocation7 + $0x8bc] sm:$0xff] }
 0x450   : > { %5729 = vmatprep.subr.bf16.mxu1 %v12213_v40  ;;  %8781 = vmatprep.subr.bf16.mxu0 %v12457_v19  ;;  %v12237_v19 = vcombine.high %v4523_v6, %v4525_v7 }
 0x451   : > { %8811 = vmatprep.mubr.bf16.mxu0 %v14795_v33 }
 0x453   : > { %5730 = vmatpush1.bf16.msra.mxu1 %v12212_v25  ;;  %8782 = vmatpush1.bf16.msra.mxu0 %v12456_v32  ;;  %v7291_v25 = vld [vmem:[#allocation7 + $0x61c] sm:$0xff] }
 0x454   : > { %5731 = vmatprep.subr.bf16.mxu1 %v12217_v58  ;;  %8783 = vmatprep.subr.bf16.mxu0 %v12462_v14  ;;  %v7294_v32 = vld [vmem:[#allocation7 + $0x67c] sm:$0xff]  ;;  %v12236_v14 = vcombine.low %v4523_v6, %v4525_v7  ;;  %v4545_v6 = vld [vmem:[#allocation7 + $0x23b4] sm:$0xff] }
 0x455   : > { %v7315_v7 = vld [vmem:[#allocation7 + $0x91c] sm:$0xff] }
 0x456   : > { %v12511_v20 = vcombine.low %v7315_v7, %v7318_v11 }
 0x457   : > { %5732 = vmatpush1.bf16.msra.mxu1 %v12216_v5  ;;  %8784 = vmatpush1.bf16.msra.mxu0 %v12461_v36  ;;  %v12492_v5 = vcombine.high %v7291_v25, %v7294_v32  ;;  %v4531_v36 = vld [vmem:[#allocation7 + $0x2114] sm:$0xff] }
 0x458   : > { %5733 = vmatprep.subr.bf16.mxu1 %v12221_v26  ;;  %8785 = vmatprep.subr.bf16.mxu0 %v12467_v38  ;;  %v12244_v52 = vcombine.low %v4531_v36, %v4533_v39 }
 0x45b   : > { %5734 = vmatpush1.bf16.msra.mxu1 %v12220_v45  ;;  %8786 = vmatpush1.bf16.msra.mxu0 %v12466_v46  ;;  %v12491_v45 = vcombine.low %v7291_v25, %v7294_v32  ;;  %v12245_v46 = vcombine.high %v4531_v36, %v4533_v39  ;;  %v5799_v25 = vld [vmem:[#allocation7 + $0x104] sm:$0xff]  ;;  %v7333_v39 = vld [vmem:[#allocation7 + $0xb5c] sm:$0xff] }
 0x45c   : > { %5735 = vmatprep.subr.bf16.mxu1 %v12225_v17  ;;  %8787 = vmatprep.subr.bf16.mxu0 %v12472_v61  ;;  %v12497_v17 = vcombine.high %v7297_v60, %v7300_v42  ;;  %v4535_v61 = vld [vmem:[#allocation7 + $0x21d4] sm:$0xff]  ;;  %v5801_v32 = vld [vmem:[#allocation7 + $0x164] sm:$0xff] }
 0x45d   : > { %v12248_v29 = vcombine.low %v4535_v61, %v4537_v47  ;;  %v5805_v36 = vld [vmem:[#allocation7 + $0x224] sm:$0xff] }
 0x45f   : > { %5736 = vmatpush1.bf16.msra.mxu1 %v12224_v56  ;;  %8788 = vmatpush1.bf16.msra.mxu0 %v12471_v34  ;;  %v12496_v56 = vcombine.low %v7297_v60, %v7300_v42  ;;  %v12249_v34 = vcombine.high %v4535_v61, %v4537_v47  ;;  %v7336_v60 = vld [vmem:[#allocation7 + $0xbbc] sm:$0xff]  ;;  %v12265_v42 = vcombine.low %v5799_v25, %v5801_v32  ;;  %v5809_v61 = vld [vmem:[#allocation7 + $0x2e4] sm:$0xff] }
 0x460   : > { %5737 = vmatprep.subr.bf16.mxu1 %v12229_v51  ;;  %8789 = vmatprep.subr.bf16.mxu0 %v12477_v12  ;;  %v12502_v51 = vcombine.high %v7303_v48, %v7306_v49  ;;  %v4539_v12 = vld [vmem:[#allocation7 + $0x2294] sm:$0xff]  ;;  %v7339_v47 = vld [vmem:[#allocation7 + $0xc1c] sm:$0xff] }
 0x461   : > { %v5626_v27 = vpop.f32.mrb[28].mxu0  ;;  %v12252_v35 = vcombine.low %v4539_v12, %v4541_v28 }
 0x462   : > { %v5628_v24 = vpop.f32.mrb[29].mxu0 }
 0x463   : > { %5738 = vmatpush1.bf16.msra.mxu1 %v12228_v0  ;;  %8790 = vmatpush1.bf16.msra.mxu0 %v12476_v1  ;;  %v5764_v4 = vrot.slane %v5628_v24, 1  ;;  %v5630_v40 = vpop.f32.mrb[30].mxu0  ;;  %v12501_v0 = vcombine.low %v7303_v48, %v7306_v49  ;;  %v12253_v1 = vcombine.high %v4539_v12, %v4541_v28  ;;  %v7342_v48 = vld [vmem:[#allocation7 + $0xc7c] sm:$0xff] }
 0x464   : > { %5739 = vmatprep.subr.bf16.mxu1 %v12233_v3  ;;  %8791 = vmatprep.subr.bf16.mxu0 %v12482_v2  ;;  %v5632_v54 = vpop.f32.mrb[31].mxu0  ;;  %v12507_v3 = vcombine.high %v7309_v41, %v7312_v62  ;;  %v4543_v2 = vld [vmem:[#allocation7 + $0x2354] sm:$0xff]  ;;  %v7345_v12 = vld [vmem:[#allocation7 + $0xcdc] sm:$0xff] }
 0x465   : > { %v5765_v58 = vrot.slane %v5632_v54, 1  ;;  %v12257_v24 = vcombine.high %v4543_v2, %v4545_v6  ;;  %v7348_v28 = vld [vmem:[#allocation7 + $0xd3c] sm:$0xff] }
 0x467   : > { %5740 = vmatpush1.bf16.msra.mxu1 %v12232_v13  ;;  %8792 = vmatpush1.bf16.msra.mxu0 %v12481_v16  ;;  %v5766_v50 = vsel %vm1699_vm1, %v5764_v4, %v5765_v58  ;;  %v5767_v30 = vsel %vm1699_vm1, %v5765_v58, %v5764_v4  ;;  %v12512_v13 = vcombine.high %v7315_v7, %v7318_v11  ;;  %v5795_v16 = vld [vmem:[#allocation7 + $0x44] sm:$0xff]  ;;  %v7327_v58 = vld [vmem:[#allocation7 + $0xa9c] sm:$0xff] }
 0x468   : > { %5741 = vmatprep.subr.bf16.mxu1 %v12237_v19  ;;  %8793 = vmatprep.subr.bf16.mxu0 %v12487_v53  ;;  %v14802_v26 = vadd.f32 %v5766_v50, %v5626_v27  ;;  %v14804_v38 = vadd.f32 %v5767_v30, %v5630_v40  ;;  %v12506_v27 = vcombine.low %v7309_v41, %v7312_v62  ;;  %v5797_v4 = vld [vmem:[#allocation7 + $0xa4] sm:$0xff]  ;;  %v7321_v40 = vld [vmem:[#allocation7 + $0x9dc] sm:$0xff] }
 0x469   : > { %v7324_v19 = vld [vmem:[#allocation7 + $0xa3c] sm:$0xff]  ;;  %v12256_v53 = vcombine.low %v4543_v2, %v4545_v6  ;;  %v12262_v43 = vcombine.high %v5795_v16, %v5797_v4  ;;  %v12266_v50 = vcombine.high %v5799_v25, %v5801_v32  ;;  %v12531_v62 = vcombine.low %v7339_v47, %v7342_v48  ;;  %v5823_v32 = vld [vmem:[#allocation7 + $0x584] sm:$0xff] }
 0x46a   : > { %v12517_v54 = vcombine.high %v7321_v40, %v7324_v19  ;;  %v7354_v2 = vld [vmem:[#allocation7 + $0xdfc] sm:$0xff]  ;;  %v12536_v11 = vcombine.low %v7345_v12, %v7348_v28 }
 0x46b   : > { %5742 = vmatpush1.bf16.msra.mxu1 %v12236_v14  ;;  %8794 = vmatpush1.bf16.msra.mxu0 %v12486_v37  ;;  %v7330_v14 = vld [vmem:[#allocation7 + $0xafc] sm:$0xff]  ;;  %v12261_v37 = vcombine.low %v5795_v16, %v5797_v4  ;;  %v5821_v16 = vld [vmem:[#allocation7 + $0x524] sm:$0xff] }
 0x46c   : > { %5743 = vmatprep.subr.bf16.mxu1 %v12241_v23  ;;  %8795 = vmatprep.subr.bf16.mxu0 %v12492_v5  ;;  %v12516_v23 = vcombine.low %v7321_v40, %v7324_v19  ;;  %v12522_v30 = vcombine.high %v7327_v58, %v7330_v14  ;;  %v5803_v5 = vld [vmem:[#allocation7 + $0x1c4] sm:$0xff]  ;;  %v7357_v4 = vld [vmem:[#allocation7 + $0xe5c] sm:$0xff] }
 0x46d   : > { %v12269_v49 = vcombine.low %v5803_v5, %v5805_v36  ;;  %v14809_v6 = vld [vmem:[%s14553_s13] ss:$24 sps:$4 sm:$0xff]   ;;  %v14813_v19 = vld [vmem:[%s14553_s13 + $0xc] ss:$24 sps:$4 sm:$0xff]  }
 0x46e   : > { %v7360_v40 = vld [vmem:[#allocation7 + $0xebc] sm:$0xff] }
 0x46f   : > { %5744 = vmatpush1.bf16.msra.mxu1 %v12240_v44  ;;  %8796 = vmatpush1.bf16.msra.mxu0 %v12491_v45  ;;  %v12521_v44 = vcombine.low %v7327_v58, %v7330_v14  ;;  %v12270_v45 = vcombine.high %v5803_v5, %v5805_v36  ;;  %v12547_v25 = vcombine.high %v7357_v4, %v7360_v40  ;;  %v3107_v5 = vld [vmem:[#allocation13 + $0x3] sm:$0x1] }
 0x470   : > { %5745 = vmatprep.subr.bf16.mxu1 %v12245_v46  ;;  %8797 = vmatprep.subr.bf16.mxu0 %v12497_v17  ;;  %v12527_v46 = vcombine.high %v7333_v39, %v7336_v60  ;;  %v5807_v17 = vld [vmem:[#allocation7 + $0x284] sm:$0xff] }
 0x471   : > { %v12273_v41 = vcombine.low %v5807_v17, %v5809_v61 }
 0x473   : > { %5746 = vmatpush1.bf16.msra.mxu1 %v12244_v52  ;;  %8798 = vmatpush1.bf16.msra.mxu0 %v12496_v56  ;;  %v12526_v52 = vcombine.low %v7333_v39, %v7336_v60  ;;  %v12532_v56 = vcombine.high %v7339_v47, %v7342_v48  ;;  %v12546_v60 = vcombine.low %v7357_v4, %v7360_v40  ;;  %v7372_v47 = vld [vmem:[#allocation7 + $0x103c] sm:$0xff]  ;;  %v5837_v4 = vld [vmem:[#allocation7 + $0x824] sm:$0xff] }
 0x474   : > { %5747 = vmatprep.subr.bf16.mxu1 %v12249_v34  ;;  %8799 = vmatprep.subr.bf16.mxu0 %v12502_v51  ;;  %v5811_v34 = vld [vmem:[#allocation7 + $0x344] sm:$0xff]  ;;  %v3108_v48 = vadd.f32 %v3107_v5, %v14713_v8  ;;  %v7381_v40 = vld [vmem:[#allocation7 + $0x115c] sm:$0xff] }
 0x475   : > { %v5813_v51 = vld [vmem:[#allocation7 + $0x3a4] sm:$0xff]  ;;  %v7390_v5 = vld [vmem:[#allocation7 + $0x127c] sm:$0xff] }
 0x476   : > { %v12277_v7 = vcombine.low %v5811_v34, %v5813_v51 }
 0x477   : > { %5748 = vmatpush1.bf16.msra.mxu1 %v12248_v29  ;;  %8800 = vmatpush1.bf16.msra.mxu0 %v12501_v0  ;;  %v12537_v29 = vcombine.high %v7345_v12, %v7348_v28  ;;  %v5815_v0 = vld [vmem:[#allocation7 + $0x404] sm:$0xff] }
 0x478   : > { %5749 = vmatprep.subr.bf16.mxu1 %v12253_v1  ;;  %8801 = vmatprep.subr.bf16.mxu0 %v12507_v3  ;;  %v5817_v1 = vld [vmem:[#allocation7 + $0x464] sm:$0xff]  ;;  %v7351_v3 = vld [vmem:[#allocation7 + $0xd9c] sm:$0xff] }
 0x47b   : > { %5750 = vmatpush1.bf16.msra.mxu1 %v12252_v35  ;;  %8802 = vmatpush1.bf16.msra.mxu0 %v12506_v27  ;;  %v11921_v35 = vld [vmem:[#allocation13] ss:$0 sm:$0xff]  ;;  %v12282_v27 = vcombine.high %v5815_v0, %v5817_v1 }
 0x47c   : > { %5751 = vmatprep.subr.bf16.mxu1 %v12257_v24  ;;  %8803 = vmatprep.subr.bf16.mxu0 %v12512_v13  ;;  %v12542_v24 = vcombine.high %v7351_v3, %v7354_v2  ;;  %v5819_v13 = vld [vmem:[#allocation7 + $0x4c4] sm:$0xff]  ;;  %v3104_v58 = vadd.f32 %v11921_v35, %v14776_v18 }
 0x47d   : > { %v12285_v39 = vcombine.low %v5819_v13, %v5821_v16 }
 0x47f   : > { %5752 = vmatpush1.bf16.msra.mxu1 %v12256_v53  ;;  %8804 = vmatpush1.bf16.msra.mxu0 %v12511_v20  ;;  %v12281_v53 = vcombine.low %v5815_v0, %v5817_v1  ;;  %v12541_v20 = vcombine.low %v7351_v3, %v7354_v2  ;;  %v4336_v0 = vrot.slane %v3108_v48, %v14716_v9  ;;  %v14827_v2 = vadd.s32 8, %v14645_v10 }
 0x480   : > { %7075 = vmatprep.subr.bf16.mxu1 %v12262_v43  ;;  %8805 = vmatprep.subr.bf16.mxu0 %v12517_v54  ;;  %v3103_v43 = vadd.f32 %v11921_v35, %v14773_v15  ;;  %v12286_v54 = vcombine.high %v5819_v13, %v5821_v16  ;;  %v5835_v16 = vld [vmem:[#allocation7 + $0x7c4] sm:$0xff] }
 0x481   : > { %vm4342_vm3 = vcmp.lt.s32.totalorder %v14827_v2, 14  ;;  %vm7231_vm5 = vcmp.lt.s32.totalorder %v14827_v2, 13  ;;  %vm11146_vm7 = vcmp.lt.s32.totalorder %v14827_v2, 12 }
 0x482   : > { %5754 = vmatmul.mubr.bf16.vlgmr.msra.gmra.mrb[32].mxu1 %v14791_v22  ;;  %v12274_v22 = vcombine.high %v5807_v17, %v5809_v61  ;;  %13818 = vtanh.f32 %v3103_v43  ;;  %v7369_v61 = vld [vmem:[#allocation7 + $0xfdc] sm:$0xff] }
 0x483   : > { %7076 = vmatpush1.bf16.msra.mxu1 %v12261_v37  ;;  %8806 = vmatpush1.bf16.msra.mxu0 %v12516_v23  ;;  %v5825_v37 = vld [vmem:[#allocation7 + $0x5e4] sm:$0xff]  ;;  %v7363_v23 = vld [vmem:[#allocation7 + $0xf1c] sm:$0xff]  ;;  %13820 = vtanh.f32 %v3104_v58  ;;  %v12557_v28 = vcombine.high %v7369_v61, %v7372_v47 }
 0x484   : > { %7077 = vmatprep.subr.bf16.mxu1 %v12266_v50  ;;  %8807 = vmatprep.subr.bf16.mxu0 %v12522_v30  ;;  %v7366_v50 = vld [vmem:[#allocation7 + $0xf7c] sm:$0xff] }
 0x485   : > { %7107 = vmatprep.mubr.bf16.mxu1 %v14795_v33  ;;  %v12278_v33 = vcombine.high %v5811_v34, %v5813_v51 }
 0x487   : > { %7078 = vmatpush1.bf16.msra.mxu1 %v12265_v42  ;;  %8808 = vmatpush1.bf16.msra.mxu0 %v12521_v44  ;;  %v12290_v42 = vcombine.high %v5823_v32, %v5825_v37  ;;  %v12552_v44 = vcombine.high %v7363_v23, %v7366_v50 }
 0x488   : > { %7079 = vmatprep.subr.bf16.mxu1 %v12270_v45  ;;  %8809 = vmatprep.subr.bf16.mxu0 %v12527_v46  ;;  %v5827_v45 = vld [vmem:[#allocation7 + $0x644] sm:$0xff] }
 0x489   : > { %v5829_v46 = vld [vmem:[#allocation7 + $0x6a4] sm:$0xff] }
 0x48a   : > { %v12294_v34 = vcombine.high %v5827_v45, %v5829_v46 }
 0x48b   : > { %7080 = vmatpush1.bf16.msra.mxu1 %v12269_v49  ;;  %8810 = vmatpush1.bf16.msra.mxu0 %v12526_v52  ;;  %v12289_v49 = vcombine.low %v5823_v32, %v5825_v37  ;;  %v12551_v52 = vcombine.low %v7363_v23, %v7366_v50  ;;  %v12302_v32 = vcombine.high %v5835_v16, %v5837_v4  ;;  %v5839_v23 = vld [vmem:[#allocation7 + $0x884] sm:$0xff] }
 0x48c   : > { %7081 = vmatprep.subr.bf16.mxu1 %v12274_v22  ;;  %8822 = vmatprep.subr.bf16.mxu0 %v12532_v56  ;;  %v5841_v50 = vld [vmem:[#allocation7 + $0x8e4] sm:$0xff] }
 0x48e   : > { %8812 = vmatmul.mubr.bf16.vlgmr.msra.gmra.mrb[36].mxu0 %v14809_v6 }
 0x48f   : > { %7082 = vmatpush1.bf16.msra.mxu1 %v12273_v41  ;;  %8823 = vmatpush1.bf16.msra.mxu0 %v12531_v62  ;;  %v5831_v41 = vld [vmem:[#allocation7 + $0x704] sm:$0xff] }
 0x490   : > { %7083 = vmatprep.subr.bf16.mxu1 %v12278_v33  ;;  %8824 = vmatprep.subr.bf16.mxu0 %v12537_v29  ;;  %v5833_v62 = vld [vmem:[#allocation7 + $0x764] sm:$0xff]  ;;  %v7375_v33 = vld [vmem:[#allocation7 + $0x109c] sm:$0xff] }
 0x491   : > { %8854 = vmatprep.mubr.bf16.mxu0 %v14813_v19  ;;  %v7378_v29 = vld [vmem:[#allocation7 + $0x10fc] sm:$0xff]  ;;  %v12298_v35 = vcombine.high %v5831_v41, %v5833_v62 }
 0x492   : > { %v12562_v13 = vcombine.high %v7375_v33, %v7378_v29 }
 0x493   : > { %7084 = vmatpush1.bf16.msra.mxu1 %v12277_v7  ;;  %8825 = vmatpush1.bf16.msra.mxu0 %v12536_v11  ;;  %v12293_v7 = vcombine.low %v5827_v45, %v5829_v46  ;;  %v12556_v11 = vcombine.low %v7369_v61, %v7372_v47  ;;  %v5843_v45 = vld [vmem:[#allocation7 + $0x944] sm:$0xff]  ;;  %v12305_v61 = vcombine.low %v5839_v23, %v5841_v50 }
 0x494   : > { %7085 = vmatprep.subr.bf16.mxu1 %v12282_v27  ;;  %8826 = vmatprep.subr.bf16.mxu0 %v12542_v24  ;;  %v5845_v46 = vld [vmem:[#allocation7 + $0x9a4] sm:$0xff] }
 0x495   : > { %v4189_v14 = vpop.f32.mrb[28].mxu1  ;;  %v12310_v48 = vcombine.high %v5843_v45, %v5845_v46 }
 0x496   : > { %v4191_v30 = vpop.f32.mrb[29].mxu1 }
 0x497   : > { %v4193_v36 = vpop.f32.mrb[30].mxu1  ;;  %7086 = vmatpush1.bf16.msra.mxu1 %v12281_v53  ;;  %8827 = vmatpush1.bf16.msra.mxu0 %v12541_v20  ;;  %v4321_v18 = vrot.slane %v4191_v30, 1  ;;  %v7384_v53 = vld [vmem:[#allocation7 + $0x11bc] sm:$0xff] }
 0x498   : > { %v4195_v15 = vpop.f32.mrb[31].mxu1  ;;  %7087 = vmatprep.subr.bf16.mxu1 %v12286_v54  ;;  %8828 = vmatprep.subr.bf16.mxu0 %v12547_v25  ;;  %v12297_v54 = vcombine.low %v5831_v41, %v5833_v62  ;;  %v12561_v25 = vcombine.low %v7375_v33, %v7378_v29  ;;  %v12567_v37 = vcombine.high %v7381_v40, %v7384_v53  ;;  %v7387_v30 = vld [vmem:[#allocation7 + $0x121c] sm:$0xff]  ;;  %v5851_v62 = vld [vmem:[#allocation7 + $0xac4] sm:$0xff] }
 0x499   : > { %v4322_v17 = vrot.slane %v4195_v15, 1  ;;  %v12571_v47 = vcombine.low %v7387_v30, %v7390_v5  ;;  %v5853_v33 = vld [vmem:[#allocation7 + $0xb24] sm:$0xff]  ;;  %v7405_v29 = vld [vmem:[#allocation7 + $0x145c] sm:$0xff] }
 0x49b   : > { %v4323_v22 = vsel %vm1699_vm1, %v4321_v18, %v4322_v17  ;;  %v4324_v56 = vsel %vm1699_vm1, %v4322_v17, %v4321_v18  ;;  %7088 = vmatpush1.bf16.msra.mxu1 %v12285_v39  ;;  %8829 = vmatpush1.bf16.msra.mxu0 %v12546_v60  ;;  %v12301_v39 = vcombine.low %v5835_v16, %v5837_v4  ;;  %v7393_v18 = vld [vmem:[#allocation7 + $0x12dc] sm:$0xff] }
 0x49c   : > { %v4325_v51 = vadd.f32 %v4323_v22, %v4189_v14  ;;  %v4326_v12 = vadd.f32 %v4324_v56, %v4193_v36  ;;  %7089 = vmatprep.subr.bf16.mxu1 %v12290_v42  ;;  %8830 = vmatprep.subr.bf16.mxu0 %v12552_v44  ;;  %v12566_v60 = vcombine.low %v7381_v40, %v7384_v53  ;;  %v7396_v17 = vld [vmem:[#allocation7 + $0x133c] sm:$0xff]  ;;  %v5849_v22 = vld [vmem:[#allocation7 + $0xa64] sm:$0xff] }
 0x49d   : > { %v12306_v42 = vcombine.high %v5839_v23, %v5841_v50  ;;  %v12572_v44 = vcombine.high %v7387_v30, %v7390_v5  ;;  %v7399_v56 = vld [vmem:[#allocation7 + $0x139c] sm:$0xff]  ;;  %v12317_v16 = vcombine.low %v5851_v62, %v5853_v33 }
 0x49e   : > { %v4331_v1 = vadd.f32 %v14762_v31, %v4325_v51  ;;  %v4332_v3 = vadd.f32 %v14766_v63, %v4326_v12  ;;  %v13819_v31 = vpop.eup %13818  ;;  %v12309_v51 = vcombine.low %v5843_v45, %v5845_v46  ;;  %v12576_v12 = vcombine.low %v7393_v18, %v7396_v17  ;;  %v7423_v23 = vld [vmem:[#allocation7 + $0x169c] sm:$0xff] }
 0x49f   : > { %7090 = vmatpush1.bf16.msra.mxu1 %v12289_v49  ;;  %8831 = vmatpush1.bf16.msra.mxu0 %v12551_v52  ;;  %v13821_v43 = vpop.eup %13820  ;;  %v12577_v49 = vcombine.high %v7393_v18, %v7396_v17  ;;  %v5847_v52 = vld [vmem:[#allocation7 + $0xa04] sm:$0xff]  ;;  %v7426_v50 = vld [vmem:[#allocation7 + $0x16fc] sm:$0xff] }
 0x4a0   : > { %v4337_v27 = vadd.f32 %v4336_v0, %v4331_v1  ;;  %v4338_v24 = vadd.f32 %v4336_v0, %v4332_v3  ;;  %7091 = vmatprep.subr.bf16.mxu1 %v12294_v34  ;;  %8832 = vmatprep.subr.bf16.mxu0 %v12557_v28  ;;  %v7402_v34 = vld [vmem:[#allocation7 + $0x13fc] sm:$0xff]  ;;  %v12314_v28 = vcombine.high %v5847_v52, %v5849_v22 }
 0x4a1   : > { %v12582_v41 = vcombine.high %v7399_v56, %v7402_v34  ;;  %v7408_v0 = vld [vmem:[#allocation7 + $0x14bc] sm:$0xff]  ;;  %v12313_v1 = vcombine.low %v5847_v52, %v5849_v22  ;;  %v12581_v3 = vcombine.low %v7399_v56, %v7402_v34  ;;  %v12601_v18 = vcombine.low %v7423_v23, %v7426_v50 }
 0x4a2   : > { %v4339_v20 = vmax.f32 %v4337_v27, 0.0  ;;  %v4340_v63 = vmax.f32 %v4338_v24, 0.0  ;;  %v5857_v27 = vld [vmem:[#allocation7 + $0xbe4] sm:$0xff]  ;;  %v7411_v24 = vld [vmem:[#allocation7 + $0x151c] sm:$0xff]  ;;  %v12586_v4 = vcombine.low %v7405_v29, %v7408_v0 }
 0x4a3   : > { %7092 = vmatpush1.bf16.msra.mxu1 %v12293_v7  ;;  %8833 = vmatpush1.bf16.msra.mxu0 %v12556_v11  ;;  %v12318_v7 = vcombine.high %v5851_v62, %v5853_v33  ;;  %v12587_v11 = vcombine.high %v7405_v29, %v7408_v0  ;;  %v7432_v45 = vld [vmem:[#allocation7 + $0x17bc] sm:$0xff]  ;;  %v5879_v0 = vld [vmem:[#allocation7 + $0x1004] sm:$0xff] }
 0x4a4   : > { %v4343_v58 = vmul.f32 %v13819_v31, %v4339_v20  ;;  %v4344_v14 = vmul.f32 %v13821_v43, %v4340_v63  ;;  %7093 = vmatprep.subr.bf16.mxu1 %v12298_v35  ;;  %8834 = vmatprep.subr.bf16.mxu0 %v12562_v13  ;;  %v5855_v35 = vld [vmem:[#allocation7 + $0xb84] sm:$0xff]  ;;  %v7414_v13 = vld [vmem:[#allocation7 + $0x157c] sm:$0xff] }
 0x4a5   : > { %v12322_v40 = vcombine.high %v5855_v35, %v5857_v27  ;;  %v12592_v53 = vcombine.high %v7411_v24, %v7414_v13  ;;  %v5859_v31 = vld [vmem:[#allocation7 + $0xc44] sm:$0xff]  ;;  %v7417_v63 = vld [vmem:[#allocation7 + $0x15dc] sm:$0xff] }
 0x4a6   : > { %v4346_v36 = vsel %vm4342_vm3, %v4344_v14, -inf  ;;  %v5861_v20 = vld [vmem:[#allocation7 + $0xca4] sm:$0xff]  ;;  %v7420_v43 = vld [vmem:[#allocation7 + $0x163c] sm:$0xff] }
 0x4a7   : > { %7094 = vmatpush1.bf16.msra.mxu1 %v12297_v54  ;;  %8835 = vmatpush1.bf16.msra.mxu0 %v12561_v25  ;;  %v14830_v15 = vmax.f32 %v4343_v58, %v4346_v36  ;;  %v12321_v54 = vcombine.low %v5855_v35, %v5857_v27  ;;  %v12591_v25 = vcombine.low %v7411_v24, %v7414_v13  ;;  %v5863_v14 = vld [vmem:[#allocation7 + $0xd04] sm:$0xff]  ;;  %v7438_v52 = vld [vmem:[#allocation7 + $0x187c] sm:$0xff] }
 0x4a8   : > { %7095 = vmatprep.subr.bf16.mxu1 %v12302_v32  ;;  %8836 = vmatprep.subr.bf16.mxu0 %v12567_v37  ;;  %v12326_v32 = vcombine.high %v5859_v31, %v5861_v20  ;;  %v12597_v58 = vcombine.high %v7417_v63, %v7420_v43  ;;  %v5865_v37 = vld [vmem:[#allocation7 + $0xd64] sm:$0xff]  ;;  %v12325_v30 = vcombine.low %v5859_v31, %v5861_v20 }
 0x4a9   : > { %v12596_v5 = vcombine.low %v7417_v63, %v7420_v43  ;;  %v12330_v36 = vcombine.high %v5863_v14, %v5865_v37  ;;  %v12329_v46 = vcombine.low %v5863_v14, %v5865_v37  ;;  %v5883_v13 = vld [vmem:[#allocation7 + $0x10c4] sm:$0xff] }
 0x4aa   : > { %v5887_v63 = vld [vmem:[#allocation7 + $0x1184] sm:$0xff] }
 0x4ab   : > { %7096 = vmatpush1.bf16.msra.mxu1 %v12301_v39  ;;  %8837 = vmatpush1.bf16.msra.mxu0 %v12566_v60  ;;  %v12602_v39 = vcombine.high %v7423_v23, %v7426_v50  ;;  %v5867_v60 = vld [vmem:[#allocation7 + $0xdc4] sm:$0xff]  ;;  %v7465_v50 = vld [vmem:[#allocation7 + $0x1bdc] sm:$0xff] }
 0x4ac   : > { %7097 = vmatprep.subr.bf16.mxu1 %v12306_v42  ;;  %8838 = vmatprep.subr.bf16.mxu0 %v12572_v44  ;;  %v5869_v42 = vld [vmem:[#allocation7 + $0xe24] sm:$0xff]  ;;  %v7429_v44 = vld [vmem:[#allocation7 + $0x175c] sm:$0xff] }
 0x4ad   : > { %v12334_v17 = vcombine.high %v5867_v60, %v5869_v42  ;;  %v12333_v22 = vcombine.low %v5867_v60, %v5869_v42  ;;  %v12606_v56 = vcombine.low %v7429_v44, %v7432_v45  ;;  %v5889_v43 = vld [vmem:[#allocation7 + $0x11e4] sm:$0xff] }
 0x4ae   : > { %v12354_v14 = vcombine.high %v5887_v63, %v5889_v43  ;;  %v5891_v37 = vld [vmem:[#allocation7 + $0x1244] sm:$0xff] }
 0x4af   : > { %7098 = vmatpush1.bf16.msra.mxu1 %v12305_v61  ;;  %8839 = vmatpush1.bf16.msra.mxu0 %v12571_v47  ;;  %v12607_v61 = vcombine.high %v7429_v44, %v7432_v45  ;;  %v5871_v47 = vld [vmem:[#allocation7 + $0xe84] sm:$0xff]  ;;  %v7471_v45 = vld [vmem:[#allocation7 + $0x1c9c] sm:$0xff] }
 0x4b0   : > { %7099 = vmatprep.subr.bf16.mxu1 %v12310_v48  ;;  %8840 = vmatprep.subr.bf16.mxu0 %v12577_v49  ;;  %v5873_v48 = vld [vmem:[#allocation7 + $0xee4] sm:$0xff]  ;;  %v7435_v49 = vld [vmem:[#allocation7 + $0x181c] sm:$0xff] }
 0x4b1   : > { %v12612_v34 = vcombine.high %v7435_v49, %v7438_v52  ;;  %v12337_v62 = vcombine.low %v5871_v47, %v5873_v48  ;;  %v12611_v33 = vcombine.low %v7435_v49, %v7438_v52  ;;  %v5893_v23 = vld [vmem:[#allocation7 + $0x12a4] sm:$0xff]  ;;  %v7477_v52 = vld [vmem:[#allocation7 + $0x1d5c] sm:$0xff] }
 0x4b2   : > { %v5895_v42 = vld [vmem:[#allocation7 + $0x1304] sm:$0xff] }
 0x4b3   : > { %7100 = vmatpush1.bf16.msra.mxu1 %v12309_v51  ;;  %8841 = vmatpush1.bf16.msra.mxu0 %v12576_v12  ;;  %v5875_v51 = vld [vmem:[#allocation7 + $0xf44] sm:$0xff] }
 0x4b4   : > { %7101 = vmatprep.subr.bf16.mxu1 %v12314_v28  ;;  %8842 = vmatprep.subr.bf16.mxu0 %v12582_v41  ;;  %v5877_v12 = vld [vmem:[#allocation7 + $0xfa4] sm:$0xff]  ;;  %v7441_v28 = vld [vmem:[#allocation7 + $0x18dc] sm:$0xff] }
 0x4b5   : > { %v7444_v41 = vld [vmem:[#allocation7 + $0x193c] sm:$0xff]  ;;  %v12342_v29 = vcombine.high %v5875_v51, %v5877_v12  ;;  %v5897_v44 = vld [vmem:[#allocation7 + $0x1364] sm:$0xff] }
 0x4b6   : > { %v12616_v35 = vcombine.low %v7441_v28, %v7444_v41  ;;  %v5901_v49 = vld [vmem:[#allocation7 + $0x1424] sm:$0xff] }
 0x4b7   : > { %7102 = vmatpush1.bf16.msra.mxu1 %v12313_v1  ;;  %8843 = vmatpush1.bf16.msra.mxu0 %v12581_v3  ;;  %v5881_v1 = vld [vmem:[#allocation7 + $0x1064] sm:$0xff]  ;;  %v7447_v3 = vld [vmem:[#allocation7 + $0x199c] sm:$0xff] }
 0x4b8   : > { %7103 = vmatprep.subr.bf16.mxu1 %v12318_v7  ;;  %8844 = vmatprep.subr.bf16.mxu0 %v12587_v11  ;;  %v7450_v7 = vld [vmem:[#allocation7 + $0x19fc] sm:$0xff]  ;;  %v12341_v11 = vcombine.low %v5875_v51, %v5877_v12  ;;  %v12346_v27 = vcombine.high %v5879_v0, %v5881_v1  ;;  %v5903_v12 = vld [vmem:[#allocation7 + $0x1484] sm:$0xff] }
 0x4b9   : > { %v12622_v24 = vcombine.high %v7447_v3, %v7450_v7  ;;  %v12621_v31 = vcombine.low %v7447_v3, %v7450_v7  ;;  %v5909_v3 = vld [vmem:[#allocation7 + $0x15a4] sm:$0xff]  ;;  %v7489_v7 = vld [vmem:[#allocation7 + $0x1edc] sm:$0xff] }
 0x4bb   : > { %7104 = vmatpush1.bf16.msra.mxu1 %v12317_v16  ;;  %8845 = vmatpush1.bf16.msra.mxu0 %v12586_v4  ;;  %v5885_v16 = vld [vmem:[#allocation7 + $0x1124] sm:$0xff]  ;;  %v7453_v4 = vld [vmem:[#allocation7 + $0x1a5c] sm:$0xff] }
 0x4bc   : > { %7105 = vmatprep.subr.bf16.mxu1 %v12322_v40  ;;  %8846 = vmatprep.subr.bf16.mxu0 %v12592_v53  ;;  %v7456_v40 = vld [vmem:[#allocation7 + $0x1abc] sm:$0xff]  ;;  %v12345_v53 = vcombine.low %v5879_v0, %v5881_v1  ;;  %v5907_v1 = vld [vmem:[#allocation7 + $0x1544] sm:$0xff] }
 0x4bd   : > { %v12627_v20 = vcombine.high %v7453_v4, %v7456_v40 }
 0x4bf   : > { %7106 = vmatpush1.bf16.msra.mxu1 %v12321_v54  ;;  %8847 = vmatpush1.bf16.msra.mxu0 %v12591_v25  ;;  %v7459_v54 = vld [vmem:[#allocation7 + $0x1b1c] sm:$0xff] }
 0x4c0   : > { %7118 = vmatprep.subr.bf16.mxu1 %v12326_v32  ;;  %8848 = vmatprep.subr.bf16.mxu0 %v12597_v58  ;;  %v7462_v25 = vld [vmem:[#allocation7 + $0x1b7c] sm:$0xff]  ;;  %v12349_v32 = vcombine.low %v5883_v13, %v5885_v16  ;;  %v12626_v58 = vcombine.low %v7453_v4, %v7456_v40  ;;  %v5913_v4 = vld [vmem:[#allocation7 + $0x1664] sm:$0xff] }
 0x4c1   : > { %v7495_v40 = vld [vmem:[#allocation7 + $0x1f9c] sm:$0xff] }
 0x4c2   : > { %7108 = vmatmul.mubr.bf16.vlgmr.msra.gmra.mrb[36].mxu1 %v14809_v6  ;;  %v12338_v6 = vcombine.high %v5871_v47, %v5873_v48  ;;  %v5899_v48 = vld [vmem:[#allocation7 + $0x13c4] sm:$0xff] }
 0x4c3   : > { %7119 = vmatpush1.bf16.msra.mxu1 %v12325_v30  ;;  %8849 = vmatpush1.bf16.msra.mxu0 %v12596_v5  ;;  %v7468_v30 = vld [vmem:[#allocation7 + $0x1c3c] sm:$0xff]  ;;  %v12353_v5 = vcombine.low %v5887_v63, %v5889_v43  ;;  %v5915_v43 = vld [vmem:[#allocation7 + $0x16c4] sm:$0xff] }
 0x4c4   : > { %7120 = vmatprep.subr.bf16.mxu1 %v12330_v36  ;;  %8850 = vmatprep.subr.bf16.mxu0 %v12602_v39  ;;  %v12631_v36 = vcombine.low %v7459_v54, %v7462_v25  ;;  %v12358_v39 = vcombine.high %v5891_v37, %v5893_v23  ;;  %v12637_v60 = vcombine.high %v7465_v50, %v7468_v30 }
 0x4c5   : > { %7150 = vmatprep.mubr.bf16.mxu1 %v14813_v19  ;;  %v12617_v19 = vcombine.high %v7441_v28, %v7444_v41  ;;  %v5905_v28 = vld [vmem:[#allocation7 + $0x14e4] sm:$0xff]  ;;  %v7483_v41 = vld [vmem:[#allocation7 + $0x1e1c] sm:$0xff] }
 0x4c7   : > { %7121 = vmatpush1.bf16.msra.mxu1 %v12329_v46  ;;  %8851 = vmatpush1.bf16.msra.mxu0 %v12601_v18  ;;  %v7474_v46 = vld [vmem:[#allocation7 + $0x1cfc] sm:$0xff]  ;;  %v12357_v18 = vcombine.low %v5891_v37, %v5893_v23  ;;  %v5919_v23 = vld [vmem:[#allocation7 + $0x1784] sm:$0xff] }
 0x4c8   : > { %7122 = vmatprep.subr.bf16.mxu1 %v12334_v17  ;;  %8852 = vmatprep.subr.bf16.mxu0 %v12607_v61  ;;  %v12636_v17 = vcombine.low %v7465_v50, %v7468_v30  ;;  %v12362_v61 = vcombine.high %v5895_v42, %v5897_v44  ;;  %v12642_v47 = vcombine.high %v7471_v45, %v7474_v46  ;;  %v5921_v50 = vld [vmem:[#allocation7 + $0x17e4] sm:$0xff]  ;;  %v7507_v30 = vld [vmem:[#allocation7 + $0x211c] sm:$0xff] }
 0x4cb   : > { %7123 = vmatpush1.bf16.msra.mxu1 %v12333_v22  ;;  %8853 = vmatpush1.bf16.msra.mxu0 %v12606_v56  ;;  %v7480_v22 = vld [vmem:[#allocation7 + $0x1dbc] sm:$0xff]  ;;  %v12361_v56 = vcombine.low %v5895_v42, %v5897_v44  ;;  %v5923_v44 = vld [vmem:[#allocation7 + $0x1844] sm:$0xff] }
 0x4cc   : > { %7124 = vmatprep.subr.bf16.mxu1 %v12338_v6  ;;  %8865 = vmatprep.subr.bf16.mxu0 %v12612_v34  ;;  %v12641_v6 = vcombine.low %v7471_v45, %v7474_v46  ;;  %v12366_v34 = vcombine.high %v5899_v48, %v5901_v49  ;;  %v12647_v51 = vcombine.high %v7477_v52, %v7480_v22  ;;  %v5925_v45 = vld [vmem:[#allocation7 + $0x18a4] sm:$0xff]  ;;  %v7513_v46 = vld [vmem:[#allocation7 + $0x21dc] sm:$0xff] }
 0x4ce   : > { %8855 = vmatmul.mubr.bf16.vlgmr.msra.gmra.mrb[36].mxu0 %v14783_v59  ;;  %v12350_v59 = vcombine.high %v5883_v13, %v5885_v16  ;;  %v5911_v16 = vld [vmem:[#allocation7 + $0x1604] sm:$0xff] }
 0x4cf   : > { %7125 = vmatpush1.bf16.msra.mxu1 %v12337_v62  ;;  %8866 = vmatpush1.bf16.msra.mxu0 %v12611_v33  ;;  %v7486_v62 = vld [vmem:[#allocation7 + $0x1e7c] sm:$0xff]  ;;  %v12365_v33 = vcombine.low %v5899_v48, %v5901_v49  ;;  %v5927_v49 = vld [vmem:[#allocation7 + $0x1904] sm:$0xff] }
 0x4d0   : > { %7126 = vmatprep.subr.bf16.mxu1 %v12342_v29  ;;  %8867 = vmatprep.subr.bf16.mxu0 %v12617_v19  ;;  %v12646_v29 = vcombine.low %v7477_v52, %v7480_v22  ;;  %v12370_v19 = vcombine.high %v5903_v12, %v5905_v28  ;;  %v12652_v0 = vcombine.high %v7483_v41, %v7486_v62  ;;  %v5929_v52 = vld [vmem:[#allocation7 + $0x1964] sm:$0xff]  ;;  %v7519_v22 = vld [vmem:[#allocation7 + $0x229c] sm:$0xff] }
 0x4d1   : > { %8897 = vmatprep.mubr.bf16.mxu0 %v14787_v55  ;;  %v12632_v55 = vcombine.high %v7459_v54, %v7462_v25  ;;  %v5917_v54 = vld [vmem:[#allocation7 + $0x1724] sm:$0xff]  ;;  %v7501_v25 = vld [vmem:[#allocation7 + $0x205c] sm:$0xff] }
 0x4d3   : > { %7127 = vmatpush1.bf16.msra.mxu1 %v12341_v11  ;;  %8868 = vmatpush1.bf16.msra.mxu0 %v12616_v35  ;;  %v7492_v11 = vld [vmem:[#allocation7 + $0x1f3c] sm:$0xff]  ;;  %v12369_v35 = vcombine.low %v5903_v12, %v5905_v28  ;;  %v5931_v28 = vld [vmem:[#allocation7 + $0x19c4] sm:$0xff] }
 0x4d4   : > { %7128 = vmatprep.subr.bf16.mxu1 %v12346_v27  ;;  %8869 = vmatprep.subr.bf16.mxu0 %v12622_v24  ;;  %v12651_v27 = vcombine.low %v7483_v41, %v7486_v62  ;;  %v12374_v24 = vcombine.high %v5907_v1, %v5909_v3  ;;  %v12657_v13 = vcombine.high %v7489_v7, %v7492_v11  ;;  %v5933_v41 = vld [vmem:[#allocation7 + $0x1a24] sm:$0xff]  ;;  %v7525_v62 = vld [vmem:[#allocation7 + $0x235c] sm:$0xff] }
 0x4d7   : > { %7129 = vmatpush1.bf16.msra.mxu1 %v12345_v53  ;;  %8870 = vmatpush1.bf16.msra.mxu0 %v12621_v31  ;;  %v7498_v53 = vld [vmem:[#allocation7 + $0x1ffc] sm:$0xff]  ;;  %v12373_v31 = vcombine.low %v5907_v1, %v5909_v3  ;;  %v12398_v1 = vcombine.high %v5931_v28, %v5933_v41 }
 0x4d8   : > { %7130 = vmatprep.subr.bf16.mxu1 %v12350_v59  ;;  %8871 = vmatprep.subr.bf16.mxu0 %v12627_v20  ;;  %v12656_v59 = vcombine.low %v7489_v7, %v7492_v11  ;;  %v12378_v20 = vcombine.high %v5911_v16, %v5913_v4  ;;  %v12662_v63 = vcombine.high %v7495_v40, %v7498_v53  ;;  %v5935_v7 = vld [vmem:[#allocation7 + $0x1a84] sm:$0xff] }
 0x4d9   : > { %v5937_v11 = vld [vmem:[#allocation7 + $0x1ae4] sm:$0xff] }
 0x4db   : > { %7131 = vmatpush1.bf16.msra.mxu1 %v12349_v32  ;;  %8872 = vmatpush1.bf16.msra.mxu0 %v12626_v58  ;;  %v7504_v32 = vld [vmem:[#allocation7 + $0x20bc] sm:$0xff]  ;;  %v12377_v58 = vcombine.low %v5911_v16, %v5913_v4  ;;  %v12402_v4 = vcombine.high %v5935_v7, %v5937_v11 }
 0x4dc   : > { %7132 = vmatprep.subr.bf16.mxu1 %v12354_v14  ;;  %8873 = vmatprep.subr.bf16.mxu0 %v12632_v55  ;;  %v12661_v14 = vcombine.low %v7495_v40, %v7498_v53  ;;  %v12382_v55 = vcombine.high %v5915_v43, %v5917_v54  ;;  %v12667_v37 = vcombine.high %v7501_v25, %v7504_v32  ;;  %v7245_v53 = vld [vmem:[#allocation7 + $0x2c] sm:$0xf] }
 0x4df   : > { %7133 = vmatpush1.bf16.msra.mxu1 %v12353_v5  ;;  %8874 = vmatpush1.bf16.msra.mxu0 %v12631_v36  ;;  %v7510_v5 = vld [vmem:[#allocation7 + $0x217c] sm:$0xff]  ;;  %v12381_v36 = vcombine.low %v5915_v43, %v5917_v54  ;;  %v7302_v43 = vld [vmem:[#allocation7 + $0x74c] sm:$0xf]  ;;  %v12401_v54 = vcombine.low %v5935_v7, %v5937_v11 }
 0x4e0   : > { %7134 = vmatprep.subr.bf16.mxu1 %v12358_v39  ;;  %8875 = vmatprep.subr.bf16.mxu0 %v12637_v60  ;;  %v12666_v39 = vcombine.low %v7501_v25, %v7504_v32  ;;  %v12386_v60 = vcombine.high %v5919_v23, %v5921_v50  ;;  %v12672_v42 = vcombine.high %v7507_v30, %v7510_v5  ;;  %v7323_v7 = vld [vmem:[#allocation7 + $0x9ec] sm:$0xf] }
 0x4e1   : > { %v7326_v11 = vld [vmem:[#allocation7 + $0xa4c] sm:$0xf] }
 0x4e3   : > { %7135 = vmatpush1.bf16.msra.mxu1 %v12357_v18  ;;  %8876 = vmatpush1.bf16.msra.mxu0 %v12636_v17  ;;  %v7516_v18 = vld [vmem:[#allocation7 + $0x223c] sm:$0xff]  ;;  %v12385_v17 = vcombine.low %v5919_v23, %v5921_v50  ;;  %v5945_v23 = vld [vmem:[#allocation7 + $0x1c64] sm:$0xff]  ;;  %v7305_v50 = vld [vmem:[#allocation7 + $0x7ac] sm:$0xf] }
 0x4e4   : > { %7136 = vmatprep.subr.bf16.mxu1 %v12362_v61  ;;  %8877 = vmatprep.subr.bf16.mxu0 %v12642_v47  ;;  %v12671_v61 = vcombine.low %v7507_v30, %v7510_v5  ;;  %v12390_v47 = vcombine.high %v5923_v44, %v5925_v45  ;;  %v12677_v48 = vcombine.high %v7513_v46, %v7516_v18  ;;  %v7308_v30 = vld [vmem:[#allocation7 + $0x80c] sm:$0xf]  ;;  %v14842_v5 = vld [vmem:[%s14553_s13 + $0x10] ss:$24 sps:$4 sm:$0xff]  }
 0x4e7   : > { %7137 = vmatpush1.bf16.msra.mxu1 %v12361_v56  ;;  %8878 = vmatpush1.bf16.msra.mxu0 %v12641_v6  ;;  %v7522_v56 = vld [vmem:[#allocation7 + $0x22fc] sm:$0xff]  ;;  %v12389_v6 = vcombine.low %v5923_v44, %v5925_v45  ;;  %v7257_v44 = vld [vmem:[#allocation7 + $0x1ac] sm:$0xf] }
 0x4e8   : > { %7138 = vmatprep.subr.bf16.mxu1 %v12366_v34  ;;  %8879 = vmatprep.subr.bf16.mxu0 %v12647_v51  ;;  %v12676_v34 = vcombine.low %v7513_v46, %v7516_v18  ;;  %v12394_v51 = vcombine.high %v5927_v49, %v5929_v52  ;;  %v12682_v12 = vcombine.high %v7519_v22, %v7522_v56  ;;  %v7260_v45 = vld [vmem:[#allocation7 + $0x20c] sm:$0xf]  ;;  %v5947_v46 = vld [vmem:[#allocation7 + $0x1cc4] sm:$0xff] }
 0x4e9   : > { %v5949_v18 = vld [vmem:[#allocation7 + $0x1d24] sm:$0xff] }
 0x4eb   : > { %7139 = vmatpush1.bf16.msra.mxu1 %v12365_v33  ;;  %8880 = vmatpush1.bf16.msra.mxu0 %v12646_v29  ;;  %v7528_v33 = vld [vmem:[#allocation7 + $0x23bc] sm:$0xff] }
 0x4ec   : > { %7140 = vmatprep.subr.bf16.mxu1 %v12370_v19  ;;  %8881 = vmatprep.subr.bf16.mxu0 %v12652_v0  ;;  %v13847_v29 = vld [vmem:[%s14553_s13 + $0x8] ss:$24 sps:$4 sm:$0xff]   ;;  %v12393_v19 = vcombine.low %v5927_v49, %v5929_v52  ;;  %v12681_v0 = vcombine.low %v7519_v22, %v7522_v56  ;;  %v12687_v3 = vcombine.high %v7525_v62, %v7528_v33  ;;  %v7263_v56 = vld [vmem:[#allocation7 + $0x26c] sm:$0xf] }
 0x4ed   : > { %v12686_v16 = vcombine.low %v7525_v62, %v7528_v33  ;;  %v12465_v49 = vcombine.low %v7257_v44, %v7260_v45  ;;  %v12414_v52 = vcombine.high %v5947_v46, %v5949_v18 }
 0x4ef   : > { %7141 = vmatpush1.bf16.msra.mxu1 %v12369_v35  ;;  %8882 = vmatpush1.bf16.msra.mxu0 %v12651_v27  ;;  %v7293_v35 = vld [vmem:[#allocation7 + $0x62c] sm:$0xf] }
 0x4f0   : > { %7142 = vmatprep.subr.bf16.mxu1 %v12374_v24  ;;  %8883 = vmatprep.subr.bf16.mxu0 %v12657_v13  ;;  %v7296_v27 = vld [vmem:[#allocation7 + $0x68c] sm:$0xf]  ;;  %v12397_v13 = vcombine.low %v5931_v28, %v5933_v41  ;;  %v12413_v41 = vcombine.low %v5947_v46, %v5949_v18 }
 0x4f1   : > { %v14838_v24 = vld [vmem:[%s14553_s13 + $0x14] ss:$24 sps:$4 sm:$0xff]   ;;  %v12495_v40 = vcombine.low %v7293_v35, %v7296_v27 }
 0x4f2   : > { %v7320_v28 = vld [vmem:[#allocation7 + $0x98c] sm:$0xf] }
 0x4f3   : > { %7143 = vmatpush1.bf16.msra.mxu1 %v12373_v31  ;;  %8884 = vmatpush1.bf16.msra.mxu0 %v12656_v59  ;;  %v7248_v31 = vld [vmem:[#allocation7 + $0x8c] sm:$0xf]  ;;  %v5939_v59 = vld [vmem:[#allocation7 + $0x1b44] sm:$0xff] }
 0x4f4   : > { %7144 = vmatprep.subr.bf16.mxu1 %v12378_v20  ;;  %8885 = vmatprep.subr.bf16.mxu0 %v12662_v63  ;;  %v5941_v20 = vld [vmem:[#allocation7 + $0x1ba4] sm:$0xff]  ;;  %v7299_v63 = vld [vmem:[#allocation7 + $0x6ec] sm:$0xf]  ;;  %v12455_v25 = vcombine.low %v7245_v53, %v7248_v31 }
 0x4f5   : > { %v12406_v32 = vcombine.high %v5939_v59, %v5941_v20  ;;  %v5959_v53 = vld [vmem:[#allocation7 + $0x1f04] sm:$0xff] }
 0x4f6   : > { %v5961_v31 = vld [vmem:[#allocation7 + $0x1f64] sm:$0xff] }
 0x4f7   : > { %7145 = vmatpush1.bf16.msra.mxu1 %v12377_v58  ;;  %8886 = vmatpush1.bf16.msra.mxu0 %v12661_v14  ;;  %v12500_v58 = vcombine.low %v7299_v63, %v7302_v43  ;;  %v7251_v14 = vld [vmem:[#allocation7 + $0xec] sm:$0xf] }
 0x4f8   : > { %7146 = vmatprep.subr.bf16.mxu1 %v12382_v55  ;;  %8887 = vmatprep.subr.bf16.mxu0 %v12667_v37  ;;  %v7254_v55 = vld [vmem:[#allocation7 + $0x14c] sm:$0xf]  ;;  %v5943_v37 = vld [vmem:[#allocation7 + $0x1c04] sm:$0xff] }
 0x4fb   : > { %7147 = vmatpush1.bf16.msra.mxu1 %v12381_v36  ;;  %8888 = vmatpush1.bf16.msra.mxu0 %v12666_v39  ;;  %v12405_v36 = vcombine.low %v5939_v59, %v5941_v20  ;;  %v12460_v39 = vcombine.low %v7251_v14, %v7254_v55  ;;  %v7329_v59 = vld [vmem:[#allocation7 + $0xaac] sm:$0xf]  ;;  %v5963_v14 = vld [vmem:[#allocation7 + $0x1fc4] sm:$0xff] }
 0x4fc   : > { %7148 = vmatprep.subr.bf16.mxu1 %v12386_v60  ;;  %8889 = vmatprep.subr.bf16.mxu0 %v12672_v42  ;;  %v12410_v60 = vcombine.high %v5943_v37, %v5945_v23  ;;  %v12505_v42 = vcombine.low %v7305_v50, %v7308_v30  ;;  %v7332_v20 = vld [vmem:[#allocation7 + $0xb0c] sm:$0xf]  ;;  %v5965_v55 = vld [vmem:[#allocation7 + $0x2024] sm:$0xff] }
 0x4fd   : > { %v12430_v46 = vcombine.high %v5963_v14, %v5965_v55 }
 0x4ff   : > { %7149 = vmatpush1.bf16.msra.mxu1 %v12385_v17  ;;  %8890 = vmatpush1.bf16.msra.mxu0 %v12671_v61  ;;  %v7311_v17 = vld [vmem:[#allocation7 + $0x86c] sm:$0xf] }
 0x500   : > { %7161 = vmatprep.subr.bf16.mxu1 %v12390_v47  ;;  %8891 = vmatprep.subr.bf16.mxu0 %v12677_v48  ;;  %v7314_v61 = vld [vmem:[#allocation7 + $0x8cc] sm:$0xf]  ;;  %v12409_v48 = vcombine.low %v5943_v37, %v5945_v23 }
 0x501   : > { %v14846_v47 = vld [vmem:[%s14553_s13 + $0x4] ss:$24 sps:$4 sm:$0xff]   ;;  %v12510_v22 = vcombine.low %v7311_v17, %v7314_v61 }
 0x502   : > { %7151 = vmatmul.mubr.bf16.vlgmr.msra.gmra.mrb[36].mxu1 %v13847_v29  ;;  %v7335_v37 = vld [vmem:[#allocation7 + $0xb6c] sm:$0xf]  ;;  %v5967_v17 = vld [vmem:[#allocation7 + $0x2084] sm:$0xff] }
 0x503   : > { %7162 = vmatpush1.bf16.msra.mxu1 %v12389_v6  ;;  %8892 = vmatpush1.bf16.msra.mxu0 %v12676_v34  ;;  %v7266_v6 = vld [vmem:[#allocation7 + $0x2cc] sm:$0xf]  ;;  %v5951_v34 = vld [vmem:[#allocation7 + $0x1d84] sm:$0xff] }
 0x504   : > { %7163 = vmatprep.subr.bf16.mxu1 %v12394_v51  ;;  %8893 = vmatprep.subr.bf16.mxu0 %v12682_v12  ;;  %v5953_v51 = vld [vmem:[#allocation7 + $0x1de4] sm:$0xff]  ;;  %v7317_v12 = vld [vmem:[#allocation7 + $0x92c] sm:$0xf]  ;;  %v12470_v62 = vcombine.low %v7263_v56, %v7266_v6  ;;  %v12429_v56 = vcombine.low %v5963_v14, %v5965_v55 }
 0x505   : > { %7193 = vmatprep.mubr.bf16.mxu1 %v14838_v24  ;;  %v12418_v33 = vcombine.high %v5951_v34, %v5953_v51  ;;  %v12515_v29 = vcombine.low %v7317_v12, %v7320_v28  ;;  %v12417_v35 = vcombine.low %v5951_v34, %v5953_v51  ;;  %v7338_v23 = vld [vmem:[#allocation7 + $0xbcc] sm:$0xf]  ;;  %v5969_v61 = vld [vmem:[#allocation7 + $0x20e4] sm:$0xff] }
 0x506   : > { %v12530_v18 = vcombine.low %v7335_v37, %v7338_v23  ;;  %v12434_v34 = vcombine.high %v5967_v17, %v5969_v61  ;;  %v5981_v14 = vld [vmem:[#allocation7 + $0x2324] sm:$0xff]  ;;  %v7503_v55 = vld [vmem:[#allocation7 + $0x206c] sm:$0xf] }
 0x507   : > { %7164 = vmatpush1.bf16.msra.mxu1 %v12393_v19  ;;  %8894 = vmatpush1.bf16.msra.mxu0 %v12681_v0  ;;  %v7269_v19 = vld [vmem:[#allocation7 + $0x32c] sm:$0xf] }
 0x508   : > { %7165 = vmatprep.subr.bf16.mxu1 %v12398_v1  ;;  %8895 = vmatprep.subr.bf16.mxu0 %v12687_v3  ;;  %v7272_v0 = vld [vmem:[#allocation7 + $0x38c] sm:$0xf]  ;;  %v5955_v1 = vld [vmem:[#allocation7 + $0x1e44] sm:$0xff] }
 0x509   : > { %v5957_v3 = vld [vmem:[#allocation7 + $0x1ea4] sm:$0xff]  ;;  %v12475_v27 = vcombine.low %v7269_v19, %v7272_v0  ;;  %v7506_v37 = vld [vmem:[#allocation7 + $0x20cc] sm:$0xf] }
 0x50a   : > { %v12421_v63 = vcombine.low %v5955_v1, %v5957_v3  ;;  %v5973_v0 = vld [vmem:[#allocation7 + $0x21a4] sm:$0xff] }
 0x50b   : > { %7166 = vmatpush1.bf16.msra.mxu1 %v12397_v13  ;;  %8896 = vmatpush1.bf16.msra.mxu0 %v12686_v16  ;;  %v12422_v13 = vcombine.high %v5955_v1, %v5957_v3  ;;  %v12520_v16 = vcombine.low %v7323_v7, %v7326_v11  ;;  %v7491_v1 = vld [vmem:[#allocation7 + $0x1eec] sm:$0xf]  ;;  %v12433_v7 = vcombine.low %v5967_v17, %v5969_v61 }
 0x50c   : > { %7167 = vmatprep.subr.bf16.mxu1 %v12402_v4  ;;  %13166 = vmatprep.subr.bf16.mxu0 %v12495_v40  ;;  %v7275_v4 = vld [vmem:[#allocation7 + $0x3ec] sm:$0xf] }
 0x50d   : > { %v7278_v40 = vld [vmem:[#allocation7 + $0x44c] sm:$0xf] }
 0x50e   : > { %8898 = vmatmul.mubr.bf16.vlgmr.msra.gmra.mrb[36].mxu0 %v14842_v5  ;;  %v12480_v43 = vcombine.low %v7275_v4, %v7278_v40  ;;  %v7494_v3 = vld [vmem:[#allocation7 + $0x1f4c] sm:$0xf]  ;;  %v5975_v4 = vld [vmem:[#allocation7 + $0x2204] sm:$0xff] }
 0x50f   : > { %7168 = vmatpush1.bf16.msra.mxu1 %v12401_v54  ;;  %13167 = vmatpush3.bf16.msra.mxu0 %v12455_v25  ;;  %v12426_v54 = vcombine.high %v5959_v53, %v5961_v31  ;;  %v12525_v25 = vcombine.low %v7329_v59, %v7332_v20  ;;  %v5977_v40 = vld [vmem:[#allocation7 + $0x2264] sm:$0xff] }
 0x510   : > { %7169 = vmatprep.subr.bf16.mxu1 %v12406_v32  ;;  %13168 = vmatprep.subr.bf16.mxu0 %v12500_v58  ;;  %v7281_v32 = vld [vmem:[#allocation7 + $0x4ac] sm:$0xf]  ;;  %v14858_v59 = vld [vmem:[%s14553_s13] ss:$24 sps:$4 sm:$0xff]   ;;  %v12441_v23 = vcombine.low %v5975_v4, %v5977_v40 }
 0x511   : > { %9069 = vmatprep.mubr.bf16.mxu0 %v14846_v47  ;;  %v7284_v58 = vld [vmem:[#allocation7 + $0x50c] sm:$0xf] }
 0x513   : > { %7170 = vmatpush1.bf16.msra.mxu1 %v12405_v36  ;;  %13169 = vmatpush3.bf16.msra.mxu0 %v12460_v39  ;;  %v12425_v36 = vcombine.low %v5959_v53, %v5961_v31  ;;  %v12485_v39 = vcombine.low %v7281_v32, %v7284_v58  ;;  %v7497_v53 = vld [vmem:[#allocation7 + $0x1fac] sm:$0xf]  ;;  %v5979_v58 = vld [vmem:[#allocation7 + $0x22c4] sm:$0xff] }
 0x514   : > { %7171 = vmatprep.subr.bf16.mxu1 %v12410_v60  ;;  %13170 = vmatprep.subr.bf16.mxu0 %v12505_v42  ;;  %v7287_v60 = vld [vmem:[#allocation7 + $0x56c] sm:$0xf] }
 0x515   : > { %v7290_v42 = vld [vmem:[#allocation7 + $0x5cc] sm:$0xf] }
 0x516   : > { %v12490_v6 = vcombine.low %v7287_v60, %v7290_v42  ;;  %v7500_v31 = vld [vmem:[#allocation7 + $0x200c] sm:$0xf]  ;;  %v5983_v42 = vld [vmem:[#allocation7 + $0x2384] sm:$0xff] }
 0x517   : > { %7172 = vmatpush1.bf16.msra.mxu1 %v12409_v48  ;;  %13171 = vmatpush3.bf16.msra.mxu0 %v12465_v49  ;;  %v7485_v49 = vld [vmem:[#allocation7 + $0x1e2c] sm:$0xf] }
 0x518   : > { %7173 = vmatprep.subr.bf16.mxu1 %v12414_v52  ;;  %13172 = vmatprep.subr.bf16.mxu0 %v12510_v22  ;;  %v7488_v52 = vld [vmem:[#allocation7 + $0x1e8c] sm:$0xf] }
 0x519   : > { %v12655_v28 = vcombine.low %v7485_v49, %v7488_v52  ;;  %v7452_v32 = vld [vmem:[#allocation7 + $0x1a0c] sm:$0xf]  ;;  %v7244_v52 = vld [vmem:[#allocation7 + $0x24] sm:$0xff] }
 0x51a   : > { %v7458_v60 = vld [vmem:[#allocation7 + $0x1acc] sm:$0xf] }
 0x51b   : > { %7174 = vmatpush1.bf16.msra.mxu1 %v12413_v41  ;;  %13173 = vmatpush3.bf16.msra.mxu0 %v12470_v62  ;;  %v7437_v41 = vld [vmem:[#allocation7 + $0x182c] sm:$0xf] }
 0x51c   : > { %7175 = vmatprep.subr.bf16.mxu1 %v12418_v33  ;;  %13174 = vmatprep.subr.bf16.mxu0 %v12515_v29  ;;  %v7440_v62 = vld [vmem:[#allocation7 + $0x188c] sm:$0xf]  ;;  %v5971_v33 = vld [vmem:[#allocation7 + $0x2144] sm:$0xff] }
 0x51d   : > { %v12615_v11 = vcombine.low %v7437_v41, %v7440_v62  ;;  %v12437_v20 = vcombine.low %v5971_v33, %v5973_v0  ;;  %v7464_v49 = vld [vmem:[#allocation7 + $0x1b8c] sm:$0xf] }
 0x51e   : > { %v7467_v41 = vld [vmem:[#allocation7 + $0x1bec] sm:$0xf] }
 0x51f   : > { %7176 = vmatpush1.bf16.msra.mxu1 %v12417_v35  ;;  %13175 = vmatpush3.bf16.msra.mxu0 %v12475_v27  ;;  %v12438_v35 = vcombine.high %v5971_v33, %v5973_v0  ;;  %v12660_v27 = vcombine.low %v7491_v1, %v7494_v3  ;;  %v7470_v62 = vld [vmem:[#allocation7 + $0x1c4c] sm:$0xf]  ;;  %v7250_v33 = vld [vmem:[#allocation7 + $0xe4] sm:$0xff] }
 0x520   : > { %7177 = vmatprep.subr.bf16.mxu1 %v12422_v13  ;;  %13176 = vmatprep.subr.bf16.mxu0 %v12520_v16  ;;  %v7443_v13 = vld [vmem:[#allocation7 + $0x18ec] sm:$0xf]  ;;  %v7253_v0 = vld [vmem:[#allocation7 + $0x144] sm:$0xff] }
 0x521   : > { %v7066_v50 = vpop.f32.mrb[32].mxu0  ;;  %v7446_v16 = vld [vmem:[#allocation7 + $0x194c] sm:$0xf] }
 0x522   : > { %v7068_v30 = vpop.f32.mrb[33].mxu0  ;;  %v7521_v1 = vld [vmem:[#allocation7 + $0x22ac] sm:$0xf] }
 0x523   : > { %7178 = vmatpush1.bf16.msra.mxu1 %v12421_v63  ;;  %13177 = vmatpush3.bf16.msra.mxu0 %v12480_v43  ;;  %v7204_v44 = vrot.slane %v7068_v30, 1  ;;  %v7070_v45 = vpop.f32.mrb[34].mxu0  ;;  %v12620_v63 = vcombine.low %v7443_v13, %v7446_v16  ;;  %v12442_v43 = vcombine.high %v5975_v4, %v5977_v40  ;;  %v12446_v30 = vcombine.high %v5979_v58, %v5981_v14  ;;  %v7524_v3 = vld [vmem:[#allocation7 + $0x230c] sm:$0xf]  ;;  %v7256_v4 = vld [vmem:[#allocation7 + $0x1a4] sm:$0xff] }
 0x524   : > { %7179 = vmatprep.subr.bf16.mxu1 %v12426_v54  ;;  %13178 = vmatprep.subr.bf16.mxu0 %v12525_v25  ;;  %v7072_v48 = vpop.f32.mrb[35].mxu0  ;;  %v12665_v54 = vcombine.low %v7497_v53, %v7500_v31  ;;  %v7449_v25 = vld [vmem:[#allocation7 + $0x19ac] sm:$0xf]  ;;  %v7259_v40 = vld [vmem:[#allocation7 + $0x204] sm:$0xff] }
 0x525   : > { %v7205_v22 = vrot.slane %v7072_v48, 1  ;;  %v7461_v48 = vld [vmem:[#allocation7 + $0x1b2c] sm:$0xf] }
 0x526   : > { %v7473_v13 = vld [vmem:[#allocation7 + $0x1cac] sm:$0xf] }
 0x527   : > { %7180 = vmatpush1.bf16.msra.mxu1 %v12425_v36  ;;  %13179 = vmatpush3.bf16.msra.mxu0 %v12485_v39  ;;  %v7206_v51 = vsel %vm1699_vm1, %v7204_v44, %v7205_v22  ;;  %v7207_v12 = vsel %vm1699_vm1, %v7205_v22, %v7204_v44  ;;  %v12670_v36 = vcombine.low %v7503_v55, %v7506_v37  ;;  %v7455_v39 = vld [vmem:[#allocation7 + $0x1a6c] sm:$0xf]  ;;  %v5985_v44 = vld [vmem:[#allocation7 + $0x23e4] sm:$0xff]  ;;  %v9197_v55 = vld [vmem:[#allocation7 + $0x54] sm:$0xff] }
 0x528   : > { %7181 = vmatprep.subr.bf16.mxu1 %v12430_v46  ;;  %13180 = vmatprep.subr.bf16.mxu0 %v12530_v18  ;;  %v14853_v29 = vadd.f32 %v7206_v51, %v7066_v50  ;;  %v14855_v19 = vadd.f32 %v7207_v12, %v7070_v45  ;;  %v12625_v50 = vcombine.low %v7449_v25, %v7452_v32  ;;  %v7509_v45 = vld [vmem:[#allocation7 + $0x212c] sm:$0xf]  ;;  %v7247_v22 = vld [vmem:[#allocation7 + $0x84] sm:$0xff]  ;;  %v9200_v37 = vld [vmem:[#allocation7 + $0xb4] sm:$0xff] }
 0x529   : > { %v7512_v46 = vld [vmem:[#allocation7 + $0x218c] sm:$0xf]  ;;  %v12445_v18 = vcombine.low %v5979_v58, %v5981_v14  ;;  %v12630_v17 = vcombine.low %v7455_v39, %v7458_v60  ;;  %v12635_v51 = vcombine.low %v7461_v48, %v7464_v49  ;;  %v12454_v12 = vcombine.high %v7244_v52, %v7247_v22  ;;  %v7262_v58 = vld [vmem:[#allocation7 + $0x264] sm:$0xff]  ;;  %v9209_v48 = vld [vmem:[#allocation7 + $0x1d4] sm:$0xff] }
 0x52a   : > { %v12675_v61 = vcombine.low %v7509_v45, %v7512_v46  ;;  %v7476_v16 = vld [vmem:[#allocation7 + $0x1d0c] sm:$0xf]  ;;  %v7265_v14 = vld [vmem:[#allocation7 + $0x2c4] sm:$0xff]  ;;  %v12694_v46 = vcombine.low %v9197_v55, %v9200_v37  ;;  %v9212_v49 = vld [vmem:[#allocation7 + $0x234] sm:$0xff] }
 0x52b   : > { %7182 = vmatpush1.bf16.msra.mxu1 %v12429_v56  ;;  %13181 = vmatpush3.bf16.msra.mxu0 %v12490_v6  ;;  %v7515_v56 = vld [vmem:[#allocation7 + $0x21ec] sm:$0xf]  ;;  %v7268_v39 = vld [vmem:[#allocation7 + $0x324] sm:$0xff]  ;;  %v12468_v45 = vcombine.low %v7262_v58, %v7265_v14 }
 0x52c   : > { %7183 = vmatprep.subr.bf16.mxu1 %v12434_v34  ;;  %13210 = vmatprep.subr.bf16.mxu0 %v12655_v28  ;;  %v7518_v6 = vld [vmem:[#allocation7 + $0x224c] sm:$0xf]  ;;  %v12449_v34 = vcombine.low %v5983_v42, %v5985_v44  ;;  %v7271_v60 = vld [vmem:[#allocation7 + $0x384] sm:$0xff] }
 0x52d   : > { %v12680_v28 = vcombine.low %v7515_v56, %v7518_v6  ;;  %v7527_v53 = vld [vmem:[#allocation7 + $0x236c] sm:$0xf]  ;;  %v12705_v6 = vcombine.high %v9209_v48, %v9212_v49 }
 0x52e   : > { %9070 = vmatmul.mubr.bf16.vlgmr.msra.gmra.mrb[40].mxu0 %v14858_v59  ;;  %v7530_v31 = vld [vmem:[#allocation7 + $0x23cc] sm:$0xf] }
 0x52f   : > { %7184 = vmatpush1.bf16.msra.mxu1 %v12433_v7  ;;  %13211 = vmatpush3.bf16.msra.mxu0 %v12615_v11  ;;  %v12453_v7 = vcombine.low %v7244_v52, %v7247_v22  ;;  %v12640_v11 = vcombine.low %v7467_v41, %v7470_v62  ;;  %v7479_v25 = vld [vmem:[#allocation7 + $0x1d6c] sm:$0xf]  ;;  %v12473_v52 = vcombine.low %v7268_v39, %v7271_v60 }
 0x530   : > { %7185 = vmatprep.subr.bf16.mxu1 %v12438_v35  ;;  %13212 = vmatprep.subr.bf16.mxu0 %v12660_v27  ;;  %v12459_v35 = vcombine.high %v7250_v33, %v7253_v0  ;;  %v12685_v27 = vcombine.low %v7521_v1, %v7524_v3  ;;  %v7482_v32 = vld [vmem:[#allocation7 + $0x1dcc] sm:$0xf]  ;;  %v12704_v62 = vcombine.low %v9209_v48, %v9212_v49  ;;  %v7286_v1 = vld [vmem:[#allocation7 + $0x564] sm:$0xff] }
 0x531   : > { %9151 = vmatprep.mubr.bf16.mxu0 %v14838_v24  ;;  %v12450_v24 = vcombine.high %v5983_v42, %v5985_v44  ;;  %v9203_v42 = vld [vmem:[#allocation7 + $0x114] sm:$0xff]  ;;  %v7289_v3 = vld [vmem:[#allocation7 + $0x5c4] sm:$0xff] }
 0x532   : > { %v9206_v44 = vld [vmem:[#allocation7 + $0x174] sm:$0xff]  ;;  %v7304_v48 = vld [vmem:[#allocation7 + $0x7a4] sm:$0xff] }
 0x533   : > { %7186 = vmatpush1.bf16.msra.mxu1 %v12437_v20  ;;  %13213 = vmatpush3.bf16.msra.mxu0 %v12620_v63  ;;  %v12458_v20 = vcombine.low %v7250_v33, %v7253_v0  ;;  %v12645_v63 = vcombine.low %v7473_v13, %v7476_v16  ;;  %v12699_v22 = vcombine.low %v9203_v42, %v9206_v44  ;;  %v7307_v49 = vld [vmem:[#allocation7 + $0x804] sm:$0xff] }
 0x534   : > { %7187 = vmatprep.subr.bf16.mxu1 %v12442_v43  ;;  %13214 = vmatprep.subr.bf16.mxu0 %v12665_v54  ;;  %v12464_v43 = vcombine.high %v7256_v4, %v7259_v40  ;;  %v12690_v54 = vcombine.low %v7527_v53, %v7530_v31  ;;  %v12489_v53 = vcombine.high %v7286_v1, %v7289_v3 }
 0x537   : > { %7188 = vmatpush1.bf16.msra.mxu1 %v12441_v23  ;;  %13215 = vmatpush3.bf16.msra.mxu0 %v12625_v50  ;;  %v12463_v23 = vcombine.low %v7256_v4, %v7259_v40  ;;  %v12650_v50 = vcombine.low %v7479_v25, %v7482_v32 }
 0x538   : > { %7189 = vmatprep.subr.bf16.mxu1 %v12446_v30  ;;  %13216 = vmatprep.subr.bf16.mxu0 %v12670_v36  ;;  %v12469_v30 = vcombine.high %v7262_v58, %v7265_v14  ;;  %v12695_v36 = vcombine.high %v9197_v55, %v9200_v37  ;;  %v12488_v58 = vcombine.low %v7286_v1, %v7289_v3  ;;  %v9227_v14 = vld [vmem:[#allocation7 + $0x414] sm:$0xff]  ;;  %v7316_v3 = vld [vmem:[#allocation7 + $0x924] sm:$0xff] }
 0x539   : > { %v9230_v55 = vld [vmem:[#allocation7 + $0x474] sm:$0xff] }
 0x53b   : > { %7190 = vmatpush1.bf16.msra.mxu1 %v12445_v18  ;;  %13217 = vmatpush3.bf16.msra.mxu0 %v12630_v17  ;;  %v12474_v18 = vcombine.high %v7268_v39, %v7271_v60  ;;  %v12700_v17 = vcombine.high %v9203_v42, %v9206_v44  ;;  %v12720_v44 = vcombine.high %v9227_v14, %v9230_v55 }
 0x53c   : > { %7191 = vmatprep.subr.bf16.mxu1 %v12450_v24  ;;  %13218 = vmatprep.subr.bf16.mxu0 %v12675_v61  ;;  %v7274_v24 = vld [vmem:[#allocation7 + $0x3e4] sm:$0xff] }
 0x53d   : > { %v7277_v61 = vld [vmem:[#allocation7 + $0x444] sm:$0xff] }
 0x53e   : > { %v12479_v56 = vcombine.high %v7274_v24, %v7277_v61  ;;  %v12478_v41 = vcombine.low %v7274_v24, %v7277_v61 }
 0x53f   : > { %7192 = vmatpush1.bf16.msra.mxu1 %v12449_v34  ;;  %13219 = vmatpush3.bf16.msra.mxu0 %v12635_v51  ;;  %v7280_v34 = vld [vmem:[#allocation7 + $0x4a4] sm:$0xff] }
 0x540   : > { %8908 = vmatprep.subr.bf16.mxu1 %v12454_v12  ;;  %13220 = vmatprep.subr.bf16.mxu0 %v12680_v28  ;;  %v7283_v51 = vld [vmem:[#allocation7 + $0x504] sm:$0xff]  ;;  %v9215_v12 = vld [vmem:[#allocation7 + $0x294] sm:$0xff] }
 0x541   : > { %v9218_v28 = vld [vmem:[#allocation7 + $0x2f4] sm:$0xff] }
 0x542   : > { %7194 = vmatmul.mubr.bf16.vlgmr.msra.gmra.mrb[36].mxu1 %v14842_v5  ;;  %v12710_v33 = vcombine.high %v9215_v12, %v9218_v28  ;;  %v12709_v40 = vcombine.low %v9215_v12, %v9218_v28  ;;  %v7310_v12 = vld [vmem:[#allocation7 + $0x864] sm:$0xff] }
 0x543   : > { %8909 = vmatpush1.bf16.msra.mxu1 %v12453_v7  ;;  %13221 = vmatpush3.bf16.msra.mxu0 %v12640_v11  ;;  %v9221_v11 = vld [vmem:[#allocation7 + $0x354] sm:$0xff]  ;;  %v7313_v28 = vld [vmem:[#allocation7 + $0x8c4] sm:$0xff] }
 0x544   : > { %8910 = vmatprep.subr.bf16.mxu1 %v12459_v35  ;;  %13222 = vmatprep.subr.bf16.mxu0 %v12685_v27  ;;  %v9224_v35 = vld [vmem:[#allocation7 + $0x3b4] sm:$0xff] }
 0x545   : > { %8940 = vmatprep.mubr.bf16.mxu1 %v14846_v47 }
 0x547   : > { %8911 = vmatpush1.bf16.msra.mxu1 %v12458_v20  ;;  %13223 = vmatpush3.bf16.msra.mxu0 %v12645_v63  ;;  %v12715_v63 = vcombine.high %v9221_v11, %v9224_v35 }
 0x548   : > { %8912 = vmatprep.subr.bf16.mxu1 %v12464_v43  ;;  %13224 = vmatprep.subr.bf16.mxu0 %v12690_v54  ;;  %v7292_v43 = vld [vmem:[#allocation7 + $0x624] sm:$0xff] }
 0x549   : > { %v7295_v54 = vld [vmem:[#allocation7 + $0x684] sm:$0xff] }
 0x54a   : > { %v12494_v39 = vcombine.high %v7292_v43, %v7295_v54 }
 0x54b   : > { %8913 = vmatpush1.bf16.msra.mxu1 %v12463_v23  ;;  %13225 = vmatpush3.bf16.msra.mxu0 %v12650_v50 }
 0x54c   : > { %8914 = vmatprep.subr.bf16.mxu1 %v12469_v30  ;;  %10861 = vmatprep.subr.bf16.mxu0 %v12695_v36  ;;  %v12714_v36 = vcombine.low %v9221_v11, %v9224_v35  ;;  %v9251_v11 = vld [vmem:[#allocation7 + $0x714] sm:$0xff] }
 0x54d   : > { %v9254_v35 = vld [vmem:[#allocation7 + $0x774] sm:$0xff] }
 0x54e   : > { %9152 = vmatmul.mubr.bf16.vlgmr.msra.gmra.mrb[44].mxu0 %v14842_v5  ;;  %v12484_v5 = vcombine.high %v7280_v34, %v7283_v51 }
 0x54f   : > { %8915 = vmatpush1.bf16.msra.mxu1 %v12468_v45  ;;  %10862 = vmatpush1.bf16.msra.mxu0 %v12694_v46  ;;  %v7301_v45 = vld [vmem:[#allocation7 + $0x744] sm:$0xff]  ;;  %v9236_v46 = vld [vmem:[#allocation7 + $0x534] sm:$0xff] }
 0x550   : > { %8916 = vmatprep.subr.bf16.mxu1 %v12474_v18  ;;  %10863 = vmatprep.subr.bf16.mxu0 %v12700_v17  ;;  %v12493_v18 = vcombine.low %v7292_v43, %v7295_v54  ;;  %v12719_v17 = vcombine.low %v9227_v14, %v9230_v55  ;;  %v9266_v14 = vld [vmem:[#allocation7 + $0x8f4] sm:$0xff] }
 0x551   : > { %10893 = vmatprep.mubr.bf16.mxu0 %v14846_v47  ;;  %v12483_v47 = vcombine.low %v7280_v34, %v7283_v51  ;;  %v12504_v34 = vcombine.high %v7304_v48, %v7307_v49 }
 0x553   : > { %8917 = vmatpush1.bf16.msra.mxu1 %v12473_v52  ;;  %10864 = vmatpush1.bf16.msra.mxu0 %v12699_v22  ;;  %v9239_v52 = vld [vmem:[#allocation7 + $0x594] sm:$0xff] }
 0x554   : > { %8918 = vmatprep.subr.bf16.mxu1 %v12479_v56  ;;  %10865 = vmatprep.subr.bf16.mxu0 %v12705_v6  ;;  %v9242_v22 = vld [vmem:[#allocation7 + $0x5f4] sm:$0xff] }
 0x555   : > { %v5755_v0 = vpop.f32.mrb[32].mxu1  ;;  %v12730_v51 = vcombine.high %v9239_v52, %v9242_v22 }
 0x556   : > { %v5757_v7 = vpop.f32.mrb[33].mxu1  ;;  %v5770_v13 = vrot.slane %v5755_v0, 2  ;;  %v12509_v0 = vcombine.high %v7310_v12, %v7313_v28 }
 0x557   : > { %v5759_v27 = vpop.f32.mrb[34].mxu1  ;;  %8919 = vmatpush1.bf16.msra.mxu1 %v12478_v41  ;;  %10866 = vmatpush1.bf16.msra.mxu0 %v12704_v62  ;;  %v5776_v31 = vrot.slane %v5757_v7, 3  ;;  %v9245_v41 = vld [vmem:[#allocation7 + $0x654] sm:$0xff]  ;;  %v7319_v7 = vld [vmem:[#allocation7 + $0x984] sm:$0xff] }
 0x558   : > { %v5771_v16 = vrot.slane %v5759_v27, 2  ;;  %v5761_v4 = vpop.f32.mrb[35].mxu1  ;;  %8920 = vmatprep.subr.bf16.mxu1 %v12484_v5  ;;  %10867 = vmatprep.subr.bf16.mxu0 %v12710_v33  ;;  %v9248_v62 = vld [vmem:[#allocation7 + $0x6b4] sm:$0xff]  ;;  %v12503_v5 = vcombine.low %v7304_v48, %v7307_v49  ;;  %v12729_v33 = vcombine.low %v9239_v52, %v9242_v22  ;;  %v12508_v27 = vcombine.low %v7310_v12, %v7313_v28 }
 0x559   : > { %v5777_v20 = vrot.slane %v5761_v4, 3  ;;  %v12735_v1 = vcombine.high %v9245_v41, %v9248_v62  ;;  %v7322_v4 = vld [vmem:[#allocation7 + $0x9e4] sm:$0xff] }
 0x55a   : > { %v5772_v25 = vsel %vm1706_vm2, %v5770_v13, %v5771_v16  ;;  %v5773_v32 = vsel %vm1706_vm2, %v5771_v16, %v5770_v13  ;;  %v12514_v13 = vcombine.high %v7316_v3, %v7319_v7  ;;  %v12740_v16 = vcombine.high %v9251_v11, %v9254_v35 }
 0x55b   : > { %v5774_v37 = vadd.f32 %v5772_v25, %v14802_v26  ;;  %v5775_v23 = vadd.f32 %v5773_v32, %v14804_v38  ;;  %v5779_v50 = vsel %vm5778_vm4, %v5776_v31, %v5777_v20  ;;  %v5780_v30 = vsel %vm5778_vm4, %v5777_v20, %v5776_v31  ;;  %8921 = vmatpush1.bf16.msra.mxu1 %v12483_v47  ;;  %v7298_v26 = vld [vmem:[#allocation7 + $0x6e4] sm:$0xff]  ;;  %v9233_v38 = vld [vmem:[#allocation7 + $0x4d4] sm:$0xff] }
 0x55c   : > { %10868 = vmatpush1.bf16.msra.mxu0 %v12709_v40  ;;  %8922 = vmatprep.subr.bf16.mxu1 %v12489_v53  ;;  %v12499_v24 = vcombine.high %v7298_v26, %v7301_v45  ;;  %v12725_v61 = vcombine.high %v9233_v38, %v9236_v46  ;;  %v12498_v56 = vcombine.low %v7298_v26, %v7301_v45  ;;  %v7325_v40 = vld [vmem:[#allocation7 + $0xa44] sm:$0xff]  ;;  %v9257_v53 = vld [vmem:[#allocation7 + $0x7d4] sm:$0xff] }
 0x55d   : > { %v14877_v60 = vadd.f32 %v5779_v50, %v5774_v37  ;;  %v14879_v42 = vadd.f32 %v5780_v30, %v5775_v23  ;;  %10869 = vmatprep.subr.bf16.mxu0 %v12715_v63  ;;  %v12724_v6 = vcombine.low %v9233_v38, %v9236_v46  ;;  %v12734_v47 = vcombine.low %v9245_v41, %v9248_v62  ;;  %v9260_v31 = vld [vmem:[#allocation7 + $0x834] sm:$0xff]  ;;  %v7328_v25 = vld [vmem:[#allocation7 + $0xaa4] sm:$0xff] }
 0x55e   : > { %v12513_v20 = vcombine.low %v7316_v3, %v7319_v7  ;;  %v12739_v63 = vcombine.low %v9251_v11, %v9254_v35  ;;  %v12519_v43 = vcombine.high %v7322_v4, %v7325_v40  ;;  %v12745_v54 = vcombine.high %v9257_v53, %v9260_v31  ;;  %v7331_v32 = vld [vmem:[#allocation7 + $0xb04] sm:$0xff] }
 0x55f   : > { %8923 = vmatpush1.bf16.msra.mxu1 %v12488_v58  ;;  %v9263_v58 = vld [vmem:[#allocation7 + $0x894] sm:$0xff]  ;;  %v12518_v55 = vcombine.low %v7322_v4, %v7325_v40  ;;  %v12744_v37 = vcombine.low %v9257_v53, %v9260_v31  ;;  %v12524_v23 = vcombine.high %v7328_v25, %v7331_v32  ;;  %v7334_v30 = vld [vmem:[#allocation7 + $0xb64] sm:$0xff]  ;;  %v12523_v26 = vcombine.low %v7328_v25, %v7331_v32 }
 0x560   : > { %10870 = vmatpush1.bf16.msra.mxu0 %v12714_v36  ;;  %8924 = vmatprep.subr.bf16.mxu1 %v12494_v39  ;;  %v12750_v50 = vcombine.high %v9263_v58, %v9266_v14  ;;  %v7337_v36 = vld [vmem:[#allocation7 + $0xbc4] sm:$0xff]  ;;  %v9269_v39 = vld [vmem:[#allocation7 + $0x954] sm:$0xff]  ;;  %v12749_v45 = vcombine.low %v9263_v58, %v9266_v14 }
 0x561   : > { %10871 = vmatprep.subr.bf16.mxu0 %v12720_v44  ;;  %v9272_v44 = vld [vmem:[#allocation7 + $0x9b4] sm:$0xff]  ;;  %v12529_v38 = vcombine.high %v7334_v30, %v7337_v36  ;;  %v12528_v48 = vcombine.low %v7334_v30, %v7337_v36 }
 0x562   : > { %v12755_v46 = vcombine.high %v9269_v39, %v9272_v44  ;;  %v12754_v49 = vcombine.low %v9269_v39, %v9272_v44  ;;  %v14883_v7 = vld [vmem:[%s14553_s13 + $0xc] ss:$24 sps:$4 sm:$0xff]  }
 0x563   : > { %8925 = vmatpush1.bf16.msra.mxu1 %v12493_v18  ;;  %v7340_v18 = vld [vmem:[#allocation7 + $0xc24] sm:$0xff]  ;;  %v9296_v4 = vld [vmem:[#allocation7 + $0xcb4] sm:$0xff] }
 0x564   : > { %10872 = vmatpush1.bf16.msra.mxu0 %v12719_v17  ;;  %8926 = vmatprep.subr.bf16.mxu1 %v12499_v24  ;;  %v7343_v17 = vld [vmem:[#allocation7 + $0xc84] sm:$0xff]  ;;  %v9275_v24 = vld [vmem:[#allocation7 + $0xa14] sm:$0xff] }
 0x565   : > { %10873 = vmatprep.subr.bf16.mxu0 %v12725_v61  ;;  %v9278_v61 = vld [vmem:[#allocation7 + $0xa74] sm:$0xff]  ;;  %v12534_v52 = vcombine.high %v7340_v18, %v7343_v17  ;;  %v12533_v12 = vcombine.low %v7340_v18, %v7343_v17 }
 0x566   : > { %v12760_v22 = vcombine.high %v9275_v24, %v9278_v61  ;;  %v12759_v28 = vcombine.low %v9275_v24, %v9278_v61  ;;  %v9302_v25 = vld [vmem:[#allocation7 + $0xd74] sm:$0xff] }
 0x567   : > { %8927 = vmatpush1.bf16.msra.mxu1 %v12498_v56  ;;  %v7346_v56 = vld [vmem:[#allocation7 + $0xce4] sm:$0xff]  ;;  %v9308_v30 = vld [vmem:[#allocation7 + $0xe34] sm:$0xff] }
 0x568   : > { %10874 = vmatpush1.bf16.msra.mxu0 %v12724_v6  ;;  %8928 = vmatprep.subr.bf16.mxu1 %v12504_v34  ;;  %v7349_v6 = vld [vmem:[#allocation7 + $0xd44] sm:$0xff]  ;;  %v9281_v34 = vld [vmem:[#allocation7 + $0xad4] sm:$0xff] }
 0x569   : > { %10875 = vmatprep.subr.bf16.mxu0 %v12730_v51  ;;  %v9284_v51 = vld [vmem:[#allocation7 + $0xb34] sm:$0xff]  ;;  %v12539_v41 = vcombine.high %v7346_v56, %v7349_v6  ;;  %v12538_v3 = vcombine.low %v7346_v56, %v7349_v6 }
 0x56a   : > { %v12765_v62 = vcombine.high %v9281_v34, %v9284_v51  ;;  %v12764_v11 = vcombine.low %v9281_v34, %v9284_v51  ;;  %v9314_v18 = vld [vmem:[#allocation7 + $0xef4] sm:$0xff] }
 0x56b   : > { %8929 = vmatpush1.bf16.msra.mxu1 %v12503_v5  ;;  %v7352_v5 = vld [vmem:[#allocation7 + $0xda4] sm:$0xff] }
 0x56c   : > { %10876 = vmatpush1.bf16.msra.mxu0 %v12729_v33  ;;  %8930 = vmatprep.subr.bf16.mxu1 %v12509_v0  ;;  %v7355_v33 = vld [vmem:[#allocation7 + $0xe04] sm:$0xff]  ;;  %v9287_v0 = vld [vmem:[#allocation7 + $0xb94] sm:$0xff] }
 0x56d   : > { %10877 = vmatprep.subr.bf16.mxu0 %v12735_v1  ;;  %v9290_v1 = vld [vmem:[#allocation7 + $0xbf4] sm:$0xff]  ;;  %v12544_v35 = vcombine.high %v7352_v5, %v7355_v33  ;;  %v12543_v40 = vcombine.low %v7352_v5, %v7355_v33 }
 0x56e   : > { %v12769_v53 = vcombine.low %v9287_v0, %v9290_v1 }
 0x56f   : > { %8931 = vmatpush1.bf16.msra.mxu1 %v12508_v27  ;;  %v12770_v27 = vcombine.high %v9287_v0, %v9290_v1 }
 0x570   : > { %10878 = vmatpush1.bf16.msra.mxu0 %v12734_v47  ;;  %8932 = vmatprep.subr.bf16.mxu1 %v12514_v13  ;;  %v7358_v47 = vld [vmem:[#allocation7 + $0xe64] sm:$0xff] }
 0x571   : > { %10879 = vmatprep.subr.bf16.mxu0 %v12740_v16  ;;  %v7361_v13 = vld [vmem:[#allocation7 + $0xec4] sm:$0xff]  ;;  %v9293_v16 = vld [vmem:[#allocation7 + $0xc54] sm:$0xff] }
 0x572   : > { %v12549_v31 = vcombine.high %v7358_v47, %v7361_v13  ;;  %v12548_v32 = vcombine.low %v7358_v47, %v7361_v13  ;;  %v12774_v58 = vcombine.low %v9293_v16, %v9296_v4 }
 0x573   : > { %8933 = vmatpush1.bf16.msra.mxu1 %v12513_v20  ;;  %v12775_v20 = vcombine.high %v9293_v16, %v9296_v4 }
 0x574   : > { %10880 = vmatpush1.bf16.msra.mxu0 %v12739_v63  ;;  %8934 = vmatprep.subr.bf16.mxu1 %v12519_v43  ;;  %v7364_v63 = vld [vmem:[#allocation7 + $0xf24] sm:$0xff] }
 0x575   : > { %10881 = vmatprep.subr.bf16.mxu0 %v12745_v54  ;;  %v7367_v43 = vld [vmem:[#allocation7 + $0xf84] sm:$0xff]  ;;  %v9299_v54 = vld [vmem:[#allocation7 + $0xd14] sm:$0xff] }
 0x576   : > { %v12554_v14 = vcombine.high %v7364_v63, %v7367_v43  ;;  %v12553_v36 = vcombine.low %v7364_v63, %v7367_v43  ;;  %v12779_v39 = vcombine.low %v9299_v54, %v9302_v25 }
 0x577   : > { %8935 = vmatpush1.bf16.msra.mxu1 %v12518_v55  ;;  %v12780_v55 = vcombine.high %v9299_v54, %v9302_v25 }
 0x578   : > { %10882 = vmatpush1.bf16.msra.mxu0 %v12744_v37  ;;  %8936 = vmatprep.subr.bf16.mxu1 %v12524_v23  ;;  %v7370_v37 = vld [vmem:[#allocation7 + $0xfe4] sm:$0xff] }
 0x579   : > { %10883 = vmatprep.subr.bf16.mxu0 %v12750_v50  ;;  %v7373_v23 = vld [vmem:[#allocation7 + $0x1044] sm:$0xff]  ;;  %v9305_v50 = vld [vmem:[#allocation7 + $0xdd4] sm:$0xff] }
 0x57a   : > { %v12559_v44 = vcombine.high %v7370_v37, %v7373_v23  ;;  %v12558_v17 = vcombine.low %v7370_v37, %v7373_v23  ;;  %v12784_v24 = vcombine.low %v9305_v50, %v9308_v30 }
 0x57b   : > { %8937 = vmatpush1.bf16.msra.mxu1 %v12523_v26  ;;  %v12785_v26 = vcombine.high %v9305_v50, %v9308_v30 }
 0x57c   : > { %10884 = vmatpush1.bf16.msra.mxu0 %v12749_v45  ;;  %8938 = vmatprep.subr.bf16.mxu1 %v12529_v38  ;;  %v7376_v45 = vld [vmem:[#allocation7 + $0x10a4] sm:$0xff] }
 0x57d   : > { %10885 = vmatprep.subr.bf16.mxu0 %v12755_v46  ;;  %v7379_v38 = vld [vmem:[#allocation7 + $0x1104] sm:$0xff]  ;;  %v9311_v46 = vld [vmem:[#allocation7 + $0xe94] sm:$0xff] }
 0x57e   : > { %v12564_v61 = vcombine.high %v7376_v45, %v7379_v38  ;;  %v12563_v56 = vcombine.low %v7376_v45, %v7379_v38  ;;  %v12789_v6 = vcombine.low %v9311_v46, %v9314_v18 }
 0x57f   : > { %8939 = vmatpush1.bf16.msra.mxu1 %v12528_v48  ;;  %v7382_v48 = vld [vmem:[#allocation7 + $0x1164] sm:$0xff] }
 0x580   : > { %10886 = vmatpush1.bf16.msra.mxu0 %v12754_v49  ;;  %8951 = vmatprep.subr.bf16.mxu1 %v12534_v52  ;;  %v7385_v49 = vld [vmem:[#allocation7 + $0x11c4] sm:$0xff]  ;;  %v9317_v52 = vld [vmem:[#allocation7 + $0xf54] sm:$0xff] }
 0x581   : > { %10887 = vmatprep.subr.bf16.mxu0 %v12760_v22  ;;  %v9320_v22 = vld [vmem:[#allocation7 + $0xfb4] sm:$0xff]  ;;  %v12569_v34 = vcombine.high %v7382_v48, %v7385_v49  ;;  %v12568_v5 = vcombine.low %v7382_v48, %v7385_v49 }
 0x582   : > { %8941 = vmatmul.mubr.bf16.vlgmr.msra.gmra.mrb[40].mxu1 %v14858_v59  ;;  %v12795_v51 = vcombine.high %v9317_v52, %v9320_v22  ;;  %v12794_v33 = vcombine.low %v9317_v52, %v9320_v22 }
 0x583   : > { %8952 = vmatpush1.bf16.msra.mxu1 %v12533_v12  ;;  %8983 = vmatprep.mubr.bf16.mxu1 %v14883_v7  ;;  %v7388_v12 = vld [vmem:[#allocation7 + $0x1224] sm:$0xff] }
 0x584   : > { %10888 = vmatpush1.bf16.msra.mxu0 %v12759_v28  ;;  %8953 = vmatprep.subr.bf16.mxu1 %v12539_v41  ;;  %v7391_v28 = vld [vmem:[#allocation7 + $0x1284] sm:$0xff]  ;;  %v9323_v41 = vld [vmem:[#allocation7 + $0x1014] sm:$0xff] }
 0x585   : > { %10889 = vmatprep.subr.bf16.mxu0 %v12765_v62  ;;  %v9326_v62 = vld [vmem:[#allocation7 + $0x1074] sm:$0xff]  ;;  %v12574_v0 = vcombine.high %v7388_v12, %v7391_v28  ;;  %v12573_v47 = vcombine.low %v7388_v12, %v7391_v28 }
 0x586   : > { %v12800_v1 = vcombine.high %v9323_v41, %v9326_v62  ;;  %v12799_v13 = vcombine.low %v9323_v41, %v9326_v62 }
 0x587   : > { %8954 = vmatpush1.bf16.msra.mxu1 %v12538_v3  ;;  %v7394_v3 = vld [vmem:[#allocation7 + $0x12e4] sm:$0xff] }
 0x588   : > { %10890 = vmatpush1.bf16.msra.mxu0 %v12764_v11  ;;  %8955 = vmatprep.subr.bf16.mxu1 %v12544_v35  ;;  %v7397_v11 = vld [vmem:[#allocation7 + $0x1344] sm:$0xff]  ;;  %v9329_v35 = vld [vmem:[#allocation7 + $0x10d4] sm:$0xff] }
 0x589   : > { %10891 = vmatprep.subr.bf16.mxu0 %v12770_v27  ;;  %v9332_v27 = vld [vmem:[#allocation7 + $0x1134] sm:$0xff]  ;;  %v12579_v16 = vcombine.high %v7394_v3, %v7397_v11  ;;  %v12578_v63 = vcombine.low %v7394_v3, %v7397_v11 }
 0x58a   : > { %v12805_v4 = vcombine.high %v9329_v35, %v9332_v27  ;;  %v12804_v43 = vcombine.low %v9329_v35, %v9332_v27 }
 0x58b   : > { %8956 = vmatpush1.bf16.msra.mxu1 %v12543_v40  ;;  %v7400_v40 = vld [vmem:[#allocation7 + $0x13a4] sm:$0xff] }
 0x58c   : > { %10892 = vmatpush1.bf16.msra.mxu0 %v12769_v53  ;;  %8957 = vmatprep.subr.bf16.mxu1 %v12549_v31  ;;  %v7403_v53 = vld [vmem:[#allocation7 + $0x1404] sm:$0xff]  ;;  %v9335_v31 = vld [vmem:[#allocation7 + $0x1194] sm:$0xff] }
 0x58d   : > { %10904 = vmatprep.subr.bf16.mxu0 %v12775_v20  ;;  %v9338_v20 = vld [vmem:[#allocation7 + $0x11f4] sm:$0xff]  ;;  %v12584_v54 = vcombine.high %v7400_v40, %v7403_v53  ;;  %v12583_v37 = vcombine.low %v7400_v40, %v7403_v53 }
 0x58e   : > { %v12810_v25 = vcombine.high %v9335_v31, %v9338_v20  ;;  %v12809_v23 = vcombine.low %v9335_v31, %v9338_v20 }
 0x58f   : > { %8958 = vmatpush1.bf16.msra.mxu1 %v12548_v32  ;;  %10894 = vmatmul.mubr.bf16.vlgmr.msra.gmra.mrb[48].mxu0 %v14858_v59  ;;  %v12790_v59 = vcombine.high %v9311_v46, %v9314_v18  ;;  %v7406_v32 = vld [vmem:[#allocation7 + $0x1464] sm:$0xff] }
 0x590   : > { %10905 = vmatpush1.bf16.msra.mxu0 %v12774_v58  ;;  %8959 = vmatprep.subr.bf16.mxu1 %v12554_v14  ;;  %v7409_v58 = vld [vmem:[#allocation7 + $0x14c4] sm:$0xff]  ;;  %v9341_v14 = vld [vmem:[#allocation7 + $0x1254] sm:$0xff] }
 0x591   : > { %10906 = vmatprep.subr.bf16.mxu0 %v12780_v55  ;;  %10936 = vmatprep.mubr.bf16.mxu0 %v14883_v7  ;;  %v9344_v55 = vld [vmem:[#allocation7 + $0x12b4] sm:$0xff]  ;;  %v12589_v50 = vcombine.high %v7406_v32, %v7409_v58  ;;  %v12588_v45 = vcombine.low %v7406_v32, %v7409_v58 }
 0x592   : > { %v12815_v30 = vcombine.high %v9341_v14, %v9344_v55  ;;  %v12814_v38 = vcombine.low %v9341_v14, %v9344_v55 }
 0x593   : > { %8960 = vmatpush1.bf16.msra.mxu1 %v12553_v36  ;;  %v7412_v36 = vld [vmem:[#allocation7 + $0x1524] sm:$0xff] }
 0x594   : > { %10907 = vmatpush1.bf16.msra.mxu0 %v12779_v39  ;;  %8961 = vmatprep.subr.bf16.mxu1 %v12559_v44  ;;  %v7415_v39 = vld [vmem:[#allocation7 + $0x1584] sm:$0xff]  ;;  %v9347_v44 = vld [vmem:[#allocation7 + $0x1314] sm:$0xff] }
 0x595   : > { %10908 = vmatprep.subr.bf16.mxu0 %v12785_v26  ;;  %v9350_v26 = vld [vmem:[#allocation7 + $0x1374] sm:$0xff]  ;;  %v12594_v46 = vcombine.high %v7412_v36, %v7415_v39  ;;  %v12593_v48 = vcombine.low %v7412_v36, %v7415_v39 }
 0x596   : > { %v12820_v18 = vcombine.high %v9347_v44, %v9350_v26  ;;  %v12819_v49 = vcombine.low %v9347_v44, %v9350_v26  ;;  %v9386_v36 = vld [vmem:[#allocation7 + $0x17f4] sm:$0xff] }
 0x597   : > { %8962 = vmatpush1.bf16.msra.mxu1 %v12558_v17  ;;  %v7418_v17 = vld [vmem:[#allocation7 + $0x15e4] sm:$0xff] }
 0x598   : > { %10909 = vmatpush1.bf16.msra.mxu0 %v12784_v24  ;;  %8963 = vmatprep.subr.bf16.mxu1 %v12564_v61  ;;  %v7421_v24 = vld [vmem:[#allocation7 + $0x1644] sm:$0xff]  ;;  %v9353_v61 = vld [vmem:[#allocation7 + $0x13d4] sm:$0xff] }
 0x599   : > { %10910 = vmatprep.subr.bf16.mxu0 %v12790_v59  ;;  %v9356_v59 = vld [vmem:[#allocation7 + $0x1434] sm:$0xff]  ;;  %v12599_v52 = vcombine.high %v7418_v17, %v7421_v24  ;;  %v12598_v12 = vcombine.low %v7418_v17, %v7421_v24 }
 0x59a   : > { %v12825_v22 = vcombine.high %v9353_v61, %v9356_v59  ;;  %v12824_v28 = vcombine.low %v9353_v61, %v9356_v59  ;;  %v13854_v44 = vld [vmem:[%s14553_s13 + $0x14] ss:$24 sps:$4 sm:$0xff]  }
 0x59b   : > { %8964 = vmatpush1.bf16.msra.mxu1 %v12563_v56  ;;  %v7424_v56 = vld [vmem:[#allocation7 + $0x16a4] sm:$0xff]  ;;  %v9389_v17 = vld [vmem:[#allocation7 + $0x1854] sm:$0xff] }
 0x59c   : > { %10911 = vmatpush1.bf16.msra.mxu0 %v12789_v6  ;;  %8965 = vmatprep.subr.bf16.mxu1 %v12569_v34  ;;  %v7427_v6 = vld [vmem:[#allocation7 + $0x1704] sm:$0xff]  ;;  %v9359_v34 = vld [vmem:[#allocation7 + $0x1494] sm:$0xff] }
 0x59d   : > { %10912 = vmatprep.subr.bf16.mxu0 %v12795_v51  ;;  %v9362_v51 = vld [vmem:[#allocation7 + $0x14f4] sm:$0xff]  ;;  %v12604_v41 = vcombine.high %v7424_v56, %v7427_v6  ;;  %v12603_v3 = vcombine.low %v7424_v56, %v7427_v6 }
 0x59e   : > { %v12830_v62 = vcombine.high %v9359_v34, %v9362_v51  ;;  %v12829_v11 = vcombine.low %v9359_v34, %v9362_v51  ;;  %v9392_v24 = vld [vmem:[#allocation7 + $0x18b4] sm:$0xff] }
 0x59f   : > { %8966 = vmatpush1.bf16.msra.mxu1 %v12568_v5  ;;  %v7430_v5 = vld [vmem:[#allocation7 + $0x1764] sm:$0xff]  ;;  %v9395_v56 = vld [vmem:[#allocation7 + $0x1914] sm:$0xff]  ;;  %v12854_v51 = vcombine.low %v9389_v17, %v9392_v24 }
 0x5a0   : > { %10913 = vmatpush1.bf16.msra.mxu0 %v12794_v33  ;;  %8967 = vmatprep.subr.bf16.mxu1 %v12574_v0  ;;  %v7433_v33 = vld [vmem:[#allocation7 + $0x17c4] sm:$0xff]  ;;  %v9365_v0 = vld [vmem:[#allocation7 + $0x1554] sm:$0xff] }
 0x5a1   : > { %10914 = vmatprep.subr.bf16.mxu0 %v12800_v1  ;;  %v9368_v1 = vld [vmem:[#allocation7 + $0x15b4] sm:$0xff]  ;;  %v12609_v35 = vcombine.high %v7430_v5, %v7433_v33  ;;  %v12608_v40 = vcombine.low %v7430_v5, %v7433_v33 }
 0x5a2   : > { %v12835_v27 = vcombine.high %v9365_v0, %v9368_v1  ;;  %v12834_v53 = vcombine.low %v9365_v0, %v9368_v1  ;;  %v9398_v6 = vld [vmem:[#allocation7 + $0x1974] sm:$0xff] }
 0x5a3   : > { %8968 = vmatpush1.bf16.msra.mxu1 %v12573_v47  ;;  %v7436_v47 = vld [vmem:[#allocation7 + $0x1824] sm:$0xff]  ;;  %v9401_v5 = vld [vmem:[#allocation7 + $0x19d4] sm:$0xff]  ;;  %v12859_v1 = vcombine.low %v9395_v56, %v9398_v6 }
 0x5a4   : > { %10915 = vmatpush1.bf16.msra.mxu0 %v12799_v13  ;;  %8969 = vmatprep.subr.bf16.mxu1 %v12579_v16  ;;  %v7439_v13 = vld [vmem:[#allocation7 + $0x1884] sm:$0xff]  ;;  %v9371_v16 = vld [vmem:[#allocation7 + $0x1614] sm:$0xff] }
 0x5a5   : > { %10916 = vmatprep.subr.bf16.mxu0 %v12805_v4  ;;  %v9374_v4 = vld [vmem:[#allocation7 + $0x1674] sm:$0xff]  ;;  %v12614_v31 = vcombine.high %v7436_v47, %v7439_v13  ;;  %v12613_v32 = vcombine.low %v7436_v47, %v7439_v13 }
 0x5a6   : > { %v12840_v20 = vcombine.high %v9371_v16, %v9374_v4  ;;  %v12839_v58 = vcombine.low %v9371_v16, %v9374_v4  ;;  %v9404_v33 = vld [vmem:[#allocation7 + $0x1a34] sm:$0xff] }
 0x5a7   : > { %8970 = vmatpush1.bf16.msra.mxu1 %v12578_v63  ;;  %v7442_v63 = vld [vmem:[#allocation7 + $0x18e4] sm:$0xff]  ;;  %v9407_v47 = vld [vmem:[#allocation7 + $0x1a94] sm:$0xff]  ;;  %v12864_v4 = vcombine.low %v9401_v5, %v9404_v33 }
 0x5a8   : > { %10917 = vmatpush1.bf16.msra.mxu0 %v12804_v43  ;;  %8971 = vmatprep.subr.bf16.mxu1 %v12584_v54  ;;  %v7445_v43 = vld [vmem:[#allocation7 + $0x1944] sm:$0xff]  ;;  %v9377_v54 = vld [vmem:[#allocation7 + $0x16d4] sm:$0xff] }
 0x5a9   : > { %10918 = vmatprep.subr.bf16.mxu0 %v12810_v25  ;;  %v9380_v25 = vld [vmem:[#allocation7 + $0x1734] sm:$0xff]  ;;  %v12619_v14 = vcombine.high %v7442_v63, %v7445_v43  ;;  %v12618_v39 = vcombine.low %v7442_v63, %v7445_v43 }
 0x5aa   : > { %v12845_v55 = vcombine.high %v9377_v54, %v9380_v25  ;;  %v12844_v26 = vcombine.low %v9377_v54, %v9380_v25  ;;  %v9410_v13 = vld [vmem:[#allocation7 + $0x1af4] sm:$0xff] }
 0x5ab   : > { %8972 = vmatpush1.bf16.msra.mxu1 %v12583_v37  ;;  %v7448_v37 = vld [vmem:[#allocation7 + $0x19a4] sm:$0xff]  ;;  %v9413_v63 = vld [vmem:[#allocation7 + $0x1b54] sm:$0xff]  ;;  %v12869_v25 = vcombine.low %v9407_v47, %v9410_v13 }
 0x5ac   : > { %10919 = vmatpush1.bf16.msra.mxu0 %v12809_v23  ;;  %8973 = vmatprep.subr.bf16.mxu1 %v12589_v50  ;;  %v7451_v23 = vld [vmem:[#allocation7 + $0x1a04] sm:$0xff]  ;;  %v9416_v43 = vld [vmem:[#allocation7 + $0x1bb4] sm:$0xff] }
 0x5ad   : > { %10920 = vmatprep.subr.bf16.mxu0 %v12815_v30  ;;  %v14889_v50 = vld [vmem:[%s14553_s13 + $0x8] ss:$24 sps:$4 sm:$0xff]   ;;  %v12623_v61 = vcombine.low %v7448_v37, %v7451_v23 }
 0x5ae   : > { %v9383_v30 = vld [vmem:[#allocation7 + $0x1794] sm:$0xff] }
 0x5af   : > { %8974 = vmatpush1.bf16.msra.mxu1 %v12588_v45  ;;  %v12624_v45 = vcombine.high %v7448_v37, %v7451_v23  ;;  %v12849_v59 = vcombine.low %v9383_v30, %v9386_v36  ;;  %v9419_v37 = vld [vmem:[#allocation7 + $0x1c14] sm:$0xff] }
 0x5b0   : > { %10921 = vmatpush1.bf16.msra.mxu0 %v12814_v38  ;;  %8975 = vmatprep.subr.bf16.mxu1 %v12594_v46  ;;  %v12850_v38 = vcombine.high %v9383_v30, %v9386_v36  ;;  %v7454_v46 = vld [vmem:[#allocation7 + $0x1a64] sm:$0xff]  ;;  %v9422_v23 = vld [vmem:[#allocation7 + $0x1c74] sm:$0xff]  ;;  %v12874_v36 = vcombine.low %v9413_v63, %v9416_v43 }
 0x5b1   : > { %10922 = vmatprep.subr.bf16.mxu0 %v12820_v18  ;;  %v7457_v18 = vld [vmem:[#allocation7 + $0x1ac4] sm:$0xff] }
 0x5b2   : > { %v12628_v34 = vcombine.low %v7454_v46, %v7457_v18 }
 0x5b3   : > { %8976 = vmatpush1.bf16.msra.mxu1 %v12593_v48  ;;  %v12629_v48 = vcombine.high %v7454_v46, %v7457_v18  ;;  %v9428_v46 = vld [vmem:[#allocation7 + $0x1d34] sm:$0xff] }
 0x5b4   : > { %10923 = vmatpush1.bf16.msra.mxu0 %v12819_v49  ;;  %8977 = vmatprep.subr.bf16.mxu1 %v12599_v52  ;;  %v12855_v49 = vcombine.high %v9389_v17, %v9392_v24  ;;  %v7460_v52 = vld [vmem:[#allocation7 + $0x1b24] sm:$0xff]  ;;  %v12879_v17 = vcombine.low %v9419_v37, %v9422_v23 }
 0x5b5   : > { %10924 = vmatprep.subr.bf16.mxu0 %v12825_v22  ;;  %v7463_v22 = vld [vmem:[#allocation7 + $0x1b84] sm:$0xff] }
 0x5b6   : > { %v12633_v0 = vcombine.low %v7460_v52, %v7463_v22 }
 0x5b7   : > { %8978 = vmatpush1.bf16.msra.mxu1 %v12598_v12  ;;  %v12634_v12 = vcombine.high %v7460_v52, %v7463_v22  ;;  %v9431_v52 = vld [vmem:[#allocation7 + $0x1d94] sm:$0xff] }
 0x5b8   : > { %10925 = vmatpush1.bf16.msra.mxu0 %v12824_v28  ;;  %8979 = vmatprep.subr.bf16.mxu1 %v12604_v41  ;;  %v12860_v28 = vcombine.high %v9395_v56, %v9398_v6  ;;  %v7466_v41 = vld [vmem:[#allocation7 + $0x1be4] sm:$0xff]  ;;  %v9434_v22 = vld [vmem:[#allocation7 + $0x1df4] sm:$0xff] }
 0x5b9   : > { %10926 = vmatprep.subr.bf16.mxu0 %v12830_v62  ;;  %v7469_v62 = vld [vmem:[#allocation7 + $0x1c44] sm:$0xff] }
 0x5ba   : > { %v12638_v16 = vcombine.low %v7466_v41, %v7469_v62 }
 0x5bb   : > { %8980 = vmatpush1.bf16.msra.mxu1 %v12603_v3  ;;  %v12639_v3 = vcombine.high %v7466_v41, %v7469_v62  ;;  %v12890_v62 = vcombine.high %v9431_v52, %v9434_v22 }
 0x5bc   : > { %10927 = vmatpush1.bf16.msra.mxu0 %v12829_v11  ;;  %8981 = vmatprep.subr.bf16.mxu1 %v12609_v35  ;;  %v12865_v11 = vcombine.high %v9401_v5, %v9404_v33  ;;  %v7472_v35 = vld [vmem:[#allocation7 + $0x1ca4] sm:$0xff] }
 0x5bd   : > { %10928 = vmatprep.subr.bf16.mxu0 %v12835_v27  ;;  %v7475_v27 = vld [vmem:[#allocation7 + $0x1d04] sm:$0xff] }
 0x5be   : > { %v12643_v54 = vcombine.low %v7472_v35, %v7475_v27  ;;  %v7502_v5 = vld [vmem:[#allocation7 + $0x2064] sm:$0xff] }
 0x5bf   : > { %8982 = vmatpush1.bf16.msra.mxu1 %v12608_v40  ;;  %v12644_v40 = vcombine.high %v7472_v35, %v7475_v27  ;;  %v7505_v33 = vld [vmem:[#allocation7 + $0x20c4] sm:$0xff]  ;;  %v12889_v35 = vcombine.low %v9431_v52, %v9434_v22 }
 0x5c0   : > { %10929 = vmatpush1.bf16.msra.mxu0 %v12834_v53  ;;  %8994 = vmatprep.subr.bf16.mxu1 %v12614_v31  ;;  %v12870_v53 = vcombine.high %v9407_v47, %v9410_v13  ;;  %v7478_v31 = vld [vmem:[#allocation7 + $0x1d64] sm:$0xff]  ;;  %v12669_v13 = vcombine.high %v7502_v5, %v7505_v33 }
 0x5c1   : > { %10930 = vmatprep.subr.bf16.mxu0 %v12840_v20  ;;  %v7481_v20 = vld [vmem:[#allocation7 + $0x1dc4] sm:$0xff] }
 0x5c2   : > { %8984 = vmatmul.mubr.bf16.vlgmr.msra.gmra.mrb[40].mxu1 %v14889_v50  ;;  %v12648_v30 = vcombine.low %v7478_v31, %v7481_v20 }
 0x5c3   : > { %8995 = vmatpush1.bf16.msra.mxu1 %v12613_v32  ;;  %9026 = vmatprep.mubr.bf16.mxu1 %v13854_v44  ;;  %v12649_v32 = vcombine.high %v7478_v31, %v7481_v20  ;;  %v7511_v31 = vld [vmem:[#allocation7 + $0x2184] sm:$0xff]  ;;  %v9443_v20 = vld [vmem:[#allocation7 + $0x1f14] sm:$0xff] }
 0x5c4   : > { %10931 = vmatpush1.bf16.msra.mxu0 %v12839_v58  ;;  %8996 = vmatprep.subr.bf16.mxu1 %v12619_v14  ;;  %v12875_v58 = vcombine.high %v9413_v63, %v9416_v43  ;;  %v7484_v14 = vld [vmem:[#allocation7 + $0x1e24] sm:$0xff]  ;;  %v9446_v63 = vld [vmem:[#allocation7 + $0x1f74] sm:$0xff]  ;;  %v12668_v43 = vcombine.low %v7502_v5, %v7505_v33  ;;  %v7341_v33 = vld [vmem:[#allocation7 + $0xc2c] sm:$0xf] }
 0x5c5   : > { %10932 = vmatprep.subr.bf16.mxu0 %v12845_v55  ;;  %v7487_v55 = vld [vmem:[#allocation7 + $0x1e84] sm:$0xff] }
 0x5c6   : > { %v12653_v18 = vcombine.low %v7484_v14, %v7487_v55 }
 0x5c7   : > { %8997 = vmatpush1.bf16.msra.mxu1 %v12618_v39  ;;  %v12654_v39 = vcombine.high %v7484_v14, %v7487_v55  ;;  %v7517_v14 = vld [vmem:[#allocation7 + $0x2244] sm:$0xff]  ;;  %v9449_v55 = vld [vmem:[#allocation7 + $0x1fd4] sm:$0xff] }
 0x5c8   : > { %10933 = vmatpush1.bf16.msra.mxu0 %v12844_v26  ;;  %8998 = vmatprep.subr.bf16.mxu1 %v12624_v45  ;;  %v7490_v26 = vld [vmem:[#allocation7 + $0x1ee4] sm:$0xff] }
 0x5c9   : > { %10934 = vmatprep.subr.bf16.mxu0 %v12850_v38  ;;  %v7493_v45 = vld [vmem:[#allocation7 + $0x1f44] sm:$0xff]  ;;  %v9425_v38 = vld [vmem:[#allocation7 + $0x1cd4] sm:$0xff] }
 0x5ca   : > { %v12659_v24 = vcombine.high %v7490_v26, %v7493_v45  ;;  %v12658_v6 = vcombine.low %v7490_v26, %v7493_v45  ;;  %v7523_v26 = vld [vmem:[#allocation7 + $0x2304] sm:$0xff]  ;;  %v9455_v45 = vld [vmem:[#allocation7 + $0x2094] sm:$0xff] }
 0x5cb   : > { %8999 = vmatpush1.bf16.msra.mxu1 %v12623_v61  ;;  %v12885_v61 = vcombine.high %v9425_v38, %v9428_v46 }
 0x5cc   : > { %10935 = vmatpush1.bf16.msra.mxu0 %v12849_v59  ;;  %9000 = vmatprep.subr.bf16.mxu1 %v12629_v48  ;;  %v7496_v59 = vld [vmem:[#allocation7 + $0x1fa4] sm:$0xff] }
 0x5cd   : > { %10947 = vmatprep.subr.bf16.mxu0 %v12855_v49  ;;  %v7499_v48 = vld [vmem:[#allocation7 + $0x2004] sm:$0xff] }
 0x5cf   : > { %9001 = vmatpush1.bf16.msra.mxu1 %v12628_v34  ;;  %10937 = vmatmul.mubr.bf16.vlgmr.msra.gmra.mrb[48].mxu0 %v14889_v50 }
 0x5d0   : > { %10948 = vmatpush1.bf16.msra.mxu0 %v12854_v51  ;;  %9002 = vmatprep.subr.bf16.mxu1 %v12634_v12  ;;  %v12884_v12 = vcombine.low %v9425_v38, %v9428_v46  ;;  %v9458_v38 = vld [vmem:[#allocation7 + $0x20f4] sm:$0xff] }
 0x5d1   : > { %10949 = vmatprep.subr.bf16.mxu0 %v12860_v28  ;;  %10979 = vmatprep.mubr.bf16.mxu0 %v13854_v44  ;;  %v12880_v44 = vcombine.high %v9419_v37, %v9422_v23  ;;  %v12664_v28 = vcombine.high %v7496_v59, %v7499_v48  ;;  %v9452_v37 = vld [vmem:[#allocation7 + $0x2034] sm:$0xff]  ;;  %v12909_v22 = vcombine.low %v9455_v45, %v9458_v38 }
 0x5d3   : > { %9003 = vmatpush1.bf16.msra.mxu1 %v12633_v0 }
 0x5d4   : > { %10950 = vmatpush1.bf16.msra.mxu0 %v12859_v1  ;;  %9004 = vmatprep.subr.bf16.mxu1 %v12639_v3  ;;  %v9437_v1 = vld [vmem:[#allocation7 + $0x1e54] sm:$0xff] }
 0x5d5   : > { %10951 = vmatprep.subr.bf16.mxu0 %v12865_v11  ;;  %v9440_v3 = vld [vmem:[#allocation7 + $0x1eb4] sm:$0xff]  ;;  %v12663_v11 = vcombine.low %v7496_v59, %v7499_v48  ;;  %v7529_v59 = vld [vmem:[#allocation7 + $0x23c4] sm:$0xff] }
 0x5d6   : > { %v9461_v48 = vld [vmem:[#allocation7 + $0x2154] sm:$0xff] }
 0x5d7   : > { %9005 = vmatpush1.bf16.msra.mxu1 %v12638_v16 }
 0x5d8   : > { %10952 = vmatpush1.bf16.msra.mxu0 %v12864_v4  ;;  %9006 = vmatprep.subr.bf16.mxu1 %v12644_v40  ;;  %v12895_v40 = vcombine.high %v9437_v1, %v9440_v3 }
 0x5d9   : > { %10953 = vmatprep.subr.bf16.mxu0 %v12870_v53  ;;  %v7508_v53 = vld [vmem:[#allocation7 + $0x2124] sm:$0xff] }
 0x5da   : > { %v12673_v23 = vcombine.low %v7508_v53, %v7511_v31 }
 0x5db   : > { %9007 = vmatpush1.bf16.msra.mxu1 %v12643_v54  ;;  %v12894_v54 = vcombine.low %v9437_v1, %v9440_v3  ;;  %v7395_v3 = vld [vmem:[#allocation7 + $0x12ec] sm:$0xf] }
 0x5dc   : > { %10954 = vmatpush1.bf16.msra.mxu0 %v12869_v25  ;;  %9008 = vmatprep.subr.bf16.mxu1 %v12649_v32  ;;  %v12674_v25 = vcombine.high %v7508_v53, %v7511_v31  ;;  %v12900_v32 = vcombine.high %v9443_v20, %v9446_v63  ;;  %v7347_v53 = vld [vmem:[#allocation7 + $0xcec] sm:$0xf] }
 0x5dd   : > { %10955 = vmatprep.subr.bf16.mxu0 %v12875_v58  ;;  %v7514_v58 = vld [vmem:[#allocation7 + $0x21e4] sm:$0xff]  ;;  %v7350_v31 = vld [vmem:[#allocation7 + $0xd4c] sm:$0xf] }
 0x5de   : > { %v12678_v46 = vcombine.low %v7514_v58, %v7517_v14 }
 0x5df   : > { %9009 = vmatpush1.bf16.msra.mxu1 %v12648_v30  ;;  %v12899_v30 = vcombine.low %v9443_v20, %v9446_v63  ;;  %v7401_v63 = vld [vmem:[#allocation7 + $0x13ac] sm:$0xf] }
 0x5e0   : > { %10956 = vmatpush1.bf16.msra.mxu0 %v12874_v36  ;;  %9010 = vmatprep.subr.bf16.mxu1 %v12654_v39  ;;  %v12679_v36 = vcombine.high %v7514_v58, %v7517_v14  ;;  %v12905_v39 = vcombine.high %v9449_v55, %v9452_v37  ;;  %v12540_v58 = vcombine.low %v7347_v53, %v7350_v31  ;;  %v9309_v31 = vld [vmem:[#allocation7 + $0xe3c] sm:$0xf] }
 0x5e1   : > { %10957 = vmatprep.subr.bf16.mxu0 %v12880_v44  ;;  %v8899_v49 = vpop.f32.mrb[36].mxu0  ;;  %v7520_v44 = vld [vmem:[#allocation7 + $0x22a4] sm:$0xff] }
 0x5e2   : > { %v8901_v56 = vpop.f32.mrb[37].mxu0  ;;  %v12683_v52 = vcombine.low %v7520_v44, %v7523_v26 }
 0x5e3   : > { %9011 = vmatpush1.bf16.msra.mxu1 %v12653_v18  ;;  %v9160_v34 = vrot.slane %v8901_v56, 1  ;;  %v8903_v51 = vpop.f32.mrb[38].mxu0  ;;  %v12904_v18 = vcombine.low %v9449_v55, %v9452_v37  ;;  %v7353_v37 = vld [vmem:[#allocation7 + $0xdac] sm:$0xf] }
 0x5e4   : > { %10958 = vmatpush1.bf16.msra.mxu0 %v12879_v17  ;;  %9012 = vmatprep.subr.bf16.mxu1 %v12659_v24  ;;  %v8905_v41 = vpop.f32.mrb[39].mxu0  ;;  %v12684_v17 = vcombine.high %v7520_v44, %v7523_v26  ;;  %v12910_v24 = vcombine.high %v9455_v45, %v9458_v38  ;;  %v9342_v44 = vld [vmem:[#allocation7 + $0x125c] sm:$0xf] }
 0x5e5   : > { %10959 = vmatprep.subr.bf16.mxu0 %v12885_v61  ;;  %v9161_v0 = vrot.slane %v8905_v41, 1  ;;  %v7526_v61 = vld [vmem:[#allocation7 + $0x2364] sm:$0xff]  ;;  %v9345_v26 = vld [vmem:[#allocation7 + $0x12bc] sm:$0xf] }
 0x5e6   : > { %v12689_v56 = vcombine.high %v7526_v61, %v7529_v59  ;;  %v12688_v41 = vcombine.low %v7526_v61, %v7529_v59  ;;  %v12816_v61 = vcombine.low %v9342_v44, %v9345_v26  ;;  %v9297_v59 = vld [vmem:[#allocation7 + $0xcbc] sm:$0xf]  ;;  %v7431_v26 = vld [vmem:[#allocation7 + $0x176c] sm:$0xf] }
 0x5e7   : > { %9013 = vmatpush1.bf16.msra.mxu1 %v12658_v6  ;;  %v9162_v27 = vsel %vm1699_vm1, %v9160_v34, %v9161_v0  ;;  %v9163_v47 = vsel %vm1699_vm1, %v9161_v0, %v9160_v34  ;;  %v7389_v34 = vld [vmem:[#allocation7 + $0x122c] sm:$0xf] }
 0x5e8   : > { %10960 = vmatpush1.bf16.msra.mxu0 %v12884_v12  ;;  %9014 = vmatprep.subr.bf16.mxu1 %v12664_v28  ;;  %v14898_v16 = vadd.f32 %v9162_v27, %v8899_v49  ;;  %v14900_v4 = vadd.f32 %v9163_v47, %v8903_v51  ;;  %v9464_v49 = vld [vmem:[#allocation7 + $0x21b4] sm:$0xff]  ;;  %v7392_v51 = vld [vmem:[#allocation7 + $0x128c] sm:$0xf] }
 0x5e9   : > { %10961 = vmatprep.subr.bf16.mxu0 %v12890_v62  ;;  %v12915_v6 = vcombine.high %v9461_v48, %v9464_v49  ;;  %v9467_v12 = vld [vmem:[#allocation7 + $0x2214] sm:$0xff]  ;;  %v12914_v62 = vcombine.low %v9461_v48, %v9464_v49  ;;  %v12575_v5 = vcombine.low %v7389_v34, %v7392_v51  ;;  %v7344_v0 = vld [vmem:[#allocation7 + $0xc8c] sm:$0xf] }
 0x5ea   : > { %v9470_v28 = vld [vmem:[#allocation7 + $0x2274] sm:$0xff]  ;;  %v12535_v47 = vcombine.low %v7341_v33, %v7344_v0  ;;  %v7413_v48 = vld [vmem:[#allocation7 + $0x152c] sm:$0xf]  ;;  %v9354_v0 = vld [vmem:[#allocation7 + $0x13dc] sm:$0xf] }
 0x5eb   : > { %9015 = vmatpush1.bf16.msra.mxu1 %v12663_v11  ;;  %v12920_v1 = vcombine.high %v9467_v12, %v9470_v28  ;;  %v7398_v11 = vld [vmem:[#allocation7 + $0x134c] sm:$0xf]  ;;  %v9476_v27 = vld [vmem:[#allocation7 + $0x2334] sm:$0xff] }
 0x5ec   : > { %10962 = vmatpush1.bf16.msra.mxu0 %v12889_v35  ;;  %9016 = vmatprep.subr.bf16.mxu1 %v12669_v13  ;;  %v9473_v35 = vld [vmem:[#allocation7 + $0x22d4] sm:$0xff]  ;;  %v12919_v13 = vcombine.low %v9467_v12, %v9470_v28  ;;  %v7416_v49 = vld [vmem:[#allocation7 + $0x158c] sm:$0xf]  ;;  %v9300_v28 = vld [vmem:[#allocation7 + $0xd1c] sm:$0xf] }
 0x5ed   : > { %10963 = vmatprep.subr.bf16.mxu0 %v12895_v40  ;;  %v12580_v40 = vcombine.low %v7395_v3, %v7398_v11  ;;  %v12925_v20 = vcombine.high %v9473_v35, %v9476_v27  ;;  %v12924_v14 = vcombine.low %v9473_v35, %v9476_v27  ;;  %v12595_v34 = vcombine.low %v7413_v48, %v7416_v49  ;;  %v7365_v51 = vld [vmem:[#allocation7 + $0xf2c] sm:$0xf]  ;;  %v12258_v3 = vld [vmem:[#allocation13 + $0x1] ss:$0 sm:$0xff] }
 0x5ee   : > { %v7368_v12 = vld [vmem:[#allocation7 + $0xf8c] sm:$0xf] }
 0x5ef   : > { %9017 = vmatpush1.bf16.msra.mxu1 %v12668_v43  ;;  %v7404_v43 = vld [vmem:[#allocation7 + $0x140c] sm:$0xf]  ;;  %v12555_v11 = vcombine.low %v7365_v51, %v7368_v12  ;;  %v9321_v12 = vld [vmem:[#allocation7 + $0xfbc] sm:$0xf] }
 0x5f0   : > { %10964 = vmatpush1.bf16.msra.mxu0 %v12894_v54  ;;  %9018 = vmatprep.subr.bf16.mxu1 %v12674_v25  ;;  %v13855_v54 = vld [vmem:[%s14553_s13 + $0x10] ss:$24 sps:$4 sm:$0xff]   ;;  %v12585_v55 = vcombine.low %v7401_v63, %v7404_v43  ;;  %v7422_v33 = vld [vmem:[#allocation7 + $0x164c] sm:$0xf]  ;;  %v5788_v43 = vadd.f32 %v12258_v3, %v14877_v60 }
 0x5f1   : > { %10965 = vmatprep.subr.bf16.mxu0 %v12900_v32  ;;  %v9479_v25 = vld [vmem:[#allocation7 + $0x2394] sm:$0xff]  ;;  %v7428_v63 = vld [vmem:[#allocation7 + $0x170c] sm:$0xf] }
 0x5f2   : > { %v9482_v32 = vld [vmem:[#allocation7 + $0x23f4] sm:$0xff]  ;;  %v7434_v60 = vld [vmem:[#allocation7 + $0x17cc] sm:$0xf]  ;;  %13822 = vtanh.f32 %v5788_v43  ;;  %v9378_v43 = vld [vmem:[#allocation7 + $0x16dc] sm:$0xf] }
 0x5f3   : > { %9019 = vmatpush1.bf16.msra.mxu1 %v12673_v23  ;;  %v7356_v23 = vld [vmem:[#allocation7 + $0xe0c] sm:$0xf]  ;;  %v12929_v38 = vcombine.low %v9479_v25, %v9482_v32 }
 0x5f4   : > { %10966 = vmatpush1.bf16.msra.mxu0 %v12899_v30  ;;  %9020 = vmatprep.subr.bf16.mxu1 %v12679_v36  ;;  %v12930_v30 = vcombine.high %v9479_v25, %v9482_v32  ;;  %v7407_v36 = vld [vmem:[#allocation7 + $0x146c] sm:$0xf]  ;;  %v12545_v45 = vcombine.low %v7353_v37, %v7356_v23  ;;  %v9360_v25 = vld [vmem:[#allocation7 + $0x149c] sm:$0xf] }
 0x5f5   : > { %10967 = vmatprep.subr.bf16.mxu0 %v12905_v39  ;;  %v7410_v39 = vld [vmem:[#allocation7 + $0x14cc] sm:$0xf]  ;;  %v9363_v32 = vld [vmem:[#allocation7 + $0x14fc] sm:$0xf] }
 0x5f7   : > { %9021 = vmatpush1.bf16.msra.mxu1 %v12678_v46  ;;  %v12590_v46 = vcombine.low %v7407_v36, %v7410_v39  ;;  %v9312_v36 = vld [vmem:[#allocation7 + $0xe9c] sm:$0xf] }
 0x5f8   : > { %10968 = vmatpush1.bf16.msra.mxu0 %v12904_v18  ;;  %9022 = vmatprep.subr.bf16.mxu1 %v12684_v17  ;;  %v7359_v18 = vld [vmem:[#allocation7 + $0xe6c] sm:$0xf]  ;;  %v9315_v39 = vld [vmem:[#allocation7 + $0xefc] sm:$0xf] }
 0x5f9   : > { %10969 = vmatprep.subr.bf16.mxu0 %v12910_v24  ;;  %v7362_v17 = vld [vmem:[#allocation7 + $0xecc] sm:$0xf]  ;;  %v9294_v24 = vld [vmem:[#allocation7 + $0xc5c] sm:$0xf]  ;;  %v12791_v49 = vcombine.low %v9312_v36, %v9315_v39 }
 0x5fb   : > { %9023 = vmatpush1.bf16.msra.mxu1 %v12683_v52  ;;  %v9348_v52 = vld [vmem:[#allocation7 + $0x131c] sm:$0xf] }
 0x5fc   : > { %10970 = vmatpush1.bf16.msra.mxu0 %v12909_v22  ;;  %9024 = vmatprep.subr.bf16.mxu1 %v12689_v56  ;;  %v9351_v22 = vld [vmem:[#allocation7 + $0x137c] sm:$0xf]  ;;  %v12550_v56 = vcombine.low %v7359_v18, %v7362_v17  ;;  %v7383_v17 = vld [vmem:[#allocation7 + $0x116c] sm:$0xf] }
 0x5fd   : > { %10971 = vmatprep.subr.bf16.mxu0 %v12915_v6  ;;  %v12776_v6 = vcombine.low %v9294_v24, %v9297_v59  ;;  %v7386_v24 = vld [vmem:[#allocation7 + $0x11cc] sm:$0xf] }
 0x5ff   : > { %9025 = vmatpush1.bf16.msra.mxu1 %v12688_v41  ;;  %v12821_v41 = vcombine.low %v9348_v52, %v9351_v22  ;;  %v12610_v52 = vcombine.low %v7431_v26, %v7434_v60  ;;  %v9318_v22 = vld [vmem:[#allocation7 + $0xf5c] sm:$0xf]  ;;  %v9211_v26 = vld [vmem:[#allocation7 + $0x22c] sm:$0xff] }
 0x600   : > { %10972 = vmatpush1.bf16.msra.mxu0 %v12914_v62  ;;  %13188 = vmatprep.subr.bf16.mxu1 %v12575_v5  ;;  %v9303_v62 = vld [vmem:[#allocation7 + $0xd7c] sm:$0xf]  ;;  %v7419_v5 = vld [vmem:[#allocation7 + $0x15ec] sm:$0xf] }
 0x601   : > { %10973 = vmatprep.subr.bf16.mxu0 %v12920_v1  ;;  %v9357_v1 = vld [vmem:[#allocation7 + $0x143c] sm:$0xf]  ;;  %v12781_v35 = vcombine.low %v9300_v28, %v9303_v62  ;;  %v12600_v27 = vcombine.low %v7419_v5, %v7422_v33  ;;  %v9196_v28 = vld [vmem:[#allocation7 + $0x4c] sm:$0xff]  ;;  %v12570_v33 = vcombine.low %v7383_v17, %v7386_v24 }
 0x602   : > { %9027 = vmatmul.mubr.bf16.vlgmr.msra.gmra.mrb[40].mxu1 %v13855_v54  ;;  %v12826_v53 = vcombine.low %v9354_v0, %v9357_v1  ;;  %v9372_v0 = vld [vmem:[#allocation7 + $0x161c] sm:$0xf] }
 0x603   : > { %13189 = vmatpush3.bf16.msra.mxu1 %v12535_v47  ;;  %9110 = vmatprep.mubr.bf16.mxu1 %v14883_v7  ;;  %v7371_v47 = vld [vmem:[#allocation7 + $0xfec] sm:$0xf]  ;;  %v9375_v1 = vld [vmem:[#allocation7 + $0x167c] sm:$0xf] }
 0x604   : > { %10974 = vmatpush1.bf16.msra.mxu0 %v12919_v13  ;;  %13190 = vmatprep.subr.bf16.mxu1 %v12580_v40  ;;  %v7374_v13 = vld [vmem:[#allocation7 + $0x104c] sm:$0xf]  ;;  %v9306_v40 = vld [vmem:[#allocation7 + $0xddc] sm:$0xf] }
 0x605   : > { %10975 = vmatprep.subr.bf16.mxu0 %v12925_v20  ;;  %v7425_v20 = vld [vmem:[#allocation7 + $0x16ac] sm:$0xf]  ;;  %v12786_v37 = vcombine.low %v9306_v40, %v9309_v31  ;;  %v9384_v60 = vld [vmem:[#allocation7 + $0x179c] sm:$0xf] }
 0x606   : > { %v12605_v23 = vcombine.low %v7425_v20, %v7428_v63  ;;  %v9327_v20 = vld [vmem:[#allocation7 + $0x107c] sm:$0xf]  ;;  %v9205_v63 = vld [vmem:[#allocation7 + $0x16c] sm:$0xff] }
 0x607   : > { %13191 = vmatpush3.bf16.msra.mxu1 %v12540_v58  ;;  %v12560_v58 = vcombine.low %v7371_v47, %v7374_v13  ;;  %v9324_v13 = vld [vmem:[#allocation7 + $0x101c] sm:$0xf] }
 0x608   : > { %10976 = vmatpush1.bf16.msra.mxu0 %v12924_v14  ;;  %13192 = vmatprep.subr.bf16.mxu1 %v12585_v55  ;;  %v7377_v14 = vld [vmem:[#allocation7 + $0x10ac] sm:$0xf]  ;;  %v5792_v55 = vld [vmem:[#allocation13 + $0x4] sm:$0x1] }
 0x609   : > { %10977 = vmatprep.subr.bf16.mxu0 %v12930_v30  ;;  %v7380_v30 = vld [vmem:[#allocation7 + $0x110c] sm:$0xf] }
 0x60a   : > { %v12565_v18 = vcombine.low %v7377_v14, %v7380_v30  ;;  %v13823_v14 = vpop.eup %13822 }
 0x60b   : > { %13193 = vmatpush3.bf16.msra.mxu1 %v12545_v45 }
 0x60c   : > { %10978 = vmatpush1.bf16.msra.mxu0 %v12929_v38  ;;  %13194 = vmatprep.subr.bf16.mxu1 %v12590_v46  ;;  %v9366_v38 = vld [vmem:[#allocation7 + $0x155c] sm:$0xf] }
 0x60d   : > { %13254 = vmatprep.subr.bf16.mxu0 %v12816_v61 }
 0x60f   : > { %13195 = vmatpush3.bf16.msra.mxu1 %v12550_v56  ;;  %10980 = vmatmul.mubr.bf16.vlgmr.msra.gmra.mrb[48].mxu0 %v13855_v54  ;;  %v5789_v54 = vadd.f32 %v12258_v3, %v14879_v42  ;;  %v9369_v42 = vld [vmem:[#allocation7 + $0x15bc] sm:$0xf]  ;;  %v5793_v56 = vadd.f32 %v5792_v55, %v14713_v8  ;;  %v12801_v55 = vcombine.low %v9324_v13, %v9327_v20  ;;  %v13797_v13 = vld [vmem:[#allocation11 + $0x8] sm:$0xff]  }
 0x610   : > { %13255 = vmatpush3.bf16.msra.mxu0 %v12776_v6  ;;  %13196 = vmatprep.subr.bf16.mxu1 %v12595_v34  ;;  %v12836_v51 = vcombine.low %v9366_v38, %v9369_v42  ;;  %v9235_v20 = vld [vmem:[#allocation7 + $0x52c] sm:$0xff] }
 0x611   : > { %13256 = vmatprep.subr.bf16.mxu0 %v12821_v41  ;;  %11063 = vmatprep.mubr.bf16.mxu0 %v14883_v7  ;;  %v12831_v7 = vcombine.low %v9360_v25, %v9363_v32  ;;  %13824 = vtanh.f32 %v5789_v54  ;;  %v9199_v41 = vld [vmem:[#allocation7 + $0xac] sm:$0xff]  ;;  %v7225_v40 = vrot.slane %v5793_v56, %v14716_v9  ;;  %v9381_v25 = vld [vmem:[#allocation7 + $0x173c] sm:$0xf] }
 0x612   : > { %v12693_v47 = vcombine.high %v9196_v28, %v9199_v41  ;;  %v12846_v39 = vcombine.low %v9378_v43, %v9381_v25  ;;  %v13799_v25 = vld [vmem:[#allocation11 + $0x10] sm:$0xff]  }
 0x613   : > { %13197 = vmatpush3.bf16.msra.mxu1 %v12555_v11 }
 0x614   : > { %13257 = vmatpush3.bf16.msra.mxu0 %v12781_v35  ;;  %13198 = vmatprep.subr.bf16.mxu1 %v12600_v27  ;;  %v12796_v27 = vcombine.low %v9318_v22, %v9321_v12 }
 0x615   : > { %v7195_v44 = vpop.f32.mrb[36].mxu1  ;;  %13258 = vmatprep.subr.bf16.mxu0 %v12826_v53 }
 0x616   : > { %v7197_v45 = vpop.f32.mrb[37].mxu1  ;;  %v7210_v61 = vrot.slane %v7195_v44, 2  ;;  %v9333_v44 = vld [vmem:[#allocation7 + $0x113c] sm:$0xf] }
 0x617   : > { %v7199_v46 = vpop.f32.mrb[38].mxu1  ;;  %13199 = vmatpush3.bf16.msra.mxu1 %v12560_v58  ;;  %v7216_v6 = vrot.slane %v7197_v45, 3  ;;  %v12692_v58 = vcombine.low %v9196_v28, %v9199_v41  ;;  %v9387_v45 = vld [vmem:[#allocation7 + $0x17fc] sm:$0xf]  ;;  %v13794_v28 = vld [vmem:[#allocation11 + $0x40] sm:$0xff]   ;;  %v9220_v41 = vld [vmem:[#allocation7 + $0x34c] sm:$0xff] }
 0x618   : > { %v7211_v59 = vrot.slane %v7199_v46, 2  ;;  %v7201_v48 = vpop.f32.mrb[39].mxu1  ;;  %13259 = vmatpush3.bf16.msra.mxu0 %v12786_v37  ;;  %13200 = vmatprep.subr.bf16.mxu1 %v12605_v23  ;;  %v9330_v23 = vld [vmem:[#allocation7 + $0x10dc] sm:$0xf] }
 0x619   : > { %v7217_v34 = vrot.slane %v7201_v48, 3  ;;  %13260 = vmatprep.subr.bf16.mxu0 %v12831_v7  ;;  %v9208_v7 = vld [vmem:[#allocation7 + $0x1cc] sm:$0xff]  ;;  %v12806_v17 = vcombine.low %v9330_v23, %v9333_v44  ;;  %v9339_v48 = vld [vmem:[#allocation7 + $0x11fc] sm:$0xf] }
 0x61a   : > { %v7212_v62 = vsel %vm1706_vm2, %v7210_v61, %v7211_v59  ;;  %v7213_v5 = vsel %vm1706_vm2, %v7211_v59, %v7210_v61  ;;  %v12703_v24 = vcombine.high %v9208_v7, %v9211_v26  ;;  %v9336_v61 = vld [vmem:[#allocation7 + $0x119c] sm:$0xf]  ;;  %v12851_v59 = vcombine.low %v9384_v60, %v9387_v45  ;;  %v13804_v60 = vld [vmem:[#allocation11 + $0x68] sm:$0xff]  }
 0x61b   : > { %v7214_v3 = vadd.f32 %v7212_v62, %v14853_v29  ;;  %v7215_v8 = vadd.f32 %v7213_v5, %v14855_v19  ;;  %v7218_v11 = vsel %vm5778_vm4, %v7216_v6, %v7217_v34  ;;  %v7219_v35 = vsel %vm5778_vm4, %v7217_v34, %v7216_v6  ;;  %13201 = vmatpush3.bf16.msra.mxu1 %v12565_v18  ;;  %v9202_v19 = vld [vmem:[#allocation7 + $0x10c] sm:$0xff]  ;;  %v13825_v9 = vpop.eup %13824 }
 0x61c   : > { %13261 = vmatpush3.bf16.msra.mxu0 %v12791_v49  ;;  %13202 = vmatprep.subr.bf16.mxu1 %v12610_v52  ;;  %v12841_v29 = vcombine.low %v9372_v0, %v9375_v1  ;;  %v12698_v37 = vcombine.high %v9202_v19, %v9205_v63  ;;  %v12697_v46 = vcombine.low %v9202_v19, %v9205_v63  ;;  %v14922_v18 = vld [vmem:[%s14553_s13 + $0x4] ss:$24 sps:$4 sm:$0xff]  }
 0x61d   : > { %v7220_v53 = vadd.f32 %v7218_v11, %v7214_v3  ;;  %v7221_v31 = vadd.f32 %v7219_v35, %v7215_v8  ;;  %13262 = vmatprep.subr.bf16.mxu0 %v12836_v51  ;;  %v9214_v49 = vld [vmem:[#allocation7 + $0x28c] sm:$0xff]  ;;  %v12702_v6 = vcombine.low %v9208_v7, %v9211_v26  ;;  %v12811_v34 = vcombine.low %v9336_v61, %v9339_v48  ;;  %v13795_v0 = vld [vmem:[#allocation11] sm:$0xff]  }
 0x61e   : > { %v9217_v52 = vld [vmem:[#allocation7 + $0x2ec] sm:$0xff]  ;;  %v13803_v7 = vld [vmem:[#allocation11 + $0x20] sm:$0xff]  }
 0x61f   : > { %v7226_v32 = vadd.f32 %v7225_v40, %v7220_v53  ;;  %v7227_v54 = vadd.f32 %v7225_v40, %v7221_v31  ;;  %13203 = vmatpush3.bf16.msra.mxu1 %v12570_v33  ;;  %v12708_v51 = vcombine.high %v9214_v49, %v9217_v52  ;;  %v9223_v62 = vld [vmem:[#allocation7 + $0x3ac] sm:$0xff]  ;;  %v12707_v33 = vcombine.low %v9214_v49, %v9217_v52 }
 0x620   : > { %13263 = vmatpush3.bf16.msra.mxu0 %v12796_v27  ;;  %10732 = vmatprep.subr.bf16.mxu1 %v12693_v47  ;;  %v12713_v1 = vcombine.high %v9220_v41, %v9223_v62  ;;  %v13796_v8 = vld [vmem:[#allocation11 + $0x48] sm:$0xff]   ;;  %v12712_v47 = vcombine.low %v9220_v41, %v9223_v62  ;;  %v13798_v31 = vld [vmem:[#allocation11 + $0x50] sm:$0xff]  }
 0x621   : > { %v7228_v30 = vmax.f32 %v7226_v32, 0.0  ;;  %v7229_v36 = vmax.f32 %v7227_v54, 0.0  ;;  %13264 = vmatprep.subr.bf16.mxu0 %v12841_v29  ;;  %v9226_v11 = vld [vmem:[#allocation7 + $0x40c] sm:$0xff] }
 0x622   : > { %9111 = vmatmul.mubr.bf16.vlgmr.msra.gmra.mrb[44].mxu1 %v14889_v50  ;;  %v9229_v35 = vld [vmem:[#allocation7 + $0x46c] sm:$0xff] }
 0x623   : > { %v7232_v38 = vmul.f32 %v13823_v14, %v7228_v30  ;;  %v7233_v42 = vmul.f32 %v13825_v9, %v7229_v36  ;;  %10733 = vmatpush1.bf16.msra.mxu1 %v12692_v58  ;;  %10764 = vmatprep.mubr.bf16.mxu1 %v14922_v18  ;;  %v12718_v40 = vcombine.high %v9226_v11, %v9229_v35  ;;  %v9232_v29 = vld [vmem:[#allocation7 + $0x4cc] sm:$0xff]  ;;  %v4348_v14 = vrot.slane %v14830_v15, 4  ;;  %v13802_v9 = vld [vmem:[#allocation11 + $0x60] sm:$0xff]  }
 0x624   : > { %13265 = vmatpush3.bf16.msra.mxu0 %v12801_v55  ;;  %10734 = vmatprep.subr.bf16.mxu1 %v12698_v37  ;;  %v12717_v63 = vcombine.low %v9226_v11, %v9229_v35  ;;  %v12723_v32 = vcombine.high %v9232_v29, %v9235_v20  ;;  %v9238_v54 = vld [vmem:[#allocation7 + $0x58c] sm:$0xff]  ;;  %v12722_v55 = vcombine.low %v9232_v29, %v9235_v20  ;;  %v13801_v37 = vld [vmem:[#allocation11 + $0x18] sm:$0xff]  }
 0x625   : > { %13266 = vmatprep.subr.bf16.mxu0 %v12846_v39  ;;  %v7235_v22 = vsel %vm7231_vm5, %v7233_v42, -inf  ;;  %v9241_v58 = vld [vmem:[#allocation7 + $0x5ec] sm:$0xff]  ;;  %v4349_v39 = vmax.f32 %v14830_v15, %v4348_v14 }
 0x626   : > { %v7236_v56 = vmax.f32 %v7232_v38, %v7235_v22  ;;  %v12728_v23 = vcombine.high %v9238_v54, %v9241_v58  ;;  %v9244_v30 = vld [vmem:[#allocation7 + $0x64c] sm:$0xff]  ;;  %v12727_v44 = vcombine.low %v9238_v54, %v9241_v58 }
 0x627   : > { %10735 = vmatpush1.bf16.msra.mxu1 %v12697_v46  ;;  %v9247_v36 = vld [vmem:[#allocation7 + $0x6ac] sm:$0xff]  ;;  %v4350_v42 = vrot.slane %v4349_v39, 2 }
 0x628   : > { %13267 = vmatpush3.bf16.msra.mxu0 %v12806_v17  ;;  %10736 = vmatprep.subr.bf16.mxu1 %v12703_v24  ;;  %v7237_v12 = vrot.slane %v7236_v56, 4  ;;  %v12733_v26 = vcombine.high %v9244_v30, %v9247_v36  ;;  %v9250_v45 = vld [vmem:[#allocation7 + $0x70c] sm:$0xff]  ;;  %v12732_v46 = vcombine.low %v9244_v30, %v9247_v36 }
 0x629   : > { %13268 = vmatprep.subr.bf16.mxu0 %v12851_v59  ;;  %v9253_v38 = vld [vmem:[#allocation7 + $0x76c] sm:$0xff]  ;;  %v4351_v48 = vmax.f32 %v4349_v39, %v4350_v42 }
 0x62a   : > { %v7238_v5 = vmax.f32 %v7236_v56, %v7237_v12  ;;  %v13805_v17 = vld [vmem:[#allocation11 + $0x28] sm:$0xff]   ;;  %v12738_v24 = vcombine.high %v9250_v45, %v9253_v38  ;;  %v13806_v61 = vld [vmem:[#allocation11 + $0x70] sm:$0xff]   ;;  %v12737_v49 = vcombine.low %v9250_v45, %v9253_v38  ;;  %v13808_v56 = vld [vmem:[#allocation11 + $0x78] sm:$0xff]  }
 0x62b   : > { %10737 = vmatpush1.bf16.msra.mxu1 %v12702_v6  ;;  %v9256_v15 = vld [vmem:[#allocation7 + $0x7cc] sm:$0xff] }
 0x62c   : > { %13269 = vmatpush3.bf16.msra.mxu0 %v12811_v34  ;;  %10738 = vmatprep.subr.bf16.mxu1 %v12708_v51  ;;  %v7239_v3 = vrot.slane %v7238_v5, 2  ;;  %v9259_v59 = vld [vmem:[#allocation7 + $0x82c] sm:$0xff]  ;;  %v4352_v51 = vrot.slane %v4351_v48, 1 }
 0x62d   : > { %13298 = vmatprep.subr.bf16.mxu0 %v13794_v28  ;;  %v13807_v52 = vld [vmem:[#allocation11 + $0x30] sm:$0xff]   ;;  %v12743_v22 = vcombine.high %v9256_v15, %v9259_v59  ;;  %v12742_v12 = vcombine.low %v9256_v15, %v9259_v59  ;;  %v13809_v28 = vld [vmem:[#allocation11 + $0x38] sm:$0xff]  }
 0x62e   : > { %v7240_v27 = vmax.f32 %v7238_v5, %v7239_v3  ;;  %v9262_v6 = vld [vmem:[#allocation7 + $0x88c] sm:$0xff]  ;;  %v4353_v62 = vmax.f32 %v4351_v48, %v4352_v51 }
 0x62f   : > { %10739 = vmatpush1.bf16.msra.mxu1 %v12707_v33  ;;  %11064 = vmatmul.mubr.bf16.vlgmr.msra.gmra.mrb[52].mxu0 %v14889_v50  ;;  %v13800_v50 = vld [vmem:[#allocation11 + $0x58] sm:$0xff]   ;;  %v9265_v34 = vld [vmem:[#allocation7 + $0x8ec] sm:$0xff] }
 0x630   : > { %13299 = vmatpush3.bf16.msra.mxu0 %v13795_v0  ;;  %10740 = vmatprep.subr.bf16.mxu1 %v12713_v1  ;;  %v7241_v53 = vrot.slane %v7240_v27, 1  ;;  %v12748_v41 = vcombine.high %v9262_v6, %v9265_v34  ;;  %v9268_v5 = vld [vmem:[#allocation7 + $0x94c] sm:$0xff]  ;;  %v12747_v0 = vcombine.low %v9262_v6, %v9265_v34  ;;  %v11158_v3 = vpack.c.bf16 %v4353_v62, %v4353_v62 }
 0x631   : > { %13300 = vmatprep.subr.bf16.mxu0 %v13796_v8  ;;  %v9271_v33 = vld [vmem:[#allocation7 + $0x9ac] sm:$0xff] }
 0x632   : > { %v7242_v19 = vmax.f32 %v7240_v27, %v7241_v53  ;;  %v12753_v1 = vcombine.high %v9268_v5, %v9271_v33  ;;  %v9274_v8 = vld [vmem:[#allocation7 + $0xa0c] sm:$0xff]  ;;  %v12752_v35 = vcombine.low %v9268_v5, %v9271_v33 }
 0x633   : > { %10741 = vmatpush1.bf16.msra.mxu1 %v12712_v47  ;;  %v9277_v11 = vld [vmem:[#allocation7 + $0xa6c] sm:$0xff] }
 0x634   : > { %13301 = vmatpush3.bf16.msra.mxu0 %v13797_v13  ;;  %10742 = vmatprep.subr.bf16.mxu1 %v12718_v40  ;;  %v11159_v43 = vpack.c.bf16 %v7242_v19, %v7242_v19  ;;  %v12758_v27 = vcombine.high %v9274_v8, %v9277_v11  ;;  %v9280_v47 = vld [vmem:[#allocation7 + $0xacc] sm:$0xff]  ;;  %v12757_v40 = vcombine.low %v9274_v8, %v9277_v11 }
 0x635   : > { %13302 = vmatprep.subr.bf16.mxu0 %v13798_v31  ;;  %v9283_v13 = vld [vmem:[#allocation7 + $0xb2c] sm:$0xff] }
 0x636   : > { %11386 = vmatprep.mubr.bf16.mxu0 %v11159_v43  ;;  %v12763_v53 = vcombine.high %v9280_v47, %v9283_v13  ;;  %v9286_v31 = vld [vmem:[#allocation7 + $0xb8c] sm:$0xff]  ;;  %v12762_v20 = vcombine.low %v9280_v47, %v9283_v13 }
 0x637   : > { %10743 = vmatpush1.bf16.msra.mxu1 %v12717_v63  ;;  %v9289_v29 = vld [vmem:[#allocation7 + $0xbec] sm:$0xff] }
 0x638   : > { %13303 = vmatpush3.bf16.msra.mxu0 %v13799_v25  ;;  %10744 = vmatprep.subr.bf16.mxu1 %v12723_v32  ;;  %v12768_v19 = vcombine.high %v9286_v31, %v9289_v29  ;;  %v9292_v63 = vld [vmem:[#allocation7 + $0xc4c] sm:$0xff]  ;;  %v12767_v25 = vcombine.low %v9286_v31, %v9289_v29 }
 0x639   : > { %13304 = vmatprep.subr.bf16.mxu0 %v13800_v50  ;;  %v9295_v43 = vld [vmem:[#allocation7 + $0xcac] sm:$0xff] }
 0x63a   : > { %v12773_v32 = vcombine.high %v9292_v63, %v9295_v43  ;;  %v9298_v50 = vld [vmem:[#allocation7 + $0xd0c] sm:$0xff]  ;;  %v12772_v58 = vcombine.low %v9292_v63, %v9295_v43 }
 0x63b   : > { %10745 = vmatpush1.bf16.msra.mxu1 %v12722_v55  ;;  %v9301_v54 = vld [vmem:[#allocation7 + $0xd6c] sm:$0xff] }
 0x63c   : > { %13305 = vmatpush3.bf16.msra.mxu0 %v13801_v37  ;;  %10746 = vmatprep.subr.bf16.mxu1 %v12728_v23  ;;  %v12778_v14 = vcombine.high %v9298_v50, %v9301_v54  ;;  %v9304_v55 = vld [vmem:[#allocation7 + $0xdcc] sm:$0xff] }
 0x63d   : > { %13306 = vmatprep.subr.bf16.mxu0 %v13802_v9  ;;  %v9307_v37 = vld [vmem:[#allocation7 + $0xe2c] sm:$0xff]  ;;  %v12777_v9 = vcombine.low %v9298_v50, %v9301_v54 }
 0x63e   : > { %v14931_v23 = vld [vmem:[%s14553_s13] ss:$24 sps:$4 sm:$0xff]   ;;  %v13858_v30 = vld [vmem:[%s14553_s13 + $0xc] ss:$24 sps:$4 sm:$0xff]   ;;  %v12783_v36 = vcombine.high %v9304_v55, %v9307_v37 }
 0x63f   : > { %10747 = vmatpush1.bf16.msra.mxu1 %v12727_v44  ;;  %v9310_v39 = vld [vmem:[#allocation7 + $0xe8c] sm:$0xff] }
 0x640   : > { %13307 = vmatpush3.bf16.msra.mxu0 %v13803_v7  ;;  %10748 = vmatprep.subr.bf16.mxu1 %v12733_v26  ;;  %v9313_v44 = vld [vmem:[#allocation7 + $0xeec] sm:$0xff]  ;;  %v12782_v7 = vcombine.low %v9304_v55, %v9307_v37 }
 0x641   : > { %13308 = vmatprep.subr.bf16.mxu0 %v13804_v60  ;;  %v12788_v26 = vcombine.high %v9310_v39, %v9313_v44  ;;  %v9316_v60 = vld [vmem:[#allocation7 + $0xf4c] sm:$0xff]  ;;  %v12787_v38 = vcombine.low %v9310_v39, %v9313_v44 }
 0x642   : > { %v9319_v45 = vld [vmem:[#allocation7 + $0xfac] sm:$0xff] }
 0x643   : > { %10749 = vmatpush1.bf16.msra.mxu1 %v12732_v46  ;;  %v12793_v42 = vcombine.high %v9316_v60, %v9319_v45  ;;  %v9322_v46 = vld [vmem:[#allocation7 + $0x100c] sm:$0xff] }
 0x644   : > { %13309 = vmatpush3.bf16.msra.mxu0 %v13805_v17  ;;  %10750 = vmatprep.subr.bf16.mxu1 %v12738_v24  ;;  %v9325_v17 = vld [vmem:[#allocation7 + $0x106c] sm:$0xff]  ;;  %v12792_v24 = vcombine.low %v9316_v60, %v9319_v45 }
 0x645   : > { %13310 = vmatprep.subr.bf16.mxu0 %v13806_v61  ;;  %v13182_v61 = vpop.f32.mrb[40].mxu0  ;;  %v12798_v15 = vcombine.high %v9322_v46, %v9325_v17  ;;  %v9328_v48 = vld [vmem:[#allocation7 + $0x10cc] sm:$0xff] }
 0x646   : > { %v13183_v59 = vpop.f32.mrb[41].mxu0  ;;  %v9340_v33 = vld [vmem:[#allocation7 + $0x124c] sm:$0xff] }
 0x647   : > { %10751 = vmatpush1.bf16.msra.mxu1 %v12737_v49  ;;  %v9331_v49 = vld [vmem:[#allocation7 + $0x112c] sm:$0xff] }
 0x648   : > { %13311 = vmatpush3.bf16.msra.mxu0 %v13807_v52  ;;  %10752 = vmatprep.subr.bf16.mxu1 %v12743_v22  ;;  %v14935_v52 = vadd.f32 %v13183_v59, %v13182_v61  ;;  %v13185_v22 = vpop.f32.mrb[42].mxu0  ;;  %v12803_v34 = vcombine.high %v9328_v48, %v9331_v49  ;;  %v9346_v13 = vld [vmem:[#allocation7 + $0x130c] sm:$0xff] }
 0x649   : > { %13312 = vmatprep.subr.bf16.mxu0 %v13808_v56  ;;  %v12797_v56 = vcombine.low %v9322_v46, %v9325_v17  ;;  %v13186_v6 = vpop.f32.mrb[43].mxu0  ;;  %v9352_v29 = vld [vmem:[#allocation7 + $0x13cc] sm:$0xff] }
 0x64a   : > { %v14937_v51 = vadd.f32 %v13186_v6, %v13185_v22  ;;  %v13226_v5 = vpop.f32.mrb[44].mxu0  ;;  %v9358_v43 = vld [vmem:[#allocation7 + $0x148c] sm:$0xff] }
 0x64b   : > { %10753 = vmatpush1.bf16.msra.mxu1 %v12742_v12  ;;  %v9334_v12 = vld [vmem:[#allocation7 + $0x118c] sm:$0xff] }
 0x64c   : > { %13313 = vmatpush3.bf16.msra.mxu0 %v13809_v28  ;;  %10754 = vmatprep.subr.bf16.mxu1 %v12748_v41  ;;  %v9337_v28 = vld [vmem:[#allocation7 + $0x11ec] sm:$0xff]  ;;  %v12802_v41 = vcombine.low %v9328_v48, %v9331_v49 }
 0x64d   : > { %v12808_v62 = vcombine.high %v9334_v12, %v9337_v28  ;;  %v12807_v11 = vcombine.low %v9334_v12, %v9337_v28  ;;  %v9364_v54 = vld [vmem:[#allocation7 + $0x154c] sm:$0xff] }
 0x64e   : > { %v9370_v37 = vld [vmem:[#allocation7 + $0x160c] sm:$0xff] }
 0x64f   : > { %10755 = vmatpush1.bf16.msra.mxu1 %v12747_v0  ;;  %11387 = vmatmul.mubr.bf16.vlgmr.msra.gmra.mrb[56].mxu0 %v11158_v3  ;;  %v9343_v0 = vld [vmem:[#allocation7 + $0x12ac] sm:$0xff] }
 0x650   : > { %10756 = vmatprep.subr.bf16.mxu1 %v12753_v1  ;;  %v13227_v1 = vpop.f32.mrb[45].mxu0  ;;  %v9376_v39 = vld [vmem:[#allocation7 + $0x16cc] sm:$0xff] }
 0x651   : > { %v14939_v3 = vadd.f32 %v13227_v1, %v13226_v5  ;;  %v13229_v8 = vpop.f32.mrb[46].mxu0  ;;  %v9379_v44 = vld [vmem:[#allocation7 + $0x172c] sm:$0xff] }
 0x652   : > { %v9382_v60 = vld [vmem:[#allocation7 + $0x178c] sm:$0xff] }
 0x653   : > { %10757 = vmatpush1.bf16.msra.mxu1 %v12752_v35  ;;  %v13230_v35 = vpop.f32.mrb[47].mxu0  ;;  %v9385_v45 = vld [vmem:[#allocation7 + $0x17ec] sm:$0xff] }
 0x654   : > { %10758 = vmatprep.subr.bf16.mxu1 %v12758_v27  ;;  %v12813_v27 = vcombine.high %v9340_v33, %v9343_v0  ;;  %v14941_v47 = vadd.f32 %v13230_v35, %v13229_v8  ;;  %v9388_v46 = vld [vmem:[#allocation7 + $0x184c] sm:$0xff] }
 0x655   : > { %v9391_v17 = vld [vmem:[#allocation7 + $0x18ac] sm:$0xff] }
 0x656   : > { %v12853_v61 = vcombine.high %v9388_v46, %v9391_v17  ;;  %v9397_v59 = vld [vmem:[#allocation7 + $0x196c] sm:$0xff]  ;;  %v12852_v48 = vcombine.low %v9388_v46, %v9391_v17 }
 0x657   : > { %10759 = vmatpush1.bf16.msra.mxu1 %v12757_v40  ;;  %v9349_v40 = vld [vmem:[#allocation7 + $0x136c] sm:$0xff] }
 0x658   : > { %10760 = vmatprep.subr.bf16.mxu1 %v12763_v53  ;;  %v12812_v53 = vcombine.low %v9340_v33, %v9343_v0  ;;  %v12818_v31 = vcombine.high %v9346_v13, %v9349_v40  ;;  %v9400_v22 = vld [vmem:[#allocation7 + $0x19cc] sm:$0xff] }
 0x659   : > { %v13859_v6 = vld [vmem:[%s14553_s13 + $0x8] ss:$24 sps:$4 sm:$0xff]   ;;  %v14945_v12 = vld [vmem:[%s14553_s13 + $0x14] ss:$24 sps:$4 sm:$0xff]  }
 0x65a   : > { %v9412_v0 = vld [vmem:[#allocation7 + $0x1b4c] sm:$0xff] }
 0x65b   : > { %10761 = vmatpush1.bf16.msra.mxu1 %v12762_v20  ;;  %v9355_v20 = vld [vmem:[#allocation7 + $0x142c] sm:$0xff] }
 0x65c   : > { %10762 = vmatprep.subr.bf16.mxu1 %v12768_v19  ;;  %v12817_v19 = vcombine.low %v9346_v13, %v9349_v40  ;;  %v12823_v63 = vcombine.high %v9352_v29, %v9355_v20  ;;  %v9415_v1 = vld [vmem:[#allocation7 + $0x1bac] sm:$0xff] }
 0x65d   : > { %v9418_v35 = vld [vmem:[#allocation7 + $0x1c0c] sm:$0xff]  ;;  %v12872_v13 = vcombine.low %v9412_v0, %v9415_v1 }
 0x65f   : > { %10763 = vmatpush1.bf16.msra.mxu1 %v12767_v25  ;;  %v9361_v25 = vld [vmem:[#allocation7 + $0x14ec] sm:$0xff] }
 0x660   : > { %10775 = vmatprep.subr.bf16.mxu1 %v12773_v32  ;;  %v12822_v32 = vcombine.low %v9352_v29, %v9355_v20  ;;  %v12828_v50 = vcombine.high %v9358_v43, %v9361_v25 }
 0x662   : > { %10765 = vmatmul.mubr.bf16.vlgmr.msra.gmra.mrb[48].mxu1 %v14931_v23 }
 0x663   : > { %10776 = vmatpush1.bf16.msra.mxu1 %v12772_v58  ;;  %10807 = vmatprep.mubr.bf16.mxu1 %v13858_v30  ;;  %v9367_v58 = vld [vmem:[#allocation7 + $0x15ac] sm:$0xff] }
 0x664   : > { %10777 = vmatprep.subr.bf16.mxu1 %v12778_v14  ;;  %v12827_v14 = vcombine.low %v9358_v43, %v9361_v25  ;;  %v12833_v55 = vcombine.high %v9364_v54, %v9367_v58  ;;  %v12832_v30 = vcombine.low %v9364_v54, %v9367_v58 }
 0x667   : > { %10778 = vmatpush1.bf16.msra.mxu1 %v12777_v9  ;;  %v9373_v9 = vld [vmem:[#allocation7 + $0x166c] sm:$0xff] }
 0x668   : > { %10779 = vmatprep.subr.bf16.mxu1 %v12783_v36  ;;  %v12838_v36 = vcombine.high %v9370_v37, %v9373_v9 }
 0x66b   : > { %10780 = vmatpush1.bf16.msra.mxu1 %v12782_v7  ;;  %v12837_v7 = vcombine.low %v9370_v37, %v9373_v9 }
 0x66c   : > { %10781 = vmatprep.subr.bf16.mxu1 %v12788_v26  ;;  %v12843_v26 = vcombine.high %v9376_v39, %v9379_v44 }
 0x66f   : > { %10782 = vmatpush1.bf16.msra.mxu1 %v12787_v38  ;;  %v12842_v38 = vcombine.low %v9376_v39, %v9379_v44 }
 0x670   : > { %10783 = vmatprep.subr.bf16.mxu1 %v12793_v42  ;;  %v12848_v42 = vcombine.high %v9382_v60, %v9385_v45 }
 0x673   : > { %10784 = vmatpush1.bf16.msra.mxu1 %v12792_v24  ;;  %v12847_v24 = vcombine.low %v9382_v60, %v9385_v45 }
 0x674   : > { %10785 = vmatprep.subr.bf16.mxu1 %v12798_v15  ;;  %v9394_v15 = vld [vmem:[#allocation7 + $0x190c] sm:$0xff] }
 0x675   : > { %v12858_v49 = vcombine.high %v9394_v15, %v9397_v59 }
 0x677   : > { %10786 = vmatpush1.bf16.msra.mxu1 %v12797_v56  ;;  %v9403_v56 = vld [vmem:[#allocation7 + $0x1a2c] sm:$0xff] }
 0x678   : > { %10787 = vmatprep.subr.bf16.mxu1 %v12803_v34  ;;  %v12857_v34 = vcombine.low %v9394_v15, %v9397_v59  ;;  %v12863_v28 = vcombine.high %v9400_v22, %v9403_v56  ;;  %v12862_v5 = vcombine.low %v9400_v22, %v9403_v56 }
 0x67b   : > { %10788 = vmatpush1.bf16.msra.mxu1 %v12802_v41  ;;  %v9406_v41 = vld [vmem:[#allocation7 + $0x1a8c] sm:$0xff] }
 0x67c   : > { %10789 = vmatprep.subr.bf16.mxu1 %v12808_v62  ;;  %v9409_v62 = vld [vmem:[#allocation7 + $0x1aec] sm:$0xff] }
 0x67d   : > { %v12868_v33 = vcombine.high %v9406_v41, %v9409_v62  ;;  %v12867_v8 = vcombine.low %v9406_v41, %v9409_v62 }
 0x67f   : > { %10790 = vmatpush1.bf16.msra.mxu1 %v12807_v11  ;;  %v12873_v11 = vcombine.high %v9412_v0, %v9415_v1 }
 0x680   : > { %10791 = vmatprep.subr.bf16.mxu1 %v12813_v27  ;;  %v9421_v27 = vld [vmem:[#allocation7 + $0x1c6c] sm:$0xff] }
 0x681   : > { %v12878_v40 = vcombine.high %v9418_v35, %v9421_v27  ;;  %v12877_v29 = vcombine.low %v9418_v35, %v9421_v27  ;;  %v9246_v27 = vld [vmem:[#allocation7 + $0x65c] sm:$0xf] }
 0x683   : > { %10792 = vmatpush1.bf16.msra.mxu1 %v12812_v53  ;;  %v9424_v53 = vld [vmem:[#allocation7 + $0x1ccc] sm:$0xff] }
 0x684   : > { %10793 = vmatprep.subr.bf16.mxu1 %v12818_v31  ;;  %v9427_v31 = vld [vmem:[#allocation7 + $0x1d2c] sm:$0xff] }
 0x685   : > { %v12883_v20 = vcombine.high %v9424_v53, %v9427_v31  ;;  %v12882_v43 = vcombine.low %v9424_v53, %v9427_v31 }
 0x687   : > { %10794 = vmatpush1.bf16.msra.mxu1 %v12817_v19  ;;  %v9430_v19 = vld [vmem:[#allocation7 + $0x1d8c] sm:$0xff] }
 0x688   : > { %10795 = vmatprep.subr.bf16.mxu1 %v12823_v63  ;;  %v9433_v63 = vld [vmem:[#allocation7 + $0x1dec] sm:$0xff] }
 0x689   : > { %v12888_v25 = vcombine.high %v9430_v19, %v9433_v63  ;;  %v12887_v54 = vcombine.low %v9430_v19, %v9433_v63 }
 0x68b   : > { %10796 = vmatpush1.bf16.msra.mxu1 %v12822_v32  ;;  %v9436_v32 = vld [vmem:[#allocation7 + $0x1e4c] sm:$0xff] }
 0x68c   : > { %10797 = vmatprep.subr.bf16.mxu1 %v12828_v50  ;;  %v9439_v50 = vld [vmem:[#allocation7 + $0x1eac] sm:$0xff] }
 0x68d   : > { %v12893_v58 = vcombine.high %v9436_v32, %v9439_v50  ;;  %v12892_v37 = vcombine.low %v9436_v32, %v9439_v50  ;;  %v9201_v32 = vld [vmem:[#allocation7 + $0xbc] sm:$0xf] }
 0x68f   : > { %10798 = vmatpush1.bf16.msra.mxu1 %v12827_v14  ;;  %v9442_v14 = vld [vmem:[#allocation7 + $0x1f0c] sm:$0xff] }
 0x690   : > { %10799 = vmatprep.subr.bf16.mxu1 %v12833_v55  ;;  %v9445_v55 = vld [vmem:[#allocation7 + $0x1f6c] sm:$0xff] }
 0x691   : > { %v12898_v9 = vcombine.high %v9442_v14, %v9445_v55  ;;  %v12897_v39 = vcombine.low %v9442_v14, %v9445_v55  ;;  %v9204_v55 = vld [vmem:[#allocation7 + $0x11c] sm:$0xf] }
 0x693   : > { %10800 = vmatpush1.bf16.msra.mxu1 %v12832_v30  ;;  %v9448_v30 = vld [vmem:[#allocation7 + $0x1fcc] sm:$0xff] }
 0x694   : > { %10801 = vmatprep.subr.bf16.mxu1 %v12838_v36  ;;  %v9451_v36 = vld [vmem:[#allocation7 + $0x202c] sm:$0xff] }
 0x695   : > { %v12903_v44 = vcombine.high %v9448_v30, %v9451_v36  ;;  %v12902_v60 = vcombine.low %v9448_v30, %v9451_v36  ;;  %v9261_v30 = vld [vmem:[#allocation7 + $0x83c] sm:$0xf]  ;;  %v14963_v36 = vld [vmem:[%s14553_s13 + $0x10] ss:$24 sps:$4 sm:$0xff]  }
 0x697   : > { %10802 = vmatpush1.bf16.msra.mxu1 %v12837_v7  ;;  %v9454_v7 = vld [vmem:[#allocation7 + $0x208c] sm:$0xff] }
 0x698   : > { %10803 = vmatprep.subr.bf16.mxu1 %v12843_v26  ;;  %v9457_v26 = vld [vmem:[#allocation7 + $0x20ec] sm:$0xff] }
 0x699   : > { %v12908_v45 = vcombine.high %v9454_v7, %v9457_v26  ;;  %v12907_v46 = vcombine.low %v9454_v7, %v9457_v26 }
 0x69b   : > { %10804 = vmatpush1.bf16.msra.mxu1 %v12842_v38  ;;  %v9460_v38 = vld [vmem:[#allocation7 + $0x214c] sm:$0xff] }
 0x69c   : > { %10805 = vmatprep.subr.bf16.mxu1 %v12848_v42  ;;  %v9463_v42 = vld [vmem:[#allocation7 + $0x21ac] sm:$0xff] }
 0x69d   : > { %v12913_v17 = vcombine.high %v9460_v38, %v9463_v42  ;;  %v12912_v15 = vcombine.low %v9460_v38, %v9463_v42  ;;  %v9213_v38 = vld [vmem:[#allocation7 + $0x23c] sm:$0xf] }
 0x69f   : > { %10806 = vmatpush1.bf16.msra.mxu1 %v12847_v24  ;;  %v9466_v24 = vld [vmem:[#allocation7 + $0x220c] sm:$0xff] }
 0x6a0   : > { %10818 = vmatprep.subr.bf16.mxu1 %v12853_v61  ;;  %v9469_v61 = vld [vmem:[#allocation7 + $0x226c] sm:$0xff] }
 0x6a1   : > { %v12918_v59 = vcombine.high %v9466_v24, %v9469_v61  ;;  %v12917_v22 = vcombine.low %v9466_v24, %v9469_v61  ;;  %v9267_v24 = vld [vmem:[#allocation7 + $0x8fc] sm:$0xf] }
 0x6a2   : > { %10808 = vmatmul.mubr.bf16.vlgmr.msra.gmra.mrb[48].mxu1 %v13859_v6 }
 0x6a3   : > { %10819 = vmatpush1.bf16.msra.mxu1 %v12852_v48  ;;  %10850 = vmatprep.mubr.bf16.mxu1 %v14945_v12  ;;  %v9472_v48 = vld [vmem:[#allocation7 + $0x22cc] sm:$0xff] }
 0x6a4   : > { %10820 = vmatprep.subr.bf16.mxu1 %v12858_v49  ;;  %v9475_v49 = vld [vmem:[#allocation7 + $0x232c] sm:$0xff] }
 0x6a5   : > { %v12923_v56 = vcombine.high %v9472_v48, %v9475_v49 }
 0x6a7   : > { %10821 = vmatpush1.bf16.msra.mxu1 %v12857_v34  ;;  %v9478_v34 = vld [vmem:[#allocation7 + $0x238c] sm:$0xff] }
 0x6a8   : > { %10822 = vmatprep.subr.bf16.mxu1 %v12863_v28  ;;  %v9481_v28 = vld [vmem:[#allocation7 + $0x23ec] sm:$0xff] }
 0x6a9   : > { %v12927_v31 = vcombine.low %v9478_v34, %v9481_v28 }
 0x6ab   : > { %10823 = vmatpush1.bf16.msra.mxu1 %v12862_v5  ;;  %v12922_v5 = vcombine.low %v9472_v48, %v9475_v49 }
 0x6ac   : > { %10824 = vmatprep.subr.bf16.mxu1 %v12868_v33 }
 0x6af   : > { %10825 = vmatpush1.bf16.msra.mxu1 %v12867_v8  ;;  %v12928_v8 = vcombine.high %v9478_v34, %v9481_v28 }
 0x6b0   : > { %10826 = vmatprep.subr.bf16.mxu1 %v12873_v11 }
 0x6b3   : > { %10827 = vmatpush1.bf16.msra.mxu1 %v12872_v13  ;;  %v9249_v13 = vld [vmem:[#allocation7 + $0x6bc] sm:$0xf] }
 0x6b4   : > { %10828 = vmatprep.subr.bf16.mxu1 %v12878_v40 }
 0x6b7   : > { %10829 = vmatpush1.bf16.msra.mxu1 %v12877_v29 }
 0x6b8   : > { %10830 = vmatprep.subr.bf16.mxu1 %v12883_v20 }
 0x6bb   : > { %10831 = vmatpush1.bf16.msra.mxu1 %v12882_v43  ;;  %v12736_v43 = vcombine.low %v9246_v27, %v9249_v13  ;;  %v9228_v13 = vld [vmem:[#allocation7 + $0x41c] sm:$0xf] }
 0x6bc   : > { %10832 = vmatprep.subr.bf16.mxu1 %v12888_v25  ;;  %v9198_v25 = vld [vmem:[#allocation7 + $0x5c] sm:$0xf] }
 0x6bf   : > { %10833 = vmatpush1.bf16.msra.mxu1 %v12887_v54 }
 0x6c0   : > { %10834 = vmatprep.subr.bf16.mxu1 %v12893_v58  ;;  %v9252_v58 = vld [vmem:[#allocation7 + $0x71c] sm:$0xf] }
 0x6c3   : > { %10835 = vmatpush1.bf16.msra.mxu1 %v12892_v37  ;;  %v9207_v37 = vld [vmem:[#allocation7 + $0x17c] sm:$0xf] }
 0x6c4   : > { %10836 = vmatprep.subr.bf16.mxu1 %v12898_v9  ;;  %v9258_v9 = vld [vmem:[#allocation7 + $0x7dc] sm:$0xf] }
 0x6c7   : > { %10837 = vmatpush1.bf16.msra.mxu1 %v12897_v39 }
 0x6c8   : > { %10838 = vmatprep.subr.bf16.mxu1 %v12903_v44  ;;  %v12701_v44 = vcombine.low %v9204_v55, %v9207_v37 }
 0x6cb   : > { %10839 = vmatpush1.bf16.msra.mxu1 %v12902_v60  ;;  %v12746_v60 = vcombine.low %v9258_v9, %v9261_v30  ;;  %v9240_v9 = vld [vmem:[#allocation7 + $0x59c] sm:$0xf] }
 0x6cc   : > { %10840 = vmatprep.subr.bf16.mxu1 %v12908_v45  ;;  %v9210_v45 = vld [vmem:[#allocation7 + $0x1dc] sm:$0xf] }
 0x6cd   : > { %v12706_v48 = vcombine.low %v9210_v45, %v9213_v38  ;;  %v9243_v30 = vld [vmem:[#allocation7 + $0x5fc] sm:$0xf] }
 0x6ce   : > { %v12731_v38 = vcombine.low %v9240_v9, %v9243_v30  ;;  %v9474_v9 = vld [vmem:[#allocation7 + $0x22dc] sm:$0xf] }
 0x6cf   : > { %10841 = vmatpush1.bf16.msra.mxu1 %v12907_v46  ;;  %v9477_v30 = vld [vmem:[#allocation7 + $0x233c] sm:$0xf] }
 0x6d0   : > { %10842 = vmatprep.subr.bf16.mxu1 %v12913_v17  ;;  %v9264_v17 = vld [vmem:[#allocation7 + $0x89c] sm:$0xf] }
 0x6d3   : > { %10843 = vmatpush1.bf16.msra.mxu1 %v12912_v15 }
 0x6d4   : > { %10844 = vmatprep.subr.bf16.mxu1 %v12918_v59 }
 0x6d5   : > { %v9028_v6 = vpop.f32.mrb[40].mxu1 }
 0x6d6   : > { %v9030_v41 = vpop.f32.mrb[41].mxu1  ;;  %v9166_v33 = vrot.slane %v9028_v6, 2  ;;  %v9219_v6 = vld [vmem:[#allocation7 + $0x2fc] sm:$0xf] }
 0x6d7   : > { %v9032_v62 = vpop.f32.mrb[42].mxu1  ;;  %10845 = vmatpush1.bf16.msra.mxu1 %v12917_v22  ;;  %v9172_v11 = vrot.slane %v9030_v41, 3  ;;  %v12751_v22 = vcombine.low %v9264_v17, %v9267_v24  ;;  %v9270_v41 = vld [vmem:[#allocation7 + $0x95c] sm:$0xf] }
 0x6d8   : > { %v9167_v0 = vrot.slane %v9032_v62, 2  ;;  %v9034_v1 = vpop.f32.mrb[43].mxu1  ;;  %10846 = vmatprep.subr.bf16.mxu1 %v12923_v56  ;;  %v9216_v56 = vld [vmem:[#allocation7 + $0x29c] sm:$0xf] }
 0x6d9   : > { %v9173_v35 = vrot.slane %v9034_v1, 3  ;;  %v9273_v62 = vld [vmem:[#allocation7 + $0x9bc] sm:$0xf] }
 0x6da   : > { %v9168_v40 = vsel %vm1706_vm2, %v9166_v33, %v9167_v0  ;;  %v9169_v53 = vsel %vm1706_vm2, %v9167_v0, %v9166_v33  ;;  %v12756_v33 = vcombine.low %v9270_v41, %v9273_v62  ;;  %v9222_v0 = vld [vmem:[#allocation7 + $0x35c] sm:$0xf] }
 0x6db   : > { %v9170_v29 = vadd.f32 %v9168_v40, %v14898_v16  ;;  %v9171_v20 = vadd.f32 %v9169_v53, %v14900_v4  ;;  %v9174_v19 = vsel %vm5778_vm4, %v9172_v11, %v9173_v35  ;;  %v9175_v63 = vsel %vm5778_vm4, %v9173_v35, %v9172_v11  ;;  %10847 = vmatpush1.bf16.msra.mxu1 %v12922_v5  ;;  %v9255_v16 = vld [vmem:[#allocation7 + $0x77c] sm:$0xf] }
 0x6dc   : > { %10848 = vmatprep.subr.bf16.mxu1 %v12928_v8  ;;  %v12696_v4 = vcombine.low %v9198_v25, %v9201_v32  ;;  %v12741_v14 = vcombine.low %v9252_v58, %v9255_v16  ;;  %v12711_v5 = vcombine.low %v9216_v56, %v9219_v6  ;;  %v9225_v1 = vld [vmem:[#allocation7 + $0x3bc] sm:$0xf] }
 0x6dd   : > { %v14958_v50 = vadd.f32 %v9174_v19, %v9170_v29  ;;  %v14960_v54 = vadd.f32 %v9175_v63, %v9171_v20  ;;  %v9276_v8 = vld [vmem:[#allocation7 + $0xa1c] sm:$0xf]  ;;  %v12716_v35 = vcombine.low %v9222_v0, %v9225_v1 }
 0x6de   : > { %v9279_v11 = vld [vmem:[#allocation7 + $0xa7c] sm:$0xf] }
 0x6df   : > { %10849 = vmatpush1.bf16.msra.mxu1 %v12927_v31  ;;  %v12761_v27 = vcombine.low %v9276_v8, %v9279_v11  ;;  %v9231_v40 = vld [vmem:[#allocation7 + $0x47c] sm:$0xf] }
 0x6e0   : > { %13232 = vmatprep.subr.bf16.mxu1 %v12736_v43  ;;  %v9282_v53 = vld [vmem:[#allocation7 + $0xadc] sm:$0xf]  ;;  %v12721_v29 = vcombine.low %v9228_v13, %v9231_v40 }
 0x6e1   : > { %v9285_v31 = vld [vmem:[#allocation7 + $0xb3c] sm:$0xf] }
 0x6e2   : > { %10851 = vmatmul.mubr.bf16.vlgmr.msra.gmra.mrb[48].mxu1 %v14963_v36  ;;  %v10981_v39 = vpop.f32.mrb[48].mxu0  ;;  %v12766_v20 = vcombine.low %v9282_v53, %v9285_v31  ;;  %v9234_v19 = vld [vmem:[#allocation7 + $0x4dc] sm:$0xf] }
 0x6e3   : > { %13233 = vmatpush3.bf16.msra.mxu1 %v12696_v4  ;;  %11022 = vmatprep.mubr.bf16.mxu1 %v14922_v18  ;;  %v11119_v7 = vrot.slane %v10981_v39, 2  ;;  %v10983_v26 = vpop.f32.mrb[49].mxu0  ;;  %v9237_v63 = vld [vmem:[#allocation7 + $0x53c] sm:$0xf] }
 0x6e4   : > { %13234 = vmatprep.subr.bf16.mxu1 %v12741_v14  ;;  %v11125_v42 = vrot.slane %v10983_v26, 3  ;;  %v10985_v46 = vpop.f32.mrb[50].mxu0  ;;  %v9288_v25 = vld [vmem:[#allocation7 + $0xb9c] sm:$0xf]  ;;  %v12726_v14 = vcombine.low %v9234_v19, %v9237_v63 }
 0x6e5   : > { %v11120_v61 = vrot.slane %v10985_v46, 2  ;;  %v10987_v15 = vpop.f32.mrb[51].mxu0  ;;  %v9291_v32 = vld [vmem:[#allocation7 + $0xbfc] sm:$0xf] }
 0x6e6   : > { %v11126_v59 = vrot.slane %v10987_v15, 3  ;;  %v12771_v37 = vcombine.low %v9288_v25, %v9291_v32  ;;  %v9441_v26 = vld [vmem:[#allocation7 + $0x1ebc] sm:$0xf] }
 0x6e7   : > { %13235 = vmatpush3.bf16.msra.mxu1 %v12701_v44  ;;  %v14969_v49 = vsel %vm1706_vm2, %v11119_v7, %v11120_v61  ;;  %v14973_v18 = vsel %vm1706_vm2, %v11120_v61, %v11119_v7  ;;  %v9438_v7 = vld [vmem:[#allocation7 + $0x1e5c] sm:$0xf] }
 0x6e8   : > { %13236 = vmatprep.subr.bf16.mxu1 %v12746_v60  ;;  %v14977_v34 = vsel %vm5778_vm4, %v11125_v42, %v11126_v59  ;;  %v14981_v28 = vsel %vm5778_vm4, %v11126_v59, %v11125_v42  ;;  %v12896_v42 = vcombine.low %v9438_v7, %v9441_v26  ;;  %v9390_v46 = vld [vmem:[#allocation7 + $0x185c] sm:$0xf] }
 0x6e9   : > { %v9393_v17 = vld [vmem:[#allocation7 + $0x18bc] sm:$0xf] }
 0x6ea   : > { %v9444_v61 = vld [vmem:[#allocation7 + $0x1f1c] sm:$0xf] }
 0x6eb   : > { %13237 = vmatpush3.bf16.msra.mxu1 %v12706_v48  ;;  %v9447_v15 = vld [vmem:[#allocation7 + $0x1f7c] sm:$0xf]  ;;  %v12856_v48 = vcombine.low %v9390_v46, %v9393_v17 }
 0x6ec   : > { %13238 = vmatprep.subr.bf16.mxu1 %v12751_v22  ;;  %v9396_v22 = vld [vmem:[#allocation7 + $0x191c] sm:$0xf] }
 0x6ed   : > { %v9450_v41 = vld [vmem:[#allocation7 + $0x1fdc] sm:$0xf] }
 0x6ee   : > { %v9402_v11 = vld [vmem:[#allocation7 + $0x19dc] sm:$0xf] }
 0x6ef   : > { %13239 = vmatpush3.bf16.msra.mxu1 %v12711_v5  ;;  %v9459_v40 = vld [vmem:[#allocation7 + $0x20fc] sm:$0xf] }
 0x6f0   : > { %13240 = vmatprep.subr.bf16.mxu1 %v12756_v33  ;;  %v9462_v19 = vld [vmem:[#allocation7 + $0x215c] sm:$0xf] }
 0x6f1   : > { %v9414_v25 = vld [vmem:[#allocation7 + $0x1b5c] sm:$0xf] }
 0x6f2   : > { %v9417_v32 = vld [vmem:[#allocation7 + $0x1bbc] sm:$0xf] }
 0x6f3   : > { %13241 = vmatpush3.bf16.msra.mxu1 %v12716_v35  ;;  %v9405_v35 = vld [vmem:[#allocation7 + $0x1a3c] sm:$0xf] }
 0x6f4   : > { %13242 = vmatprep.subr.bf16.mxu1 %v12761_v27  ;;  %v9426_v7 = vld [vmem:[#allocation7 + $0x1cdc] sm:$0xf] }
 0x6f5   : > { %v13204_v43 = vpop.f32.mrb[44].mxu1  ;;  %v9429_v26 = vld [vmem:[#allocation7 + $0x1d3c] sm:$0xf] }
 0x6f6   : > { %v13205_v58 = vpop.f32.mrb[45].mxu1  ;;  %v9432_v46 = vld [vmem:[#allocation7 + $0x1d9c] sm:$0xf] }
 0x6f7   : > { %v13206_v16 = vadd.f32 %v13205_v58, %v13204_v43  ;;  %v13207_v4 = vpop.f32.mrb[46].mxu1  ;;  %13243 = vmatpush3.bf16.msra.mxu1 %v12721_v29  ;;  %v9408_v29 = vld [vmem:[#allocation7 + $0x1a9c] sm:$0xf] }
 0x6f8   : > { %v13208_v55 = vpop.f32.mrb[47].mxu1  ;;  %13244 = vmatprep.subr.bf16.mxu1 %v12766_v20  ;;  %v9411_v20 = vld [vmem:[#allocation7 + $0x1afc] sm:$0xf] }
 0x6f9   : > { %v9113_v39 = vadd.f32 %v13206_v16, %v14935_v52  ;;  %v13209_v44 = vadd.f32 %v13208_v55, %v13207_v4  ;;  %v12871_v63 = vcombine.low %v9408_v29, %v9411_v20  ;;  %v9468_v58 = vld [vmem:[#allocation7 + $0x221c] sm:$0xf]  ;;  %v12876_v4 = vcombine.low %v9414_v25, %v9417_v32 }
 0x6fa   : > { %v9471_v16 = vld [vmem:[#allocation7 + $0x227c] sm:$0xf] }
 0x6fb   : > { %v9116_v60 = vadd.f32 %v13209_v44, %v14937_v51  ;;  %v9154_v45 = vadd.f32 %v14939_v3, %v9113_v39  ;;  %13245 = vmatpush3.bf16.msra.mxu1 %v12726_v14  ;;  %v12901_v51 = vcombine.low %v9444_v61, %v9447_v15  ;;  %v9399_v3 = vld [vmem:[#allocation7 + $0x197c] sm:$0xf]  ;;  %v12921_v14 = vcombine.low %v9468_v58, %v9471_v16  ;;  %v12691_v16 = vld [vmem:[#allocation13 + $0x2] ss:$0 sm:$0xff] }
 0x6fc   : > { %13246 = vmatprep.subr.bf16.mxu1 %v12771_v37  ;;  %v12861_v0 = vcombine.low %v9396_v22, %v9399_v3  ;;  %v9420_v55 = vld [vmem:[#allocation7 + $0x1c1c] sm:$0xf]  ;;  %v12926_v44 = vcombine.low %v9474_v9, %v9477_v30  ;;  %v13811_v22 = vld [vmem:[#allocation11 + $0x88] sm:$0xff]   ;;  %v13812_v3 = vld [vmem:[#allocation11 + $0x90] sm:$0xff]  }
 0x6fd   : > { %v9157_v24 = vadd.f32 %v14941_v47, %v9116_v60  ;;  %v9178_v52 = vrot.slane %v9154_v45, 4  ;;  %v9453_v47 = vld [vmem:[#allocation7 + $0x203c] sm:$0xf] }
 0x6fe   : > { %v12906_v8 = vcombine.low %v9450_v41, %v9453_v47  ;;  %v9423_v37 = vld [vmem:[#allocation7 + $0x1c7c] sm:$0xf]  ;;  %v13816_v41 = vld [vmem:[#allocation11 + $0xb0] sm:$0xff]  }
 0x6ff   : > { %v9179_v59 = vrot.slane %v9157_v24, 4  ;;  %13247 = vmatpush3.bf16.msra.mxu1 %v12731_v38  ;;  %v12881_v39 = vcombine.low %v9420_v55, %v9423_v37  ;;  %v9480_v60 = vld [vmem:[#allocation7 + $0x239c] sm:$0xf]  ;;  %v12886_v38 = vcombine.low %v9426_v7, %v9429_v26 }
 0x700   : > { %13276 = vmatprep.subr.bf16.mxu1 %v12896_v42  ;;  %v9483_v45 = vld [vmem:[#allocation7 + $0x23fc] sm:$0xf] }
 0x701   : > { %v9181_v56 = vsel %vm9180_vm6, %v9178_v52, %v9179_v59  ;;  %v9182_v6 = vsel %vm9180_vm6, %v9179_v59, %v9178_v52  ;;  %v12931_v42 = vcombine.low %v9480_v60, %v9483_v45  ;;  %v9435_v17 = vld [vmem:[#allocation7 + $0x1dfc] sm:$0xf] }
 0x702   : > { %v14993_v62 = vadd.f32 %v9181_v56, %v14958_v50  ;;  %v14996_v5 = vadd.f32 %v9182_v6, %v14960_v54  ;;  %11023 = vmatmul.mubr.bf16.vlgmr.msra.gmra.mrb[52].mxu1 %v14931_v23  ;;  %v13270_v33 = vpop.f32.mrb[52].mxu0  ;;  %v9456_v50 = vld [vmem:[#allocation7 + $0x209c] sm:$0xf]  ;;  %v12866_v23 = vcombine.low %v9402_v11, %v9405_v35  ;;  %v12891_v24 = vcombine.low %v9432_v46, %v9435_v17  ;;  %v13814_v56 = vld [vmem:[#allocation11 + $0xa0] sm:$0xff]   ;;  %v13815_v6 = vld [vmem:[#allocation11 + $0xa8] sm:$0xff]  }
 0x703   : > { %13277 = vmatpush3.bf16.msra.mxu1 %v12856_v48  ;;  %v13271_v1 = vpop.f32.mrb[53].mxu0  ;;  %11104 = vmatprep.mubr.bf16.mxu1 %v14945_v12  ;;  %v12911_v31 = vcombine.low %v9456_v50, %v9459_v40  ;;  %v9465_v12 = vld [vmem:[#allocation7 + $0x21bc] sm:$0xf] }
 0x704   : > { %13278 = vmatprep.subr.bf16.mxu1 %v12901_v51  ;;  %v15000_v27 = vadd.f32 %v13271_v1, %v13270_v33  ;;  %v13273_v13 = vpop.f32.mrb[54].mxu0  ;;  %v12916_v43 = vcombine.low %v9462_v19, %v9465_v12  ;;  %v13810_v51 = vld [vmem:[#allocation11 + $0x80] sm:$0xff]   ;;  %v13817_v47 = vld [vmem:[#allocation11 + $0xb8] sm:$0xff]  }
 0x705   : > { %v13274_v53 = vpop.f32.mrb[55].mxu0 }
 0x706   : > { %v15002_v54 = vadd.f32 %v13274_v53, %v13273_v13 }
 0x707   : > { %13279 = vmatpush3.bf16.msra.mxu1 %v12861_v0 }
 0x708   : > { %13280 = vmatprep.subr.bf16.mxu1 %v12906_v8 }
 0x70b   : > { %13281 = vmatpush3.bf16.msra.mxu1 %v12866_v23 }
 0x70c   : > { %13282 = vmatprep.subr.bf16.mxu1 %v12911_v31 }
 0x70f   : > { %13283 = vmatpush3.bf16.msra.mxu1 %v12871_v63 }
 0x710   : > { %13284 = vmatprep.subr.bf16.mxu1 %v12916_v43 }
 0x713   : > { %13285 = vmatpush3.bf16.msra.mxu1 %v12876_v4 }
 0x714   : > { %13286 = vmatprep.subr.bf16.mxu1 %v12921_v14 }
 0x717   : > { %13287 = vmatpush3.bf16.msra.mxu1 %v12881_v39 }
 0x718   : > { %13288 = vmatprep.subr.bf16.mxu1 %v12926_v44 }
 0x71b   : > { %13289 = vmatpush3.bf16.msra.mxu1 %v12886_v38 }
 0x71c   : > { %13290 = vmatprep.subr.bf16.mxu1 %v12931_v42 }
 0x71f   : > { %13291 = vmatpush3.bf16.msra.mxu1 %v12891_v24 }
 0x720   : > { %13349 = vmatprep.subr.bf16.mxu1 %v14194_v57 }
 0x722   : > { %11105 = vmatmul.mubr.bf16.vlgmr.msra.gmra.mrb[56].mxu1 %v14963_v36  ;;  %v13314_v61 = vpop.f32.mrb[56].mxu0  ;;  %v13813_v36 = vld [vmem:[#allocation11 + $0x98] sm:$0xff]  }
 0x723   : > { %v13315_v15 = vpop.f32.mrb[57].mxu0  ;;  %13365 = vmatprep.mubr.msk.bf16.mxu1 %vm14195_vm0, %v14194_v57  ;;  %13350 = vmatpush3.bf16.msra.mxu1 %v13810_v51 }
 0x724   : > { %v15008_v52 = vadd.f32 %v13315_v15, %v13314_v61  ;;  %v13317_v59 = vpop.f32.mrb[58].mxu0  ;;  %13351 = vmatprep.subr.bf16.mxu1 %v14194_v57 }
 0x725   : > { %v13318_v48 = vpop.f32.mrb[59].mxu0 }
 0x727   : > { %13352 = vmatpush3.bf16.msra.mxu1 %v13811_v22 }
 0x728   : > { %13353 = vmatprep.subr.bf16.mxu1 %v14194_v57 }
 0x72b   : > { %13354 = vmatpush3.bf16.msra.mxu1 %v13812_v3  ;;  %v11209_v3 = vld [vmem:[#allocation14] sm:$0x1] }
 0x72c   : > { %13355 = vmatprep.subr.bf16.mxu1 %v14194_v57  ;;  %v11389_v2 = vadd.f32 %v15008_v52, %v11209_v3 }
 0x72f   : > { %13356 = vmatpush3.bf16.msra.mxu1 %v13813_v36 }
 0x730   : > { %13357 = vmatprep.subr.bf16.mxu1 %v14194_v57 }
 0x733   : > { %13358 = vmatpush3.bf16.msra.mxu1 %v13814_v56 }
 0x734   : > { %13359 = vmatprep.subr.bf16.mxu1 %v14194_v57 }
 0x737   : > { %13360 = vmatpush3.bf16.msra.mxu1 %v13815_v6 }
 0x738   : > { %13361 = vmatprep.subr.bf16.mxu1 %v14194_v57 }
 0x73b   : > { %13362 = vmatpush3.bf16.msra.mxu1 %v13816_v41 }
 0x73c   : > { %13363 = vmatprep.subr.bf16.mxu1 %v14194_v57 }
 0x73f   : > { %13364 = vmatpush3.bf16.msra.mxu1 %v13817_v47 }
 0x7b5   : > { %v10852_v33 = vpop.f32.mrb[48].mxu1 }
 0x7b6   : > { %v10854_v0 = vpop.f32.mrb[49].mxu1 }
 0x7b7   : > { %v10856_v1 = vpop.f32.mrb[50].mxu1  ;;  %v11113_v11 = vrot.slane %v10854_v0, 1 }
 0x7b8   : > { %v10858_v8 = vpop.f32.mrb[51].mxu1 }
 0x7b9   : > { %v11114_v35 = vrot.slane %v10858_v8, 1 }
 0x7bb   : > { %v11115_v13 = vsel %vm1699_vm1, %v11113_v11, %v11114_v35  ;;  %v11116_v50 = vsel %vm1699_vm1, %v11114_v35, %v11113_v11 }
 0x7bc   : > { %v11117_v40 = vadd.f32 %v11115_v13, %v10852_v33  ;;  %v11118_v53 = vadd.f32 %v11116_v50, %v10856_v1 }
 0x7be   : > { %v11123_v23 = vadd.f32 %v14969_v49, %v11117_v40  ;;  %v11124_v31 = vadd.f32 %v14973_v18, %v11118_v53  ;;  %v9190_v49 = vadd.f32 %v12691_v16, %v14993_v62  ;;  %v9191_v18 = vadd.f32 %v12691_v16, %v14996_v5 }
 0x7c0   : > { %v11129_v57 = vadd.f32 %v14977_v34, %v11123_v23  ;;  %v11130_v29 = vadd.f32 %v14981_v28, %v11124_v31  ;;  %13826 = vtanh.f32 %v9190_v49 }
 0x7c1   : > { %13828 = vtanh.f32 %v9191_v18 }
 0x7ca   : > { %v13827_v60 = vpop.eup %13826 }
 0x7cb   : > { %v13829_v42 = vpop.eup %13828 }
 0x7d5   : > { %v13248_v20 = vpop.f32.mrb[52].mxu1 }
 0x7d6   : > { %v13249_v19 = vpop.f32.mrb[53].mxu1 }
 0x7d7   : > { %v13250_v12 = vadd.f32 %v13249_v19, %v13248_v20  ;;  %v13251_v63 = vpop.f32.mrb[54].mxu1 }
 0x7d8   : > { %v13252_v43 = vpop.f32.mrb[55].mxu1 }
 0x7d9   : > { %v11066_v25 = vadd.f32 %v15000_v27, %v13250_v12  ;;  %v13253_v32 = vadd.f32 %v13252_v43, %v13251_v63 }
 0x7db   : > { %v11069_v58 = vadd.f32 %v15002_v54, %v13253_v32 }
 0x7f5   : > { %v13292_v4 = vpop.f32.mrb[56].mxu1 }
 0x7f6   : > { %v13293_v14 = vpop.f32.mrb[57].mxu1 }
 0x7f7   : > { %v13294_v34 = vadd.f32 %v13293_v14, %v13292_v4  ;;  %v13295_v55 = vpop.f32.mrb[58].mxu1 }
 0x7f8   : > { %v13296_v28 = vpop.f32.mrb[59].mxu1 }
 0x7f9   : > { %v11107_v37 = vadd.f32 %v13294_v34, %v11066_v25  ;;  %v13297_v9 = vadd.f32 %v13296_v28, %v13295_v55 }
 0x7fb   : > { %v11110_v30 = vadd.f32 %v13297_v9, %v11069_v58  ;;  %v11131_v39 = vrot.slane %v11107_v37, 4 }
 0x7fd   : > { %v11132_v27 = vrot.slane %v11110_v30, 4 }
 0x7ff   : > { %v11133_v54 = vsel %vm9180_vm6, %v11131_v39, %v11132_v27  ;;  %v11134_v44 = vsel %vm9180_vm6, %v11132_v27, %v11131_v39 }
 0x800   : > { %v11135_v62 = vadd.f32 %v11133_v54, %v11129_v57  ;;  %v11136_v7 = vadd.f32 %v11134_v44, %v11130_v29 }
 0x802   : > { %v11141_v5 = vadd.f32 %v14720_v21, %v11135_v62  ;;  %v11142_v26 = vadd.f32 %v14720_v21, %v11136_v7 }
 0x804   : > { %v11143_v45 = vmax.f32 %v11141_v5, 0.0  ;;  %v11144_v38 = vmax.f32 %v11142_v26, 0.0 }
 0x806   : > { %v11147_v46 = vmul.f32 %v13827_v60, %v11143_v45  ;;  %v11148_v17 = vmul.f32 %v13829_v42, %v11144_v38 }
 0x808   : > { %v11150_v24 = vsel %vm11146_vm7, %v11148_v17, -inf }
 0x809   : > { %v11151_v61 = vmax.f32 %v11147_v46, %v11150_v24 }
 0x80b   : > { %v11152_v10 = vrot.slane %v11151_v61, 4 }
 0x80d   : > { %v11153_v15 = vmax.f32 %v11151_v61, %v11152_v10 }
 0x80f   : > { %v11154_v59 = vrot.slane %v11153_v15, 2 }
 0x811   : > { %v11155_v48 = vmax.f32 %v11153_v15, %v11154_v59 }
 0x813   : > { %v11156_v51 = vrot.slane %v11155_v48, 1 }
 0x815   : > { %v11157_v22 = vmax.f32 %v11155_v48, %v11156_v51 }
 0x817   : > { %v11160_v21 = vpack.c.bf16 %v11157_v22, %v11157_v22 }
 0x819   : > { %13366 = vmatmul.mubr.bf16.vlgmr.msra.gmra.mrb[60].mxu1 %v11160_v21 }
 0x8ec   : > { %v11428_v36 = vpop.f32.mrb[60].mxu1 }
 0x8ed   : > { %v11429_v56 = vadd.f32 %v11428_v36, %v11389_v2  ;;  %v13367_v6 = vpop.f32.mrb[61].mxu1 }
 0x8ee   : > { %v11431_v41 = vpop.f32.mrb[62].mxu1 }
 0x8ef   : > { %11434 = vst [vmem:[%s445_s2] sm:$0x1] %v11429_v56  ;;  %v13368_v47 = vpop.f32.mrb[63].mxu1 }
 0x8f0   : > { %14103 = shalt.err (!%p14100_p1)
}
 0x8f1   : > { %s14104_s19 = scalar_lea.hbm %s15042_s14, 16  ;;  %s14108_s15 = scalar_lea.hbm %s15094_s8, 32 }
 0x8f2   : > { %p14105_p10 = scmp.ne.s32.totalorder %s15042_s14, %s14104_s19  ;;  %p14109_p12 = scmp.lt.u32.totalorder %s15042_s14, %s15094_s8 }
 0x8f3   : > { %p14110_p0 = scmp.lt.u32.totalorder %s14108_s15, %s14104_s19  ;;  %p14112_p7 = scmp.lt.u32.totalorder %s14104_s19, %s15042_s14 }
 0x8f4   : > { %p14106_p11 = pnand %p14105_p10, %p15127_p9 }
 0x8f5   : > { %p14111_p13 = por %p14110_p0, %p14109_p12 }
 0x8f6   : > { %p14107_p3 = pneg %p14106_p11 }
 0x8f7   : > { %p14113_p6 = por %p14112_p7, %p14111_p13 }
 0x8f9   : > { %p14114_p2 = pnand %p14113_p6, %p14107_p3 }
 0x8fb   : > { %14117 = shalt.err (!%p14114_p2)
}
 0x8fc   : > { %13482 = dma.vmem_to_hbm [thread:$0]  (%p15127_p9), %s15044_s4, 16, %s15042_s14, %s11436_s11  }
 0x8fd PF: > { %s11460_s12 = sand.u32 1, %s14164_s27   ;;  %p15128_p5 = scmp.ne.s32.totalorder %s15114_s10, 0 }
 0x8fe   : > { %p15129_p8 = scmp.ge.s32.totalorder %s14176_s30, 2  ;;  %s11461_s16 = scalar_lea.sflag [#allocation4], %s11460_s12 }
 0x900   : > { %p13511_p4 = pnand %p15129_p8, %p15128_p5 }
 0x902   : > { %14159 = dma.done.wait (!%p13511_p4), %s11461_s16, 16  }
 0x903   : > { %14161 = vsyncadd (!%p13511_p4), %s11461_s16, 4294967280  ;;  %p27_p1 = scmp.ge.s32.totalorder %s14426_s21, 4   ;;  %s15130_s27 = smov %s14168_s28 }
 0x904   : > { %s15131_s28 = smov %s14172_s29  ;;  %s15132_s29 = smov %s14437_s17 }
 0x905   : > { %s15133_s30 = smov %s14426_s21  ;;  %29 = sbr.rel (!%p27_p1) target bundleno = 16 (0x10), region = 134 }
 0x90c   :  { %11465 = vsyncpa [#allocation3], 1 }
 0x90d   :  { %11467 = vsyncpa [#allocation3 + $0x1], 1 }
 0x90e   :  { %11468 = vsyncpa [#allocation6], 1 }
 0x90f   :  { %11470 = vsyncpa [#allocation6 + $0x1], 1 }
 0x910   :  { %11471 = vsyncpa [#allocation9], 1 }
 0x911   :  { %11472 = vsyncpa [#allocation12], 1 }
 0x912   :  { %11473 = vsyncpa [#allocation15], 1 }
 0x913   :  { %11474 = vsyncpa [#allocation4], 1 }
 0x914   :  { %11476 = vsyncpa [#allocation4 + $0x1], 1 }

</bundles_post_ra>
